<compile_context>
chip_gen: v7x
topology: tpu7x:2x2x1
jax: 0.10.0
libtpu: 0.0.40
codegen_flags: <defaults>
</compile_context>

<pallas_src>
import jax
import jax.numpy as jnp
from jax.experimental import pallas as pl
from jax.experimental.pallas import tpu as pltpu

DILATIONS = [1, 2, 4, 8]          # dilation_base=2, num_blocks=4
BN_EPS = 1e-5
MAXD = max(DILATIONS)
PAD = 2 * MAXD                    # halo rows per sample side ('same' padding)

_VMEM = pl.BlockSpec(memory_space=pltpu.MemorySpace.VMEM)


# ----------------------------------------------------------------------------
# Fused forward kernel
# ----------------------------------------------------------------------------
def make_fused_kernel(B, L, C, Cb):
    BL = B * L
    LPAD = L + 2 * PAD
    dils = DILATIONS + list(reversed(DILATIONS))           # 8 blocks: enc then dec
    f32, bf16 = jnp.float32, jnp.bfloat16

    def kernel(x_ref, w5_ref, wres_ref, aff_ref,
               wd1_ref, wd2_ref, wu1_ref, wu2_ref, misc_ref,
               o_ref, hpad_ref, hbuf_ref):

        # Zero the per-sample halo rows once. Interiors are rewritten before
        # every block; halos are never written again, so they stay zero and
        # give 'same' zero padding + cross-batch-seam isolation for free.
        zhalo = jnp.zeros((PAD, C), f32)
        for s in range(B):
            hpad_ref[s * LPAD:s * LPAD + PAD, :] = zhalo
            hpad_ref[s * LPAD + PAD + L:(s + 1) * LPAD, :] = zhalo

        # ---- encoder input 1x1 conv (Cin = 1): broadcast FMA on the VPU
        h = x_ref[...] * misc_ref[0:1, :] + misc_ref[1:2, :]           # (BL, C)

        # ---- one WaveNet block: dilated conv(k=5) -> BN(eval) -> gate -> res
        def wavenet_block(h, i):
            d = dils[i]
            for s in range(B):                                          # stage
                hpad_ref[s * LPAD + PAD:s * LPAD + PAD + L, :] = h[s * L:(s + 1) * L, :]
            taps = []
            for k in range(5):                                          # 5 taps
                off = PAD + (k - 2) * d                                  # static
                parts = [hpad_ref[s * LPAD + off:s * LPAD + off + L, :]
                         for s in range(B)]
                taps.append(jnp.concatenate(parts, axis=0))              # (BL, C)
            cat = jnp.concatenate(taps, axis=1).astype(bf16)             # (BL, 5C)
            y = jnp.dot(cat, w5_ref[i], preferred_element_type=f32)      # (BL, 2C)
            y = y + aff_ref[i:i + 1, 0:2 * C]          # conv bias + BN(eval) shift
            gated = jnp.tanh(y[:, :C]) * jax.nn.sigmoid(y[:, C:2 * C])   # f32 gate
            res = jnp.dot(gated.astype(bf16), wres_ref[i],
                          preferred_element_type=f32)
            return res + aff_ref[i:i + 1, 2 * C:3 * C] + h

        # ---- stride-4 Conv1d(k=4): 4 strided phase reads -> one K=4C matmul
        def down4(h, n_in, w, bias_row):
            n_out = n_in // 4
            hbuf_ref[0:n_in, :] = h
            g = jnp.concatenate(
                [hbuf_ref[pl.ds(k, n_out, stride=4), :] for k in range(4)],
                axis=1).astype(bf16)                                     # (n_out, 4C)
            return jnp.dot(g, w, preferred_element_type=f32) + bias_row

        # ---- stride-4 ConvTranspose1d(k=4): one matmul -> 4 strided writes
        def up4(h, n_in, w, c_out, bias_row):
            y = jnp.dot(h.astype(bf16), w, preferred_element_type=f32)   # (n_in, 4*c_out)
            for k in range(4):
                hbuf_ref[pl.ds(k, n_in, stride=4), 0:c_out] = \
                    y[:, k * c_out:(k + 1) * c_out]
            return hbuf_ref[0:4 * n_in, 0:c_out] + bias_row

        # ---- encoder
        for i in range(4):
            h = wavenet_block(h, i)
        h = down4(h, BL, wd1_ref[...], misc_ref[4:5, :])                 # (BL/4, C)
        h = down4(h, BL // 4, wd2_ref[...], misc_ref[5:6, 0:Cb])         # (BL/16, Cb)

        # ---- decoder
        h = up4(h, BL // 16, wu1_ref[...], C, misc_ref[6:7, :])          # (BL/4, C)
        h = up4(h, BL // 4, wu2_ref[...], C, misc_ref[7:8, :])           # (BL, C)
        for i in range(4, 8):
            h = wavenet_block(h, i)

        # ---- decoder output 1x1 conv (Cout = 1), emitted lane-dense (1, BL):
        # contract channels of the misc pack (8, C) against h (BL, C); row 2
        # holds wout, other rows are harmless byproducts.
        o_all = jax.lax.dot_general(
            misc_ref[...].astype(bf16), h.astype(bf16),
            dimension_numbers=(((1,), (1,)), ((), ())),
            preferred_element_type=f32)                                  # (8, BL)
        o_ref[...] = o_all[2:3, :] + misc_ref[3:4, 0:1]

    return kernel


# ----------------------------------------------------------------------------
# One-time parameter packing (BN folding, bf16 weights, packed biases)
# ----------------------------------------------------------------------------
def pack_params(params, B, L):
    C = params['enc_in_w'].shape[1]
    Cb = params['enc_down2_w'].shape[2]
    blocks = list(params['enc_blocks']) + list(params['dec_blocks'])

    w5_l, aff_l, wres_l = [], [], []
    for p in blocks:
        inv = p['gamma'] / jnp.sqrt(p['rvar'] + BN_EPS)                  # (2C,)
        shift = p['beta'] + (p['bconv'] - p['rmean']) * inv              # (2C,)
        # wconv (5, C, 2C): fold BN scale into output columns, flatten taps
        # along K in the same (k, cin) order as the in-kernel lane concat.
        w5_l.append((p['wconv'] * inv[None, None, :]).reshape(5 * C, 2 * C))
        aff_l.append(jnp.concatenate([shift, p['bres']]))                # (3C,)
        wres_l.append(p['wres'])

    misc = jnp.zeros((8, C), jnp.float32)
    misc = misc.at[0, :].set(params['enc_in_w'][0])          # win
    misc = misc.at[1, :].set(params['enc_in_b'])             # bin
    misc = misc.at[2, :].set(params['dec_out_w'][:, 0])      # wout
    misc = misc.at[3, 0].set(params['dec_out_b'][0])         # bout
    misc = misc.at[4, :].set(params['enc_down1_b'])
    misc = misc.at[5, :Cb].set(params['enc_down2_b'])
    misc = misc.at[6, :].set(params['dec_up1_b'])
    misc = misc.at[7, :].set(params['dec_up2_b'])

    packed = dict(
        w5=jnp.stack(w5_l).astype(jnp.bfloat16),             # (8, 5C, 2C)
        wres=jnp.stack(wres_l).astype(jnp.bfloat16),         # (8, C, C)
        aff=jnp.stack(aff_l).astype(jnp.float32),            # (8, 3C)
        # down conv weights (k, cin, cout) -> (4C, cout), matching phase concat
        wd1=params['enc_down1_w'].reshape(4 * C, C).astype(jnp.bfloat16),
        wd2=params['enc_down2_w'].reshape(4 * C, Cb).astype(jnp.bfloat16),
        # transpose-conv weights (cin, cout, k) -> (cin, 4*cout), k-major lanes
        wu1=jnp.transpose(params['dec_up1_w'], (0, 2, 1)).reshape(Cb, 4 * C)
            .astype(jnp.bfloat16),
        wu2=jnp.transpose(params['dec_up2_w'], (0, 2, 1)).reshape(C, 4 * C)
            .astype(jnp.bfloat16),
        misc=misc,
    )
    return packed, C, Cb


def model_forward(x_ncl, packed, B, L, C, Cb):
    assert L % 16 == 0, "two stride-4 stages require L % 16 == 0"
    BL = B * L
    x2 = jnp.transpose(x_ncl, (0, 2, 1)).astype(jnp.float32).reshape(BL, 1)
    kernel = make_fused_kernel(B, L, C, Cb)
    out = pl.pallas_call(
        kernel,
        out_shape=jax.ShapeDtypeStruct((1, BL), jnp.float32),
        in_specs=[_VMEM] * 9,
        out_specs=_VMEM,
        scratch_shapes=[pltpu.VMEM((B * (L + 2 * PAD), C), jnp.float32),  # halo
                        pltpu.VMEM((BL, C), jnp.float32)],                # flat
    )(x2, packed['w5'], packed['wres'], packed['aff'],
      packed['wd1'], packed['wd2'], packed['wu1'], packed['wu2'],
      packed['misc'])
    # frame_length is None in this config -> no trailing slice
    return out.reshape(B, L)[:, None, :]                     # -> (B, 1, L)


# ----------------------------------------------------------------------------
# Deterministic parameter init (PyTorch layout conventions)
# ----------------------------------------------------------------------------
def init_params(key, cin=1, ch=32, cb=8):
    keys = iter(jax.random.split(key, 128))

    def nrm(shape, scale=0.1):
        return scale * jax.random.normal(next(keys), shape, jnp.float32)

    def block(C):
        return dict(
            wconv=nrm((5, C, 2 * C)), bconv=nrm((2 * C,)),
            gamma=1.0 + nrm((2 * C,)), beta=nrm((2 * C,)),
            rmean=nrm((2 * C,)), rvar=1.0 + jnp.abs(nrm((2 * C,))),
            wres=nrm((C, C)), bres=nrm((C,)),
        )

    return dict(
        enc_in_w=nrm((cin, ch)), enc_in_b=nrm((ch,)),
        enc_blocks=[block(ch) for _ in range(4)],
        enc_down1_w=nrm((4, ch, ch)), enc_down1_b=nrm((ch,)),
        enc_down2_w=nrm((4, ch, cb)), enc_down2_b=nrm((cb,)),
        dec_up1_w=nrm((cb, ch, 4)), dec_up1_b=nrm((ch,)),
        dec_up2_w=nrm((ch, ch, 4)), dec_up2_b=nrm((ch,)),
        dec_blocks=[block(ch) for _ in range(4)],
        dec_out_w=nrm((ch, cin)), dec_out_b=nrm((cin,)),
    )


# ----------------------------------------------------------------------------
# Pure-JAX reference (PyTorch semantics, NCL layout) for self-check
# ----------------------------------------------------------------------------
def _ref_block(x, p, d):
    C = x.shape[1]
    wt = jnp.transpose(p['wconv'], (2, 1, 0))                # (2C, C, 5)
    y = jax.lax.conv_general_dilated(
        x, wt, window_strides=(1,), padding=[(2 * d, 2 * d)],
        rhs_dilation=(d,), dimension_numbers=('NCH', 'OIH', 'NCH'))
    y = y + p['bconv'][None, :, None]
    y = ((y - p['rmean'][None, :, None]) / jnp.sqrt(p['rvar'] + BN_EPS)[None, :, None]
         * p['gamma'][None, :, None] + p['beta'][None, :, None])
    f, g = y[:, :C, :], y[:, C:, :]
    gated = jnp.tanh(f) * jax.nn.sigmoid(g)
    res = jnp.einsum('co,bcl->bol', p['wres'], gated) + p['bres'][None, :, None]
    return res + x


def reference_forward(x, params):
    def c1(h, w, b):
        return jnp.einsum('co,bcl->bol', w, h) + b[None, :, None]

    def cs4(h, wraw, b):
        wt = jnp.transpose(wraw, (2, 1, 0))
        y = jax.lax.conv_general_dilated(
            h, wt, window_strides=(4,), padding='VALID',
            dimension_numbers=('NCH', 'OIH', 'NCH'))
        return y + b[None, :, None]

    def ct4(h, wraw, b):
        y = jnp.einsum('bcl,cok->bolk', h, wraw)
        B_, Co, L_, K = y.shape
        return y.reshape(B_, Co, L_ * K) + b[None, :, None]

    h = c1(x.astype(jnp.float32), params['enc_in_w'], params['enc_in_b'])
    for p, d in zip(params['enc_blocks'], DILATIONS):
        h = _ref_block(h, p, d)
    h = cs4(h, params['enc_down1_w'], params['enc_down1_b'])
    h = cs4(h, params['enc_down2_w'], params['enc_down2_b'])
    h = ct4(h, params['dec_up1_w'], params['dec_up1_b'])
    h = ct4(h, params['dec_up2_w'], params['dec_up2_b'])
    for p, d in zip(params['dec_blocks'], list(reversed(DILATIONS))):
        h = _ref_block(h, p, d)
    return c1(h, params['dec_out_w'], params['dec_out_b'])


if __name__ == "__main__":
    key = jax.random.PRNGKey(0)
    kp, kx = jax.random.split(key)
    params = init_params(kp)

    # torch input layout: (batch=2, input_channels=1, length=64); 64 = 16*4 so
    # the two stride-4 downsamples / upsamples round-trip exactly.
    B, L = 2, 64
    packed, C, Cb = pack_params(params, B, L)
    x = jax.random.normal(kx, (B, 1, L), jnp.float32)

    fwd = jax.jit(lambda xx: model_forward(xx, packed, B, L, C, Cb))
    out = jax.block_until_ready(fwd(x))
    assert out.shape == (B, 1, L), out.shape

    ref = reference_forward(x, params)
    err = float(jnp.max(jnp.abs(out - ref)))
    tol = 5e-2 * (1.0 + float(jnp.max(jnp.abs(ref))))        # bf16 MXU operands
    assert err < tol, f"max abs err {err:.4g} vs tol {tol:.4g}"

    print("KERNEL_OK")
</pallas_src>

<mosaic_0001>
module attributes {stable_mosaic.version = 11 : i64} {
  func.func @kernel(%arg0: memref<128x1xf32, #tpu.memory_space<vmem>>, %arg1: memref<8x160x64xbf16, #tpu.memory_space<vmem>>, %arg2: memref<8x32x32xbf16, #tpu.memory_space<vmem>>, %arg3: memref<8x96xf32, #tpu.memory_space<vmem>>, %arg4: memref<128x32xbf16, #tpu.memory_space<vmem>>, %arg5: memref<128x8xbf16, #tpu.memory_space<vmem>>, %arg6: memref<8x128xbf16, #tpu.memory_space<vmem>>, %arg7: memref<32x128xbf16, #tpu.memory_space<vmem>>, %arg8: memref<8x32xf32, #tpu.memory_space<vmem>>, %arg9: memref<1x128xf32, #tpu.memory_space<vmem>>, %arg10: memref<192x32xf32, #tpu.memory_space<vmem>>, %arg11: memref<128x32xf32, #tpu.memory_space<vmem>>) attributes {dimension_semantics = [], scalar_prefetch = 0 : i64, scratch_operands = 2 : i64, tpu.core_type = #tpu.core_type<tc>} {
    %cst = arith.constant 0.000000e+00 : f32
    %0 = vector.broadcast %cst : f32 to vector<16x32xf32>
    %c0 = arith.constant 0 : index
    %c0_0 = arith.constant 0 : index
    %1 = vector.load %arg10[%c0, %c0_0] : memref<192x32xf32, #tpu.memory_space<vmem>>, vector<16x32xf32>
    tpu.vector_store %arg10[%c0, %c0_0], %0 {strides = array<i32>} : memref<192x32xf32, #tpu.memory_space<vmem>>, vector<16x32xf32>,
    %c80 = arith.constant 80 : index
    %c0_1 = arith.constant 0 : index
    %2 = vector.load %arg10[%c80, %c0_1] : memref<192x32xf32, #tpu.memory_space<vmem>>, vector<16x32xf32>
    tpu.vector_store %arg10[%c80, %c0_1], %0 {strides = array<i32>} : memref<192x32xf32, #tpu.memory_space<vmem>>, vector<16x32xf32>,
    %c96 = arith.constant 96 : index
    %c0_2 = arith.constant 0 : index
    %3 = vector.load %arg10[%c96, %c0_2] : memref<192x32xf32, #tpu.memory_space<vmem>>, vector<16x32xf32>
    tpu.vector_store %arg10[%c96, %c0_2], %0 {strides = array<i32>} : memref<192x32xf32, #tpu.memory_space<vmem>>, vector<16x32xf32>,
    %c176 = arith.constant 176 : index
    %c0_3 = arith.constant 0 : index
    %4 = vector.load %arg10[%c176, %c0_3] : memref<192x32xf32, #tpu.memory_space<vmem>>, vector<16x32xf32>
    tpu.vector_store %arg10[%c176, %c0_3], %0 {strides = array<i32>} : memref<192x32xf32, #tpu.memory_space<vmem>>, vector<16x32xf32>,
    %c0_4 = arith.constant 0 : index
    %c0_5 = arith.constant 0 : index
    %5 = vector.load %arg0[%c0_4, %c0_5] : memref<128x1xf32, #tpu.memory_space<vmem>>, vector<128x1xf32>
    %c0_6 = arith.constant 0 : index
    %c0_7 = arith.constant 0 : index
    %6 = vector.load %arg8[%c0_6, %c0_7] : memref<8x32xf32, #tpu.memory_space<vmem>>, vector<1x32xf32>
    %7 = vector.broadcast %5 : vector<128x1xf32> to vector<128x32xf32>
    %8 = vector.broadcast %6 : vector<1x32xf32> to vector<128x32xf32>
    %9 = arith.mulf %7, %8 : vector<128x32xf32>
    %c1 = arith.constant 1 : index
    %c0_8 = arith.constant 0 : index
    %10 = vector.load %arg8[%c1, %c0_8] : memref<8x32xf32, #tpu.memory_space<vmem>>, vector<1x32xf32>
    %11 = vector.broadcast %10 : vector<1x32xf32> to vector<128x32xf32>
    %12 = arith.addf %9, %11 : vector<128x32xf32>
    %13 = vector.extract_strided_slice %12 {offsets = [0, 0], sizes = [64, 32], strides = [1, 1]} : vector<128x32xf32> to vector<64x32xf32>
    %c16 = arith.constant 16 : index
    %c0_9 = arith.constant 0 : index
    %14 = vector.load %arg10[%c16, %c0_9] : memref<192x32xf32, #tpu.memory_space<vmem>>, vector<64x32xf32>
    tpu.vector_store %arg10[%c16, %c0_9], %13 {strides = array<i32>} : memref<192x32xf32, #tpu.memory_space<vmem>>, vector<64x32xf32>,
    %15 = vector.extract_strided_slice %12 {offsets = [64, 0], sizes = [64, 32], strides = [1, 1]} : vector<128x32xf32> to vector<64x32xf32>
    %c112 = arith.constant 112 : index
    %c0_10 = arith.constant 0 : index
    %16 = vector.load %arg10[%c112, %c0_10] : memref<192x32xf32, #tpu.memory_space<vmem>>, vector<64x32xf32>
    tpu.vector_store %arg10[%c112, %c0_10], %15 {strides = array<i32>} : memref<192x32xf32, #tpu.memory_space<vmem>>, vector<64x32xf32>,
    %c14 = arith.constant 14 : index
    %c0_11 = arith.constant 0 : index
    %17 = vector.load %arg10[%c14, %c0_11] : memref<192x32xf32, #tpu.memory_space<vmem>>, vector<64x32xf32>
    %c110 = arith.constant 110 : index
    %c0_12 = arith.constant 0 : index
    %18 = vector.load %arg10[%c110, %c0_12] : memref<192x32xf32, #tpu.memory_space<vmem>>, vector<64x32xf32>
    %19 = tpu.concatenate %17, %18 in 0 : vector<64x32xf32>, vector<64x32xf32> -> vector<128x32xf32>
    %c15 = arith.constant 15 : index
    %c0_13 = arith.constant 0 : index
    %20 = vector.load %arg10[%c15, %c0_13] : memref<192x32xf32, #tpu.memory_space<vmem>>, vector<64x32xf32>
    %c111 = arith.constant 111 : index
    %c0_14 = arith.constant 0 : index
    %21 = vector.load %arg10[%c111, %c0_14] : memref<192x32xf32, #tpu.memory_space<vmem>>, vector<64x32xf32>
    %22 = tpu.concatenate %20, %21 in 0 : vector<64x32xf32>, vector<64x32xf32> -> vector<128x32xf32>
    %c16_15 = arith.constant 16 : index
    %c0_16 = arith.constant 0 : index
    %23 = vector.load %arg10[%c16_15, %c0_16] : memref<192x32xf32, #tpu.memory_space<vmem>>, vector<64x32xf32>
    %c112_17 = arith.constant 112 : index
    %c0_18 = arith.constant 0 : index
    %24 = vector.load %arg10[%c112_17, %c0_18] : memref<192x32xf32, #tpu.memory_space<vmem>>, vector<64x32xf32>
    %25 = tpu.concatenate %23, %24 in 0 : vector<64x32xf32>, vector<64x32xf32> -> vector<128x32xf32>
    %c17 = arith.constant 17 : index
    %c0_19 = arith.constant 0 : index
    %26 = vector.load %arg10[%c17, %c0_19] : memref<192x32xf32, #tpu.memory_space<vmem>>, vector<64x32xf32>
    %c113 = arith.constant 113 : index
    %c0_20 = arith.constant 0 : index
    %27 = vector.load %arg10[%c113, %c0_20] : memref<192x32xf32, #tpu.memory_space<vmem>>, vector<64x32xf32>
    %28 = tpu.concatenate %26, %27 in 0 : vector<64x32xf32>, vector<64x32xf32> -> vector<128x32xf32>
    %c18 = arith.constant 18 : index
    %c0_21 = arith.constant 0 : index
    %29 = vector.load %arg10[%c18, %c0_21] : memref<192x32xf32, #tpu.memory_space<vmem>>, vector<64x32xf32>
    %c114 = arith.constant 114 : index
    %c0_22 = arith.constant 0 : index
    %30 = vector.load %arg10[%c114, %c0_22] : memref<192x32xf32, #tpu.memory_space<vmem>>, vector<64x32xf32>
    %31 = tpu.concatenate %29, %30 in 0 : vector<64x32xf32>, vector<64x32xf32> -> vector<128x32xf32>
    %32 = tpu.concatenate %19, %22, %25, %28, %31 in 1 : vector<128x32xf32>, vector<128x32xf32>, vector<128x32xf32>, vector<128x32xf32>, vector<128x32xf32> -> vector<128x160xf32>
    %33 = arith.truncf %32 : vector<128x160xf32> to vector<128x160xbf16>
    %c0_23 = arith.constant 0 : index
    %c0_24 = arith.constant 0 : index
    %c0_25 = arith.constant 0 : index
    %34 = vector.load %arg1[%c0_23, %c0_24, %c0_25] : memref<8x160x64xbf16, #tpu.memory_space<vmem>>, vector<1x160x64xbf16>
    %35 = vector.shape_cast %34 : vector<1x160x64xbf16> to vector<160x64xbf16>
    %cst_26 = arith.constant dense<0.000000e+00> : vector<128x64xf32>
    %36 = tpu.matmul %33, %35, %cst_26 {dimension_numbers = #tpu.dot_dimension_numbers<[1], [0], [0], [1], [0, 0, 1, 1], [], []>} : vector<128x160xbf16>, vector<160x64xbf16>, vector<128x64xf32> -> vector<128x64xf32>
    %c0_27 = arith.constant 0 : index
    %c0_28 = arith.constant 0 : index
    %37 = vector.load %arg3[%c0_27, %c0_28] : memref<8x96xf32, #tpu.memory_space<vmem>>, vector<1x64xf32>
    %38 = vector.broadcast %37 : vector<1x64xf32> to vector<128x64xf32>
    %39 = arith.addf %36, %38 : vector<128x64xf32>
    %40 = vector.extract_strided_slice %39 {offsets = [0, 0], sizes = [128, 32], strides = [1, 1]} : vector<128x64xf32> to vector<128x32xf32>
    %41 = math.tanh %40 : vector<128x32xf32>
    %42 = vector.extract_strided_slice %39 {offsets = [0, 32], sizes = [128, 32], strides = [1, 1]} : vector<128x64xf32> to vector<128x32xf32>
    %43 = arith.negf %42 : vector<128x32xf32>
    %44 = math.exp %43 : vector<128x32xf32>
    %cst_29 = arith.constant 1.000000e+00 : f32
    %45 = vector.broadcast %cst_29 : f32 to vector<128x32xf32>
    %46 = arith.addf %45, %44 : vector<128x32xf32>
    %47 = arith.divf %45, %46 : vector<128x32xf32>
    %48 = arith.mulf %41, %47 : vector<128x32xf32>
    %49 = arith.truncf %48 : vector<128x32xf32> to vector<128x32xbf16>
    %c0_30 = arith.constant 0 : index
    %c0_31 = arith.constant 0 : index
    %c0_32 = arith.constant 0 : index
    %50 = vector.load %arg2[%c0_30, %c0_31, %c0_32] : memref<8x32x32xbf16, #tpu.memory_space<vmem>>, vector<1x32x32xbf16>
    %51 = vector.shape_cast %50 : vector<1x32x32xbf16> to vector<32x32xbf16>
    %cst_33 = arith.constant dense<0.000000e+00> : vector<128x32xf32>
    %52 = tpu.matmul %49, %51, %cst_33 {dimension_numbers = #tpu.dot_dimension_numbers<[1], [0], [0], [1], [0, 0, 1, 1], [], []>} : vector<128x32xbf16>, vector<32x32xbf16>, vector<128x32xf32> -> vector<128x32xf32>
    %c0_34 = arith.constant 0 : index
    %c64 = arith.constant 64 : index
    %53 = vector.load %arg3[%c0_34, %c64] : memref<8x96xf32, #tpu.memory_space<vmem>>, vector<1x32xf32>
    %54 = vector.broadcast %53 : vector<1x32xf32> to vector<128x32xf32>
    %55 = arith.addf %52, %54 : vector<128x32xf32>
    %56 = arith.addf %55, %12 : vector<128x32xf32>
    %57 = vector.extract_strided_slice %56 {offsets = [0, 0], sizes = [64, 32], strides = [1, 1]} : vector<128x32xf32> to vector<64x32xf32>
    %c16_35 = arith.constant 16 : index
    %c0_36 = arith.constant 0 : index
    %58 = vector.load %arg10[%c16_35, %c0_36] : memref<192x32xf32, #tpu.memory_space<vmem>>, vector<64x32xf32>
    tpu.vector_store %arg10[%c16_35, %c0_36], %57 {strides = array<i32>} : memref<192x32xf32, #tpu.memory_space<vmem>>, vector<64x32xf32>,
    %59 = vector.extract_strided_slice %56 {offsets = [64, 0], sizes = [64, 32], strides = [1, 1]} : vector<128x32xf32> to vector<64x32xf32>
    %c112_37 = arith.constant 112 : index
    %c0_38 = arith.constant 0 : index
    %60 = vector.load %arg10[%c112_37, %c0_38] : memref<192x32xf32, #tpu.memory_space<vmem>>, vector<64x32xf32>
    tpu.vector_store %arg10[%c112_37, %c0_38], %59 {strides = array<i32>} : memref<192x32xf32, #tpu.memory_space<vmem>>, vector<64x32xf32>,
    %c12 = arith.constant 12 : index
    %c0_39 = arith.constant 0 : index
    %61 = vector.load %arg10[%c12, %c0_39] : memref<192x32xf32, #tpu.memory_space<vmem>>, vector<64x32xf32>
    %c108 = arith.constant 108 : index
    %c0_40 = arith.constant 0 : index
    %62 = vector.load %arg10[%c108, %c0_40] : memref<192x32xf32, #tpu.memory_space<vmem>>, vector<64x32xf32>
    %63 = tpu.concatenate %61, %62 in 0 : vector<64x32xf32>, vector<64x32xf32> -> vector<128x32xf32>
    %c14_41 = arith.constant 14 : index
    %c0_42 = arith.constant 0 : index
    %64 = vector.load %arg10[%c14_41, %c0_42] : memref<192x32xf32, #tpu.memory_space<vmem>>, vector<64x32xf32>
    %c110_43 = arith.constant 110 : index
    %c0_44 = arith.constant 0 : index
    %65 = vector.load %arg10[%c110_43, %c0_44] : memref<192x32xf32, #tpu.memory_space<vmem>>, vector<64x32xf32>
    %66 = tpu.concatenate %64, %65 in 0 : vector<64x32xf32>, vector<64x32xf32> -> vector<128x32xf32>
    %c16_45 = arith.constant 16 : index
    %c0_46 = arith.constant 0 : index
    %67 = vector.load %arg10[%c16_45, %c0_46] : memref<192x32xf32, #tpu.memory_space<vmem>>, vector<64x32xf32>
    %c112_47 = arith.constant 112 : index
    %c0_48 = arith.constant 0 : index
    %68 = vector.load %arg10[%c112_47, %c0_48] : memref<192x32xf32, #tpu.memory_space<vmem>>, vector<64x32xf32>
    %69 = tpu.concatenate %67, %68 in 0 : vector<64x32xf32>, vector<64x32xf32> -> vector<128x32xf32>
    %c18_49 = arith.constant 18 : index
    %c0_50 = arith.constant 0 : index
    %70 = vector.load %arg10[%c18_49, %c0_50] : memref<192x32xf32, #tpu.memory_space<vmem>>, vector<64x32xf32>
    %c114_51 = arith.constant 114 : index
    %c0_52 = arith.constant 0 : index
    %71 = vector.load %arg10[%c114_51, %c0_52] : memref<192x32xf32, #tpu.memory_space<vmem>>, vector<64x32xf32>
    %72 = tpu.concatenate %70, %71 in 0 : vector<64x32xf32>, vector<64x32xf32> -> vector<128x32xf32>
    %c20 = arith.constant 20 : index
    %c0_53 = arith.constant 0 : index
    %73 = vector.load %arg10[%c20, %c0_53] : memref<192x32xf32, #tpu.memory_space<vmem>>, vector<64x32xf32>
    %c116 = arith.constant 116 : index
    %c0_54 = arith.constant 0 : index
    %74 = vector.load %arg10[%c116, %c0_54] : memref<192x32xf32, #tpu.memory_space<vmem>>, vector<64x32xf32>
    %75 = tpu.concatenate %73, %74 in 0 : vector<64x32xf32>, vector<64x32xf32> -> vector<128x32xf32>
    %76 = tpu.concatenate %63, %66, %69, %72, %75 in 1 : vector<128x32xf32>, vector<128x32xf32>, vector<128x32xf32>, vector<128x32xf32>, vector<128x32xf32> -> vector<128x160xf32>
    %77 = arith.truncf %76 : vector<128x160xf32> to vector<128x160xbf16>
    %c1_55 = arith.constant 1 : index
    %c0_56 = arith.constant 0 : index
    %c0_57 = arith.constant 0 : index
    %78 = vector.load %arg1[%c1_55, %c0_56, %c0_57] : memref<8x160x64xbf16, #tpu.memory_space<vmem>>, vector<1x160x64xbf16>
    %79 = vector.shape_cast %78 : vector<1x160x64xbf16> to vector<160x64xbf16>
    %cst_58 = arith.constant dense<0.000000e+00> : vector<128x64xf32>
    %80 = tpu.matmul %77, %79, %cst_58 {dimension_numbers = #tpu.dot_dimension_numbers<[1], [0], [0], [1], [0, 0, 1, 1], [], []>} : vector<128x160xbf16>, vector<160x64xbf16>, vector<128x64xf32> -> vector<128x64xf32>
    %c1_59 = arith.constant 1 : index
    %c0_60 = arith.constant 0 : index
    %81 = vector.load %arg3[%c1_59, %c0_60] : memref<8x96xf32, #tpu.memory_space<vmem>>, vector<1x64xf32>
    %82 = vector.broadcast %81 : vector<1x64xf32> to vector<128x64xf32>
    %83 = arith.addf %80, %82 : vector<128x64xf32>
    %84 = vector.extract_strided_slice %83 {offsets = [0, 0], sizes = [128, 32], strides = [1, 1]} : vector<128x64xf32> to vector<128x32xf32>
    %85 = math.tanh %84 : vector<128x32xf32>
    %86 = vector.extract_strided_slice %83 {offsets = [0, 32], sizes = [128, 32], strides = [1, 1]} : vector<128x64xf32> to vector<128x32xf32>
    %87 = arith.negf %86 : vector<128x32xf32>
    %88 = math.exp %87 : vector<128x32xf32>
    %cst_61 = arith.constant 1.000000e+00 : f32
    %89 = vector.broadcast %cst_61 : f32 to vector<128x32xf32>
    %90 = arith.addf %89, %88 : vector<128x32xf32>
    %91 = arith.divf %89, %90 : vector<128x32xf32>
    %92 = arith.mulf %85, %91 : vector<128x32xf32>
    %93 = arith.truncf %92 : vector<128x32xf32> to vector<128x32xbf16>
    %c1_62 = arith.constant 1 : index
    %c0_63 = arith.constant 0 : index
    %c0_64 = arith.constant 0 : index
    %94 = vector.load %arg2[%c1_62, %c0_63, %c0_64] : memref<8x32x32xbf16, #tpu.memory_space<vmem>>, vector<1x32x32xbf16>
    %95 = vector.shape_cast %94 : vector<1x32x32xbf16> to vector<32x32xbf16>
    %cst_65 = arith.constant dense<0.000000e+00> : vector<128x32xf32>
    %96 = tpu.matmul %93, %95, %cst_65 {dimension_numbers = #tpu.dot_dimension_numbers<[1], [0], [0], [1], [0, 0, 1, 1], [], []>} : vector<128x32xbf16>, vector<32x32xbf16>, vector<128x32xf32> -> vector<128x32xf32>
    %c1_66 = arith.constant 1 : index
    %c64_67 = arith.constant 64 : index
    %97 = vector.load %arg3[%c1_66, %c64_67] : memref<8x96xf32, #tpu.memory_space<vmem>>, vector<1x32xf32>
    %98 = vector.broadcast %97 : vector<1x32xf32> to vector<128x32xf32>
    %99 = arith.addf %96, %98 : vector<128x32xf32>
    %100 = arith.addf %99, %56 : vector<128x32xf32>
    %101 = vector.extract_strided_slice %100 {offsets = [0, 0], sizes = [64, 32], strides = [1, 1]} : vector<128x32xf32> to vector<64x32xf32>
    %c16_68 = arith.constant 16 : index
    %c0_69 = arith.constant 0 : index
    %102 = vector.load %arg10[%c16_68, %c0_69] : memref<192x32xf32, #tpu.memory_space<vmem>>, vector<64x32xf32>
    tpu.vector_store %arg10[%c16_68, %c0_69], %101 {strides = array<i32>} : memref<192x32xf32, #tpu.memory_space<vmem>>, vector<64x32xf32>,
    %103 = vector.extract_strided_slice %100 {offsets = [64, 0], sizes = [64, 32], strides = [1, 1]} : vector<128x32xf32> to vector<64x32xf32>
    %c112_70 = arith.constant 112 : index
    %c0_71 = arith.constant 0 : index
    %104 = vector.load %arg10[%c112_70, %c0_71] : memref<192x32xf32, #tpu.memory_space<vmem>>, vector<64x32xf32>
    tpu.vector_store %arg10[%c112_70, %c0_71], %103 {strides = array<i32>} : memref<192x32xf32, #tpu.memory_space<vmem>>, vector<64x32xf32>,
    %c8 = arith.constant 8 : index
    %c0_72 = arith.constant 0 : index
    %105 = vector.load %arg10[%c8, %c0_72] : memref<192x32xf32, #tpu.memory_space<vmem>>, vector<64x32xf32>
    %c104 = arith.constant 104 : index
    %c0_73 = arith.constant 0 : index
    %106 = vector.load %arg10[%c104, %c0_73] : memref<192x32xf32, #tpu.memory_space<vmem>>, vector<64x32xf32>
    %107 = tpu.concatenate %105, %106 in 0 : vector<64x32xf32>, vector<64x32xf32> -> vector<128x32xf32>
    %c12_74 = arith.constant 12 : index
    %c0_75 = arith.constant 0 : index
    %108 = vector.load %arg10[%c12_74, %c0_75] : memref<192x32xf32, #tpu.memory_space<vmem>>, vector<64x32xf32>
    %c108_76 = arith.constant 108 : index
    %c0_77 = arith.constant 0 : index
    %109 = vector.load %arg10[%c108_76, %c0_77] : memref<192x32xf32, #tpu.memory_space<vmem>>, vector<64x32xf32>
    %110 = tpu.concatenate %108, %109 in 0 : vector<64x32xf32>, vector<64x32xf32> -> vector<128x32xf32>
    %c16_78 = arith.constant 16 : index
    %c0_79 = arith.constant 0 : index
    %111 = vector.load %arg10[%c16_78, %c0_79] : memref<192x32xf32, #tpu.memory_space<vmem>>, vector<64x32xf32>
    %c112_80 = arith.constant 112 : index
    %c0_81 = arith.constant 0 : index
    %112 = vector.load %arg10[%c112_80, %c0_81] : memref<192x32xf32, #tpu.memory_space<vmem>>, vector<64x32xf32>
    %113 = tpu.concatenate %111, %112 in 0 : vector<64x32xf32>, vector<64x32xf32> -> vector<128x32xf32>
    %c20_82 = arith.constant 20 : index
    %c0_83 = arith.constant 0 : index
    %114 = vector.load %arg10[%c20_82, %c0_83] : memref<192x32xf32, #tpu.memory_space<vmem>>, vector<64x32xf32>
    %c116_84 = arith.constant 116 : index
    %c0_85 = arith.constant 0 : index
    %115 = vector.load %arg10[%c116_84, %c0_85] : memref<192x32xf32, #tpu.memory_space<vmem>>, vector<64x32xf32>
    %116 = tpu.concatenate %114, %115 in 0 : vector<64x32xf32>, vector<64x32xf32> -> vector<128x32xf32>
    %c24 = arith.constant 24 : index
    %c0_86 = arith.constant 0 : index
    %117 = vector.load %arg10[%c24, %c0_86] : memref<192x32xf32, #tpu.memory_space<vmem>>, vector<64x32xf32>
    %c120 = arith.constant 120 : index
    %c0_87 = arith.constant 0 : index
    %118 = vector.load %arg10[%c120, %c0_87] : memref<192x32xf32, #tpu.memory_space<vmem>>, vector<64x32xf32>
    %119 = tpu.concatenate %117, %118 in 0 : vector<64x32xf32>, vector<64x32xf32> -> vector<128x32xf32>
    %120 = tpu.concatenate %107, %110, %113, %116, %119 in 1 : vector<128x32xf32>, vector<128x32xf32>, vector<128x32xf32>, vector<128x32xf32>, vector<128x32xf32> -> vector<128x160xf32>
    %121 = arith.truncf %120 : vector<128x160xf32> to vector<128x160xbf16>
    %c2 = arith.constant 2 : index
    %c0_88 = arith.constant 0 : index
    %c0_89 = arith.constant 0 : index
    %122 = vector.load %arg1[%c2, %c0_88, %c0_89] : memref<8x160x64xbf16, #tpu.memory_space<vmem>>, vector<1x160x64xbf16>
    %123 = vector.shape_cast %122 : vector<1x160x64xbf16> to vector<160x64xbf16>
    %cst_90 = arith.constant dense<0.000000e+00> : vector<128x64xf32>
    %124 = tpu.matmul %121, %123, %cst_90 {dimension_numbers = #tpu.dot_dimension_numbers<[1], [0], [0], [1], [0, 0, 1, 1], [], []>} : vector<128x160xbf16>, vector<160x64xbf16>, vector<128x64xf32> -> vector<128x64xf32>
    %c2_91 = arith.constant 2 : index
    %c0_92 = arith.constant 0 : index
    %125 = vector.load %arg3[%c2_91, %c0_92] : memref<8x96xf32, #tpu.memory_space<vmem>>, vector<1x64xf32>
    %126 = vector.broadcast %125 : vector<1x64xf32> to vector<128x64xf32>
    %127 = arith.addf %124, %126 : vector<128x64xf32>
    %128 = vector.extract_strided_slice %127 {offsets = [0, 0], sizes = [128, 32], strides = [1, 1]} : vector<128x64xf32> to vector<128x32xf32>
    %129 = math.tanh %128 : vector<128x32xf32>
    %130 = vector.extract_strided_slice %127 {offsets = [0, 32], sizes = [128, 32], strides = [1, 1]} : vector<128x64xf32> to vector<128x32xf32>
    %131 = arith.negf %130 : vector<128x32xf32>
    %132 = math.exp %131 : vector<128x32xf32>
    %cst_93 = arith.constant 1.000000e+00 : f32
    %133 = vector.broadcast %cst_93 : f32 to vector<128x32xf32>
    %134 = arith.addf %133, %132 : vector<128x32xf32>
    %135 = arith.divf %133, %134 : vector<128x32xf32>
    %136 = arith.mulf %129, %135 : vector<128x32xf32>
    %137 = arith.truncf %136 : vector<128x32xf32> to vector<128x32xbf16>
    %c2_94 = arith.constant 2 : index
    %c0_95 = arith.constant 0 : index
    %c0_96 = arith.constant 0 : index
    %138 = vector.load %arg2[%c2_94, %c0_95, %c0_96] : memref<8x32x32xbf16, #tpu.memory_space<vmem>>, vector<1x32x32xbf16>
    %139 = vector.shape_cast %138 : vector<1x32x32xbf16> to vector<32x32xbf16>
    %cst_97 = arith.constant dense<0.000000e+00> : vector<128x32xf32>
    %140 = tpu.matmul %137, %139, %cst_97 {dimension_numbers = #tpu.dot_dimension_numbers<[1], [0], [0], [1], [0, 0, 1, 1], [], []>} : vector<128x32xbf16>, vector<32x32xbf16>, vector<128x32xf32> -> vector<128x32xf32>
    %c2_98 = arith.constant 2 : index
    %c64_99 = arith.constant 64 : index
    %141 = vector.load %arg3[%c2_98, %c64_99] : memref<8x96xf32, #tpu.memory_space<vmem>>, vector<1x32xf32>
    %142 = vector.broadcast %141 : vector<1x32xf32> to vector<128x32xf32>
    %143 = arith.addf %140, %142 : vector<128x32xf32>
    %144 = arith.addf %143, %100 : vector<128x32xf32>
    %145 = vector.extract_strided_slice %144 {offsets = [0, 0], sizes = [64, 32], strides = [1, 1]} : vector<128x32xf32> to vector<64x32xf32>
    %c16_100 = arith.constant 16 : index
    %c0_101 = arith.constant 0 : index
    %146 = vector.load %arg10[%c16_100, %c0_101] : memref<192x32xf32, #tpu.memory_space<vmem>>, vector<64x32xf32>
    tpu.vector_store %arg10[%c16_100, %c0_101], %145 {strides = array<i32>} : memref<192x32xf32, #tpu.memory_space<vmem>>, vector<64x32xf32>,
    %147 = vector.extract_strided_slice %144 {offsets = [64, 0], sizes = [64, 32], strides = [1, 1]} : vector<128x32xf32> to vector<64x32xf32>
    %c112_102 = arith.constant 112 : index
    %c0_103 = arith.constant 0 : index
    %148 = vector.load %arg10[%c112_102, %c0_103] : memref<192x32xf32, #tpu.memory_space<vmem>>, vector<64x32xf32>
    tpu.vector_store %arg10[%c112_102, %c0_103], %147 {strides = array<i32>} : memref<192x32xf32, #tpu.memory_space<vmem>>, vector<64x32xf32>,
    %c0_104 = arith.constant 0 : index
    %c0_105 = arith.constant 0 : index
    %149 = vector.load %arg10[%c0_104, %c0_105] : memref<192x32xf32, #tpu.memory_space<vmem>>, vector<64x32xf32>
    %c96_106 = arith.constant 96 : index
    %c0_107 = arith.constant 0 : index
    %150 = vector.load %arg10[%c96_106, %c0_107] : memref<192x32xf32, #tpu.memory_space<vmem>>, vector<64x32xf32>
    %151 = tpu.concatenate %149, %150 in 0 : vector<64x32xf32>, vector<64x32xf32> -> vector<128x32xf32>
    %c8_108 = arith.constant 8 : index
    %c0_109 = arith.constant 0 : index
    %152 = vector.load %arg10[%c8_108, %c0_109] : memref<192x32xf32, #tpu.memory_space<vmem>>, vector<64x32xf32>
    %c104_110 = arith.constant 104 : index
    %c0_111 = arith.constant 0 : index
    %153 = vector.load %arg10[%c104_110, %c0_111] : memref<192x32xf32, #tpu.memory_space<vmem>>, vector<64x32xf32>
    %154 = tpu.concatenate %152, %153 in 0 : vector<64x32xf32>, vector<64x32xf32> -> vector<128x32xf32>
    %c16_112 = arith.constant 16 : index
    %c0_113 = arith.constant 0 : index
    %155 = vector.load %arg10[%c16_112, %c0_113] : memref<192x32xf32, #tpu.memory_space<vmem>>, vector<64x32xf32>
    %c112_114 = arith.constant 112 : index
    %c0_115 = arith.constant 0 : index
    %156 = vector.load %arg10[%c112_114, %c0_115] : memref<192x32xf32, #tpu.memory_space<vmem>>, vector<64x32xf32>
    %157 = tpu.concatenate %155, %156 in 0 : vector<64x32xf32>, vector<64x32xf32> -> vector<128x32xf32>
    %c24_116 = arith.constant 24 : index
    %c0_117 = arith.constant 0 : index
    %158 = vector.load %arg10[%c24_116, %c0_117] : memref<192x32xf32, #tpu.memory_space<vmem>>, vector<64x32xf32>
    %c120_118 = arith.constant 120 : index
    %c0_119 = arith.constant 0 : index
    %159 = vector.load %arg10[%c120_118, %c0_119] : memref<192x32xf32, #tpu.memory_space<vmem>>, vector<64x32xf32>
    %160 = tpu.concatenate %158, %159 in 0 : vector<64x32xf32>, vector<64x32xf32> -> vector<128x32xf32>
    %c32 = arith.constant 32 : index
    %c0_120 = arith.constant 0 : index
    %161 = vector.load %arg10[%c32, %c0_120] : memref<192x32xf32, #tpu.memory_space<vmem>>, vector<64x32xf32>
    %c128 = arith.constant 128 : index
    %c0_121 = arith.constant 0 : index
    %162 = vector.load %arg10[%c128, %c0_121] : memref<192x32xf32, #tpu.memory_space<vmem>>, vector<64x32xf32>
    %163 = tpu.concatenate %161, %162 in 0 : vector<64x32xf32>, vector<64x32xf32> -> vector<128x32xf32>
    %164 = tpu.concatenate %151, %154, %157, %160, %163 in 1 : vector<128x32xf32>, vector<128x32xf32>, vector<128x32xf32>, vector<128x32xf32>, vector<128x32xf32> -> vector<128x160xf32>
    %165 = arith.truncf %164 : vector<128x160xf32> to vector<128x160xbf16>
    %c3 = arith.constant 3 : index
    %c0_122 = arith.constant 0 : index
    %c0_123 = arith.constant 0 : index
    %166 = vector.load %arg1[%c3, %c0_122, %c0_123] : memref<8x160x64xbf16, #tpu.memory_space<vmem>>, vector<1x160x64xbf16>
    %167 = vector.shape_cast %166 : vector<1x160x64xbf16> to vector<160x64xbf16>
    %cst_124 = arith.constant dense<0.000000e+00> : vector<128x64xf32>
    %168 = tpu.matmul %165, %167, %cst_124 {dimension_numbers = #tpu.dot_dimension_numbers<[1], [0], [0], [1], [0, 0, 1, 1], [], []>} : vector<128x160xbf16>, vector<160x64xbf16>, vector<128x64xf32> -> vector<128x64xf32>
    %c3_125 = arith.constant 3 : index
    %c0_126 = arith.constant 0 : index
    %169 = vector.load %arg3[%c3_125, %c0_126] : memref<8x96xf32, #tpu.memory_space<vmem>>, vector<1x64xf32>
    %170 = vector.broadcast %169 : vector<1x64xf32> to vector<128x64xf32>
    %171 = arith.addf %168, %170 : vector<128x64xf32>
    %172 = vector.extract_strided_slice %171 {offsets = [0, 0], sizes = [128, 32], strides = [1, 1]} : vector<128x64xf32> to vector<128x32xf32>
    %173 = math.tanh %172 : vector<128x32xf32>
    %174 = vector.extract_strided_slice %171 {offsets = [0, 32], sizes = [128, 32], strides = [1, 1]} : vector<128x64xf32> to vector<128x32xf32>
    %175 = arith.negf %174 : vector<128x32xf32>
    %176 = math.exp %175 : vector<128x32xf32>
    %cst_127 = arith.constant 1.000000e+00 : f32
    %177 = vector.broadcast %cst_127 : f32 to vector<128x32xf32>
    %178 = arith.addf %177, %176 : vector<128x32xf32>
    %179 = arith.divf %177, %178 : vector<128x32xf32>
    %180 = arith.mulf %173, %179 : vector<128x32xf32>
    %181 = arith.truncf %180 : vector<128x32xf32> to vector<128x32xbf16>
    %c3_128 = arith.constant 3 : index
    %c0_129 = arith.constant 0 : index
    %c0_130 = arith.constant 0 : index
    %182 = vector.load %arg2[%c3_128, %c0_129, %c0_130] : memref<8x32x32xbf16, #tpu.memory_space<vmem>>, vector<1x32x32xbf16>
    %183 = vector.shape_cast %182 : vector<1x32x32xbf16> to vector<32x32xbf16>
    %cst_131 = arith.constant dense<0.000000e+00> : vector<128x32xf32>
    %184 = tpu.matmul %181, %183, %cst_131 {dimension_numbers = #tpu.dot_dimension_numbers<[1], [0], [0], [1], [0, 0, 1, 1], [], []>} : vector<128x32xbf16>, vector<32x32xbf16>, vector<128x32xf32> -> vector<128x32xf32>
    %c3_132 = arith.constant 3 : index
    %c64_133 = arith.constant 64 : index
    %185 = vector.load %arg3[%c3_132, %c64_133] : memref<8x96xf32, #tpu.memory_space<vmem>>, vector<1x32xf32>
    %186 = vector.broadcast %185 : vector<1x32xf32> to vector<128x32xf32>
    %187 = arith.addf %184, %186 : vector<128x32xf32>
    %188 = arith.addf %187, %144 : vector<128x32xf32>
    %c0_134 = arith.constant 0 : index
    %c0_135 = arith.constant 0 : index
    %189 = vector.load %arg4[%c0_134, %c0_135] : memref<128x32xbf16, #tpu.memory_space<vmem>>, vector<128x32xbf16>
    %c4 = arith.constant 4 : index
    %c0_136 = arith.constant 0 : index
    %190 = vector.load %arg8[%c4, %c0_136] : memref<8x32xf32, #tpu.memory_space<vmem>>, vector<1x32xf32>
    %c0_137 = arith.constant 0 : index
    %c0_138 = arith.constant 0 : index
    %191 = vector.load %arg11[%c0_137, %c0_138] : memref<128x32xf32, #tpu.memory_space<vmem>>, vector<128x32xf32>
    tpu.vector_store %arg11[%c0_137, %c0_138], %188 {strides = array<i32>} : memref<128x32xf32, #tpu.memory_space<vmem>>, vector<128x32xf32>,
    %c0_139 = arith.constant 0 : index
    %c0_140 = arith.constant 0 : index
    %192 = tpu.strided_load %arg11[%c0_139, %c0_140] {strides = array<i32: 4, 1>} : memref<128x32xf32, #tpu.memory_space<vmem>>, vector<32x32xf32>
    %c1_141 = arith.constant 1 : index
    %c0_142 = arith.constant 0 : index
    %193 = tpu.strided_load %arg11[%c1_141, %c0_142] {strides = array<i32: 4, 1>} : memref<128x32xf32, #tpu.memory_space<vmem>>, vector<32x32xf32>
    %c2_143 = arith.constant 2 : index
    %c0_144 = arith.constant 0 : index
    %194 = tpu.strided_load %arg11[%c2_143, %c0_144] {strides = array<i32: 4, 1>} : memref<128x32xf32, #tpu.memory_space<vmem>>, vector<32x32xf32>
    %c3_145 = arith.constant 3 : index
    %c0_146 = arith.constant 0 : index
    %195 = tpu.strided_load %arg11[%c3_145, %c0_146] {strides = array<i32: 4, 1>} : memref<128x32xf32, #tpu.memory_space<vmem>>, vector<32x32xf32>
    %196 = tpu.concatenate %192, %193, %194, %195 in 1 : vector<32x32xf32>, vector<32x32xf32>, vector<32x32xf32>, vector<32x32xf32> -> vector<32x128xf32>
    %197 = arith.truncf %196 : vector<32x128xf32> to vector<32x128xbf16>
    %cst_147 = arith.constant dense<0.000000e+00> : vector<32x32xf32>
    %198 = tpu.matmul %197, %189, %cst_147 {dimension_numbers = #tpu.dot_dimension_numbers<[1], [0], [0], [1], [0, 0, 1, 1], [], []>} : vector<32x128xbf16>, vector<128x32xbf16>, vector<32x32xf32> -> vector<32x32xf32>
    %199 = vector.broadcast %190 : vector<1x32xf32> to vector<32x32xf32>
    %200 = arith.addf %198, %199 : vector<32x32xf32>
    %c0_148 = arith.constant 0 : index
    %c0_149 = arith.constant 0 : index
    %201 = vector.load %arg5[%c0_148, %c0_149] : memref<128x8xbf16, #tpu.memory_space<vmem>>, vector<128x8xbf16>
    %c5 = arith.constant 5 : index
    %c0_150 = arith.constant 0 : index
    %202 = vector.load %arg8[%c5, %c0_150] : memref<8x32xf32, #tpu.memory_space<vmem>>, vector<1x8xf32>
    %c0_151 = arith.constant 0 : index
    %c0_152 = arith.constant 0 : index
    %203 = vector.load %arg11[%c0_151, %c0_152] : memref<128x32xf32, #tpu.memory_space<vmem>>, vector<32x32xf32>
    tpu.vector_store %arg11[%c0_151, %c0_152], %200 {strides = array<i32>} : memref<128x32xf32, #tpu.memory_space<vmem>>, vector<32x32xf32>,
    %c0_153 = arith.constant 0 : index
    %c0_154 = arith.constant 0 : index
    %204 = tpu.strided_load %arg11[%c0_153, %c0_154] {strides = array<i32: 4, 1>} : memref<128x32xf32, #tpu.memory_space<vmem>>, vector<8x32xf32>
    %c1_155 = arith.constant 1 : index
    %c0_156 = arith.constant 0 : index
    %205 = tpu.strided_load %arg11[%c1_155, %c0_156] {strides = array<i32: 4, 1>} : memref<128x32xf32, #tpu.memory_space<vmem>>, vector<8x32xf32>
    %c2_157 = arith.constant 2 : index
    %c0_158 = arith.constant 0 : index
    %206 = tpu.strided_load %arg11[%c2_157, %c0_158] {strides = array<i32: 4, 1>} : memref<128x32xf32, #tpu.memory_space<vmem>>, vector<8x32xf32>
    %c3_159 = arith.constant 3 : index
    %c0_160 = arith.constant 0 : index
    %207 = tpu.strided_load %arg11[%c3_159, %c0_160] {strides = array<i32: 4, 1>} : memref<128x32xf32, #tpu.memory_space<vmem>>, vector<8x32xf32>
    %208 = tpu.concatenate %204, %205, %206, %207 in 1 : vector<8x32xf32>, vector<8x32xf32>, vector<8x32xf32>, vector<8x32xf32> -> vector<8x128xf32>
    %209 = arith.truncf %208 : vector<8x128xf32> to vector<8x128xbf16>
    %cst_161 = arith.constant dense<0.000000e+00> : vector<8x8xf32>
    %210 = tpu.matmul %209, %201, %cst_161 {dimension_numbers = #tpu.dot_dimension_numbers<[1], [0], [0], [1], [0, 0, 1, 1], [], []>} : vector<8x128xbf16>, vector<128x8xbf16>, vector<8x8xf32> -> vector<8x8xf32>
    %211 = vector.broadcast %202 : vector<1x8xf32> to vector<8x8xf32>
    %212 = arith.addf %210, %211 : vector<8x8xf32>
    %c0_162 = arith.constant 0 : index
    %c0_163 = arith.constant 0 : index
    %213 = vector.load %arg6[%c0_162, %c0_163] : memref<8x128xbf16, #tpu.memory_space<vmem>>, vector<8x128xbf16>
    %c6 = arith.constant 6 : index
    %c0_164 = arith.constant 0 : index
    %214 = vector.load %arg8[%c6, %c0_164] : memref<8x32xf32, #tpu.memory_space<vmem>>, vector<1x32xf32>
    %215 = arith.truncf %212 : vector<8x8xf32> to vector<8x8xbf16>
    %cst_165 = arith.constant dense<0.000000e+00> : vector<8x128xf32>
    %216 = tpu.matmul %215, %213, %cst_165 {dimension_numbers = #tpu.dot_dimension_numbers<[1], [0], [0], [1], [0, 0, 1, 1], [], []>} : vector<8x8xbf16>, vector<8x128xbf16>, vector<8x128xf32> -> vector<8x128xf32>
    %217 = vector.extract_strided_slice %216 {offsets = [0, 0], sizes = [8, 32], strides = [1, 1]} : vector<8x128xf32> to vector<8x32xf32>
    %c0_166 = arith.constant 0 : index
    %c0_167 = arith.constant 0 : index
    %218 = tpu.strided_load %arg11[%c0_166, %c0_167] {strides = array<i32: 4, 1>} : memref<128x32xf32, #tpu.memory_space<vmem>>, vector<8x32xf32>
    tpu.strided_store %arg11[%c0_166, %c0_167], %217 {strides = array<i32: 4, 1>} : memref<128x32xf32, #tpu.memory_space<vmem>>, vector<8x32xf32>
    %219 = vector.extract_strided_slice %216 {offsets = [0, 32], sizes = [8, 32], strides = [1, 1]} : vector<8x128xf32> to vector<8x32xf32>
    %c1_168 = arith.constant 1 : index
    %c0_169 = arith.constant 0 : index
    %220 = tpu.strided_load %arg11[%c1_168, %c0_169] {strides = array<i32: 4, 1>} : memref<128x32xf32, #tpu.memory_space<vmem>>, vector<8x32xf32>
    tpu.strided_store %arg11[%c1_168, %c0_169], %219 {strides = array<i32: 4, 1>} : memref<128x32xf32, #tpu.memory_space<vmem>>, vector<8x32xf32>
    %221 = vector.extract_strided_slice %216 {offsets = [0, 64], sizes = [8, 32], strides = [1, 1]} : vector<8x128xf32> to vector<8x32xf32>
    %c2_170 = arith.constant 2 : index
    %c0_171 = arith.constant 0 : index
    %222 = tpu.strided_load %arg11[%c2_170, %c0_171] {strides = array<i32: 4, 1>} : memref<128x32xf32, #tpu.memory_space<vmem>>, vector<8x32xf32>
    tpu.strided_store %arg11[%c2_170, %c0_171], %221 {strides = array<i32: 4, 1>} : memref<128x32xf32, #tpu.memory_space<vmem>>, vector<8x32xf32>
    %223 = vector.extract_strided_slice %216 {offsets = [0, 96], sizes = [8, 32], strides = [1, 1]} : vector<8x128xf32> to vector<8x32xf32>
    %c3_172 = arith.constant 3 : index
    %c0_173 = arith.constant 0 : index
    %224 = tpu.strided_load %arg11[%c3_172, %c0_173] {strides = array<i32: 4, 1>} : memref<128x32xf32, #tpu.memory_space<vmem>>, vector<8x32xf32>
    tpu.strided_store %arg11[%c3_172, %c0_173], %223 {strides = array<i32: 4, 1>} : memref<128x32xf32, #tpu.memory_space<vmem>>, vector<8x32xf32>
    %c0_174 = arith.constant 0 : index
    %c0_175 = arith.constant 0 : index
    %225 = vector.load %arg11[%c0_174, %c0_175] : memref<128x32xf32, #tpu.memory_space<vmem>>, vector<32x32xf32>
    %226 = vector.broadcast %214 : vector<1x32xf32> to vector<32x32xf32>
    %227 = arith.addf %225, %226 : vector<32x32xf32>
    %c0_176 = arith.constant 0 : index
    %c0_177 = arith.constant 0 : index
    %228 = vector.load %arg7[%c0_176, %c0_177] : memref<32x128xbf16, #tpu.memory_space<vmem>>, vector<32x128xbf16>
    %c7 = arith.constant 7 : index
    %c0_178 = arith.constant 0 : index
    %229 = vector.load %arg8[%c7, %c0_178] : memref<8x32xf32, #tpu.memory_space<vmem>>, vector<1x32xf32>
    %230 = arith.truncf %227 : vector<32x32xf32> to vector<32x32xbf16>
    %cst_179 = arith.constant dense<0.000000e+00> : vector<32x128xf32>
    %231 = tpu.matmul %230, %228, %cst_179 {dimension_numbers = #tpu.dot_dimension_numbers<[1], [0], [0], [1], [0, 0, 1, 1], [], []>} : vector<32x32xbf16>, vector<32x128xbf16>, vector<32x128xf32> -> vector<32x128xf32>
    %232 = vector.extract_strided_slice %231 {offsets = [0, 0], sizes = [32, 32], strides = [1, 1]} : vector<32x128xf32> to vector<32x32xf32>
    %c0_180 = arith.constant 0 : index
    %c0_181 = arith.constant 0 : index
    %233 = tpu.strided_load %arg11[%c0_180, %c0_181] {strides = array<i32: 4, 1>} : memref<128x32xf32, #tpu.memory_space<vmem>>, vector<32x32xf32>
    tpu.strided_store %arg11[%c0_180, %c0_181], %232 {strides = array<i32: 4, 1>} : memref<128x32xf32, #tpu.memory_space<vmem>>, vector<32x32xf32>
    %234 = vector.extract_strided_slice %231 {offsets = [0, 32], sizes = [32, 32], strides = [1, 1]} : vector<32x128xf32> to vector<32x32xf32>
    %c1_182 = arith.constant 1 : index
    %c0_183 = arith.constant 0 : index
    %235 = tpu.strided_load %arg11[%c1_182, %c0_183] {strides = array<i32: 4, 1>} : memref<128x32xf32, #tpu.memory_space<vmem>>, vector<32x32xf32>
    tpu.strided_store %arg11[%c1_182, %c0_183], %234 {strides = array<i32: 4, 1>} : memref<128x32xf32, #tpu.memory_space<vmem>>, vector<32x32xf32>
    %236 = vector.extract_strided_slice %231 {offsets = [0, 64], sizes = [32, 32], strides = [1, 1]} : vector<32x128xf32> to vector<32x32xf32>
    %c2_184 = arith.constant 2 : index
    %c0_185 = arith.constant 0 : index
    %237 = tpu.strided_load %arg11[%c2_184, %c0_185] {strides = array<i32: 4, 1>} : memref<128x32xf32, #tpu.memory_space<vmem>>, vector<32x32xf32>
    tpu.strided_store %arg11[%c2_184, %c0_185], %236 {strides = array<i32: 4, 1>} : memref<128x32xf32, #tpu.memory_space<vmem>>, vector<32x32xf32>
    %238 = vector.extract_strided_slice %231 {offsets = [0, 96], sizes = [32, 32], strides = [1, 1]} : vector<32x128xf32> to vector<32x32xf32>
    %c3_186 = arith.constant 3 : index
    %c0_187 = arith.constant 0 : index
    %239 = tpu.strided_load %arg11[%c3_186, %c0_187] {strides = array<i32: 4, 1>} : memref<128x32xf32, #tpu.memory_space<vmem>>, vector<32x32xf32>
    tpu.strided_store %arg11[%c3_186, %c0_187], %238 {strides = array<i32: 4, 1>} : memref<128x32xf32, #tpu.memory_space<vmem>>, vector<32x32xf32>
    %c0_188 = arith.constant 0 : index
    %c0_189 = arith.constant 0 : index
    %240 = vector.load %arg11[%c0_188, %c0_189] : memref<128x32xf32, #tpu.memory_space<vmem>>, vector<128x32xf32>
    %241 = vector.broadcast %229 : vector<1x32xf32> to vector<128x32xf32>
    %242 = arith.addf %240, %241 : vector<128x32xf32>
    %243 = vector.extract_strided_slice %242 {offsets = [0, 0], sizes = [64, 32], strides = [1, 1]} : vector<128x32xf32> to vector<64x32xf32>
    %c16_190 = arith.constant 16 : index
    %c0_191 = arith.constant 0 : index
    %244 = vector.load %arg10[%c16_190, %c0_191] : memref<192x32xf32, #tpu.memory_space<vmem>>, vector<64x32xf32>
    tpu.vector_store %arg10[%c16_190, %c0_191], %243 {strides = array<i32>} : memref<192x32xf32, #tpu.memory_space<vmem>>, vector<64x32xf32>,
    %245 = vector.extract_strided_slice %242 {offsets = [64, 0], sizes = [64, 32], strides = [1, 1]} : vector<128x32xf32> to vector<64x32xf32>
    %c112_192 = arith.constant 112 : index
    %c0_193 = arith.constant 0 : index
    %246 = vector.load %arg10[%c112_192, %c0_193] : memref<192x32xf32, #tpu.memory_space<vmem>>, vector<64x32xf32>
    tpu.vector_store %arg10[%c112_192, %c0_193], %245 {strides = array<i32>} : memref<192x32xf32, #tpu.memory_space<vmem>>, vector<64x32xf32>,
    %c0_194 = arith.constant 0 : index
    %c0_195 = arith.constant 0 : index
    %247 = vector.load %arg10[%c0_194, %c0_195] : memref<192x32xf32, #tpu.memory_space<vmem>>, vector<64x32xf32>
    %c96_196 = arith.constant 96 : index
    %c0_197 = arith.constant 0 : index
    %248 = vector.load %arg10[%c96_196, %c0_197] : memref<192x32xf32, #tpu.memory_space<vmem>>, vector<64x32xf32>
    %249 = tpu.concatenate %247, %248 in 0 : vector<64x32xf32>, vector<64x32xf32> -> vector<128x32xf32>
    %c8_198 = arith.constant 8 : index
    %c0_199 = arith.constant 0 : index
    %250 = vector.load %arg10[%c8_198, %c0_199] : memref<192x32xf32, #tpu.memory_space<vmem>>, vector<64x32xf32>
    %c104_200 = arith.constant 104 : index
    %c0_201 = arith.constant 0 : index
    %251 = vector.load %arg10[%c104_200, %c0_201] : memref<192x32xf32, #tpu.memory_space<vmem>>, vector<64x32xf32>
    %252 = tpu.concatenate %250, %251 in 0 : vector<64x32xf32>, vector<64x32xf32> -> vector<128x32xf32>
    %c16_202 = arith.constant 16 : index
    %c0_203 = arith.constant 0 : index
    %253 = vector.load %arg10[%c16_202, %c0_203] : memref<192x32xf32, #tpu.memory_space<vmem>>, vector<64x32xf32>
    %c112_204 = arith.constant 112 : index
    %c0_205 = arith.constant 0 : index
    %254 = vector.load %arg10[%c112_204, %c0_205] : memref<192x32xf32, #tpu.memory_space<vmem>>, vector<64x32xf32>
    %255 = tpu.concatenate %253, %254 in 0 : vector<64x32xf32>, vector<64x32xf32> -> vector<128x32xf32>
    %c24_206 = arith.constant 24 : index
    %c0_207 = arith.constant 0 : index
    %256 = vector.load %arg10[%c24_206, %c0_207] : memref<192x32xf32, #tpu.memory_space<vmem>>, vector<64x32xf32>
    %c120_208 = arith.constant 120 : index
    %c0_209 = arith.constant 0 : index
    %257 = vector.load %arg10[%c120_208, %c0_209] : memref<192x32xf32, #tpu.memory_space<vmem>>, vector<64x32xf32>
    %258 = tpu.concatenate %256, %257 in 0 : vector<64x32xf32>, vector<64x32xf32> -> vector<128x32xf32>
    %c32_210 = arith.constant 32 : index
    %c0_211 = arith.constant 0 : index
    %259 = vector.load %arg10[%c32_210, %c0_211] : memref<192x32xf32, #tpu.memory_space<vmem>>, vector<64x32xf32>
    %c128_212 = arith.constant 128 : index
    %c0_213 = arith.constant 0 : index
    %260 = vector.load %arg10[%c128_212, %c0_213] : memref<192x32xf32, #tpu.memory_space<vmem>>, vector<64x32xf32>
    %261 = tpu.concatenate %259, %260 in 0 : vector<64x32xf32>, vector<64x32xf32> -> vector<128x32xf32>
    %262 = tpu.concatenate %249, %252, %255, %258, %261 in 1 : vector<128x32xf32>, vector<128x32xf32>, vector<128x32xf32>, vector<128x32xf32>, vector<128x32xf32> -> vector<128x160xf32>
    %263 = arith.truncf %262 : vector<128x160xf32> to vector<128x160xbf16>
    %c4_214 = arith.constant 4 : index
    %c0_215 = arith.constant 0 : index
    %c0_216 = arith.constant 0 : index
    %264 = vector.load %arg1[%c4_214, %c0_215, %c0_216] : memref<8x160x64xbf16, #tpu.memory_space<vmem>>, vector<1x160x64xbf16>
    %265 = vector.shape_cast %264 : vector<1x160x64xbf16> to vector<160x64xbf16>
    %cst_217 = arith.constant dense<0.000000e+00> : vector<128x64xf32>
    %266 = tpu.matmul %263, %265, %cst_217 {dimension_numbers = #tpu.dot_dimension_numbers<[1], [0], [0], [1], [0, 0, 1, 1], [], []>} : vector<128x160xbf16>, vector<160x64xbf16>, vector<128x64xf32> -> vector<128x64xf32>
    %c4_218 = arith.constant 4 : index
    %c0_219 = arith.constant 0 : index
    %267 = vector.load %arg3[%c4_218, %c0_219] : memref<8x96xf32, #tpu.memory_space<vmem>>, vector<1x64xf32>
    %268 = vector.broadcast %267 : vector<1x64xf32> to vector<128x64xf32>
    %269 = arith.addf %266, %268 : vector<128x64xf32>
    %270 = vector.extract_strided_slice %269 {offsets = [0, 0], sizes = [128, 32], strides = [1, 1]} : vector<128x64xf32> to vector<128x32xf32>
    %271 = math.tanh %270 : vector<128x32xf32>
    %272 = vector.extract_strided_slice %269 {offsets = [0, 32], sizes = [128, 32], strides = [1, 1]} : vector<128x64xf32> to vector<128x32xf32>
    %273 = arith.negf %272 : vector<128x32xf32>
    %274 = math.exp %273 : vector<128x32xf32>
    %cst_220 = arith.constant 1.000000e+00 : f32
    %275 = vector.broadcast %cst_220 : f32 to vector<128x32xf32>
    %276 = arith.addf %275, %274 : vector<128x32xf32>
    %277 = arith.divf %275, %276 : vector<128x32xf32>
    %278 = arith.mulf %271, %277 : vector<128x32xf32>
    %279 = arith.truncf %278 : vector<128x32xf32> to vector<128x32xbf16>
    %c4_221 = arith.constant 4 : index
    %c0_222 = arith.constant 0 : index
    %c0_223 = arith.constant 0 : index
    %280 = vector.load %arg2[%c4_221, %c0_222, %c0_223] : memref<8x32x32xbf16, #tpu.memory_space<vmem>>, vector<1x32x32xbf16>
    %281 = vector.shape_cast %280 : vector<1x32x32xbf16> to vector<32x32xbf16>
    %cst_224 = arith.constant dense<0.000000e+00> : vector<128x32xf32>
    %282 = tpu.matmul %279, %281, %cst_224 {dimension_numbers = #tpu.dot_dimension_numbers<[1], [0], [0], [1], [0, 0, 1, 1], [], []>} : vector<128x32xbf16>, vector<32x32xbf16>, vector<128x32xf32> -> vector<128x32xf32>
    %c4_225 = arith.constant 4 : index
    %c64_226 = arith.constant 64 : index
    %283 = vector.load %arg3[%c4_225, %c64_226] : memref<8x96xf32, #tpu.memory_space<vmem>>, vector<1x32xf32>
    %284 = vector.broadcast %283 : vector<1x32xf32> to vector<128x32xf32>
    %285 = arith.addf %282, %284 : vector<128x32xf32>
    %286 = arith.addf %285, %242 : vector<128x32xf32>
    %287 = vector.extract_strided_slice %286 {offsets = [0, 0], sizes = [64, 32], strides = [1, 1]} : vector<128x32xf32> to vector<64x32xf32>
    %c16_227 = arith.constant 16 : index
    %c0_228 = arith.constant 0 : index
    %288 = vector.load %arg10[%c16_227, %c0_228] : memref<192x32xf32, #tpu.memory_space<vmem>>, vector<64x32xf32>
    tpu.vector_store %arg10[%c16_227, %c0_228], %287 {strides = array<i32>} : memref<192x32xf32, #tpu.memory_space<vmem>>, vector<64x32xf32>,
    %289 = vector.extract_strided_slice %286 {offsets = [64, 0], sizes = [64, 32], strides = [1, 1]} : vector<128x32xf32> to vector<64x32xf32>
    %c112_229 = arith.constant 112 : index
    %c0_230 = arith.constant 0 : index
    %290 = vector.load %arg10[%c112_229, %c0_230] : memref<192x32xf32, #tpu.memory_space<vmem>>, vector<64x32xf32>
    tpu.vector_store %arg10[%c112_229, %c0_230], %289 {strides = array<i32>} : memref<192x32xf32, #tpu.memory_space<vmem>>, vector<64x32xf32>,
    %c8_231 = arith.constant 8 : index
    %c0_232 = arith.constant 0 : index
    %291 = vector.load %arg10[%c8_231, %c0_232] : memref<192x32xf32, #tpu.memory_space<vmem>>, vector<64x32xf32>
    %c104_233 = arith.constant 104 : index
    %c0_234 = arith.constant 0 : index
    %292 = vector.load %arg10[%c104_233, %c0_234] : memref<192x32xf32, #tpu.memory_space<vmem>>, vector<64x32xf32>
    %293 = tpu.concatenate %291, %292 in 0 : vector<64x32xf32>, vector<64x32xf32> -> vector<128x32xf32>
    %c12_235 = arith.constant 12 : index
    %c0_236 = arith.constant 0 : index
    %294 = vector.load %arg10[%c12_235, %c0_236] : memref<192x32xf32, #tpu.memory_space<vmem>>, vector<64x32xf32>
    %c108_237 = arith.constant 108 : index
    %c0_238 = arith.constant 0 : index
    %295 = vector.load %arg10[%c108_237, %c0_238] : memref<192x32xf32, #tpu.memory_space<vmem>>, vector<64x32xf32>
    %296 = tpu.concatenate %294, %295 in 0 : vector<64x32xf32>, vector<64x32xf32> -> vector<128x32xf32>
    %c16_239 = arith.constant 16 : index
    %c0_240 = arith.constant 0 : index
    %297 = vector.load %arg10[%c16_239, %c0_240] : memref<192x32xf32, #tpu.memory_space<vmem>>, vector<64x32xf32>
    %c112_241 = arith.constant 112 : index
    %c0_242 = arith.constant 0 : index
    %298 = vector.load %arg10[%c112_241, %c0_242] : memref<192x32xf32, #tpu.memory_space<vmem>>, vector<64x32xf32>
    %299 = tpu.concatenate %297, %298 in 0 : vector<64x32xf32>, vector<64x32xf32> -> vector<128x32xf32>
    %c20_243 = arith.constant 20 : index
    %c0_244 = arith.constant 0 : index
    %300 = vector.load %arg10[%c20_243, %c0_244] : memref<192x32xf32, #tpu.memory_space<vmem>>, vector<64x32xf32>
    %c116_245 = arith.constant 116 : index
    %c0_246 = arith.constant 0 : index
    %301 = vector.load %arg10[%c116_245, %c0_246] : memref<192x32xf32, #tpu.memory_space<vmem>>, vector<64x32xf32>
    %302 = tpu.concatenate %300, %301 in 0 : vector<64x32xf32>, vector<64x32xf32> -> vector<128x32xf32>
    %c24_247 = arith.constant 24 : index
    %c0_248 = arith.constant 0 : index
    %303 = vector.load %arg10[%c24_247, %c0_248] : memref<192x32xf32, #tpu.memory_space<vmem>>, vector<64x32xf32>
    %c120_249 = arith.constant 120 : index
    %c0_250 = arith.constant 0 : index
    %304 = vector.load %arg10[%c120_249, %c0_250] : memref<192x32xf32, #tpu.memory_space<vmem>>, vector<64x32xf32>
    %305 = tpu.concatenate %303, %304 in 0 : vector<64x32xf32>, vector<64x32xf32> -> vector<128x32xf32>
    %306 = tpu.concatenate %293, %296, %299, %302, %305 in 1 : vector<128x32xf32>, vector<128x32xf32>, vector<128x32xf32>, vector<128x32xf32>, vector<128x32xf32> -> vector<128x160xf32>
    %307 = arith.truncf %306 : vector<128x160xf32> to vector<128x160xbf16>
    %c5_251 = arith.constant 5 : index
    %c0_252 = arith.constant 0 : index
    %c0_253 = arith.constant 0 : index
    %308 = vector.load %arg1[%c5_251, %c0_252, %c0_253] : memref<8x160x64xbf16, #tpu.memory_space<vmem>>, vector<1x160x64xbf16>
    %309 = vector.shape_cast %308 : vector<1x160x64xbf16> to vector<160x64xbf16>
    %cst_254 = arith.constant dense<0.000000e+00> : vector<128x64xf32>
    %310 = tpu.matmul %307, %309, %cst_254 {dimension_numbers = #tpu.dot_dimension_numbers<[1], [0], [0], [1], [0, 0, 1, 1], [], []>} : vector<128x160xbf16>, vector<160x64xbf16>, vector<128x64xf32> -> vector<128x64xf32>
    %c5_255 = arith.constant 5 : index
    %c0_256 = arith.constant 0 : index
    %311 = vector.load %arg3[%c5_255, %c0_256] : memref<8x96xf32, #tpu.memory_space<vmem>>, vector<1x64xf32>
    %312 = vector.broadcast %311 : vector<1x64xf32> to vector<128x64xf32>
    %313 = arith.addf %310, %312 : vector<128x64xf32>
    %314 = vector.extract_strided_slice %313 {offsets = [0, 0], sizes = [128, 32], strides = [1, 1]} : vector<128x64xf32> to vector<128x32xf32>
    %315 = math.tanh %314 : vector<128x32xf32>
    %316 = vector.extract_strided_slice %313 {offsets = [0, 32], sizes = [128, 32], strides = [1, 1]} : vector<128x64xf32> to vector<128x32xf32>
    %317 = arith.negf %316 : vector<128x32xf32>
    %318 = math.exp %317 : vector<128x32xf32>
    %cst_257 = arith.constant 1.000000e+00 : f32
    %319 = vector.broadcast %cst_257 : f32 to vector<128x32xf32>
    %320 = arith.addf %319, %318 : vector<128x32xf32>
    %321 = arith.divf %319, %320 : vector<128x32xf32>
    %322 = arith.mulf %315, %321 : vector<128x32xf32>
    %323 = arith.truncf %322 : vector<128x32xf32> to vector<128x32xbf16>
    %c5_258 = arith.constant 5 : index
    %c0_259 = arith.constant 0 : index
    %c0_260 = arith.constant 0 : index
    %324 = vector.load %arg2[%c5_258, %c0_259, %c0_260] : memref<8x32x32xbf16, #tpu.memory_space<vmem>>, vector<1x32x32xbf16>
    %325 = vector.shape_cast %324 : vector<1x32x32xbf16> to vector<32x32xbf16>
    %cst_261 = arith.constant dense<0.000000e+00> : vector<128x32xf32>
    %326 = tpu.matmul %323, %325, %cst_261 {dimension_numbers = #tpu.dot_dimension_numbers<[1], [0], [0], [1], [0, 0, 1, 1], [], []>} : vector<128x32xbf16>, vector<32x32xbf16>, vector<128x32xf32> -> vector<128x32xf32>
    %c5_262 = arith.constant 5 : index
    %c64_263 = arith.constant 64 : index
    %327 = vector.load %arg3[%c5_262, %c64_263] : memref<8x96xf32, #tpu.memory_space<vmem>>, vector<1x32xf32>
    %328 = vector.broadcast %327 : vector<1x32xf32> to vector<128x32xf32>
    %329 = arith.addf %326, %328 : vector<128x32xf32>
    %330 = arith.addf %329, %286 : vector<128x32xf32>
    %331 = vector.extract_strided_slice %330 {offsets = [0, 0], sizes = [64, 32], strides = [1, 1]} : vector<128x32xf32> to vector<64x32xf32>
    %c16_264 = arith.constant 16 : index
    %c0_265 = arith.constant 0 : index
    %332 = vector.load %arg10[%c16_264, %c0_265] : memref<192x32xf32, #tpu.memory_space<vmem>>, vector<64x32xf32>
    tpu.vector_store %arg10[%c16_264, %c0_265], %331 {strides = array<i32>} : memref<192x32xf32, #tpu.memory_space<vmem>>, vector<64x32xf32>,
    %333 = vector.extract_strided_slice %330 {offsets = [64, 0], sizes = [64, 32], strides = [1, 1]} : vector<128x32xf32> to vector<64x32xf32>
    %c112_266 = arith.constant 112 : index
    %c0_267 = arith.constant 0 : index
    %334 = vector.load %arg10[%c112_266, %c0_267] : memref<192x32xf32, #tpu.memory_space<vmem>>, vector<64x32xf32>
    tpu.vector_store %arg10[%c112_266, %c0_267], %333 {strides = array<i32>} : memref<192x32xf32, #tpu.memory_space<vmem>>, vector<64x32xf32>,
    %c12_268 = arith.constant 12 : index
    %c0_269 = arith.constant 0 : index
    %335 = vector.load %arg10[%c12_268, %c0_269] : memref<192x32xf32, #tpu.memory_space<vmem>>, vector<64x32xf32>
    %c108_270 = arith.constant 108 : index
    %c0_271 = arith.constant 0 : index
    %336 = vector.load %arg10[%c108_270, %c0_271] : memref<192x32xf32, #tpu.memory_space<vmem>>, vector<64x32xf32>
    %337 = tpu.concatenate %335, %336 in 0 : vector<64x32xf32>, vector<64x32xf32> -> vector<128x32xf32>
    %c14_272 = arith.constant 14 : index
    %c0_273 = arith.constant 0 : index
    %338 = vector.load %arg10[%c14_272, %c0_273] : memref<192x32xf32, #tpu.memory_space<vmem>>, vector<64x32xf32>
    %c110_274 = arith.constant 110 : index
    %c0_275 = arith.constant 0 : index
    %339 = vector.load %arg10[%c110_274, %c0_275] : memref<192x32xf32, #tpu.memory_space<vmem>>, vector<64x32xf32>
    %340 = tpu.concatenate %338, %339 in 0 : vector<64x32xf32>, vector<64x32xf32> -> vector<128x32xf32>
    %c16_276 = arith.constant 16 : index
    %c0_277 = arith.constant 0 : index
    %341 = vector.load %arg10[%c16_276, %c0_277] : memref<192x32xf32, #tpu.memory_space<vmem>>, vector<64x32xf32>
    %c112_278 = arith.constant 112 : index
    %c0_279 = arith.constant 0 : index
    %342 = vector.load %arg10[%c112_278, %c0_279] : memref<192x32xf32, #tpu.memory_space<vmem>>, vector<64x32xf32>
    %343 = tpu.concatenate %341, %342 in 0 : vector<64x32xf32>, vector<64x32xf32> -> vector<128x32xf32>
    %c18_280 = arith.constant 18 : index
    %c0_281 = arith.constant 0 : index
    %344 = vector.load %arg10[%c18_280, %c0_281] : memref<192x32xf32, #tpu.memory_space<vmem>>, vector<64x32xf32>
    %c114_282 = arith.constant 114 : index
    %c0_283 = arith.constant 0 : index
    %345 = vector.load %arg10[%c114_282, %c0_283] : memref<192x32xf32, #tpu.memory_space<vmem>>, vector<64x32xf32>
    %346 = tpu.concatenate %344, %345 in 0 : vector<64x32xf32>, vector<64x32xf32> -> vector<128x32xf32>
    %c20_284 = arith.constant 20 : index
    %c0_285 = arith.constant 0 : index
    %347 = vector.load %arg10[%c20_284, %c0_285] : memref<192x32xf32, #tpu.memory_space<vmem>>, vector<64x32xf32>
    %c116_286 = arith.constant 116 : index
    %c0_287 = arith.constant 0 : index
    %348 = vector.load %arg10[%c116_286, %c0_287] : memref<192x32xf32, #tpu.memory_space<vmem>>, vector<64x32xf32>
    %349 = tpu.concatenate %347, %348 in 0 : vector<64x32xf32>, vector<64x32xf32> -> vector<128x32xf32>
    %350 = tpu.concatenate %337, %340, %343, %346, %349 in 1 : vector<128x32xf32>, vector<128x32xf32>, vector<128x32xf32>, vector<128x32xf32>, vector<128x32xf32> -> vector<128x160xf32>
    %351 = arith.truncf %350 : vector<128x160xf32> to vector<128x160xbf16>
    %c6_288 = arith.constant 6 : index
    %c0_289 = arith.constant 0 : index
    %c0_290 = arith.constant 0 : index
    %352 = vector.load %arg1[%c6_288, %c0_289, %c0_290] : memref<8x160x64xbf16, #tpu.memory_space<vmem>>, vector<1x160x64xbf16>
    %353 = vector.shape_cast %352 : vector<1x160x64xbf16> to vector<160x64xbf16>
    %cst_291 = arith.constant dense<0.000000e+00> : vector<128x64xf32>
    %354 = tpu.matmul %351, %353, %cst_291 {dimension_numbers = #tpu.dot_dimension_numbers<[1], [0], [0], [1], [0, 0, 1, 1], [], []>} : vector<128x160xbf16>, vector<160x64xbf16>, vector<128x64xf32> -> vector<128x64xf32>
    %c6_292 = arith.constant 6 : index
    %c0_293 = arith.constant 0 : index
    %355 = vector.load %arg3[%c6_292, %c0_293] : memref<8x96xf32, #tpu.memory_space<vmem>>, vector<1x64xf32>
    %356 = vector.broadcast %355 : vector<1x64xf32> to vector<128x64xf32>
    %357 = arith.addf %354, %356 : vector<128x64xf32>
    %358 = vector.extract_strided_slice %357 {offsets = [0, 0], sizes = [128, 32], strides = [1, 1]} : vector<128x64xf32> to vector<128x32xf32>
    %359 = math.tanh %358 : vector<128x32xf32>
    %360 = vector.extract_strided_slice %357 {offsets = [0, 32], sizes = [128, 32], strides = [1, 1]} : vector<128x64xf32> to vector<128x32xf32>
    %361 = arith.negf %360 : vector<128x32xf32>
    %362 = math.exp %361 : vector<128x32xf32>
    %cst_294 = arith.constant 1.000000e+00 : f32
    %363 = vector.broadcast %cst_294 : f32 to vector<128x32xf32>
    %364 = arith.addf %363, %362 : vector<128x32xf32>
    %365 = arith.divf %363, %364 : vector<128x32xf32>
    %366 = arith.mulf %359, %365 : vector<128x32xf32>
    %367 = arith.truncf %366 : vector<128x32xf32> to vector<128x32xbf16>
    %c6_295 = arith.constant 6 : index
    %c0_296 = arith.constant 0 : index
    %c0_297 = arith.constant 0 : index
    %368 = vector.load %arg2[%c6_295, %c0_296, %c0_297] : memref<8x32x32xbf16, #tpu.memory_space<vmem>>, vector<1x32x32xbf16>
    %369 = vector.shape_cast %368 : vector<1x32x32xbf16> to vector<32x32xbf16>
    %cst_298 = arith.constant dense<0.000000e+00> : vector<128x32xf32>
    %370 = tpu.matmul %367, %369, %cst_298 {dimension_numbers = #tpu.dot_dimension_numbers<[1], [0], [0], [1], [0, 0, 1, 1], [], []>} : vector<128x32xbf16>, vector<32x32xbf16>, vector<128x32xf32> -> vector<128x32xf32>
    %c6_299 = arith.constant 6 : index
    %c64_300 = arith.constant 64 : index
    %371 = vector.load %arg3[%c6_299, %c64_300] : memref<8x96xf32, #tpu.memory_space<vmem>>, vector<1x32xf32>
    %372 = vector.broadcast %371 : vector<1x32xf32> to vector<128x32xf32>
    %373 = arith.addf %370, %372 : vector<128x32xf32>
    %374 = arith.addf %373, %330 : vector<128x32xf32>
    %375 = vector.extract_strided_slice %374 {offsets = [0, 0], sizes = [64, 32], strides = [1, 1]} : vector<128x32xf32> to vector<64x32xf32>
    %c16_301 = arith.constant 16 : index
    %c0_302 = arith.constant 0 : index
    %376 = vector.load %arg10[%c16_301, %c0_302] : memref<192x32xf32, #tpu.memory_space<vmem>>, vector<64x32xf32>
    tpu.vector_store %arg10[%c16_301, %c0_302], %375 {strides = array<i32>} : memref<192x32xf32, #tpu.memory_space<vmem>>, vector<64x32xf32>,
    %377 = vector.extract_strided_slice %374 {offsets = [64, 0], sizes = [64, 32], strides = [1, 1]} : vector<128x32xf32> to vector<64x32xf32>
    %c112_303 = arith.constant 112 : index
    %c0_304 = arith.constant 0 : index
    %378 = vector.load %arg10[%c112_303, %c0_304] : memref<192x32xf32, #tpu.memory_space<vmem>>, vector<64x32xf32>
    tpu.vector_store %arg10[%c112_303, %c0_304], %377 {strides = array<i32>} : memref<192x32xf32, #tpu.memory_space<vmem>>, vector<64x32xf32>,
    %c14_305 = arith.constant 14 : index
    %c0_306 = arith.constant 0 : index
    %379 = vector.load %arg10[%c14_305, %c0_306] : memref<192x32xf32, #tpu.memory_space<vmem>>, vector<64x32xf32>
    %c110_307 = arith.constant 110 : index
    %c0_308 = arith.constant 0 : index
    %380 = vector.load %arg10[%c110_307, %c0_308] : memref<192x32xf32, #tpu.memory_space<vmem>>, vector<64x32xf32>
    %381 = tpu.concatenate %379, %380 in 0 : vector<64x32xf32>, vector<64x32xf32> -> vector<128x32xf32>
    %c15_309 = arith.constant 15 : index
    %c0_310 = arith.constant 0 : index
    %382 = vector.load %arg10[%c15_309, %c0_310] : memref<192x32xf32, #tpu.memory_space<vmem>>, vector<64x32xf32>
    %c111_311 = arith.constant 111 : index
    %c0_312 = arith.constant 0 : index
    %383 = vector.load %arg10[%c111_311, %c0_312] : memref<192x32xf32, #tpu.memory_space<vmem>>, vector<64x32xf32>
    %384 = tpu.concatenate %382, %383 in 0 : vector<64x32xf32>, vector<64x32xf32> -> vector<128x32xf32>
    %c16_313 = arith.constant 16 : index
    %c0_314 = arith.constant 0 : index
    %385 = vector.load %arg10[%c16_313, %c0_314] : memref<192x32xf32, #tpu.memory_space<vmem>>, vector<64x32xf32>
    %c112_315 = arith.constant 112 : index
    %c0_316 = arith.constant 0 : index
    %386 = vector.load %arg10[%c112_315, %c0_316] : memref<192x32xf32, #tpu.memory_space<vmem>>, vector<64x32xf32>
    %387 = tpu.concatenate %385, %386 in 0 : vector<64x32xf32>, vector<64x32xf32> -> vector<128x32xf32>
    %c17_317 = arith.constant 17 : index
    %c0_318 = arith.constant 0 : index
    %388 = vector.load %arg10[%c17_317, %c0_318] : memref<192x32xf32, #tpu.memory_space<vmem>>, vector<64x32xf32>
    %c113_319 = arith.constant 113 : index
    %c0_320 = arith.constant 0 : index
    %389 = vector.load %arg10[%c113_319, %c0_320] : memref<192x32xf32, #tpu.memory_space<vmem>>, vector<64x32xf32>
    %390 = tpu.concatenate %388, %389 in 0 : vector<64x32xf32>, vector<64x32xf32> -> vector<128x32xf32>
    %c18_321 = arith.constant 18 : index
    %c0_322 = arith.constant 0 : index
    %391 = vector.load %arg10[%c18_321, %c0_322] : memref<192x32xf32, #tpu.memory_space<vmem>>, vector<64x32xf32>
    %c114_323 = arith.constant 114 : index
    %c0_324 = arith.constant 0 : index
    %392 = vector.load %arg10[%c114_323, %c0_324] : memref<192x32xf32, #tpu.memory_space<vmem>>, vector<64x32xf32>
    %393 = tpu.concatenate %391, %392 in 0 : vector<64x32xf32>, vector<64x32xf32> -> vector<128x32xf32>
    %394 = tpu.concatenate %381, %384, %387, %390, %393 in 1 : vector<128x32xf32>, vector<128x32xf32>, vector<128x32xf32>, vector<128x32xf32>, vector<128x32xf32> -> vector<128x160xf32>
    %395 = arith.truncf %394 : vector<128x160xf32> to vector<128x160xbf16>
    %c7_325 = arith.constant 7 : index
    %c0_326 = arith.constant 0 : index
    %c0_327 = arith.constant 0 : index
    %396 = vector.load %arg1[%c7_325, %c0_326, %c0_327] : memref<8x160x64xbf16, #tpu.memory_space<vmem>>, vector<1x160x64xbf16>
    %397 = vector.shape_cast %396 : vector<1x160x64xbf16> to vector<160x64xbf16>
    %cst_328 = arith.constant dense<0.000000e+00> : vector<128x64xf32>
    %398 = tpu.matmul %395, %397, %cst_328 {dimension_numbers = #tpu.dot_dimension_numbers<[1], [0], [0], [1], [0, 0, 1, 1], [], []>} : vector<128x160xbf16>, vector<160x64xbf16>, vector<128x64xf32> -> vector<128x64xf32>
    %c7_329 = arith.constant 7 : index
    %c0_330 = arith.constant 0 : index
    %399 = vector.load %arg3[%c7_329, %c0_330] : memref<8x96xf32, #tpu.memory_space<vmem>>, vector<1x64xf32>
    %400 = vector.broadcast %399 : vector<1x64xf32> to vector<128x64xf32>
    %401 = arith.addf %398, %400 : vector<128x64xf32>
    %402 = vector.extract_strided_slice %401 {offsets = [0, 0], sizes = [128, 32], strides = [1, 1]} : vector<128x64xf32> to vector<128x32xf32>
    %403 = math.tanh %402 : vector<128x32xf32>
    %404 = vector.extract_strided_slice %401 {offsets = [0, 32], sizes = [128, 32], strides = [1, 1]} : vector<128x64xf32> to vector<128x32xf32>
    %405 = arith.negf %404 : vector<128x32xf32>
    %406 = math.exp %405 : vector<128x32xf32>
    %cst_331 = arith.constant 1.000000e+00 : f32
    %407 = vector.broadcast %cst_331 : f32 to vector<128x32xf32>
    %408 = arith.addf %407, %406 : vector<128x32xf32>
    %409 = arith.divf %407, %408 : vector<128x32xf32>
    %410 = arith.mulf %403, %409 : vector<128x32xf32>
    %411 = arith.truncf %410 : vector<128x32xf32> to vector<128x32xbf16>
    %c7_332 = arith.constant 7 : index
    %c0_333 = arith.constant 0 : index
    %c0_334 = arith.constant 0 : index
    %412 = vector.load %arg2[%c7_332, %c0_333, %c0_334] : memref<8x32x32xbf16, #tpu.memory_space<vmem>>, vector<1x32x32xbf16>
    %413 = vector.shape_cast %412 : vector<1x32x32xbf16> to vector<32x32xbf16>
    %cst_335 = arith.constant dense<0.000000e+00> : vector<128x32xf32>
    %414 = tpu.matmul %411, %413, %cst_335 {dimension_numbers = #tpu.dot_dimension_numbers<[1], [0], [0], [1], [0, 0, 1, 1], [], []>} : vector<128x32xbf16>, vector<32x32xbf16>, vector<128x32xf32> -> vector<128x32xf32>
    %c7_336 = arith.constant 7 : index
    %c64_337 = arith.constant 64 : index
    %415 = vector.load %arg3[%c7_336, %c64_337] : memref<8x96xf32, #tpu.memory_space<vmem>>, vector<1x32xf32>
    %416 = vector.broadcast %415 : vector<1x32xf32> to vector<128x32xf32>
    %417 = arith.addf %414, %416 : vector<128x32xf32>
    %418 = arith.addf %417, %374 : vector<128x32xf32>
    %c0_338 = arith.constant 0 : index
    %c0_339 = arith.constant 0 : index
    %419 = vector.load %arg8[%c0_338, %c0_339] : memref<8x32xf32, #tpu.memory_space<vmem>>, vector<8x32xf32>
    %420 = arith.truncf %419 : vector<8x32xf32> to vector<8x32xbf16>
    %421 = arith.truncf %418 : vector<128x32xf32> to vector<128x32xbf16>
    %cst_340 = arith.constant dense<0.000000e+00> : vector<8x128xf32>
    %422 = tpu.matmul %420, %421, %cst_340 {dimension_numbers = #tpu.dot_dimension_numbers<[1], [1], [0], [0], [0, 0, 1, 0], [], []>} : vector<8x32xbf16>, vector<128x32xbf16>, vector<8x128xf32> -> vector<8x128xf32>
    %423 = vector.extract_strided_slice %422 {offsets = [2, 0], sizes = [1, 128], strides = [1, 1]} : vector<8x128xf32> to vector<1x128xf32>
    %c3_341 = arith.constant 3 : index
    %c0_342 = arith.constant 0 : index
    %424 = vector.load %arg8[%c3_341, %c0_342] : memref<8x32xf32, #tpu.memory_space<vmem>>, vector<1x1xf32>
    %425 = vector.broadcast %424 : vector<1x1xf32> to vector<1x128xf32>
    %426 = arith.addf %423, %425 : vector<1x128xf32>
    %c0_343 = arith.constant 0 : index
    %c0_344 = arith.constant 0 : index
    %427 = vector.load %arg9[%c0_343, %c0_344] : memref<1x128xf32, #tpu.memory_space<vmem>>, vector<1x128xf32>
    tpu.vector_store %arg9[%c0_343, %c0_344], %426 {strides = array<i32>} : memref<1x128xf32, #tpu.memory_space<vmem>>, vector<1x128xf32>,
    return
  }
}

</mosaic_0001>

<bundles_post_ra>
// kernel: _lambda_.1
= control target key start
LH: loop header
LB: loop body
LE: loop exit
PB: predicated region body
PF: predicated region fallthrough
CT: control target
= control target key end

     0   :  { %14 = vsyncpa [#allocation5], 0  ;;  %s13881_s0 = inlined_call_operand.vmem [shape: f32[128,1], index: 0, kind: input, shape index: {}]   ;;  %s13882_s1 = inlined_call_operand.hbm [shape: bf16[8,160,64], index: 1, kind: input, shape index: {}]   ;;  %s13883_s2 = inlined_call_operand.vmem [shape: bf16[8,32,32], index: 2, kind: input, shape index: {}]   ;;  %s13884_s3 = inlined_call_operand.vmem [shape: f32[8,96], index: 3, kind: input, shape index: {}]   ;;  %s13885_s4 = inlined_call_operand.hbm [shape: bf16[128,32], index: 4, kind: input, shape index: {}]   ;;  %s13886_s5 = inlined_call_operand.hbm [shape: bf16[128,8], index: 5, kind: input, shape index: {}]   ;;  %s13887_s6 = inlined_call_operand.vmem [shape: bf16[8,128], index: 6, kind: input, shape index: {}]   ;;  %s13888_s7 = inlined_call_operand.vmem [shape: bf16[32,128], index: 7, kind: input, shape index: {}]   ;;  %s13889_s8 = inlined_call_operand.vmem [shape: f32[8,32], index: 8, kind: input, shape index: {}]   ;;  %s13890_s9 = inlined_call_operand.vmem [shape: f32[1,128], index: 9, kind: output, shape index: {}]  }
   0x1   :  { %15 = vsyncpa [#allocation7], 0  ;;  %s10686_s30 = smov [#allocation6]   ;;  %s10687_s11 = smov [#allocation4]  }
   0x2   :  { %s39_s10 = sshll.u32 %s10686_s30, 4  ;;  %s23_s12 = sshll.u32 %s10687_s11, 4  ;;  %s40_s10 = int_to_ptr.vmem [resolvable:$true] %s39_s10  ;;  %s10746_s12 = int_to_ptr.vmem [resolvable:$true] %s23_s12 }
   0x3   :  { %s10616_s15 = scalar_lea.hbm %s13885_s4, 1024 }
   0x4   :  { %p10617_p0 = scmp.ne.s32.totalorder %s13885_s4, %s10616_s15  ;;  %p10620_p1 = scmp.lt.u32.totalorder %s10616_s15, %s13885_s4 }
   0x6   :  { %p10622_p2 = pnand %p10620_p1, %p10617_p0 }
   0x8   :  { %10625 = shalt.err (!%p10622_p2)
}
   0x9   :  { %s10626_s20 = scalar_lea.vmem %s40_s10, 1024  ;;  %p10631_p4 = scmp.lt.s32.totalorder %s40_s10, %s40_s10 }
   0xa   :  { %p10627_p3 = scmp.ne.s32.totalorder %s40_s10, %s10626_s20  ;;  %p10632_p5 = scmp.lt.s32.totalorder %s10626_s20, %s10626_s20 }
   0xc   :  { %p10633_p6 = por %p10632_p5, %p10631_p4 }
   0xe   :  { %p10634_p7 = pnand %p10633_p6, %p10627_p3 }
  0x10   :  { %10637 = shalt.err (!%p10634_p7)
}
  0x11   :  { %s10688_s21 = smov 64   ;;  %s10689_s22 = smov 4  }
  0x12   :  { %45 = dma.hbm_to_vmem [thread:$0]  %s13885_s4, 1024, %s40_s10, [#allocation7], %s10688_s21, %s10688_s21, %s10689_s22  }
  0x13   :  { %s10638_s27 = scalar_lea.hbm %s13882_s1, 10240 }
  0x14   :  { %p10639_p8 = scmp.ne.s32.totalorder %s13882_s1, %s10638_s27  ;;  %p10642_p9 = scmp.lt.u32.totalorder %s10638_s27, %s13882_s1 }
  0x16   :  { %p10644_p10 = pnand %p10642_p9, %p10639_p8 }
  0x18   :  { %10647 = shalt.err (!%p10644_p10)
}
  0x19   :  { %s10648_s13 = scalar_lea.vmem %s10746_s12, 10240  ;;  %p10653_p12 = scmp.lt.s32.totalorder %s10746_s12, %s10746_s12 }
  0x1a   :  { %p10649_p11 = scmp.ne.s32.totalorder %s10746_s12, %s10648_s13  ;;  %p10654_p13 = scmp.lt.s32.totalorder %s10648_s13, %s10648_s13 }
  0x1c   :  { %p10655_p0 = por %p10654_p13, %p10653_p12 }
  0x1e   :  { %p10656_p1 = pnand %p10655_p0, %p10649_p11 }
  0x20   :  { %10659 = shalt.err (!%p10656_p1)
}
  0x21   :  { %29 = dma.hbm_to_vmem [thread:$0]  %s13882_s1, 10240, %s10746_s12, [#allocation5], %s10688_s21, %s10688_s21, %s10689_s22  }
  0x22   :  { %s10690_s14 = smov [#allocation8]   ;;  %s10660_s18 = scalar_lea.hbm %s13886_s5, 1024 }
  0x23   :  { %s51_s15 = sshll.u32 %s10690_s14, 4  ;;  %p10661_p2 = scmp.ne.s32.totalorder %s13886_s5, %s10660_s18  ;;  %s52_s15 = int_to_ptr.vmem [resolvable:$true] %s51_s15 }
  0x24   :  { %p10664_p3 = scmp.lt.u32.totalorder %s10660_s18, %s13886_s5 }
  0x26   :  { %p10666_p4 = pnand %p10664_p3, %p10661_p2 }
  0x28   :  { %10669 = shalt.err (!%p10666_p4)
}
  0x29   :  { %s10670_s25 = scalar_lea.vmem %s52_s15, 1024  ;;  %p10675_p6 = scmp.lt.s32.totalorder %s52_s15, %s52_s15 }
  0x2a   :  { %p10671_p5 = scmp.ne.s32.totalorder %s52_s15, %s10670_s25  ;;  %p10676_p7 = scmp.lt.s32.totalorder %s10670_s25, %s10670_s25 }
  0x2c   :  { %p10677_p8 = por %p10676_p7, %p10675_p6 }
  0x2e   :  { %p10678_p9 = pnand %p10677_p8, %p10671_p5 }
  0x30   :  { %10681 = shalt.err (!%p10678_p9)
}
  0x31   :  { %57 = dma.hbm_to_vmem [thread:$0]  %s13886_s5, 1024, %s52_s15, [#allocation7], %s10688_s21, %s10688_s21, %s10689_s22  }
  0x32   :  { %10682 = dma.done.wait [#allocation5], 10240  }
  0x33   :  { %10683 = vsyncadd [#allocation5], 4294957056 }
  0x34   :  { %10684 = dma.done.wait [#allocation7], 2048  }
  0x35   :  { %10685 = vsyncadd [#allocation7], 4294965248  ;;  %v10691_v0 = vmov 0   ;;  %v85_v1 = vld [vmem:[%s13881_s0 + $0x10] sm:$0xff]  ;;  %v83_v2 = vld [vmem:[%s13881_s0] sm:$0xff]  ;;  %vm74_vm0 = vcmask 261120  }
  0x36   :  { %8739 = vset.pattern.permute.xlu1 %v10691_v0  ;;  %8738 = vset.pattern.permute.xlu0 %v10691_v0  ;;  %v86_v3 = vld [vmem:[%s13881_s0 + $0x18] sm:$0xff]  ;;  %v84_v4 = vld [vmem:[%s13881_s0 + $0x8] sm:$0xff]  ;;  %v87_v6 = vld [vmem:[%s13881_s0 + $0x20] sm:$0xff]  ;;  %v10692_v9 = vmov 0.0   ;;  %s10693_s15 = smov 32   ;;  %s10694_s16 = smov 96  }
  0x37   :  { %684 = vmatprep.subr.bf16.mxu0 %v10691_v0  ;;  %112 = vperm.xlu1 %8739, %v85_v1   ;;  %v88_v5 = vld [vmem:[%s13881_s0 + $0x28] sm:$0xff]  ;;  %v90_v7 = vld [vmem:[%s13881_s0 + $0x38] sm:$0xff]  ;;  %v89_v8 = vld [vmem:[%s13881_s0 + $0x30] sm:$0xff]  ;;  %76 = vst.msk [vmem:[#allocation2 + $0x8] sm:$0xff] %vm74_vm0, %v10692_v9  ;;  %vm525_vm1 = vcmask 523264   ;;  %vm542_vm2 = vcmask 785408  }
  0x38   :  { %102 = vperm.xlu0 %8738, %v83_v2   ;;  %75 = vst.msk [vmem:[#allocation2] sm:$0xff] %vm74_vm0, %v10692_v9  ;;  %77 = vst.msk [vmem:[#allocation2 + $0x50] sm:$0xff] %vm74_vm0, %v10692_v9  ;;  %v92_v10 = vld [vmem:[%s13881_s0 + $0x48] sm:$0xff]  ;;  %v91_v11 = vld [vmem:[%s13881_s0 + $0x40] sm:$0xff]  ;;  %vm10695_vm3 = vmmov 0   ;;  %vm4102_vm4 = vcmask 1043456  }
  0x39   :  { %78 = vst.msk [vmem:[#allocation2 + $0x58] sm:$0xff] %vm74_vm0, %v10692_v9  ;;  %79 = vst.msk [vmem:[#allocation2 + $0x60] sm:$0xff] %vm74_vm0, %v10692_v9  ;;  %v94_v12 = vld [vmem:[%s13881_s0 + $0x58] sm:$0xff]  ;;  %v93_v13 = vld [vmem:[%s13881_s0 + $0x50] sm:$0xff]  ;;  %vm4098_vm5 = vcmask 64512  }
  0x3a   :  { %80 = vst.msk [vmem:[#allocation2 + $0x68] sm:$0xff] %vm74_vm0, %v10692_v9  ;;  %81 = vst.msk [vmem:[#allocation2 + $0xb0] sm:$0xff] %vm74_vm0, %v10692_v9  ;;  %v96_v14 = vld [vmem:[%s13881_s0 + $0x68] sm:$0xff]  ;;  %v95_v15 = vld [vmem:[%s13881_s0 + $0x60] sm:$0xff] }
  0x3b   :  { %117 = vperm.xlu1 %8739, %v86_v3   ;;  %82 = vst.msk [vmem:[#allocation2 + $0xb8] sm:$0xff] %vm74_vm0, %v10692_v9  ;;  %v98_v16 = vld [vmem:[%s13881_s0 + $0x78] sm:$0xff]  ;;  %v97_v17 = vld [vmem:[%s13881_s0 + $0x70] sm:$0xff]  ;;  %v9730_v18 = vld [vmem:[#allocation4] sm:$0xff]  }
  0x3c   :  { %107 = vperm.xlu0 %8738, %v84_v4   ;;  %685 = vmatpush1.bf16.msra.mxu0 %v9730_v18  ;;  %v9731_v19 = vld [vmem:[#allocation4 + $0x8] sm:$0xff]   ;;  %v9732_v20 = vld [vmem:[#allocation4 + $0x10] sm:$0xff]   ;;  %v9733_v21 = vld [vmem:[#allocation4 + $0x18] sm:$0xff]  }
  0x3d   :  { %686 = vmatprep.subr.bf16.mxu0 %v10691_v0  ;;  %v9734_v22 = vld [vmem:[#allocation4 + $0x20] sm:$0xff]   ;;  %v9735_v23 = vld [vmem:[#allocation4 + $0x28] sm:$0xff]   ;;  %v9736_v24 = vld [vmem:[#allocation4 + $0x30] sm:$0xff]  }
  0x3e   :  { %v9737_v25 = vld [vmem:[#allocation4 + $0x38] sm:$0xff]   ;;  %v10876_v26 = vld [vmem:[%s13889_s8] ss:$0 sm:$0xff]  ;;  %v10881_v27 = vld [vmem:[%s13889_s8 + $0x1] ss:$0 sm:$0xff] }
  0x3f   :  { %127 = vperm.xlu1 %8739, %v88_v5   ;;  %v9738_v50 = vld [vmem:[#allocation4 + $0x40] sm:$0xff]  }
  0x40   :  { %122 = vperm.xlu0 %8738, %v87_v6   ;;  %687 = vmatpush1.bf16.msra.mxu0 %v9731_v19 }
  0x41   :  { %688 = vmatprep.subr.bf16.mxu0 %v10691_v0 }
  0x43   :  { %137 = vperm.xlu1 %8739, %v90_v7  }
  0x44   :  { %132 = vperm.xlu0 %8738, %v89_v8   ;;  %689 = vmatpush1.bf16.msra.mxu0 %v9732_v20 }
  0x45   :  { %690 = vmatprep.subr.bf16.mxu0 %v10691_v0 }
  0x47   :  { %147 = vperm.xlu1 %8739, %v92_v10  }
  0x48   :  { %142 = vperm.xlu0 %8738, %v91_v11   ;;  %691 = vmatpush1.bf16.msra.mxu0 %v9733_v21 }
  0x49   :  { %692 = vmatprep.subr.bf16.mxu0 %v10691_v0 }
  0x4b   :  { %157 = vperm.xlu1 %8739, %v94_v12  }
  0x4c   :  { %152 = vperm.xlu0 %8738, %v93_v13   ;;  %693 = vmatpush1.bf16.msra.mxu0 %v9734_v22 }
  0x4d   :  { %694 = vmatprep.subr.bf16.mxu0 %v10691_v0 }
  0x4f   :  { %167 = vperm.xlu1 %8739, %v96_v14  }
  0x50   :  { %162 = vperm.xlu0 %8738, %v95_v15   ;;  %695 = vmatpush1.bf16.msra.mxu0 %v9735_v23 }
  0x51   :  { %696 = vmatprep.subr.bf16.mxu0 %v10691_v0 }
  0x53   :  { %177 = vperm.xlu1 %8739, %v98_v16  }
  0x54   :  { %172 = vperm.xlu0 %8738, %v97_v17   ;;  %697 = vmatpush1.bf16.msra.mxu0 %v9736_v24 }
  0x55   :  { %698 = vmatprep.subr.bf16.mxu0 %v10691_v0 }
  0x58   :  { %699 = vmatpush1.bf16.msra.mxu0 %v9737_v25 }
  0x59   :  { %700 = vmatprep.subr.bf16.mxu0 %v10691_v0 }
  0x5c   :  { %701 = vmatpush1.bf16.msra.mxu0 %v9738_v50 }
  0x5d   :  { %702 = vmatprep.subr.bf16.mxu0 %v10691_v0 }
  0xb6   :  { %v113_v28 = vpop.permute.xlu1 %112 }
  0xb7   :  { %v103_v29 = vpop.permute.xlu0 %102  ;;  %v186_v30 = vmul.f32 %v10876_v26, %v113_v28 }
  0xb8   :  { %v184_v31 = vmul.f32 %v10876_v26, %v103_v29 }
  0xb9   :  { %v10886_v32 = vadd.f32 %v10881_v27, %v186_v30  ;;  %v9739_v30 = vld [vmem:[#allocation4 + $0x48] sm:$0xff]  }
  0xba   :  { %v10889_v33 = vadd.f32 %v10881_v27, %v184_v31  ;;  %v118_v34 = vpop.permute.xlu1 %117  ;;  %703 = vmatpush1.bf16.msra.mxu0 %v9739_v30 }
  0xbb   :  { %v108_v35 = vpop.permute.xlu0 %107  ;;  %223 = vst.msk [vmem:[#allocation2 + $0x20] sm:$0xff] %vm74_vm0, %v10886_v32  ;;  %v187_v36 = vmul.f32 %v10876_v26, %v118_v34  ;;  %1586 = vmatprep.subr.bf16.mxu0 %v10691_v0 }
  0xbc   :  { %221 = vst.msk [vmem:[#allocation2 + $0x10] sm:$0xff] %vm74_vm0, %v10889_v33  ;;  %v185_v37 = vmul.f32 %v10876_v26, %v108_v35 }
  0xbd   :  { %v10898_v38 = vadd.f32 %v10881_v27, %v187_v36 }
  0xbe   :  { %v10901_v39 = vadd.f32 %v10881_v27, %v185_v37  ;;  %v128_v40 = vpop.permute.xlu1 %127 }
  0xbf   :  { %v123_v41 = vpop.permute.xlu0 %122  ;;  %224 = vst.msk [vmem:[#allocation2 + $0x28] sm:$0xff] %vm74_vm0, %v10898_v38  ;;  %v189_v42 = vmul.f32 %v10876_v26, %v128_v40 }
  0xc0   :  { %222 = vst.msk [vmem:[#allocation2 + $0x18] sm:$0xff] %vm74_vm0, %v10901_v39  ;;  %v188_v43 = vmul.f32 %v10876_v26, %v123_v41 }
  0xc1   :  { %v10910_v44 = vadd.f32 %v10881_v27, %v189_v42 }
  0xc2   :  { %v10913_v45 = vadd.f32 %v10881_v27, %v188_v43  ;;  %v138_v46 = vpop.permute.xlu1 %137  ;;  %v271_v15 = vld [vmem:[#allocation2 + $0x20] sm:$0xff] }
  0xc3   :  { %v133_v47 = vpop.permute.xlu0 %132  ;;  %226 = vst.msk [vmem:[#allocation2 + $0x38] sm:$0xff] %vm74_vm0, %v10910_v44  ;;  %v191_v48 = vmul.f32 %v10876_v26, %v138_v46  ;;  %v253_v58 = vld [vmem:[#allocation2 + $0xf] sm:$0xff] }
  0xc4   :  { %225 = vst.msk [vmem:[#allocation2 + $0x30] sm:$0xff] %vm74_vm0, %v10913_v45  ;;  %v190_v49 = vmul.f32 %v10876_v26, %v133_v47  ;;  %v269_v8 = vld [vmem:[#allocation2 + $0x10] sm:$0xff] }
  0xc5   :  { %v10922_v51 = vadd.f32 %v10881_v27, %v191_v48 }
  0xc6   :  { %v10925_v52 = vadd.f32 %v10881_v27, %v190_v49  ;;  %v148_v53 = vpop.permute.xlu1 %147  ;;  %v256_v16 = vld [vmem:[#allocation2 + $0x27] sm:$0xff] }
  0xc7   :  { %v143_v54 = vpop.permute.xlu0 %142  ;;  %228 = vst.msk [vmem:[#allocation2 + $0x48] sm:$0xff] %vm74_vm0, %v10922_v51  ;;  %v193_v55 = vmul.f32 %v10876_v26, %v148_v53  ;;  %v254_v57 = vld [vmem:[#allocation2 + $0x17] sm:$0xff]  ;;  %v255_v17 = vld [vmem:[#allocation2 + $0x1f] sm:$0xff]  ;;  %v272_v20 = vld [vmem:[#allocation2 + $0x28] sm:$0xff] }
  0xc8   :  { %227 = vst.msk [vmem:[#allocation2 + $0x40] sm:$0xff] %vm74_vm0, %v10925_v52  ;;  %v192_v56 = vmul.f32 %v10876_v26, %v143_v54  ;;  %v301_v59 = vld [vmem:[#allocation2 + $0x12] sm:$0xff]  ;;  %v302_v60 = vld [vmem:[#allocation2 + $0x1a] sm:$0xff]  ;;  %v8740_v63 = vpack.i.bf16 %v254_v57, %v253_v58  ;;  %v8755_v24 = vpack.i.bf16 %v256_v16, %v255_v17  ;;  %v8760_v29 = vpack.i.bf16 %v272_v20, %v271_v15 }
  0xc9   :  { %v10935_v61 = vadd.f32 %v10881_v27, %v193_v55  ;;  %v285_v1 = vld [vmem:[#allocation2 + $0x11] sm:$0xff]  ;;  %v286_v2 = vld [vmem:[#allocation2 + $0x19] sm:$0xff]  ;;  %v560_v3 = vpack.c.bf16 %v302_v60, %v301_v59  ;;  %v287_v23 = vld [vmem:[#allocation2 + $0x21] sm:$0xff] }
  0xca   :  { %v10938_v62 = vadd.f32 %v10881_v27, %v192_v56  ;;  %v158_v4 = vpop.permute.xlu1 %157  ;;  %8741 = vrot.lane.b32.xlu0 %v8740_v63, %s10693_s15  ;;  %v270_v10 = vld [vmem:[#allocation2 + $0x18] sm:$0xff]  ;;  %v8750_v14 = vpack.i.bf16 %v286_v2, %v285_v1 }
  0xcb   :  { %v153_v5 = vpop.permute.xlu0 %152  ;;  %230 = vst.msk [vmem:[#allocation2 + $0x78] sm:$0xff] %vm74_vm0, %v10935_v61  ;;  %v195_v6 = vmul.f32 %v10876_v26, %v158_v4  ;;  %7957 = vmatprep.mubr.msk.bf16.mxu0 %vm74_vm0, %v560_v3  ;;  %v8745_v11 = vpack.i.bf16 %v270_v10, %v269_v8  ;;  %v257_v31 = vld [vmem:[#allocation2 + $0x2f] sm:$0xff]  ;;  %v258_v34 = vld [vmem:[#allocation2 + $0x37] sm:$0xff] }
  0xcc   :  { %229 = vst.msk [vmem:[#allocation2 + $0x70] sm:$0xff] %vm74_vm0, %v10938_v62  ;;  %v194_v7 = vmul.f32 %v10876_v26, %v153_v5  ;;  %v288_v35 = vld [vmem:[#allocation2 + $0x29] sm:$0xff]  ;;  %v8770_v47 = vpack.i.bf16 %v258_v34, %v257_v31  ;;  %v274_v50 = vld [vmem:[#allocation2 + $0x38] sm:$0xff] }
  0xcd   :  { %v10949_v12 = vadd.f32 %v10881_v27, %v195_v6  ;;  %8746 = vrot.lane.b32.xlu1 %v8745_v11, %s10688_s21  ;;  %v8765_v42 = vpack.i.bf16 %v288_v35, %v287_v23  ;;  %v273_v49 = vld [vmem:[#allocation2 + $0x30] sm:$0xff] }
  0xce   :  { %v10952_v13 = vadd.f32 %v10881_v27, %v194_v7  ;;  %v168_v18 = vpop.permute.xlu1 %167  ;;  %8751 = vrot.lane.b32.xlu0 %v8750_v14, %s10694_s16  ;;  %v276_v57 = vld [vmem:[#allocation2 + $0x48] sm:$0xff] }
  0xcf   :  { %v163_v19 = vpop.permute.xlu0 %162  ;;  %232 = vst.msk [vmem:[#allocation2 + $0x88] sm:$0xff] %vm74_vm0, %v10949_v12  ;;  %v197_v21 = vmul.f32 %v10876_v26, %v168_v18  ;;  %v290_v48 = vld [vmem:[#allocation2 + $0x39] sm:$0xff]  ;;  %v260_v55 = vld [vmem:[#allocation2 + $0x47] sm:$0xff] }
  0xd0   :  { %231 = vst.msk [vmem:[#allocation2 + $0x80] sm:$0xff] %vm74_vm0, %v10952_v13  ;;  %v196_v22 = vmul.f32 %v10876_v26, %v163_v19  ;;  %v259_v53 = vld [vmem:[#allocation2 + $0x3f] sm:$0xff]  ;;  %v292_v1 = vld [vmem:[#allocation2 + $0x49] sm:$0xff] }
  0xd1   :  { %v10963_v25 = vadd.f32 %v10881_v27, %v197_v21  ;;  %8756 = vrot.lane.b32.xlu1 %v8755_v24, %s10693_s15  ;;  %v275_v56 = vld [vmem:[#allocation2 + $0x40] sm:$0xff]  ;;  %v8785_v59 = vpack.i.bf16 %v260_v55, %v259_v53 }
  0xd2   :  { %v10966_v28 = vadd.f32 %v10881_v27, %v196_v22  ;;  %v178_v36 = vpop.permute.xlu1 %177  ;;  %8761 = vrot.lane.b32.xlu0 %v8760_v29, %s10688_s21  ;;  %v291_v58 = vld [vmem:[#allocation2 + $0x41] sm:$0xff]  ;;  %v8790_v60 = vpack.i.bf16 %v276_v57, %v275_v56  ;;  %v278_v7 = vld [vmem:[#allocation2 + $0x78] sm:$0xff]  ;;  %v237_v57 = vld [vmem:[#allocation2 + $0xe] sm:$0xff] }
  0xd3   :  { %v173_v37 = vpop.permute.xlu0 %172  ;;  %234 = vst.msk [vmem:[#allocation2 + $0x98] sm:$0xff] %vm74_vm0, %v10963_v25  ;;  %v199_v40 = vmul.f32 %v10876_v26, %v178_v36  ;;  %v262_v63 = vld [vmem:[#allocation2 + $0x77] sm:$0xff]  ;;  %v261_v2 = vld [vmem:[#allocation2 + $0x6f] sm:$0xff]  ;;  %v8795_v3 = vpack.i.bf16 %v292_v1, %v291_v58 }
  0xd4   :  { %233 = vst.msk [vmem:[#allocation2 + $0x90] sm:$0xff] %vm74_vm0, %v10966_v28  ;;  %v198_v41 = vmul.f32 %v10876_v26, %v173_v37  ;;  %v289_v26 = vld [vmem:[#allocation2 + $0x31] sm:$0xff]  ;;  %v8800_v4 = vpack.i.bf16 %v262_v63, %v261_v2 }
  0xd5   :  { %v10977_v43 = vadd.f32 %v10881_v27, %v199_v40  ;;  %8766 = vrot.lane.b32.xlu1 %v8765_v42, %s10694_s16  ;;  %v8780_v54 = vpack.i.bf16 %v290_v48, %v289_v26  ;;  %v277_v6 = vld [vmem:[#allocation2 + $0x70] sm:$0xff] }
  0xd6   :  { %v10980_v46 = vadd.f32 %v10881_v27, %v198_v41  ;;  %8771 = vrot.lane.b32.xlu0 %v8770_v47, %s10693_s15  ;;  %v8775_v27 = vpack.i.bf16 %v274_v50, %v273_v49  ;;  %v293_v8 = vld [vmem:[#allocation2 + $0x71] sm:$0xff]  ;;  %v8805_v11 = vpack.i.bf16 %v278_v7, %v277_v6  ;;  %v280_v17 = vld [vmem:[#allocation2 + $0x88] sm:$0xff] }
  0xd7   :  { %236 = vst.msk [vmem:[#allocation2 + $0xa8] sm:$0xff] %vm74_vm0, %v10977_v43  ;;  %v294_v5 = vld [vmem:[#allocation2 + $0x79] sm:$0xff]  ;;  %v264_v15 = vld [vmem:[#allocation2 + $0x87] sm:$0xff] }
  0xd8   :  { %235 = vst.msk [vmem:[#allocation2 + $0xa0] sm:$0xff] %vm74_vm0, %v10980_v46  ;;  %v263_v10 = vld [vmem:[#allocation2 + $0x7f] sm:$0xff]  ;;  %v8810_v14 = vpack.i.bf16 %v294_v5, %v293_v8  ;;  %v238_v56 = vld [vmem:[#allocation2 + $0x16] sm:$0xff]  ;;  %v304_v8 = vld [vmem:[#allocation2 + $0x2a] sm:$0xff] }
  0xd9   :  { %8776 = vrot.lane.b32.xlu1 %v8775_v27, %s10688_s21  ;;  %v279_v16 = vld [vmem:[#allocation2 + $0x80] sm:$0xff]  ;;  %v8815_v18 = vpack.i.bf16 %v264_v15, %v263_v10 }
  0xda   :  { %8781 = vrot.lane.b32.xlu0 %v8780_v54, %s10694_s16  ;;  %v8820_v19 = vpack.i.bf16 %v280_v17, %v279_v16  ;;  %v295_v23 = vld [vmem:[#allocation2 + $0x81] sm:$0xff]  ;;  %v282_v34 = vld [vmem:[#allocation2 + $0x98] sm:$0xff] }
  0xdb   :  { %v265_v20 = vld [vmem:[#allocation2 + $0x8f] sm:$0xff]  ;;  %v266_v21 = vld [vmem:[#allocation2 + $0x97] sm:$0xff]  ;;  %v303_v7 = vld [vmem:[#allocation2 + $0x22] sm:$0xff] }
  0xdc   :  { %v296_v22 = vld [vmem:[#allocation2 + $0x89] sm:$0xff]  ;;  %v8830_v29 = vpack.i.bf16 %v266_v21, %v265_v20  ;;  %v297_v35 = vld [vmem:[#allocation2 + $0x91] sm:$0xff]  ;;  %v239_v21 = vld [vmem:[#allocation2 + $0x1e] sm:$0xff] }
  0xdd   :  { %8786 = vrot.lane.b32.xlu1 %v8785_v59, %s10693_s15  ;;  %v8825_v24 = vpack.i.bf16 %v296_v22, %v295_v23  ;;  %v281_v31 = vld [vmem:[#allocation2 + $0x90] sm:$0xff]  ;;  %v240_v20 = vld [vmem:[#allocation2 + $0x26] sm:$0xff] }
  0xde   :  { %8791 = vrot.lane.b32.xlu0 %v8790_v60, %s10688_s21  ;;  %v8835_v37 = vpack.i.bf16 %v282_v34, %v281_v31  ;;  %v284_v47 = vld [vmem:[#allocation2 + $0xa8] sm:$0xff] }
  0xdf   :  { %v298_v30 = vld [vmem:[#allocation2 + $0x99] sm:$0xff]  ;;  %v268_v41 = vld [vmem:[#allocation2 + $0xa7] sm:$0xff] }
  0xe0   :  { %v267_v36 = vld [vmem:[#allocation2 + $0x9f] sm:$0xff]  ;;  %v8840_v40 = vpack.i.bf16 %v298_v30, %v297_v35  ;;  %v300_v26 = vld [vmem:[#allocation2 + $0xa9] sm:$0xff] }
  0xe1   :  { %8796 = vrot.lane.b32.xlu1 %v8795_v3, %s10694_s16  ;;  %v283_v42 = vld [vmem:[#allocation2 + $0xa0] sm:$0xff]  ;;  %v8845_v48 = vpack.i.bf16 %v268_v41, %v267_v36 }
  0xe2   :  { %8801 = vrot.lane.b32.xlu0 %v8800_v4, %s10693_s15  ;;  %v8850_v49 = vpack.i.bf16 %v284_v47, %v283_v42  ;;  %v299_v50 = vld [vmem:[#allocation2 + $0xa1] sm:$0xff] }
  0xe3   :  { %v8855_v53 = vpack.i.bf16 %v300_v26, %v299_v50  ;;  %v305_v26 = vld [vmem:[#allocation2 + $0x32] sm:$0xff] }
  0xe5   :  { %8806 = vrot.lane.b32.xlu1 %v8805_v11, %s10688_s21 }
  0xe6   :  { %8811 = vrot.lane.b32.xlu0 %v8810_v14, %s10694_s16 }
  0xe9   :  { %8816 = vrot.lane.b32.xlu1 %v8815_v18, %s10693_s15 }
  0xea   :  { %8821 = vrot.lane.b32.xlu0 %v8820_v19, %s10688_s21 }
  0xed   :  { %8826 = vrot.lane.b32.xlu1 %v8825_v24, %s10694_s16 }
  0xee   :  { %8831 = vrot.lane.b32.xlu0 %v8830_v29, %s10693_s15  ;;  %v562_v29 = vpack.c.bf16 %v304_v8, %v303_v7 }
  0xf1   :  { %8836 = vrot.lane.b32.xlu1 %v8835_v37, %s10688_s21 }
  0xf2   :  { %8841 = vrot.lane.b32.xlu0 %v8840_v40, %s10694_s16  ;;  %v306_v40 = vld [vmem:[#allocation2 + $0x3a] sm:$0xff] }
  0xf5   :  { %8846 = vrot.lane.b32.xlu1 %v8845_v48, %s10693_s15 }
  0xf6   :  { %8851 = vrot.lane.b32.xlu0 %v8850_v49, %s10688_s21 }
  0xf9   :  { %8856 = vrot.lane.b32.xlu1 %v8855_v53, %s10694_s16  ;;  %v241_v53 = vld [vmem:[#allocation2 + $0x2e] sm:$0xff] }
 0x13c   :  { %v8742_v27 = vpop.permute.xlu0 %8741 }
 0x13d   :  { %v8744_v54 = vunpack.i.h.bf16 %v8742_v27  ;;  %v8743_v55 = vunpack.i.l.bf16 %v8742_v27  ;;  %v242_v27 = vld [vmem:[#allocation2 + $0x36] sm:$0xff] }
 0x13f   :  { %v8747_v58 = vpop.permute.xlu1 %8746  ;;  %v510_v59 = vsel %vm74_vm0, %v238_v56, %v8744_v54  ;;  %v509_v60 = vsel %vm74_vm0, %v237_v57, %v8743_v55  ;;  %v564_v57 = vpack.c.bf16 %v306_v40, %v305_v26 }
 0x140   :  { %v8752_v63 = vpop.permute.xlu0 %8751  ;;  %v8749_v1 = vunpack.i.h.bf16 %v8747_v58  ;;  %v8748_v2 = vunpack.i.l.bf16 %v8747_v58 }
 0x141   :  { %v8754_v3 = vunpack.i.h.bf16 %v8752_v63  ;;  %v8753_v4 = vunpack.i.l.bf16 %v8752_v63 }
 0x142   :  { %v526_v5 = vsel %vm525_vm1, %v509_v60, %v8748_v2  ;;  %v527_v6 = vsel %vm525_vm1, %v510_v59, %v8749_v1 }
 0x143   :  { %v8757_v10 = vpop.permute.xlu1 %8756  ;;  %v543_v14 = vsel %vm542_vm2, %v526_v5, %v8753_v4  ;;  %v544_v15 = vsel %vm542_vm2, %v527_v6, %v8754_v3  ;;  %v307_v5 = vld [vmem:[#allocation2 + $0x42] sm:$0xff] }
 0x144   :  { %v8762_v11 = vpop.permute.xlu0 %8761  ;;  %v8759_v16 = vunpack.i.h.bf16 %v8757_v10  ;;  %v8758_v17 = vunpack.i.l.bf16 %v8757_v10  ;;  %v559_v22 = vpack.c.bf16 %v544_v15, %v543_v14 }
 0x145   :  { %v8764_v18 = vunpack.i.h.bf16 %v8762_v11  ;;  %v8763_v19 = vunpack.i.l.bf16 %v8762_v11  ;;  %v308_v11 = vld [vmem:[#allocation2 + $0x4a] sm:$0xff] }
 0x146   :  { %v512_v23 = vsel %vm74_vm0, %v240_v20, %v8759_v16  ;;  %v511_v24 = vsel %vm74_vm0, %v239_v21, %v8758_v17  ;;  %717 = vmatmul.mubr.bf16.vlgmr.msra.gmra.mrb[0].mxu0 %v559_v22  ;;  %v566_v21 = vpack.c.bf16 %v308_v11, %v307_v5 }
 0x147   :  { %v8767_v30 = vpop.permute.xlu1 %8766  ;;  %v528_v34 = vsel %vm525_vm1, %v511_v24, %v8763_v19  ;;  %v529_v35 = vsel %vm525_vm1, %v512_v23, %v8764_v18  ;;  %7958 = vmatprep.mubr.msk.bf16.mxu0 %vm74_vm0, %v562_v29  ;;  %v243_v18 = vld [vmem:[#allocation2 + $0x3e] sm:$0xff]  ;;  %v244_v19 = vld [vmem:[#allocation2 + $0x46] sm:$0xff] }
 0x148   :  { %v8772_v31 = vpop.permute.xlu0 %8771  ;;  %v8769_v36 = vunpack.i.h.bf16 %v8767_v30  ;;  %v8768_v37 = vunpack.i.l.bf16 %v8767_v30 }
 0x149   :  { %v8774_v41 = vunpack.i.h.bf16 %v8772_v31  ;;  %v8773_v42 = vunpack.i.l.bf16 %v8772_v31 }
 0x14a   :  { %v545_v47 = vsel %vm542_vm2, %v528_v34, %v8768_v37  ;;  %v546_v48 = vsel %vm542_vm2, %v529_v35, %v8769_v36  ;;  %v310_v36 = vld [vmem:[#allocation2 + $0x7a] sm:$0xff] }
 0x14b   :  { %v8777_v49 = vpop.permute.xlu1 %8776  ;;  %v561_v56 = vpack.c.bf16 %v546_v48, %v545_v47  ;;  %v514_v58 = vsel %vm74_vm0, %v242_v27, %v8774_v41  ;;  %v513_v59 = vsel %vm74_vm0, %v241_v53, %v8773_v42  ;;  %v309_v48 = vld [vmem:[#allocation2 + $0x72] sm:$0xff] }
 0x14c   :  { %v8782_v50 = vpop.permute.xlu0 %8781  ;;  %v8779_v54 = vunpack.i.h.bf16 %v8777_v49  ;;  %v8778_v55 = vunpack.i.l.bf16 %v8777_v49  ;;  %v246_v49 = vld [vmem:[#allocation2 + $0x76] sm:$0xff]  ;;  %v245_v53 = vld [vmem:[#allocation2 + $0x6e] sm:$0xff] }
 0x14d   :  { %v8784_v60 = vunpack.i.h.bf16 %v8782_v50  ;;  %v8783_v63 = vunpack.i.l.bf16 %v8782_v50 }
 0x14e   :  { %725 = vmatmul.mubr.bf16.gmra.mrb[4].mxu0 %v561_v56  ;;  %v530_v3 = vsel %vm525_vm1, %v513_v59, %v8778_v55  ;;  %v531_v4 = vsel %vm525_vm1, %v514_v58, %v8779_v54  ;;  %v568_v54 = vpack.c.bf16 %v310_v36, %v309_v48 }
 0x14f   :  { %v8787_v1 = vpop.permute.xlu1 %8786  ;;  %7959 = vmatprep.mubr.msk.bf16.mxu0 %vm74_vm0, %v564_v57  ;;  %v547_v8 = vsel %vm542_vm2, %v530_v3, %v8783_v63  ;;  %v548_v10 = vsel %vm542_vm2, %v531_v4, %v8784_v60 }
 0x150   :  { %v8792_v2 = vpop.permute.xlu0 %8791  ;;  %v8789_v6 = vunpack.i.h.bf16 %v8787_v1  ;;  %v8788_v7 = vunpack.i.l.bf16 %v8787_v1  ;;  %v563_v20 = vpack.c.bf16 %v548_v10, %v547_v8  ;;  %v311_v10 = vld [vmem:[#allocation2 + $0x82] sm:$0xff] }
 0x151   :  { %v8794_v15 = vunpack.i.h.bf16 %v8792_v2  ;;  %v8793_v16 = vunpack.i.l.bf16 %v8792_v2  ;;  %v312_v2 = vld [vmem:[#allocation2 + $0x8a] sm:$0xff] }
 0x152   :  { %v515_v22 = vsel %vm74_vm0, %v243_v18, %v8788_v7  ;;  %v516_v23 = vsel %vm74_vm0, %v244_v19, %v8789_v6 }
 0x153   :  { %v8797_v14 = vpop.permute.xlu1 %8796  ;;  %v532_v31 = vsel %vm525_vm1, %v515_v22, %v8793_v16  ;;  %v533_v34 = vsel %vm525_vm1, %v516_v23, %v8794_v15  ;;  %v248_v15 = vld [vmem:[#allocation2 + $0x86] sm:$0xff] }
 0x154   :  { %v8802_v17 = vpop.permute.xlu0 %8801  ;;  %v8799_v24 = vunpack.i.h.bf16 %v8797_v14  ;;  %v8798_v29 = vunpack.i.l.bf16 %v8797_v14  ;;  %v247_v14 = vld [vmem:[#allocation2 + $0x7e] sm:$0xff] }
 0x155   :  { %v8804_v37 = vunpack.i.h.bf16 %v8802_v17  ;;  %v8803_v40 = vunpack.i.l.bf16 %v8802_v17  ;;  %v570_v17 = vpack.c.bf16 %v312_v2, %v311_v10  ;;  %v316_v2 = vld [vmem:[#allocation2 + $0xaa] sm:$0xff] }
 0x156   :  { %733 = vmatmul.mubr.bf16.gmra.mrb[8].mxu0 %v563_v20  ;;  %v549_v41 = vsel %vm542_vm2, %v532_v31, %v8798_v29  ;;  %v550_v42 = vsel %vm542_vm2, %v533_v34, %v8799_v24  ;;  %v314_v29 = vld [vmem:[#allocation2 + $0x9a] sm:$0xff] }
 0x157   :  { %v8807_v30 = vpop.permute.xlu1 %8806  ;;  %7960 = vmatprep.mubr.msk.bf16.mxu0 %vm74_vm0, %v566_v21  ;;  %v565_v27 = vpack.c.bf16 %v550_v42, %v549_v41  ;;  %v518_v55 = vsel %vm74_vm0, %v246_v49, %v8804_v37  ;;  %v517_v56 = vsel %vm74_vm0, %v245_v53, %v8803_v40  ;;  %v313_v37 = vld [vmem:[#allocation2 + $0x92] sm:$0xff] }
 0x158   :  { %v8812_v35 = vpop.permute.xlu0 %8811  ;;  %v8809_v50 = vunpack.i.h.bf16 %v8807_v30  ;;  %v8808_v26 = vunpack.i.l.bf16 %v8807_v30  ;;  %v249_v40 = vld [vmem:[#allocation2 + $0x8e] sm:$0xff]  ;;  %v250_v41 = vld [vmem:[#allocation2 + $0x96] sm:$0xff] }
 0x159   :  { %v8814_v57 = vunpack.i.h.bf16 %v8812_v35  ;;  %v8813_v58 = vunpack.i.l.bf16 %v8812_v35 }
 0x15a   :  { %v534_v63 = vsel %vm525_vm1, %v517_v56, %v8808_v26  ;;  %v535_v1 = vsel %vm525_vm1, %v518_v55, %v8809_v50  ;;  %v572_v50 = vpack.c.bf16 %v314_v29, %v313_v37 }
 0x15b   :  { %v8817_v47 = vpop.permute.xlu1 %8816  ;;  %v551_v5 = vsel %vm542_vm2, %v534_v63, %v8813_v58  ;;  %v552_v6 = vsel %vm542_vm2, %v535_v1, %v8814_v57  ;;  %v315_v58 = vld [vmem:[#allocation2 + $0xa2] sm:$0xff] }
 0x15c   :  { %v8822_v59 = vpop.permute.xlu0 %8821  ;;  %v8819_v3 = vunpack.i.h.bf16 %v8817_v47  ;;  %v8818_v4 = vunpack.i.l.bf16 %v8817_v47  ;;  %v567_v16 = vpack.c.bf16 %v552_v6, %v551_v5  ;;  %v251_v6 = vld [vmem:[#allocation2 + $0x9e] sm:$0xff]  ;;  %v574_v10 = vpack.c.bf16 %v316_v2, %v315_v58 }
 0x15d   :  { %v8824_v7 = vunpack.i.h.bf16 %v8822_v59  ;;  %v8823_v8 = vunpack.i.l.bf16 %v8822_v59 }
 0x15e   :  { %741 = vmatmul.mubr.bf16.gmra.mrb[12].mxu0 %v565_v27  ;;  %v520_v18 = vsel %vm74_vm0, %v248_v15, %v8819_v3  ;;  %v519_v19 = vsel %vm74_vm0, %v247_v14, %v8818_v4 }
 0x15f   :  { %7961 = vmatprep.mubr.msk.bf16.mxu0 %vm74_vm0, %v568_v54  ;;  %v8827_v60 = vpop.permute.xlu1 %8826  ;;  %v536_v23 = vsel %vm525_vm1, %v519_v19, %v8823_v8  ;;  %v537_v24 = vsel %vm525_vm1, %v520_v18, %v8824_v7  ;;  %v252_v7 = vld [vmem:[#allocation2 + $0xa6] sm:$0xff] }
 0x160   :  { %v8832_v11 = vpop.permute.xlu0 %8831  ;;  %v8829_v20 = vunpack.i.h.bf16 %v8827_v60  ;;  %v8828_v21 = vunpack.i.l.bf16 %v8827_v60 }
 0x161   :  { %v8834_v30 = vunpack.i.h.bf16 %v8832_v11  ;;  %v8833_v31 = vunpack.i.l.bf16 %v8832_v11 }
 0x162   :  { %v553_v35 = vsel %vm542_vm2, %v536_v23, %v8828_v21  ;;  %v554_v36 = vsel %vm542_vm2, %v537_v24, %v8829_v20 }
 0x163   :  { %v8837_v22 = vpop.permute.xlu1 %8836  ;;  %v569_v49 = vpack.c.bf16 %v554_v36, %v553_v35  ;;  %v522_v26 = vsel %vm74_vm0, %v250_v41, %v8834_v30  ;;  %v521_v53 = vsel %vm74_vm0, %v249_v40, %v8833_v31 }
 0x164   :  { %v8842_v34 = vpop.permute.xlu0 %8841  ;;  %v8839_v42 = vunpack.i.h.bf16 %v8837_v22  ;;  %v8838_v47 = vunpack.i.l.bf16 %v8837_v22  ;;  %v11064_v22 = vld [vmem:[%s13884_s3] ss:$0 sm:$0xff] }
 0x165   :  { %v8844_v27 = vunpack.i.h.bf16 %v8842_v34  ;;  %v8843_v54 = vunpack.i.l.bf16 %v8842_v34 }
 0x166   :  { %749 = vmatmul.mubr.bf16.gmra.mrb[16].mxu0 %v567_v16  ;;  %v538_v56 = vsel %vm525_vm1, %v521_v53, %v8838_v47  ;;  %v539_v57 = vsel %vm525_vm1, %v522_v26, %v8839_v42 }
 0x167   :  { %7962 = vmatprep.mubr.msk.bf16.mxu0 %vm74_vm0, %v570_v17  ;;  %v8847_v48 = vpop.permute.xlu1 %8846  ;;  %v555_v63 = vsel %vm542_vm2, %v538_v56, %v8843_v54  ;;  %v556_v1 = vsel %vm542_vm2, %v539_v57, %v8844_v27 }
 0x168   :  { %v8852_v55 = vpop.permute.xlu0 %8851  ;;  %v8849_v59 = vunpack.i.h.bf16 %v8847_v48  ;;  %v8848_v60 = vunpack.i.l.bf16 %v8847_v48  ;;  %v571_v8 = vpack.c.bf16 %v556_v1, %v555_v63 }
 0x169   :  { %v8854_v4 = vunpack.i.h.bf16 %v8852_v55  ;;  %v8853_v5 = vunpack.i.l.bf16 %v8852_v55 }
 0x16a   :  { %v524_v11 = vsel %vm74_vm0, %v252_v7, %v8849_v59  ;;  %v523_v14 = vsel %vm74_vm0, %v251_v6, %v8848_v60  ;;  %v9740_v59 = vld [vmem:[%s13883_s2] sm:$0xff]  }
 0x16b   :  { %v8857_v3 = vpop.permute.xlu1 %8856  ;;  %v540_v17 = vsel %vm525_vm1, %v523_v14, %v8853_v5  ;;  %v541_v18 = vsel %vm525_vm1, %v524_v11, %v8854_v4  ;;  %8474 = vmatprep.subr.bf16.mxu1 %v9740_v59  ;;  %v9741_v14 = vld [vmem:[%s13883_s2 + $0x8] sm:$0xff]  }
 0x16c   :  { %v8859_v15 = vunpack.i.h.bf16 %v8857_v3  ;;  %v8858_v16 = vunpack.i.l.bf16 %v8857_v3  ;;  %8475 = vmatpush3.bf16.msra.mxu1 %v9740_v59 }
 0x16d   :  { %8476 = vmatprep.subr.bf16.mxu1 %v9741_v14 }
 0x16e   :  { %757 = vmatmul.mubr.bf16.gmra.mrb[20].mxu0 %v569_v49  ;;  %v557_v19 = vsel %vm542_vm2, %v540_v17, %v8858_v16  ;;  %v558_v20 = vsel %vm542_vm2, %v541_v18, %v8859_v15 }
 0x16f   :  { %7963 = vmatprep.mubr.msk.bf16.mxu0 %vm74_vm0, %v572_v50  ;;  %v573_v21 = vpack.c.bf16 %v558_v20, %v557_v19 }
 0x170   :  { %8477 = vmatpush3.bf16.msra.mxu1 %v9741_v14 }
 0x171   :  { %8708 = vmatprep.subr.bf16.mxu1 %v10691_v0 }
 0x176   :  { %765 = vmatmul.mubr.bf16.gmra.mrb[24].mxu0 %v571_v8 }
 0x177   :  { %7964 = vmatprep.mubr.msk.bf16.mxu0 %vm74_vm0, %v574_v10 }
 0x17e   :  { %773 = vmatmul.mubr.bf16.gmra.mrb[28].mxu0 %v573_v21 }
 0x219   :  { %v718_v23 = vpop.f32.mrb[0].mxu0 }
 0x21a   :  { %v11067_v24 = vadd.f32 %v11064_v22, %v718_v23  ;;  %v720_v29 = vpop.f32.mrb[1].mxu0 }
 0x21b   :  { %v721_v30 = vpop.f32.mrb[2].mxu0 }
 0x21c   :  { %v7965_v31 = vmul.f32 -1.442695, %v11067_v24  ;;  %v11071_v34 = vadd.f32 %v11064_v22, %v721_v30  ;;  %v723_v35 = vpop.f32.mrb[3].mxu0 }
 0x21e   :  { %9844 = vpow2.f32 %v7965_v31  ;;  %v7966_v36 = vmul.f32 -1.442695, %v11071_v34 }
 0x220   :  { %9846 = vpow2.f32 %v7966_v36 }
 0x221   :  { %v726_v37 = vpop.f32.mrb[4].mxu0 }
 0x222   :  { %v11075_v40 = vadd.f32 %v11064_v22, %v726_v37  ;;  %v728_v41 = vpop.f32.mrb[5].mxu0 }
 0x223   :  { %v729_v42 = vpop.f32.mrb[6].mxu0 }
 0x224   :  { %v7967_v47 = vmul.f32 -1.442695, %v11075_v40  ;;  %v11079_v48 = vadd.f32 %v11064_v22, %v729_v42  ;;  %v731_v49 = vpop.f32.mrb[7].mxu0 }
 0x226   :  { %9848 = vpow2.f32 %v7967_v47  ;;  %v7968_v50 = vmul.f32 -1.442695, %v11079_v48 }
 0x228   :  { %v9845_v26 = vpop.eup %9844  ;;  %9850 = vpow2.f32 %v7968_v50 }
 0x229   :  { %v845_v53 = vadd.f32 1.0, %v9845_v26  ;;  %v734_v27 = vpop.f32.mrb[8].mxu0 }
 0x22a   :  { %v9847_v54 = vpop.eup %9846  ;;  %v11083_v55 = vadd.f32 %v11064_v22, %v734_v27  ;;  %v736_v56 = vpop.f32.mrb[9].mxu0 }
 0x22b   :  { %9852 = vrcp.f32 %v845_v53  ;;  %v846_v57 = vadd.f32 1.0, %v9847_v54  ;;  %v737_v58 = vpop.f32.mrb[10].mxu0 }
 0x22c   :  { %v7969_v60 = vmul.f32 -1.442695, %v11083_v55  ;;  %v11090_v63 = vadd.f32 %v11064_v22, %v737_v58  ;;  %v739_v1 = vpop.f32.mrb[11].mxu0 }
 0x22d   :  { %9854 = vrcp.f32 %v846_v57 }
 0x22e   :  { %9856 = vpow2.f32 %v7969_v60  ;;  %v7970_v2 = vmul.f32 -1.442695, %v11090_v63 }
 0x230   :  { %v9849_v3 = vpop.eup %9848  ;;  %9858 = vpow2.f32 %v7970_v2 }
 0x231   :  { %v847_v4 = vadd.f32 1.0, %v9849_v3  ;;  %v742_v5 = vpop.f32.mrb[12].mxu0 }
 0x232   :  { %v9851_v6 = vpop.eup %9850  ;;  %v11094_v7 = vadd.f32 %v11064_v22, %v742_v5  ;;  %v744_v8 = vpop.f32.mrb[13].mxu0 }
 0x233   :  { %9860 = vrcp.f32 %v847_v4  ;;  %v848_v10 = vadd.f32 1.0, %v9851_v6  ;;  %v745_v11 = vpop.f32.mrb[14].mxu0 }
 0x234   :  { %v7971_v15 = vmul.f32 -1.442695, %v11094_v7  ;;  %v11101_v16 = vadd.f32 %v11064_v22, %v745_v11  ;;  %v747_v17 = vpop.f32.mrb[15].mxu0 }
 0x235   :  { %v9853_v18 = vpop.eup %9852  ;;  %9862 = vrcp.f32 %v848_v10 }
 0x236   :  { %9864 = vpow2.f32 %v7971_v15  ;;  %v7972_v19 = vmul.f32 -1.442695, %v11101_v16  ;;  %909 = vrot.lane.b32.xlu0 %v9853_v18, %s10694_s16 }
 0x237   :  { %v9855_v20 = vpop.eup %9854 }
 0x238   :  { %v9857_v21 = vpop.eup %9856  ;;  %9866 = vpow2.f32 %v7972_v19  ;;  %911 = vrot.lane.b32.xlu1 %v9855_v20, %s10694_s16 }
 0x239   :  { %v849_v23 = vadd.f32 1.0, %v9857_v21  ;;  %v750_v29 = vpop.f32.mrb[16].mxu0 }
 0x23a   :  { %v9859_v30 = vpop.eup %9858  ;;  %v11108_v31 = vadd.f32 %v11064_v22, %v750_v29  ;;  %v752_v35 = vpop.f32.mrb[17].mxu0 }
 0x23b   :  { %9868 = vrcp.f32 %v849_v23  ;;  %v850_v36 = vadd.f32 1.0, %v9859_v30  ;;  %v753_v37 = vpop.f32.mrb[18].mxu0 }
 0x23c   :  { %v7973_v41 = vmul.f32 -1.442695, %v11108_v31  ;;  %v11112_v42 = vadd.f32 %v11064_v22, %v753_v37  ;;  %v755_v47 = vpop.f32.mrb[19].mxu0 }
 0x23d   :  { %v9861_v49 = vpop.eup %9860  ;;  %9870 = vrcp.f32 %v850_v36 }
 0x23e   :  { %9872 = vpow2.f32 %v7973_v41  ;;  %v7974_v50 = vmul.f32 -1.442695, %v11112_v42  ;;  %913 = vrot.lane.b32.xlu0 %v9861_v49, %s10694_s16 }
 0x23f   :  { %v9863_v26 = vpop.eup %9862 }
 0x240   :  { %v9865_v53 = vpop.eup %9864  ;;  %9874 = vpow2.f32 %v7974_v50  ;;  %915 = vrot.lane.b32.xlu1 %v9863_v26, %s10694_s16 }
 0x241   :  { %v851_v27 = vadd.f32 1.0, %v9865_v53  ;;  %v758_v54 = vpop.f32.mrb[20].mxu0 }
 0x242   :  { %v9867_v56 = vpop.eup %9866  ;;  %v11118_v57 = vadd.f32 %v11064_v22, %v758_v54  ;;  %v760_v58 = vpop.f32.mrb[21].mxu0 }
 0x243   :  { %9876 = vrcp.f32 %v851_v27  ;;  %v852_v59 = vadd.f32 1.0, %v9867_v56  ;;  %v761_v60 = vpop.f32.mrb[22].mxu0 }
 0x244   :  { %v7975_v1 = vmul.f32 -1.442695, %v11118_v57  ;;  %v11122_v2 = vadd.f32 %v11064_v22, %v761_v60  ;;  %v763_v3 = vpop.f32.mrb[23].mxu0 }
 0x245   :  { %v9869_v4 = vpop.eup %9868  ;;  %9878 = vrcp.f32 %v852_v59 }
 0x246   :  { %9880 = vpow2.f32 %v7975_v1  ;;  %v7976_v5 = vmul.f32 -1.442695, %v11122_v2  ;;  %917 = vrot.lane.b32.xlu0 %v9869_v4, %s10694_s16 }
 0x247   :  { %v9871_v6 = vpop.eup %9870 }
 0x248   :  { %v9873_v8 = vpop.eup %9872  ;;  %9882 = vpow2.f32 %v7976_v5  ;;  %919 = vrot.lane.b32.xlu1 %v9871_v6, %s10694_s16 }
 0x249   :  { %v853_v10 = vadd.f32 1.0, %v9873_v8  ;;  %v766_v11 = vpop.f32.mrb[24].mxu0 }
 0x24a   :  { %v9875_v14 = vpop.eup %9874  ;;  %v11128_v15 = vadd.f32 %v11064_v22, %v766_v11  ;;  %v768_v17 = vpop.f32.mrb[25].mxu0 }
 0x24b   :  { %9884 = vrcp.f32 %v853_v10  ;;  %v854_v18 = vadd.f32 1.0, %v9875_v14  ;;  %v769_v19 = vpop.f32.mrb[26].mxu0 }
 0x24c   :  { %v7977_v20 = vmul.f32 -1.442695, %v11128_v15  ;;  %v11132_v21 = vadd.f32 %v11064_v22, %v769_v19  ;;  %v771_v23 = vpop.f32.mrb[27].mxu0 }
 0x24d   :  { %v9877_v29 = vpop.eup %9876  ;;  %9886 = vrcp.f32 %v854_v18 }
 0x24e   :  { %9888 = vpow2.f32 %v7977_v20  ;;  %v7978_v30 = vmul.f32 -1.442695, %v11132_v21  ;;  %921 = vrot.lane.b32.xlu0 %v9877_v29, %s10694_s16 }
 0x24f   :  { %v9879_v35 = vpop.eup %9878 }
 0x250   :  { %v9881_v36 = vpop.eup %9880  ;;  %9890 = vpow2.f32 %v7978_v30  ;;  %923 = vrot.lane.b32.xlu1 %v9879_v35, %s10694_s16 }
 0x251   :  { %v855_v37 = vadd.f32 1.0, %v9881_v36  ;;  %v774_v41 = vpop.f32.mrb[28].mxu0 }
 0x252   :  { %v9883_v47 = vpop.eup %9882  ;;  %v11138_v49 = vadd.f32 %v11064_v22, %v774_v41  ;;  %v776_v50 = vpop.f32.mrb[29].mxu0 }
 0x253   :  { %9892 = vrcp.f32 %v855_v37  ;;  %v856_v26 = vadd.f32 1.0, %v9883_v47  ;;  %v777_v53 = vpop.f32.mrb[30].mxu0 }
 0x254   :  { %v7979_v27 = vmul.f32 -1.442695, %v11138_v49  ;;  %v11142_v54 = vadd.f32 %v11064_v22, %v777_v53  ;;  %v779_v56 = vpop.f32.mrb[31].mxu0 }
 0x255   :  { %v9885_v58 = vpop.eup %9884  ;;  %9894 = vrcp.f32 %v856_v26 }
 0x256   :  { %9896 = vpow2.f32 %v7979_v27  ;;  %v7980_v59 = vmul.f32 -1.442695, %v11142_v54  ;;  %925 = vrot.lane.b32.xlu0 %v9885_v58, %s10694_s16 }
 0x257   :  { %v9887_v60 = vpop.eup %9886 }
 0x258   :  { %v9889_v1 = vpop.eup %9888  ;;  %9898 = vpow2.f32 %v7980_v59  ;;  %927 = vrot.lane.b32.xlu1 %v9887_v60, %s10694_s16 }
 0x259   :  { %v857_v3 = vadd.f32 1.0, %v9889_v1 }
 0x25a   :  { %v9891_v4 = vpop.eup %9890 }
 0x25b   :  { %9900 = vrcp.f32 %v857_v3  ;;  %v858_v5 = vadd.f32 1.0, %v9891_v4 }
 0x25d   :  { %v9893_v6 = vpop.eup %9892  ;;  %9902 = vrcp.f32 %v858_v5 }
 0x25e   :  { %929 = vrot.lane.b32.xlu0 %v9893_v6, %s10694_s16 }
 0x25f   :  { %v9895_v8 = vpop.eup %9894 }
 0x260   :  { %v9897_v10 = vpop.eup %9896  ;;  %931 = vrot.lane.b32.xlu1 %v9895_v8, %s10694_s16 }
 0x261   :  { %v859_v11 = vadd.f32 1.0, %v9897_v10 }
 0x262   :  { %v9899_v14 = vpop.eup %9898 }
 0x263   :  { %9904 = vrcp.f32 %v859_v11  ;;  %v860_v17 = vadd.f32 1.0, %v9899_v14 }
 0x265   :  { %v9901_v18 = vpop.eup %9900  ;;  %9906 = vrcp.f32 %v860_v17 }
 0x266   :  { %933 = vrot.lane.b32.xlu0 %v9901_v18, %s10694_s16  ;;  %9908 = vtanh.f32 %v11067_v24 }
 0x267   :  { %v9903_v19 = vpop.eup %9902  ;;  %9910 = vtanh.f32 %v11071_v34 }
 0x268   :  { %935 = vrot.lane.b32.xlu1 %v9903_v19, %s10694_s16  ;;  %9912 = vtanh.f32 %v11075_v40 }
 0x269   :  { %9914 = vtanh.f32 %v11079_v48 }
 0x26a   :  { %9916 = vtanh.f32 %v11083_v55 }
 0x26b   :  { %9918 = vtanh.f32 %v11090_v63 }
 0x26c   :  { %9920 = vtanh.f32 %v11094_v7 }
 0x26d   :  { %v9905_v20 = vpop.eup %9904  ;;  %9922 = vtanh.f32 %v11101_v16 }
 0x26e   :  { %937 = vrot.lane.b32.xlu0 %v9905_v20, %s10694_s16  ;;  %9924 = vtanh.f32 %v11108_v31 }
 0x26f   :  { %v9907_v23 = vpop.eup %9906  ;;  %9926 = vtanh.f32 %v11112_v42 }
 0x270   :  { %939 = vrot.lane.b32.xlu1 %v9907_v23, %s10694_s16  ;;  %v9909_v30 = vpop.eup %9908  ;;  %9928 = vtanh.f32 %v11118_v57 }
 0x271   :  { %v9911_v35 = vpop.eup %9910  ;;  %9930 = vtanh.f32 %v11122_v2 }
 0x272   :  { %998 = vrot.lane.b32.xlu0 %v11064_v22, %s10688_s21  ;;  %v9913_v24 = vpop.eup %9912  ;;  %9932 = vtanh.f32 %v11128_v15 }
 0x273   :  { %v9915_v34 = vpop.eup %9914  ;;  %9934 = vtanh.f32 %v11132_v21 }
 0x274   :  { %v9917_v27 = vpop.eup %9916  ;;  %9936 = vtanh.f32 %v11138_v49 }
 0x275   :  { %v9919_v55 = vpop.eup %9918  ;;  %9938 = vtanh.f32 %v11142_v54  ;;  %v9743_v54 = vld [vmem:[#allocation4 + $0x58] sm:$0xff]  }
 0x276   :  { %v9921_v1 = vpop.eup %9920 }
 0x277   :  { %v9923_v7 = vpop.eup %9922 }
 0x278   :  { %v9925_v8 = vpop.eup %9924 }
 0x279   :  { %v9927_v31 = vpop.eup %9926 }
 0x27a   :  { %v9929_v18 = vpop.eup %9928 }
 0x27b   :  { %v9931_v57 = vpop.eup %9930 }
 0x2a8   :  { %v910_v29 = vpop.permute.xlu0 %909 }
 0x2a9   :  { %v957_v37 = vmul.f32 %v9909_v30, %v910_v29  ;;  %v9933_v30 = vpop.eup %9932 }
 0x2aa   :  { %v912_v36 = vpop.permute.xlu1 %911  ;;  %v9935_v15 = vpop.eup %9934 }
 0x2ab   :  { %v958_v41 = vmul.f32 %v9911_v35, %v912_v36 }
 0x2ad   :  { %v973_v47 = vpack.c.bf16 %v958_v41, %v957_v37 }
 0x2af   :  { %8478 = vmatprep.mubr.msk.bf16.mxu1 %vm74_vm0, %v973_v47  ;;  %v9937_v47 = vpop.eup %9936 }
 0x2b0   :  { %v914_v22 = vpop.permute.xlu0 %913 }
 0x2b1   :  { %v959_v40 = vmul.f32 %v9913_v24, %v914_v22  ;;  %v9939_v22 = vpop.eup %9938 }
 0x2b2   :  { %v916_v50 = vpop.permute.xlu1 %915 }
 0x2b3   :  { %v960_v26 = vmul.f32 %v9915_v34, %v916_v50 }
 0x2b5   :  { %v974_v48 = vpack.c.bf16 %v960_v26, %v959_v40  ;;  %v9742_v40 = vld [vmem:[#allocation4 + $0x50] sm:$0xff]   ;;  %v9744_v26 = vld [vmem:[#allocation4 + $0x60] sm:$0xff]  }
 0x2b6   :  { %1587 = vmatpush1.bf16.msra.mxu0 %v9742_v40 }
 0x2b7   :  { %8479 = vmatmul.mubr.msk.bf16.vlgmr.msra.gmra.mrb[0].mxu1 %vm74_vm0, %v974_v48  ;;  %1588 = vmatprep.subr.bf16.mxu0 %v10691_v0  ;;  %v9745_v48 = vld [vmem:[#allocation4 + $0x68] sm:$0xff]  }
 0x2b8   :  { %v918_v53 = vpop.permute.xlu0 %917  ;;  %8718 = vmatpush1.bf16.msra.mxu1 %v9742_v40 }
 0x2b9   :  { %v961_v58 = vmul.f32 %v9917_v27, %v918_v53  ;;  %8709 = vmatprep.subr.bf16.mxu1 %v10691_v0  ;;  %v9746_v53 = vld [vmem:[#allocation4 + $0x70] sm:$0xff]   ;;  %v9747_v27 = vld [vmem:[#allocation4 + $0x78] sm:$0xff]  }
 0x2ba   :  { %v920_v56 = vpop.permute.xlu1 %919  ;;  %1589 = vmatpush1.bf16.msra.mxu0 %v9743_v54 }
 0x2bb   :  { %v962_v59 = vmul.f32 %v9919_v55, %v920_v56  ;;  %1590 = vmatprep.subr.bf16.mxu0 %v10691_v0  ;;  %v9748_v55 = vld [vmem:[#allocation4 + $0x80] sm:$0xff]  }
 0x2bc   :  { %8719 = vmatpush1.bf16.msra.mxu1 %v9743_v54 }
 0x2bd   :  { %v975_v63 = vpack.c.bf16 %v962_v59, %v961_v58  ;;  %8710 = vmatprep.subr.bf16.mxu1 %v10691_v0 }
 0x2be   :  { %1591 = vmatpush1.bf16.msra.mxu0 %v9744_v26 }
 0x2bf   :  { %8482 = vmatprep.mubr.msk.bf16.mxu1 %vm74_vm0, %v975_v63  ;;  %1592 = vmatprep.subr.bf16.mxu0 %v10691_v0 }
 0x2c0   :  { %v922_v60 = vpop.permute.xlu0 %921  ;;  %8720 = vmatpush1.bf16.msra.mxu1 %v9744_v26 }
 0x2c1   :  { %v963_v4 = vmul.f32 %v9921_v1, %v922_v60  ;;  %8711 = vmatprep.subr.bf16.mxu1 %v10691_v0 }
 0x2c2   :  { %v924_v3 = vpop.permute.xlu1 %923  ;;  %1593 = vmatpush1.bf16.msra.mxu0 %v9745_v48 }
 0x2c3   :  { %v964_v5 = vmul.f32 %v9923_v7, %v924_v3  ;;  %1594 = vmatprep.subr.bf16.mxu0 %v10691_v0 }
 0x2c4   :  { %8721 = vmatpush1.bf16.msra.mxu1 %v9745_v48 }
 0x2c5   :  { %v976_v16 = vpack.c.bf16 %v964_v5, %v963_v4  ;;  %8712 = vmatprep.subr.bf16.mxu1 %v10691_v0 }
 0x2c6   :  { %1595 = vmatpush1.bf16.msra.mxu0 %v9746_v53 }
 0x2c7   :  { %8483 = vmatmul.mubr.msk.bf16.gmra.mrb[4].mxu1 %vm74_vm0, %v976_v16  ;;  %1596 = vmatprep.subr.bf16.mxu0 %v10691_v0 }
 0x2c8   :  { %v926_v6 = vpop.permute.xlu0 %925  ;;  %8722 = vmatpush1.bf16.msra.mxu1 %v9746_v53 }
 0x2c9   :  { %v965_v11 = vmul.f32 %v9925_v8, %v926_v6  ;;  %8713 = vmatprep.subr.bf16.mxu1 %v10691_v0  ;;  %v9749_v6 = vld [vmem:[#allocation4 + $0x88] sm:$0xff]  }
 0x2ca   :  { %v928_v10 = vpop.permute.xlu1 %927  ;;  %1597 = vmatpush1.bf16.msra.mxu0 %v9747_v27 }
 0x2cb   :  { %v966_v14 = vmul.f32 %v9927_v31, %v928_v10  ;;  %1598 = vmatprep.subr.bf16.mxu0 %v10691_v0 }
 0x2cc   :  { %8723 = vmatpush1.bf16.msra.mxu1 %v9747_v27 }
 0x2cd   :  { %v977_v42 = vpack.c.bf16 %v966_v14, %v965_v11  ;;  %8714 = vmatprep.subr.bf16.mxu1 %v10691_v0 }
 0x2ce   :  { %1599 = vmatpush1.bf16.msra.mxu0 %v9748_v55 }
 0x2cf   :  { %8486 = vmatprep.mubr.msk.bf16.mxu1 %vm74_vm0, %v977_v42  ;;  %1600 = vmatprep.subr.bf16.mxu0 %v10691_v0 }
 0x2d0   :  { %v930_v17 = vpop.permute.xlu0 %929  ;;  %8724 = vmatpush1.bf16.msra.mxu1 %v9748_v55 }
 0x2d1   :  { %v967_v20 = vmul.f32 %v9929_v18, %v930_v17  ;;  %8715 = vmatprep.subr.bf16.mxu1 %v10691_v0 }
 0x2d2   :  { %v932_v19 = vpop.permute.xlu1 %931  ;;  %1601 = vmatpush1.bf16.msra.mxu0 %v9749_v6 }
 0x2d3   :  { %v968_v23 = vmul.f32 %v9931_v57, %v932_v19  ;;  %1602 = vmatprep.subr.bf16.mxu0 %v10691_v0 }
 0x2d4   :  { %8725 = vmatpush1.bf16.msra.mxu1 %v9749_v6 }
 0x2d5   :  { %v978_v2 = vpack.c.bf16 %v968_v23, %v967_v20  ;;  %8716 = vmatprep.subr.bf16.mxu1 %v10691_v0 }
 0x2d7   :  { %8487 = vmatmul.mubr.msk.bf16.gmra.mrb[8].mxu1 %vm74_vm0, %v978_v2 }
 0x2d8   :  { %v934_v29 = vpop.permute.xlu0 %933 }
 0x2d9   :  { %v969_v36 = vmul.f32 %v9933_v30, %v934_v29  ;;  %v9751_v29 = vld [vmem:[#allocation4 + $0x98] sm:$0xff]  }
 0x2da   :  { %v936_v35 = vpop.permute.xlu1 %935 }
 0x2db   :  { %v970_v37 = vmul.f32 %v9935_v15, %v936_v35 }
 0x2dd   :  { %v979_v21 = vpack.c.bf16 %v970_v37, %v969_v36 }
 0x2df   :  { %8490 = vmatprep.mubr.msk.bf16.mxu1 %vm74_vm0, %v979_v21 }
 0x2e0   :  { %v938_v41 = vpop.permute.xlu0 %937 }
 0x2e1   :  { %v971_v34 = vmul.f32 %v9937_v47, %v938_v41 }
 0x2e2   :  { %v940_v24 = vpop.permute.xlu1 %939 }
 0x2e3   :  { %v972_v50 = vmul.f32 %v9939_v22, %v940_v24 }
 0x2e4   :  { %v11193_v56 = vpop.permute.xlu0 %998 }
 0x2e5   :  { %v980_v49 = vpack.c.bf16 %v972_v50, %v971_v34 }
 0x2e7   :  { %8491 = vmatmul.mubr.msk.bf16.gmra.mrb[12].mxu1 %vm74_vm0, %v980_v49 }
 0x38a   :  { %v8480_v58 = vpop.f32.mrb[0].mxu1 }
 0x38b   :  { %v1068_v59 = vadd.f32 %v8480_v58, %v11193_v56  ;;  %v1059_v63 = vpop.f32.mrb[1].mxu1 }
 0x38c   :  { %v1060_v60 = vadd.f32 %v1059_v63, %v11193_v56  ;;  %v8481_v1 = vpop.f32.mrb[2].mxu1 }
 0x38d   :  { %v11198_v7 = vadd.f32 %v1068_v59, %v10886_v32  ;;  %v1071_v3 = vadd.f32 %v8481_v1, %v11193_v56  ;;  %v1062_v4 = vpop.f32.mrb[3].mxu1 }
 0x38e   :  { %v11202_v5 = vadd.f32 %v1060_v60, %v10889_v33  ;;  %v1063_v16 = vadd.f32 %v1062_v4, %v11193_v56  ;;  %v9750_v33 = vld [vmem:[#allocation4 + $0x90] sm:$0xff]  }
 0x38f   :  { %1140 = vst.msk [vmem:[#allocation2 + $0x20] sm:$0xff] %vm74_vm0, %v11198_v7  ;;  %v11208_v8 = vadd.f32 %v1071_v3, %v10898_v38  ;;  %1603 = vmatpush1.bf16.msra.mxu0 %v9750_v33  ;;  %8726 = vmatpush1.bf16.msra.mxu1 %v9750_v33 }
 0x390   :  { %1138 = vst.msk [vmem:[#allocation2 + $0x10] sm:$0xff] %vm74_vm0, %v11202_v5  ;;  %v11213_v32 = vadd.f32 %v1063_v16, %v10901_v39  ;;  %1604 = vmatprep.subr.bf16.mxu0 %v10691_v0  ;;  %8717 = vmatprep.subr.bf16.mxu1 %v10691_v0 }
 0x391   :  { %1141 = vst.msk [vmem:[#allocation2 + $0x28] sm:$0xff] %vm74_vm0, %v11208_v8 }
 0x392   :  { %1139 = vst.msk [vmem:[#allocation2 + $0x18] sm:$0xff] %vm74_vm0, %v11213_v32 }
 0x393   :  { %1605 = vmatpush1.bf16.msra.mxu0 %v9751_v29  ;;  %8727 = vmatpush1.bf16.msra.mxu1 %v9751_v29 }
 0x394   :  { %2447 = vmatprep.subr.bf16.mxu1 %v10691_v0 }
 0x396   :  { %v1188_v38 = vld [vmem:[#allocation2 + $0x20] sm:$0xff] }
 0x397   :  { %v1170_v35 = vld [vmem:[#allocation2 + $0xe] sm:$0xff] }
 0x398   :  { %v1189_v31 = vld [vmem:[#allocation2 + $0x28] sm:$0xff]  ;;  %v1186_v47 = vld [vmem:[#allocation2 + $0x10] sm:$0xff] }
 0x399   :  { %v1173_v10 = vld [vmem:[#allocation2 + $0x26] sm:$0xff]  ;;  %v8860_v39 = vpack.i.bf16 %v1189_v31, %v1188_v38  ;;  %v1172_v11 = vld [vmem:[#allocation2 + $0x1e] sm:$0xff]  ;;  %v11223_v14 = vld [vmem:[#allocation2 + $0x14] sm:$0xff] }
 0x39a   :  { %v11225_v42 = vld [vmem:[#allocation2 + $0x1c] sm:$0xff]  ;;  %v8484_v17 = vpop.f32.mrb[4].mxu1  ;;  %v8865_v18 = vpack.i.bf16 %v1173_v10, %v1172_v11  ;;  %v1202_v50 = vld [vmem:[#allocation2 + $0x12] sm:$0xff] }
 0x39b   :  { %v1461_v57 = vpack.c.bf16 %v11225_v42, %v11223_v14  ;;  %v1171_v19 = vld [vmem:[#allocation2 + $0x16] sm:$0xff]  ;;  %v1084_v20 = vadd.f32 %v8484_v17, %v11193_v56  ;;  %8861 = vrot.lane.b32.xlu0 %v8860_v39, %s10688_s21  ;;  %v1075_v23 = vpop.f32.mrb[5].mxu1  ;;  %v1204_v26 = vld [vmem:[#allocation2 + $0x22] sm:$0xff] }
 0x39c   :  { %v1187_v2 = vld [vmem:[#allocation2 + $0x18] sm:$0xff]  ;;  %v1076_v30 = vadd.f32 %v1075_v23, %v11193_v56  ;;  %v8485_v15 = vpop.f32.mrb[6].mxu1  ;;  %8866 = vrot.lane.b32.xlu1 %v8865_v18, %s10693_s15  ;;  %v8870_v41 = vpack.i.bf16 %v1171_v19, %v1170_v35 }
 0x39d   :  { %8002 = vmatprep.mubr.msk.bf16.mxu0 %vm74_vm0, %v1461_v57  ;;  %v11235_v36 = vadd.f32 %v1084_v20, %v10925_v52  ;;  %v1087_v37 = vadd.f32 %v8485_v15, %v11193_v56  ;;  %v1078_v21 = vpop.f32.mrb[7].mxu1  ;;  %v8875_v34 = vpack.i.bf16 %v1187_v2, %v1186_v47  ;;  %v1203_v49 = vld [vmem:[#allocation2 + $0x1a] sm:$0xff] }
 0x39e   :  { %v11239_v22 = vadd.f32 %v1076_v30, %v10913_v45  ;;  %v1079_v24 = vadd.f32 %v1078_v21, %v11193_v56  ;;  %v8880_v40 = vpack.i.bf16 %v1203_v49, %v1202_v50 }
 0x39f   :  { %1144 = vst.msk [vmem:[#allocation2 + $0x40] sm:$0xff] %vm74_vm0, %v11235_v36  ;;  %v11246_v52 = vadd.f32 %v1087_v37, %v10922_v51  ;;  %8871 = vrot.lane.b32.xlu0 %v8870_v41, %s10693_s15  ;;  %v11260_v51 = vld [vmem:[#allocation2 + $0x24] sm:$0xff] }
 0x3a0   :  { %1142 = vst.msk [vmem:[#allocation2 + $0x30] sm:$0xff] %vm74_vm0, %v11239_v22  ;;  %v11252_v45 = vadd.f32 %v1079_v24, %v10910_v44  ;;  %8876 = vrot.lane.b32.xlu1 %v8875_v34, %s10688_s21 }
 0x3a1   :  { %1145 = vst.msk [vmem:[#allocation2 + $0x48] sm:$0xff] %vm74_vm0, %v11246_v52 }
 0x3a2   :  { %1143 = vst.msk [vmem:[#allocation2 + $0x38] sm:$0xff] %vm74_vm0, %v11252_v45 }
 0x3a3   :  { %8881 = vrot.lane.b32.xlu0 %v8880_v40, %s10694_s16 }
 0x3a6   :  { %v1192_v30 = vld [vmem:[#allocation2 + $0x40] sm:$0xff] }
 0x3a7   :  { %v11262_v54 = vld [vmem:[#allocation2 + $0x2c] sm:$0xff] }
 0x3a8   :  { %v1205_v48 = vld [vmem:[#allocation2 + $0x2a] sm:$0xff]  ;;  %v1463_v44 = vpack.c.bf16 %v11262_v54, %v11260_v51 }
 0x3a9   :  { %v8885_v53 = vpack.i.bf16 %v1205_v48, %v1204_v26  ;;  %v1190_v27 = vld [vmem:[#allocation2 + $0x30] sm:$0xff]  ;;  %v1191_v55 = vld [vmem:[#allocation2 + $0x38] sm:$0xff]  ;;  %v1177_v16 = vld [vmem:[#allocation2 + $0x46] sm:$0xff] }
 0x3aa   :  { %v1175_v58 = vld [vmem:[#allocation2 + $0x36] sm:$0xff]  ;;  %v8488_v59 = vpop.f32.mrb[8].mxu1  ;;  %8003 = vmatprep.mubr.msk.bf16.mxu1 %vm74_vm0, %v1463_v44  ;;  %v8895_v63 = vpack.i.bf16 %v1191_v55, %v1190_v27  ;;  %v1174_v3 = vld [vmem:[#allocation2 + $0x2e] sm:$0xff]  ;;  %v1176_v4 = vld [vmem:[#allocation2 + $0x3e] sm:$0xff] }
 0x3ab   :  { %8886 = vrot.lane.b32.xlu1 %v8885_v53, %s10694_s16  ;;  %v1100_v60 = vadd.f32 %v8488_v59, %v11193_v56  ;;  %v1091_v1 = vpop.f32.mrb[9].mxu1  ;;  %v8890_v38 = vpack.i.bf16 %v1175_v58, %v1174_v3  ;;  %v1206_v11 = vld [vmem:[#allocation2 + $0x32] sm:$0xff]  ;;  %v1207_v17 = vld [vmem:[#allocation2 + $0x3a] sm:$0xff]  ;;  %v8910_v19 = vpack.i.bf16 %v1177_v16, %v1176_v4  ;;  %v1209_v23 = vld [vmem:[#allocation2 + $0x4a] sm:$0xff] }
 0x3ac   :  { %v1092_v6 = vadd.f32 %v1091_v1, %v11193_v56  ;;  %v8489_v33 = vpop.f32.mrb[10].mxu1  ;;  %8896 = vrot.lane.b32.xlu0 %v8895_v63, %s10688_s21  ;;  %v1193_v29 = vld [vmem:[#allocation2 + $0x48] sm:$0xff] }
 0x3ad   :  { %v11272_v31 = vadd.f32 %v1100_v60, %v10952_v13  ;;  %v1103_v10 = vadd.f32 %v8489_v33, %v11193_v56  ;;  %v1094_v39 = vpop.f32.mrb[11].mxu1  ;;  %v1208_v13 = vld [vmem:[#allocation2 + $0x42] sm:$0xff]  ;;  %v8905_v15 = vpack.i.bf16 %v1193_v29, %v1192_v30 }
 0x3ae   :  { %v11276_v18 = vadd.f32 %v1092_v6, %v10938_v62  ;;  %v1095_v57 = vadd.f32 %v1094_v39, %v11193_v56  ;;  %v8900_v62 = vpack.i.bf16 %v1207_v17, %v1206_v11 }
 0x3af   :  { %8891 = vrot.lane.b32.xlu1 %v8890_v38, %s10693_s15  ;;  %1148 = vst.msk [vmem:[#allocation2 + $0x80] sm:$0xff] %vm74_vm0, %v11272_v31  ;;  %v11283_v20 = vadd.f32 %v1103_v10, %v10949_v12  ;;  %v8915_v12 = vpack.i.bf16 %v1209_v23, %v1208_v13 }
 0x3b0   :  { %1146 = vst.msk [vmem:[#allocation2 + $0x70] sm:$0xff] %vm74_vm0, %v11276_v18  ;;  %v11288_v2 = vadd.f32 %v1095_v57, %v10935_v61  ;;  %8911 = vrot.lane.b32.xlu0 %v8910_v19, %s10693_s15 }
 0x3b1   :  { %1149 = vst.msk [vmem:[#allocation2 + $0x88] sm:$0xff] %vm74_vm0, %v11283_v20 }
 0x3b2   :  { %1147 = vst.msk [vmem:[#allocation2 + $0x78] sm:$0xff] %vm74_vm0, %v11288_v2 }
 0x3b3   :  { %8901 = vrot.lane.b32.xlu1 %v8900_v62, %s10694_s16 }
 0x3b4   :  { %8916 = vrot.lane.b32.xlu0 %v8915_v12, %s10694_s16 }
 0x3b7   :  { %8906 = vrot.lane.b32.xlu1 %v8905_v15, %s10688_s21  ;;  %v1178_v61 = vld [vmem:[#allocation2 + $0x6e] sm:$0xff] }
 0x3b8   :  { %v1194_v37 = vld [vmem:[#allocation2 + $0x70] sm:$0xff]  ;;  %v1181_v34 = vld [vmem:[#allocation2 + $0x86] sm:$0xff] }
 0x3b9   :  { %v1179_v35 = vld [vmem:[#allocation2 + $0x76] sm:$0xff]  ;;  %v1180_v48 = vld [vmem:[#allocation2 + $0x7e] sm:$0xff]  ;;  %v1197_v4 = vld [vmem:[#allocation2 + $0x88] sm:$0xff] }
 0x3ba   :  { %v1195_v21 = vld [vmem:[#allocation2 + $0x78] sm:$0xff]  ;;  %v8492_v41 = vpop.f32.mrb[12].mxu1  ;;  %v8920_v47 = vpack.i.bf16 %v1179_v35, %v1178_v61  ;;  %v8940_v1 = vpack.i.bf16 %v1181_v34, %v1180_v48 }
 0x3bb   :  { %v8925_v24 = vpack.i.bf16 %v1195_v21, %v1194_v37  ;;  %v1116_v50 = vadd.f32 %v8492_v41, %v11193_v56  ;;  %v1107_v49 = vpop.f32.mrb[13].mxu1  ;;  %v1210_v40 = vld [vmem:[#allocation2 + $0x72] sm:$0xff]  ;;  %v1211_v26 = vld [vmem:[#allocation2 + $0x7a] sm:$0xff] }
 0x3bc   :  { %v1108_v44 = vadd.f32 %v1107_v49, %v11193_v56  ;;  %v8493_v53 = vpop.f32.mrb[14].mxu1  ;;  %8921 = vrot.lane.b32.xlu1 %v8920_v47, %s10693_s15  ;;  %v8930_v60 = vpack.i.bf16 %v1211_v26, %v1210_v40 }
 0x3bd   :  { %8926 = vrot.lane.b32.xlu0 %v8925_v24, %s10688_s21  ;;  %v11303_v27 = vadd.f32 %v1116_v50, %v10980_v46  ;;  %v1119_v55 = vadd.f32 %v8493_v53, %v11193_v56  ;;  %v1110_v58 = vpop.f32.mrb[15].mxu1  ;;  %v1154_v50 = vld [vmem:[#allocation2 + $0xc] sm:$0xff] }
 0x3be   :  { %v11307_v59 = vadd.f32 %v1108_v44, %v10966_v28  ;;  %v1111_v63 = vadd.f32 %v1110_v58, %v11193_v56  ;;  %v1196_v28 = vld [vmem:[#allocation2 + $0x80] sm:$0xff] }
 0x3bf   :  { %1152 = vst.msk [vmem:[#allocation2 + $0xa0] sm:$0xff] %vm74_vm0, %v11303_v27  ;;  %v11313_v3 = vadd.f32 %v1119_v55, %v10977_v43  ;;  %v8935_v43 = vpack.i.bf16 %v1197_v4, %v1196_v28  ;;  %v1212_v56 = vld [vmem:[#allocation2 + $0x82] sm:$0xff] }
 0x3c0   :  { %1150 = vst.msk [vmem:[#allocation2 + $0x90] sm:$0xff] %vm74_vm0, %v11307_v59  ;;  %v11318_v46 = vadd.f32 %v1111_v63, %v10963_v25  ;;  %8931 = vrot.lane.b32.xlu1 %v8930_v60, %s10694_s16 }
 0x3c1   :  { %8941 = vrot.lane.b32.xlu0 %v8940_v1, %s10693_s15  ;;  %1153 = vst.msk [vmem:[#allocation2 + $0xa8] sm:$0xff] %vm74_vm0, %v11313_v3 }
 0x3c2   :  { %1151 = vst.msk [vmem:[#allocation2 + $0x98] sm:$0xff] %vm74_vm0, %v11318_v46 }
 0x3c4   :  { %8936 = vrot.lane.b32.xlu1 %v8935_v43, %s10688_s21 }
 0x3c6   :  { %v1200_v12 = vld [vmem:[#allocation2 + $0xa0] sm:$0xff] }
 0x3c7   :  { %v1213_v16 = vld [vmem:[#allocation2 + $0x8a] sm:$0xff] }
 0x3c8   :  { %v8945_v6 = vpack.i.bf16 %v1213_v16, %v1212_v56  ;;  %v1182_v33 = vld [vmem:[#allocation2 + $0x8e] sm:$0xff]  ;;  %v1185_v13 = vld [vmem:[#allocation2 + $0xa6] sm:$0xff] }
 0x3c9   :  { %v1183_v25 = vld [vmem:[#allocation2 + $0x96] sm:$0xff]  ;;  %v1184_v19 = vld [vmem:[#allocation2 + $0x9e] sm:$0xff]  ;;  %v1201_v62 = vld [vmem:[#allocation2 + $0xa8] sm:$0xff] }
 0x3ca   :  { %v1199_v38 = vld [vmem:[#allocation2 + $0x98] sm:$0xff]  ;;  %8946 = vrot.lane.b32.xlu0 %v8945_v6, %s10694_s16  ;;  %v8950_v10 = vpack.i.bf16 %v1183_v25, %v1182_v33  ;;  %v1198_v39 = vld [vmem:[#allocation2 + $0x90] sm:$0xff]  ;;  %v8970_v29 = vpack.i.bf16 %v1185_v13, %v1184_v19  ;;  %v1216_v30 = vld [vmem:[#allocation2 + $0xa2] sm:$0xff]  ;;  %v8965_v61 = vpack.i.bf16 %v1201_v62, %v1200_v12 }
 0x3cb   :  { %v1214_v11 = vld [vmem:[#allocation2 + $0x92] sm:$0xff]  ;;  %v1215_v17 = vld [vmem:[#allocation2 + $0x9a] sm:$0xff]  ;;  %v8955_v57 = vpack.i.bf16 %v1199_v38, %v1198_v39  ;;  %v1217_v15 = vld [vmem:[#allocation2 + $0xaa] sm:$0xff] }
 0x3cc   :  { %8951 = vrot.lane.b32.xlu1 %v8950_v10, %s10693_s15  ;;  %v8960_v23 = vpack.i.bf16 %v1215_v17, %v1214_v11  ;;  %v8975_v35 = vpack.i.bf16 %v1217_v15, %v1216_v30  ;;  %v1159_v17 = vld [vmem:[#allocation2 + $0x34] sm:$0xff] }
 0x3ce   :  { %8956 = vrot.lane.b32.xlu0 %v8955_v57, %s10688_s21  ;;  %v1160_v57 = vld [vmem:[#allocation2 + $0x3c] sm:$0xff] }
 0x3d0   :  { %8961 = vrot.lane.b32.xlu1 %v8960_v23, %s10694_s16 }
 0x3d2   :  { %8971 = vrot.lane.b32.xlu0 %v8970_v29, %s10693_s15  ;;  %v1465_v29 = vpack.c.bf16 %v1160_v57, %v1159_v17 }
 0x3d4   :  { %8966 = vrot.lane.b32.xlu1 %v8965_v61, %s10688_s21 }
 0x3d6   :  { %8976 = vrot.lane.b32.xlu0 %v8975_v35, %s10694_s16 }
 0x40d   :  { %v8862_v37 = vpop.permute.xlu0 %8861 }
 0x40e   :  { %v8867_v21 = vpop.permute.xlu1 %8866  ;;  %v8864_v16 = vunpack.i.h.bf16 %v8862_v37  ;;  %v8863_v6 = vunpack.i.l.bf16 %v8862_v37 }
 0x40f   :  { %v8869_v58 = vunpack.i.h.bf16 %v8867_v21  ;;  %v8868_v63 = vunpack.i.l.bf16 %v8867_v21 }
 0x411   :  { %v8872_v41 = vpop.permute.xlu0 %8871  ;;  %v1415_v56 = vsel %vm74_vm0, %v11260_v51, %v8869_v58 }
 0x412   :  { %v8874_v47 = vunpack.i.h.bf16 %v8872_v41  ;;  %v8873_v24 = vunpack.i.l.bf16 %v8872_v41  ;;  %v8877_v34 = vpop.permute.xlu1 %8876  ;;  %v1431_v39 = vsel %vm525_vm1, %v1415_v56, %v8864_v16 }
 0x413   :  { %v8879_v49 = vunpack.i.h.bf16 %v8877_v34  ;;  %v8878_v40 = vunpack.i.l.bf16 %v8877_v34 }
 0x414   :  { %v1412_v26 = vsel %vm74_vm0, %v1154_v50, %v8873_v24  ;;  %v1413_v48 = vsel %vm74_vm0, %v11223_v14, %v8874_v47  ;;  %v1414_v14 = vsel %vm74_vm0, %v11225_v42, %v8868_v63  ;;  %v1161_v47 = vld [vmem:[#allocation2 + $0x44] sm:$0xff] }
 0x415   :  { %v8882_v44 = vpop.permute.xlu0 %8881  ;;  %v1428_v60 = vsel %vm525_vm1, %v1412_v26, %v8878_v40  ;;  %v1429_v1 = vsel %vm525_vm1, %v1413_v48, %v8879_v49  ;;  %v1430_v10 = vsel %vm525_vm1, %v1414_v14, %v8863_v6  ;;  %v1218_v40 = vld [vmem:[#allocation2 + $0x4c] sm:$0xff]  ;;  %v1163_v6 = vld [vmem:[#allocation2 + $0x74] sm:$0xff] }
 0x416   :  { %v8884_v53 = vunpack.i.h.bf16 %v8882_v44  ;;  %v8883_v55 = vunpack.i.l.bf16 %v8882_v44  ;;  %v1467_v63 = vpack.c.bf16 %v1218_v40, %v1161_v47 }
 0x418   :  { %v1444_v4 = vsel %vm542_vm2, %v1428_v60, %v8883_v55  ;;  %v1445_v28 = vsel %vm542_vm2, %v1429_v1, %v8884_v53 }
 0x419   :  { %v1460_v43 = vpack.c.bf16 %v1445_v28, %v1444_v4 }
 0x41b   :  { %1619 = vmatmul.mubr.bf16.vlgmr.msra.gmra.mrb[32].mxu0 %v1460_v43 }
 0x41d   :  { %v8887_v33 = vpop.permute.xlu1 %8886 }
 0x41e   :  { %v8889_v25 = vunpack.i.h.bf16 %v8887_v33  ;;  %v8888_v38 = vunpack.i.l.bf16 %v8887_v33  ;;  %v8897_v11 = vpop.permute.xlu0 %8896 }
 0x41f   :  { %v8899_v61 = vunpack.i.h.bf16 %v8897_v11  ;;  %v8898_v35 = vunpack.i.l.bf16 %v8897_v11  ;;  %v1162_v11 = vld [vmem:[#allocation2 + $0x6c] sm:$0xff] }
 0x420   :  { %v1447_v19 = vsel %vm542_vm2, %v1431_v39, %v8889_v25  ;;  %v1446_v51 = vsel %vm542_vm2, %v1430_v10, %v8888_v38  ;;  %v1164_v38 = vld [vmem:[#allocation2 + $0x7c] sm:$0xff] }
 0x421   :  { %v1462_v13 = vpack.c.bf16 %v1447_v19, %v1446_v51  ;;  %v8892_v23 = vpop.permute.xlu1 %8891 }
 0x422   :  { %v8894_v42 = vunpack.i.h.bf16 %v8892_v23  ;;  %v8893_v62 = vunpack.i.l.bf16 %v8892_v23  ;;  %v8912_v12 = vpop.permute.xlu0 %8911  ;;  %v1469_v23 = vpack.c.bf16 %v1164_v38, %v1163_v6 }
 0x423   :  { %1627 = vmatmul.mubr.bf16.vlgmr.msra.gmra.mrb[16].mxu1 %v1462_v13  ;;  %v8914_v24 = vunpack.i.h.bf16 %v8912_v12  ;;  %v8913_v34 = vunpack.i.l.bf16 %v8912_v12 }
 0x424   :  { %v1417_v30 = vsel %vm74_vm0, %v1159_v17, %v8894_v42  ;;  %v1416_v15 = vsel %vm74_vm0, %v11262_v54, %v8893_v62  ;;  %8004 = vmatprep.mubr.msk.bf16.mxu1 %vm74_vm0, %v1465_v29 }
 0x425   :  { %v8902_v37 = vpop.permute.xlu1 %8901  ;;  %v1432_v50 = vsel %vm525_vm1, %v1416_v15, %v8898_v35  ;;  %v1433_v49 = vsel %vm525_vm1, %v1417_v30, %v8899_v61  ;;  %v1419_v60 = vsel %vm74_vm0, %v1161_v47, %v8914_v24  ;;  %v1418_v1 = vsel %vm74_vm0, %v1160_v57, %v8913_v34 }
 0x426   :  { %v8904_v21 = vunpack.i.h.bf16 %v8902_v37  ;;  %v8903_v41 = vunpack.i.l.bf16 %v8902_v37  ;;  %v8917_v54 = vpop.permute.xlu0 %8916  ;;  %v1166_v37 = vld [vmem:[#allocation2 + $0x8c] sm:$0xff] }
 0x427   :  { %v8919_v4 = vunpack.i.h.bf16 %v8917_v54  ;;  %v8918_v28 = vunpack.i.l.bf16 %v8917_v54 }
 0x428   :  { %v1448_v26 = vsel %vm542_vm2, %v1432_v50, %v8903_v41  ;;  %v1449_v48 = vsel %vm542_vm2, %v1433_v49, %v8904_v21  ;;  %v1165_v41 = vld [vmem:[#allocation2 + $0x84] sm:$0xff] }
 0x429   :  { %v8907_v44 = vpop.permute.xlu1 %8906  ;;  %v1464_v53 = vpack.c.bf16 %v1449_v48, %v1448_v26  ;;  %v1471_v50 = vpack.c.bf16 %v1166_v37, %v1165_v41 }
 0x42a   :  { %v8909_v55 = vunpack.i.h.bf16 %v8907_v44  ;;  %v8908_v58 = vunpack.i.l.bf16 %v8907_v44 }
 0x42b   :  { %1635 = vmatmul.mubr.bf16.gmra.mrb[20].mxu1 %v1464_v53 }
 0x42c   :  { %8005 = vmatprep.mubr.msk.bf16.mxu1 %vm74_vm0, %v1467_v63  ;;  %v1434_v43 = vsel %vm525_vm1, %v1418_v1, %v8908_v58  ;;  %v1435_v56 = vsel %vm525_vm1, %v1419_v60, %v8909_v55  ;;  %v1167_v55 = vld [vmem:[#allocation2 + $0x94] sm:$0xff]  ;;  %v1168_v58 = vld [vmem:[#allocation2 + $0x9c] sm:$0xff] }
 0x42d   :  { %v1450_v14 = vsel %vm542_vm2, %v1434_v43, %v8918_v28  ;;  %v1451_v16 = vsel %vm542_vm2, %v1435_v56, %v8919_v4 }
 0x42e   :  { %v8922_v33 = vpop.permute.xlu1 %8921  ;;  %v1466_v19 = vpack.c.bf16 %v1451_v16, %v1450_v14 }
 0x42f   :  { %v8927_v25 = vpop.permute.xlu0 %8926  ;;  %v8924_v10 = vunpack.i.h.bf16 %v8922_v33  ;;  %v8923_v39 = vunpack.i.l.bf16 %v8922_v33 }
 0x430   :  { %v8929_v17 = vunpack.i.h.bf16 %v8927_v25  ;;  %v8928_v57 = vunpack.i.l.bf16 %v8927_v25 }
 0x431   :  { %v1421_v51 = vsel %vm74_vm0, %v1163_v6, %v8924_v10  ;;  %v1420_v13 = vsel %vm74_vm0, %v1162_v11, %v8923_v39  ;;  %v1473_v6 = vpack.c.bf16 %v1168_v58, %v1167_v55 }
 0x432   :  { %v8932_v42 = vpop.permute.xlu1 %8931  ;;  %v1436_v12 = vsel %vm525_vm1, %v1420_v13, %v8928_v57  ;;  %v1437_v30 = vsel %vm525_vm1, %v1421_v51, %v8929_v17 }
 0x433   :  { %1643 = vmatmul.mubr.bf16.gmra.mrb[24].mxu1 %v1466_v19  ;;  %v8934_v62 = vunpack.i.h.bf16 %v8932_v42  ;;  %v8933_v29 = vunpack.i.l.bf16 %v8932_v42  ;;  %v8942_v35 = vpop.permute.xlu0 %8941 }
 0x434   :  { %8006 = vmatprep.mubr.msk.bf16.mxu1 %vm74_vm0, %v1469_v23  ;;  %v8944_v24 = vunpack.i.h.bf16 %v8942_v35  ;;  %v8943_v34 = vunpack.i.l.bf16 %v8942_v35 }
 0x435   :  { %v1452_v15 = vsel %vm542_vm2, %v1436_v12, %v8933_v29  ;;  %v1453_v61 = vsel %vm542_vm2, %v1437_v30, %v8934_v62  ;;  %v1169_v29 = vld [vmem:[#allocation2 + $0xa4] sm:$0xff]  ;;  %v1219_v30 = vld [vmem:[#allocation2 + $0xac] sm:$0xff] }
 0x436   :  { %v8937_v21 = vpop.permute.xlu1 %8936  ;;  %v1468_v47 = vpack.c.bf16 %v1453_v61, %v1452_v15  ;;  %v1423_v48 = vsel %vm74_vm0, %v1165_v41, %v8944_v24  ;;  %v1422_v54 = vsel %vm74_vm0, %v1164_v38, %v8943_v34  ;;  %v1475_v34 = vpack.c.bf16 %v1219_v30, %v1169_v29 }
 0x437   :  { %v8939_v49 = vunpack.i.h.bf16 %v8937_v21  ;;  %v8938_v40 = vunpack.i.l.bf16 %v8937_v21 }
 0x439   :  { %v1438_v60 = vsel %vm525_vm1, %v1422_v54, %v8938_v40  ;;  %v1439_v1 = vsel %vm525_vm1, %v1423_v48, %v8939_v49  ;;  %v11395_v54 = vld [vmem:[%s13884_s3 + $0x1] ss:$0 sm:$0xff] }
 0x43b   :  { %1651 = vmatmul.mubr.bf16.gmra.mrb[28].mxu1 %v1468_v47 }
 0x43c   :  { %8007 = vmatprep.mubr.msk.bf16.mxu1 %vm74_vm0, %v1471_v50  ;;  %v8947_v26 = vpop.permute.xlu0 %8946 }
 0x43d   :  { %v8949_v44 = vunpack.i.h.bf16 %v8947_v26  ;;  %v8948_v53 = vunpack.i.l.bf16 %v8947_v26 }
 0x43e   :  { %v8952_v63 = vpop.permute.xlu1 %8951 }
 0x43f   :  { %v8954_v4 = vunpack.i.h.bf16 %v8952_v63  ;;  %v8953_v28 = vunpack.i.l.bf16 %v8952_v63  ;;  %v1454_v43 = vsel %vm542_vm2, %v1438_v60, %v8948_v53  ;;  %v1455_v56 = vsel %vm542_vm2, %v1439_v1, %v8949_v44 }
 0x440   :  { %v8957_v14 = vpop.permute.xlu0 %8956  ;;  %v1470_v16 = vpack.c.bf16 %v1455_v56, %v1454_v43 }
 0x441   :  { %v1425_v33 = vsel %vm74_vm0, %v1167_v55, %v8954_v4  ;;  %v1424_v25 = vsel %vm74_vm0, %v1166_v37, %v8953_v28  ;;  %v8959_v38 = vunpack.i.h.bf16 %v8957_v14  ;;  %v8958_v10 = vunpack.i.l.bf16 %v8957_v14 }
 0x442   :  { %v8962_v39 = vpop.permute.xlu1 %8961 }
 0x443   :  { %1659 = vmatmul.mubr.bf16.gmra.mrb[32].mxu1 %v1470_v16  ;;  %v8964_v11 = vunpack.i.h.bf16 %v8962_v39  ;;  %v8963_v17 = vunpack.i.l.bf16 %v8962_v39  ;;  %v1440_v57 = vsel %vm525_vm1, %v1424_v25, %v8958_v10  ;;  %v1441_v19 = vsel %vm525_vm1, %v1425_v33, %v8959_v38 }
 0x444   :  { %8008 = vmatprep.mubr.msk.bf16.mxu1 %vm74_vm0, %v1473_v6  ;;  %v8972_v51 = vpop.permute.xlu0 %8971 }
 0x445   :  { %v8974_v13 = vunpack.i.h.bf16 %v8972_v51  ;;  %v8973_v23 = vunpack.i.l.bf16 %v8972_v51  ;;  %v1456_v42 = vsel %vm542_vm2, %v1440_v57, %v8963_v17  ;;  %v1457_v62 = vsel %vm542_vm2, %v1441_v19, %v8964_v11 }
 0x446   :  { %v8967_v12 = vpop.permute.xlu1 %8966  ;;  %v1472_v41 = vpack.c.bf16 %v1457_v62, %v1456_v42 }
 0x447   :  { %v1427_v15 = vsel %vm74_vm0, %v1169_v29, %v8974_v13  ;;  %v1426_v61 = vsel %vm74_vm0, %v1168_v58, %v8973_v23  ;;  %v8969_v35 = vunpack.i.h.bf16 %v8967_v12  ;;  %v8968_v37 = vunpack.i.l.bf16 %v8967_v12  ;;  %v9752_v29 = vld [vmem:[%s13883_s2 + $0x10] sm:$0xff]  }
 0x448   :  { %v8977_v21 = vpop.permute.xlu0 %8976  ;;  %8494 = vmatprep.subr.bf16.mxu0 %v9752_v29 }
 0x449   :  { %v8979_v47 = vunpack.i.h.bf16 %v8977_v21  ;;  %v8978_v24 = vunpack.i.l.bf16 %v8977_v21  ;;  %v1442_v50 = vsel %vm525_vm1, %v1426_v61, %v8968_v37  ;;  %v1443_v49 = vsel %vm525_vm1, %v1427_v15, %v8969_v35  ;;  %8495 = vmatpush3.bf16.msra.mxu0 %v9752_v29 }
 0x44b   :  { %1667 = vmatmul.mubr.bf16.gmra.mrb[36].mxu1 %v1472_v41  ;;  %v1458_v40 = vsel %vm542_vm2, %v1442_v50, %v8978_v24  ;;  %v1459_v26 = vsel %vm542_vm2, %v1443_v49, %v8979_v47  ;;  %v9753_v50 = vld [vmem:[%s13883_s2 + $0x18] sm:$0xff]  }
 0x44c   :  { %8009 = vmatprep.mubr.msk.bf16.mxu1 %vm74_vm0, %v1475_v34  ;;  %v1474_v48 = vpack.c.bf16 %v1459_v26, %v1458_v40  ;;  %8496 = vmatprep.subr.bf16.mxu0 %v9753_v50 }
 0x44d   :  { %8497 = vmatpush3.bf16.msra.mxu0 %v9753_v50 }
 0x453   :  { %1675 = vmatmul.mubr.bf16.gmra.mrb[40].mxu1 %v1474_v48 }
 0x4ee   :  { %v1620_v44 = vpop.f32.mrb[32].mxu0 }
 0x4ef   :  { %v11398_v53 = vadd.f32 %v11395_v54, %v1620_v44  ;;  %v1622_v55 = vpop.f32.mrb[33].mxu0 }
 0x4f0   :  { %v1623_v58 = vpop.f32.mrb[34].mxu0 }
 0x4f1   :  { %v8010_v63 = vmul.f32 -1.442695, %v11398_v53  ;;  %v11402_v60 = vadd.f32 %v11395_v54, %v1623_v58  ;;  %v1625_v1 = vpop.f32.mrb[35].mxu0 }
 0x4f3   :  { %9940 = vpow2.f32 %v8010_v63  ;;  %v8011_v4 = vmul.f32 -1.442695, %v11402_v60 }
 0x4f5   :  { %9942 = vpow2.f32 %v8011_v4 }
 0x4f6   :  { %v1628_v28 = vpop.f32.mrb[16].mxu1 }
 0x4f7   :  { %v11406_v43 = vadd.f32 %v11395_v54, %v1628_v28  ;;  %v1630_v56 = vpop.f32.mrb[17].mxu1 }
 0x4f8   :  { %v1631_v14 = vpop.f32.mrb[18].mxu1 }
 0x4f9   :  { %v8012_v16 = vmul.f32 -1.442695, %v11406_v43  ;;  %v11410_v6 = vadd.f32 %v11395_v54, %v1631_v14  ;;  %v1633_v33 = vpop.f32.mrb[19].mxu1 }
 0x4fb   :  { %9944 = vpow2.f32 %v8012_v16  ;;  %v8013_v25 = vmul.f32 -1.442695, %v11410_v6 }
 0x4fd   :  { %9946 = vpow2.f32 %v8013_v25  ;;  %v9941_v38 = vpop.eup %9940 }
 0x4fe   :  { %v1636_v10 = vpop.f32.mrb[20].mxu1  ;;  %v1747_v39 = vadd.f32 1.0, %v9941_v38 }
 0x4ff   :  { %v11414_v11 = vadd.f32 %v11395_v54, %v1636_v10  ;;  %v1638_v17 = vpop.f32.mrb[21].mxu1  ;;  %v9943_v57 = vpop.eup %9942 }
 0x500   :  { %v1639_v19 = vpop.f32.mrb[22].mxu1  ;;  %9948 = vrcp.f32 %v1747_v39  ;;  %v1748_v51 = vadd.f32 1.0, %v9943_v57 }
 0x501   :  { %v8014_v13 = vmul.f32 -1.442695, %v11414_v11  ;;  %v11418_v23 = vadd.f32 %v11395_v54, %v1639_v19  ;;  %v1641_v42 = vpop.f32.mrb[23].mxu1 }
 0x502   :  { %9950 = vrcp.f32 %v1748_v51 }
 0x503   :  { %v8015_v62 = vmul.f32 -1.442695, %v11418_v23  ;;  %9952 = vpow2.f32 %v8014_v13 }
 0x505   :  { %v9945_v12 = vpop.eup %9944  ;;  %9954 = vpow2.f32 %v8015_v62 }
 0x506   :  { %v1749_v30 = vadd.f32 1.0, %v9945_v12  ;;  %v1644_v15 = vpop.f32.mrb[24].mxu1 }
 0x507   :  { %v9947_v61 = vpop.eup %9946  ;;  %v11425_v35 = vadd.f32 %v11395_v54, %v1644_v15  ;;  %v1646_v37 = vpop.f32.mrb[25].mxu1 }
 0x508   :  { %9956 = vrcp.f32 %v1749_v30  ;;  %v1750_v21 = vadd.f32 1.0, %v9947_v61  ;;  %v1647_v41 = vpop.f32.mrb[26].mxu1 }
 0x509   :  { %v8016_v47 = vmul.f32 -1.442695, %v11425_v35  ;;  %v11429_v24 = vadd.f32 %v11395_v54, %v1647_v41  ;;  %v1649_v34 = vpop.f32.mrb[27].mxu1 }
 0x50a   :  { %9958 = vrcp.f32 %v1750_v21  ;;  %v9949_v49 = vpop.eup %9948 }
 0x50b   :  { %9960 = vpow2.f32 %v8016_v47  ;;  %v8017_v40 = vmul.f32 -1.442695, %v11429_v24  ;;  %1811 = vrot.lane.b32.xlu1 %v9949_v49, %s10694_s16 }
 0x50c   :  { %v9951_v26 = vpop.eup %9950 }
 0x50d   :  { %9962 = vpow2.f32 %v8017_v40  ;;  %v9953_v48 = vpop.eup %9952  ;;  %1813 = vrot.lane.b32.xlu0 %v9951_v26, %s10694_s16 }
 0x50e   :  { %v1652_v44 = vpop.f32.mrb[28].mxu1  ;;  %v1751_v55 = vadd.f32 1.0, %v9953_v48 }
 0x50f   :  { %v11438_v58 = vadd.f32 %v11395_v54, %v1652_v44  ;;  %v1654_v63 = vpop.f32.mrb[29].mxu1  ;;  %v9955_v1 = vpop.eup %9954 }
 0x510   :  { %v1655_v4 = vpop.f32.mrb[30].mxu1  ;;  %9964 = vrcp.f32 %v1751_v55  ;;  %v1752_v28 = vadd.f32 1.0, %v9955_v1 }
 0x511   :  { %v8018_v56 = vmul.f32 -1.442695, %v11438_v58  ;;  %v11442_v14 = vadd.f32 %v11395_v54, %v1655_v4  ;;  %v1657_v16 = vpop.f32.mrb[31].mxu1 }
 0x512   :  { %v9957_v33 = vpop.eup %9956  ;;  %9966 = vrcp.f32 %v1752_v28 }
 0x513   :  { %v8019_v25 = vmul.f32 -1.442695, %v11442_v14  ;;  %1815 = vrot.lane.b32.xlu1 %v9957_v33, %s10694_s16  ;;  %9968 = vpow2.f32 %v8018_v56 }
 0x514   :  { %v9959_v38 = vpop.eup %9958 }
 0x515   :  { %v9961_v10 = vpop.eup %9960  ;;  %1817 = vrot.lane.b32.xlu0 %v9959_v38, %s10694_s16  ;;  %9970 = vpow2.f32 %v8019_v25 }
 0x516   :  { %v1753_v39 = vadd.f32 1.0, %v9961_v10  ;;  %v1660_v17 = vpop.f32.mrb[32].mxu1 }
 0x517   :  { %v9963_v57 = vpop.eup %9962  ;;  %v11448_v19 = vadd.f32 %v11395_v54, %v1660_v17  ;;  %v1662_v51 = vpop.f32.mrb[33].mxu1 }
 0x518   :  { %9972 = vrcp.f32 %v1753_v39  ;;  %v1754_v13 = vadd.f32 1.0, %v9963_v57  ;;  %v1663_v42 = vpop.f32.mrb[34].mxu1 }
 0x519   :  { %v8020_v62 = vmul.f32 -1.442695, %v11448_v19  ;;  %v11452_v29 = vadd.f32 %v11395_v54, %v1663_v42  ;;  %v1665_v12 = vpop.f32.mrb[35].mxu1 }
 0x51a   :  { %9974 = vrcp.f32 %v1754_v13  ;;  %v9965_v30 = vpop.eup %9964 }
 0x51b   :  { %9976 = vpow2.f32 %v8020_v62  ;;  %v8021_v15 = vmul.f32 -1.442695, %v11452_v29  ;;  %1819 = vrot.lane.b32.xlu1 %v9965_v30, %s10694_s16 }
 0x51c   :  { %v9967_v61 = vpop.eup %9966 }
 0x51d   :  { %9978 = vpow2.f32 %v8021_v15  ;;  %v9969_v37 = vpop.eup %9968  ;;  %1821 = vrot.lane.b32.xlu0 %v9967_v61, %s10694_s16 }
 0x51e   :  { %v1668_v21 = vpop.f32.mrb[36].mxu1  ;;  %v1755_v41 = vadd.f32 1.0, %v9969_v37 }
 0x51f   :  { %v11458_v47 = vadd.f32 %v11395_v54, %v1668_v21  ;;  %v1670_v34 = vpop.f32.mrb[37].mxu1  ;;  %v9971_v50 = vpop.eup %9970 }
 0x520   :  { %v1671_v49 = vpop.f32.mrb[38].mxu1  ;;  %9980 = vrcp.f32 %v1755_v41  ;;  %v1756_v40 = vadd.f32 1.0, %v9971_v50 }
 0x521   :  { %v8022_v26 = vmul.f32 -1.442695, %v11458_v47  ;;  %v11462_v48 = vadd.f32 %v11395_v54, %v1671_v49  ;;  %v1673_v44 = vpop.f32.mrb[39].mxu1 }
 0x522   :  { %v9973_v55 = vpop.eup %9972  ;;  %9982 = vrcp.f32 %v1756_v40 }
 0x523   :  { %v8023_v63 = vmul.f32 -1.442695, %v11462_v48  ;;  %1823 = vrot.lane.b32.xlu1 %v9973_v55, %s10694_s16  ;;  %9984 = vpow2.f32 %v8022_v26 }
 0x524   :  { %v9975_v1 = vpop.eup %9974 }
 0x525   :  { %v9977_v4 = vpop.eup %9976  ;;  %1825 = vrot.lane.b32.xlu0 %v9975_v1, %s10694_s16  ;;  %9986 = vpow2.f32 %v8023_v63 }
 0x526   :  { %v1757_v28 = vadd.f32 1.0, %v9977_v4  ;;  %v1676_v56 = vpop.f32.mrb[40].mxu1 }
 0x527   :  { %v9979_v16 = vpop.eup %9978  ;;  %v11468_v33 = vadd.f32 %v11395_v54, %v1676_v56  ;;  %v1678_v25 = vpop.f32.mrb[41].mxu1 }
 0x528   :  { %9988 = vrcp.f32 %v1757_v28  ;;  %v1758_v38 = vadd.f32 1.0, %v9979_v16  ;;  %v1679_v10 = vpop.f32.mrb[42].mxu1 }
 0x529   :  { %v8024_v39 = vmul.f32 -1.442695, %v11468_v33  ;;  %v11472_v17 = vadd.f32 %v11395_v54, %v1679_v10  ;;  %v1681_v57 = vpop.f32.mrb[43].mxu1 }
 0x52a   :  { %9990 = vrcp.f32 %v1758_v38  ;;  %v9981_v51 = vpop.eup %9980 }
 0x52b   :  { %9992 = vpow2.f32 %v8024_v39  ;;  %v8025_v13 = vmul.f32 -1.442695, %v11472_v17  ;;  %1827 = vrot.lane.b32.xlu1 %v9981_v51, %s10694_s16 }
 0x52c   :  { %v9983_v42 = vpop.eup %9982 }
 0x52d   :  { %9994 = vpow2.f32 %v8025_v13  ;;  %v9985_v62 = vpop.eup %9984  ;;  %1829 = vrot.lane.b32.xlu0 %v9983_v42, %s10694_s16 }
 0x52e   :  { %v1759_v12 = vadd.f32 1.0, %v9985_v62 }
 0x52f   :  { %v9987_v30 = vpop.eup %9986 }
 0x530   :  { %9996 = vrcp.f32 %v1759_v12  ;;  %v1760_v15 = vadd.f32 1.0, %v9987_v30 }
 0x532   :  { %v9989_v61 = vpop.eup %9988  ;;  %9998 = vrcp.f32 %v1760_v15 }
 0x533   :  { %1831 = vrot.lane.b32.xlu1 %v9989_v61, %s10694_s16 }
 0x534   :  { %v9991_v37 = vpop.eup %9990 }
 0x535   :  { %v9993_v21 = vpop.eup %9992  ;;  %1833 = vrot.lane.b32.xlu0 %v9991_v37, %s10694_s16 }
 0x536   :  { %v1761_v41 = vadd.f32 1.0, %v9993_v21 }
 0x537   :  { %v9995_v34 = vpop.eup %9994 }
 0x538   :  { %10000 = vrcp.f32 %v1761_v41  ;;  %v1762_v50 = vadd.f32 1.0, %v9995_v34 }
 0x53a   :  { %10002 = vrcp.f32 %v1762_v50  ;;  %v9997_v49 = vpop.eup %9996 }
 0x53b   :  { %1835 = vrot.lane.b32.xlu1 %v9997_v49, %s10694_s16  ;;  %10004 = vtanh.f32 %v11398_v53 }
 0x53c   :  { %v9999_v40 = vpop.eup %9998  ;;  %10006 = vtanh.f32 %v11402_v60 }
 0x53d   :  { %1837 = vrot.lane.b32.xlu0 %v9999_v40, %s10694_s16  ;;  %10008 = vtanh.f32 %v11406_v43 }
 0x53e   :  { %10010 = vtanh.f32 %v11410_v6 }
 0x53f   :  { %10012 = vtanh.f32 %v11414_v11 }
 0x540   :  { %10014 = vtanh.f32 %v11418_v23 }
 0x541   :  { %10016 = vtanh.f32 %v11425_v35 }
 0x542   :  { %v10001_v26 = vpop.eup %10000  ;;  %10018 = vtanh.f32 %v11429_v24 }
 0x543   :  { %1839 = vrot.lane.b32.xlu1 %v10001_v26, %s10694_s16  ;;  %10020 = vtanh.f32 %v11438_v58 }
 0x544   :  { %v10003_v44 = vpop.eup %10002  ;;  %10022 = vtanh.f32 %v11442_v14 }
 0x545   :  { %1841 = vrot.lane.b32.xlu0 %v10003_v44, %s10694_s16  ;;  %v10005_v63 = vpop.eup %10004  ;;  %10024 = vtanh.f32 %v11448_v19 }
 0x546   :  { %v10007_v1 = vpop.eup %10006  ;;  %10026 = vtanh.f32 %v11452_v29 }
 0x547   :  { %1901 = vrot.lane.b32.xlu1 %v11395_v54, %s10688_s21  ;;  %v10009_v54 = vpop.eup %10008  ;;  %10028 = vtanh.f32 %v11458_v47 }
 0x548   :  { %v10011_v53 = vpop.eup %10010  ;;  %10030 = vtanh.f32 %v11462_v48 }
 0x549   :  { %v10013_v39 = vpop.eup %10012  ;;  %10032 = vtanh.f32 %v11468_v33 }
 0x54a   :  { %v10015_v11 = vpop.eup %10014  ;;  %10034 = vtanh.f32 %v11472_v17  ;;  %v9755_v17 = vld [vmem:[#allocation4 + $0xa8] sm:$0xff]  }
 0x54b   :  { %v10017_v62 = vpop.eup %10016 }
 0x54c   :  { %v10019_v35 = vpop.eup %10018 }
 0x54d   :  { %v10021_v37 = vpop.eup %10020 }
 0x54e   :  { %v10023_v58 = vpop.eup %10022 }
 0x54f   :  { %v10025_v49 = vpop.eup %10024 }
 0x550   :  { %v10027_v19 = vpop.eup %10026 }
 0x57d   :  { %v1812_v55 = vpop.permute.xlu1 %1811 }
 0x57e   :  { %v1859_v28 = vmul.f32 %v10005_v63, %v1812_v55  ;;  %v10029_v63 = vpop.eup %10028 }
 0x57f   :  { %v1814_v4 = vpop.permute.xlu0 %1813  ;;  %v10031_v47 = vpop.eup %10030 }
 0x580   :  { %v1860_v56 = vmul.f32 %v10007_v1, %v1814_v4 }
 0x582   :  { %v1875_v16 = vpack.c.bf16 %v1860_v56, %v1859_v28 }
 0x584   :  { %8498 = vmatprep.mubr.msk.bf16.mxu0 %vm74_vm0, %v1875_v16  ;;  %v10033_v16 = vpop.eup %10032 }
 0x585   :  { %v1816_v25 = vpop.permute.xlu1 %1815 }
 0x586   :  { %v1861_v43 = vmul.f32 %v10009_v54, %v1816_v25  ;;  %v10035_v25 = vpop.eup %10034 }
 0x587   :  { %v1818_v60 = vpop.permute.xlu0 %1817 }
 0x588   :  { %v1862_v38 = vmul.f32 %v10011_v53, %v1818_v60 }
 0x58a   :  { %v1876_v6 = vpack.c.bf16 %v1862_v38, %v1861_v43  ;;  %v9754_v43 = vld [vmem:[#allocation4 + $0xa0] sm:$0xff]   ;;  %v9756_v38 = vld [vmem:[#allocation4 + $0xb0] sm:$0xff]  }
 0x58b   :  { %2448 = vmatpush1.bf16.msra.mxu1 %v9754_v43 }
 0x58c   :  { %8499 = vmatmul.mubr.msk.bf16.vlgmr.msra.gmra.mrb[36].mxu0 %vm74_vm0, %v1876_v6  ;;  %2449 = vmatprep.subr.bf16.mxu1 %v10691_v0  ;;  %v9757_v6 = vld [vmem:[#allocation4 + $0xb8] sm:$0xff]  }
 0x58d   :  { %v1820_v10 = vpop.permute.xlu1 %1819 }
 0x58e   :  { %v1863_v51 = vmul.f32 %v10013_v39, %v1820_v10  ;;  %v9758_v10 = vld [vmem:[#allocation4 + $0xc0] sm:$0xff]   ;;  %v9759_v39 = vld [vmem:[#allocation4 + $0xc8] sm:$0xff]  }
 0x58f   :  { %v1822_v57 = vpop.permute.xlu0 %1821  ;;  %2450 = vmatpush1.bf16.msra.mxu1 %v9755_v17 }
 0x590   :  { %v1864_v13 = vmul.f32 %v10015_v11, %v1822_v57  ;;  %2451 = vmatprep.subr.bf16.mxu1 %v10691_v0  ;;  %v9760_v11 = vld [vmem:[#allocation4 + $0xd0] sm:$0xff]   ;;  %v9761_v57 = vld [vmem:[#allocation4 + $0xd8] sm:$0xff]  }
 0x592   :  { %v1877_v42 = vpack.c.bf16 %v1864_v13, %v1863_v51 }
 0x593   :  { %2452 = vmatpush1.bf16.msra.mxu1 %v9756_v38 }
 0x594   :  { %8502 = vmatprep.mubr.msk.bf16.mxu0 %vm74_vm0, %v1877_v42  ;;  %2453 = vmatprep.subr.bf16.mxu1 %v10691_v0 }
 0x595   :  { %v1824_v23 = vpop.permute.xlu1 %1823 }
 0x596   :  { %v1865_v30 = vmul.f32 %v10017_v62, %v1824_v23 }
 0x597   :  { %v1826_v12 = vpop.permute.xlu0 %1825  ;;  %2454 = vmatpush1.bf16.msra.mxu1 %v9757_v6 }
 0x598   :  { %v1866_v15 = vmul.f32 %v10019_v35, %v1826_v12  ;;  %2455 = vmatprep.subr.bf16.mxu1 %v10691_v0 }
 0x59a   :  { %v1878_v24 = vpack.c.bf16 %v1866_v15, %v1865_v30 }
 0x59b   :  { %2456 = vmatpush1.bf16.msra.mxu1 %v9758_v10 }
 0x59c   :  { %8503 = vmatmul.mubr.msk.bf16.gmra.mrb[40].mxu0 %vm74_vm0, %v1878_v24  ;;  %2457 = vmatprep.subr.bf16.mxu1 %v10691_v0 }
 0x59d   :  { %v1828_v61 = vpop.permute.xlu1 %1827 }
 0x59e   :  { %v1867_v41 = vmul.f32 %v10021_v37, %v1828_v61 }
 0x59f   :  { %v1830_v21 = vpop.permute.xlu0 %1829  ;;  %2458 = vmatpush1.bf16.msra.mxu1 %v9759_v39 }
 0x5a0   :  { %v1868_v34 = vmul.f32 %v10023_v58, %v1830_v21  ;;  %2459 = vmatprep.subr.bf16.mxu1 %v10691_v0  ;;  %v9763_v58 = vld [vmem:[#allocation4 + $0xe8] sm:$0xff]  }
 0x5a2   :  { %v1879_v50 = vpack.c.bf16 %v1868_v34, %v1867_v41 }
 0x5a3   :  { %2460 = vmatpush1.bf16.msra.mxu1 %v9760_v11 }
 0x5a4   :  { %8506 = vmatprep.mubr.msk.bf16.mxu0 %vm74_vm0, %v1879_v50  ;;  %2461 = vmatprep.subr.bf16.mxu1 %v10691_v0 }
 0x5a5   :  { %v1832_v14 = vpop.permute.xlu1 %1831 }
 0x5a6   :  { %v1869_v26 = vmul.f32 %v10025_v49, %v1832_v14 }
 0x5a7   :  { %v1834_v40 = vpop.permute.xlu0 %1833  ;;  %2462 = vmatpush1.bf16.msra.mxu1 %v9761_v57 }
 0x5a8   :  { %v1870_v44 = vmul.f32 %v10027_v19, %v1834_v40  ;;  %2463 = vmatprep.subr.bf16.mxu1 %v10691_v0 }
 0x5aa   :  { %v1880_v29 = vpack.c.bf16 %v1870_v44, %v1869_v26 }
 0x5ac   :  { %8507 = vmatmul.mubr.msk.bf16.gmra.mrb[44].mxu0 %vm74_vm0, %v1880_v29 }
 0x5ad   :  { %v1836_v55 = vpop.permute.xlu1 %1835 }
 0x5ae   :  { %v1871_v4 = vmul.f32 %v10029_v63, %v1836_v55 }
 0x5af   :  { %v1838_v1 = vpop.permute.xlu0 %1837 }
 0x5b0   :  { %v1872_v28 = vmul.f32 %v10031_v47, %v1838_v1 }
 0x5b2   :  { %v1881_v56 = vpack.c.bf16 %v1872_v28, %v1871_v4 }
 0x5b4   :  { %8510 = vmatprep.mubr.msk.bf16.mxu0 %vm74_vm0, %v1881_v56 }
 0x5b5   :  { %v1840_v48 = vpop.permute.xlu1 %1839 }
 0x5b6   :  { %v1873_v53 = vmul.f32 %v10033_v16, %v1840_v48 }
 0x5b7   :  { %v1842_v54 = vpop.permute.xlu0 %1841 }
 0x5b8   :  { %v1874_v60 = vmul.f32 %v10035_v25, %v1842_v54 }
 0x5b9   :  { %v11517_v51 = vpop.permute.xlu1 %1901 }
 0x5ba   :  { %v1882_v33 = vpack.c.bf16 %v1874_v60, %v1873_v53 }
 0x5bc   :  { %8511 = vmatmul.mubr.msk.bf16.gmra.mrb[48].mxu0 %vm74_vm0, %v1882_v33 }
 0x65f   :  { %v8500_v13 = vpop.f32.mrb[36].mxu0 }
 0x660   :  { %v1971_v42 = vadd.f32 %v8500_v13, %v11517_v51  ;;  %v1962_v23 = vpop.f32.mrb[37].mxu0 }
 0x661   :  { %v1963_v62 = vadd.f32 %v1962_v23, %v11517_v51  ;;  %v8501_v35 = vpop.f32.mrb[38].mxu0 }
 0x662   :  { %v11522_v12 = vadd.f32 %v1971_v42, %v11198_v7  ;;  %v1974_v30 = vadd.f32 %v8501_v35, %v11517_v51  ;;  %v1965_v15 = vpop.f32.mrb[39].mxu0 }
 0x663   :  { %v11526_v24 = vadd.f32 %v1963_v62, %v11202_v5  ;;  %v1966_v61 = vadd.f32 %v1965_v15, %v11517_v51  ;;  %v9762_v5 = vld [vmem:[#allocation4 + $0xe0] sm:$0xff]  }
 0x664   :  { %2043 = vst.msk [vmem:[#allocation2 + $0x20] sm:$0xff] %vm74_vm0, %v11522_v12  ;;  %v11532_v37 = vadd.f32 %v1974_v30, %v11208_v8  ;;  %2464 = vmatpush1.bf16.msra.mxu1 %v9762_v5 }
 0x665   :  { %2041 = vst.msk [vmem:[#allocation2 + $0x10] sm:$0xff] %vm74_vm0, %v11526_v24  ;;  %v11537_v7 = vadd.f32 %v1966_v61, %v11213_v32  ;;  %2465 = vmatprep.subr.bf16.mxu1 %v10691_v0 }
 0x666   :  { %2044 = vst.msk [vmem:[#allocation2 + $0x28] sm:$0xff] %vm74_vm0, %v11532_v37 }
 0x667   :  { %2042 = vst.msk [vmem:[#allocation2 + $0x18] sm:$0xff] %vm74_vm0, %v11537_v7 }
 0x668   :  { %2466 = vmatpush1.bf16.msra.mxu1 %v9763_v58 }
 0x66b   :  { %v11544_v21 = vld [vmem:[#allocation2 + $0x20] sm:$0xff] }
 0x66c   :  { %v2073_v8 = vld [vmem:[#allocation2 + $0xc] sm:$0xff] }
 0x66d   :  { %v11548_v32 = vld [vmem:[#allocation2 + $0x10] sm:$0xff]  ;;  %v2076_v63 = vld [vmem:[#allocation2 + $0x24] sm:$0xff] }
 0x66e   :  { %v11546_v41 = vld [vmem:[#allocation2 + $0x18] sm:$0xff] }
 0x66f   :  { %v2074_v34 = vld [vmem:[#allocation2 + $0x14] sm:$0xff]  ;;  %v8504_v50 = vpop.f32.mrb[40].mxu0  ;;  %v2322_v14 = vpack.c.bf16 %v11544_v21, %v11546_v41  ;;  %v8985_v19 = vpack.i.bf16 %v11546_v41, %v11548_v32  ;;  %v2075_v44 = vld [vmem:[#allocation2 + $0x1c] sm:$0xff] }
 0x670   :  { %v8980_v49 = vpack.i.bf16 %v2074_v34, %v2073_v8  ;;  %v1987_v40 = vadd.f32 %v8504_v50, %v11517_v51  ;;  %v1978_v26 = vpop.f32.mrb[41].mxu0  ;;  %v8990_v48 = vpack.i.bf16 %v2075_v44, %v2074_v34  ;;  %v9000_v25 = vpack.i.bf16 %v2076_v63, %v2075_v44 }
 0x671   :  { %v1979_v29 = vadd.f32 %v1978_v26, %v11517_v51  ;;  %v8505_v55 = vpop.f32.mrb[42].mxu0  ;;  %8051 = vmatprep.mubr.msk.bf16.mxu1 %vm74_vm0, %v2322_v14  ;;  %8986 = vrot.lane.b32.xlu1 %v8985_v19, %s10688_s21 }
 0x672   :  { %8981 = vrot.lane.b32.xlu0 %v8980_v49, %s10693_s15  ;;  %v11559_v47 = vadd.f32 %v1987_v40, %v11235_v36  ;;  %v1990_v1 = vadd.f32 %v8505_v55, %v11517_v51  ;;  %v1981_v4 = vpop.f32.mrb[43].mxu0  ;;  %v11572_v36 = vld [vmem:[#allocation2 + $0x28] sm:$0xff] }
 0x673   :  { %v11564_v28 = vadd.f32 %v1979_v29, %v11239_v22  ;;  %v1982_v56 = vadd.f32 %v1981_v4, %v11517_v51  ;;  %v8995_v22 = vpack.i.bf16 %v11572_v36, %v11544_v21 }
 0x674   :  { %2047 = vst.msk [vmem:[#allocation2 + $0x40] sm:$0xff] %vm74_vm0, %v11559_v47  ;;  %v11570_v16 = vadd.f32 %v1990_v1, %v11246_v52 }
 0x675   :  { %2045 = vst.msk [vmem:[#allocation2 + $0x30] sm:$0xff] %vm74_vm0, %v11564_v28  ;;  %v11577_v54 = vadd.f32 %v1982_v56, %v11252_v45  ;;  %9001 = vrot.lane.b32.xlu1 %v9000_v25, %s10693_s15 }
 0x676   :  { %8991 = vrot.lane.b32.xlu0 %v8990_v48, %s10694_s16  ;;  %2048 = vst.msk [vmem:[#allocation2 + $0x48] sm:$0xff] %vm74_vm0, %v11570_v16 }
 0x677   :  { %2046 = vst.msk [vmem:[#allocation2 + $0x38] sm:$0xff] %vm74_vm0, %v11577_v54 }
 0x67a   :  { %8996 = vrot.lane.b32.xlu0 %v8995_v22, %s10688_s21 }
 0x67b   :  { %v11622_v58 = vld [vmem:[#allocation2 + $0x40] sm:$0xff] }
 0x67c   :  { %v2077_v52 = vld [vmem:[#allocation2 + $0x2c] sm:$0xff] }
 0x67d   :  { %v9005_v53 = vpack.i.bf16 %v2077_v52, %v2076_v63  ;;  %v11592_v6 = vld [vmem:[#allocation2 + $0x30] sm:$0xff]  ;;  %v2080_v62 = vld [vmem:[#allocation2 + $0x44] sm:$0xff] }
 0x67e   :  { %v2078_v60 = vld [vmem:[#allocation2 + $0x34] sm:$0xff]  ;;  %v2079_v10 = vld [vmem:[#allocation2 + $0x3c] sm:$0xff]  ;;  %v2091_v8 = vld [vmem:[#allocation2 + $0x4c] sm:$0xff] }
 0x67f   :  { %v11588_v45 = vld [vmem:[#allocation2 + $0x38] sm:$0xff]  ;;  %v8508_v33 = vpop.f32.mrb[44].mxu0  ;;  %9006 = vrot.lane.b32.xlu1 %v9005_v53, %s10694_s16  ;;  %v9010_v43 = vpack.i.bf16 %v2078_v60, %v2077_v52  ;;  %v9020_v15 = vpack.i.bf16 %v2079_v10, %v2078_v60 }
 0x680   :  { %v2003_v17 = vadd.f32 %v8508_v33, %v11517_v51  ;;  %v1994_v38 = vpop.f32.mrb[45].mxu0  ;;  %v9015_v57 = vpack.i.bf16 %v11588_v45, %v11592_v6 }
 0x681   :  { %v1995_v39 = vadd.f32 %v1994_v38, %v11517_v51  ;;  %v8509_v11 = vpop.f32.mrb[46].mxu0  ;;  %9011 = vrot.lane.b32.xlu0 %v9010_v43, %s10693_s15 }
 0x682   :  { %v11599_v13 = vadd.f32 %v2003_v17, %v11272_v31  ;;  %v2006_v42 = vadd.f32 %v8509_v11, %v11517_v51  ;;  %v1997_v23 = vpop.f32.mrb[47].mxu0  ;;  %v11612_v31 = vld [vmem:[#allocation2 + $0x48] sm:$0xff] }
 0x683   :  { %v11603_v35 = vadd.f32 %v1995_v39, %v11276_v18  ;;  %v1998_v30 = vadd.f32 %v1997_v23, %v11517_v51  ;;  %9016 = vrot.lane.b32.xlu1 %v9015_v57, %s10688_s21  ;;  %v9030_v18 = vpack.i.bf16 %v2080_v62, %v2079_v10 }
 0x684   :  { %2051 = vst.msk [vmem:[#allocation2 + $0x80] sm:$0xff] %vm74_vm0, %v11599_v13  ;;  %v11610_v61 = vadd.f32 %v2006_v42, %v11283_v20  ;;  %v9025_v20 = vpack.i.bf16 %v11612_v31, %v11622_v58 }
 0x685   :  { %2049 = vst.msk [vmem:[#allocation2 + $0x70] sm:$0xff] %vm74_vm0, %v11603_v35  ;;  %v11617_v5 = vadd.f32 %v1998_v30, %v11288_v2  ;;  %9021 = vrot.lane.b32.xlu0 %v9020_v15, %s10694_s16  ;;  %v9035_v2 = vpack.i.bf16 %v2091_v8, %v2080_v62 }
 0x686   :  { %2052 = vst.msk [vmem:[#allocation2 + $0x88] sm:$0xff] %vm74_vm0, %v11610_v61 }
 0x687   :  { %2050 = vst.msk [vmem:[#allocation2 + $0x78] sm:$0xff] %vm74_vm0, %v11617_v5  ;;  %9031 = vrot.lane.b32.xlu1 %v9030_v18, %s10693_s15 }
 0x689   :  { %9026 = vrot.lane.b32.xlu0 %v9025_v20, %s10688_s21 }
 0x68b   :  { %9036 = vrot.lane.b32.xlu1 %v9035_v2, %s10694_s16  ;;  %v11691_v2 = vld [vmem:[#allocation2 + $0x8] sm:$0xff] }
 0x68c   :  { %v2081_v34 = vld [vmem:[#allocation2 + $0x6c] sm:$0xff] }
 0x68d   :  { %v11631_v14 = vld [vmem:[#allocation2 + $0x70] sm:$0xff]  ;;  %v2084_v63 = vld [vmem:[#allocation2 + $0x84] sm:$0xff] }
 0x68e   :  { %v2082_v50 = vld [vmem:[#allocation2 + $0x74] sm:$0xff]  ;;  %v2083_v55 = vld [vmem:[#allocation2 + $0x7c] sm:$0xff]  ;;  %v11654_v43 = vld [vmem:[#allocation2 + $0x88] sm:$0xff] }
 0x68f   :  { %v11633_v49 = vld [vmem:[#allocation2 + $0x78] sm:$0xff]  ;;  %v8512_v19 = vpop.f32.mrb[48].mxu0  ;;  %v9040_v40 = vpack.i.bf16 %v2082_v50, %v2081_v34  ;;  %v9050_v53 = vpack.i.bf16 %v2083_v55, %v2082_v50  ;;  %v9060_v60 = vpack.i.bf16 %v2084_v63, %v2083_v55 }
 0x690   :  { %v9045_v26 = vpack.i.bf16 %v11633_v49, %v11631_v14  ;;  %v2019_v44 = vadd.f32 %v8512_v19, %v11517_v51  ;;  %v2010_v29 = vpop.f32.mrb[49].mxu0 }
 0x691   :  { %v2011_v1 = vadd.f32 %v2010_v29, %v11517_v51  ;;  %v8513_v4 = vpop.f32.mrb[50].mxu0  ;;  %9041 = vrot.lane.b32.xlu0 %v9040_v40, %s10693_s15 }
 0x692   :  { %9046 = vrot.lane.b32.xlu1 %v9045_v26, %s10688_s21  ;;  %v11642_v56 = vadd.f32 %v2019_v44, %v11303_v27  ;;  %v2022_v48 = vadd.f32 %v8513_v4, %v11517_v51  ;;  %v2013_v25 = vpop.f32.mrb[51].mxu0 }
 0x693   :  { %v11646_v22 = vadd.f32 %v2011_v1, %v11307_v59  ;;  %v2014_v52 = vadd.f32 %v2013_v25, %v11517_v51  ;;  %v11665_v59 = vld [vmem:[#allocation2 + $0x80] sm:$0xff] }
 0x694   :  { %2055 = vst.msk [vmem:[#allocation2 + $0xa0] sm:$0xff] %vm74_vm0, %v11642_v56  ;;  %v11652_v33 = vadd.f32 %v2022_v48, %v11313_v3  ;;  %v9055_v3 = vpack.i.bf16 %v11654_v43, %v11665_v59 }
 0x695   :  { %2053 = vst.msk [vmem:[#allocation2 + $0x90] sm:$0xff] %vm74_vm0, %v11646_v22  ;;  %v11659_v27 = vadd.f32 %v2014_v52, %v11318_v46  ;;  %9051 = vrot.lane.b32.xlu0 %v9050_v53, %s10694_s16 }
 0x696   :  { %9061 = vrot.lane.b32.xlu1 %v9060_v60, %s10693_s15  ;;  %2056 = vst.msk [vmem:[#allocation2 + $0xa8] sm:$0xff] %vm74_vm0, %v11652_v33 }
 0x697   :  { %2054 = vst.msk [vmem:[#allocation2 + $0x98] sm:$0xff] %vm74_vm0, %v11659_v27 }
 0x699   :  { %9056 = vrot.lane.b32.xlu0 %v9055_v3, %s10688_s21 }
 0x69b   :  { %v11684_v15 = vld [vmem:[#allocation2 + $0xa0] sm:$0xff] }
 0x69c   :  { %v2085_v51 = vld [vmem:[#allocation2 + $0x8c] sm:$0xff] }
 0x69d   :  { %v9065_v46 = vpack.i.bf16 %v2085_v51, %v2084_v63  ;;  %v11675_v39 = vld [vmem:[#allocation2 + $0x90] sm:$0xff]  ;;  %v2088_v42 = vld [vmem:[#allocation2 + $0xa4] sm:$0xff] }
 0x69e   :  { %v2086_v17 = vld [vmem:[#allocation2 + $0x94] sm:$0xff]  ;;  %v2087_v11 = vld [vmem:[#allocation2 + $0x9c] sm:$0xff]  ;;  %v11681_v62 = vld [vmem:[#allocation2 + $0xa8] sm:$0xff] }
 0x69f   :  { %v11672_v38 = vld [vmem:[#allocation2 + $0x98] sm:$0xff]  ;;  %9066 = vrot.lane.b32.xlu1 %v9065_v46, %s10694_s16  ;;  %v9070_v10 = vpack.i.bf16 %v2086_v17, %v2085_v51  ;;  %v9080_v23 = vpack.i.bf16 %v2087_v11, %v2086_v17  ;;  %v9090_v30 = vpack.i.bf16 %v2088_v42, %v2087_v11  ;;  %v2092_v18 = vld [vmem:[#allocation2 + $0xac] sm:$0xff]  ;;  %v9085_v8 = vpack.i.bf16 %v11681_v62, %v11684_v15 }
 0x6a0   :  { %v9075_v57 = vpack.i.bf16 %v11672_v38, %v11675_v39  ;;  %v9095_v20 = vpack.i.bf16 %v2092_v18, %v2088_v42  ;;  %v2324_v46 = vpack.c.bf16 %v11592_v6, %v11572_v36 }
 0x6a1   :  { %9071 = vrot.lane.b32.xlu0 %v9070_v10, %s10693_s15 }
 0x6a3   :  { %9076 = vrot.lane.b32.xlu1 %v9075_v57, %s10688_s21 }
 0x6a5   :  { %9081 = vrot.lane.b32.xlu0 %v9080_v23, %s10694_s16 }
 0x6a7   :  { %9091 = vrot.lane.b32.xlu1 %v9090_v30, %s10693_s15 }
 0x6a9   :  { %9086 = vrot.lane.b32.xlu0 %v9085_v8, %s10688_s21 }
 0x6ab   :  { %9096 = vrot.lane.b32.xlu1 %v9095_v20, %s10694_s16 }
 0x6e3   :  { %v8987_v40 = vpop.permute.xlu1 %8986 }
 0x6e4   :  { %v8982_v34 = vpop.permute.xlu0 %8981  ;;  %v8989_v26 = vunpack.i.h.bf16 %v8987_v40  ;;  %v8988_v44 = vunpack.i.l.bf16 %v8987_v40 }
 0x6e5   :  { %v8984_v50 = vunpack.i.h.bf16 %v8982_v34  ;;  %v8983_v19 = vunpack.i.l.bf16 %v8982_v34 }
 0x6e7   :  { %v2273_v29 = vsel %vm74_vm0, %v11691_v2, %v8983_v19  ;;  %v2274_v55 = vsel %vm74_vm0, %v11548_v32, %v8984_v50  ;;  %v9002_v3 = vpop.permute.xlu1 %9001 }
 0x6e8   :  { %v8992_v63 = vpop.permute.xlu0 %8991  ;;  %v2289_v48 = vsel %vm525_vm1, %v2273_v29, %v8988_v44  ;;  %v2290_v25 = vsel %vm525_vm1, %v2274_v55, %v8989_v26  ;;  %v9004_v17 = vunpack.i.h.bf16 %v9002_v3  ;;  %v9003_v32 = vunpack.i.l.bf16 %v9002_v3 }
 0x6e9   :  { %v8994_v1 = vunpack.i.h.bf16 %v8992_v63  ;;  %v8993_v4 = vunpack.i.l.bf16 %v8992_v63 }
 0x6ea   :  { %v2276_v42 = vsel %vm74_vm0, %v11544_v21, %v9004_v17  ;;  %v2275_v23 = vsel %vm74_vm0, %v11546_v41, %v9003_v32  ;;  %v2326_v21 = vpack.c.bf16 %v11622_v58, %v11588_v45  ;;  %v11723_v17 = vld [vmem:[#allocation2 + $0x50] sm:$0xff] }
 0x6eb   :  { %v2305_v52 = vsel %vm542_vm2, %v2289_v48, %v8993_v4  ;;  %v2306_v53 = vsel %vm542_vm2, %v2290_v25, %v8994_v1 }
 0x6ec   :  { %v2321_v60 = vpack.c.bf16 %v2306_v53, %v2305_v52  ;;  %v8997_v51 = vpop.permute.xlu0 %8996 }
 0x6ed   :  { %v8999_v10 = vunpack.i.h.bf16 %v8997_v51  ;;  %v8998_v11 = vunpack.i.l.bf16 %v8997_v51 }
 0x6ee   :  { %2480 = vmatmul.mubr.bf16.vlgmr.msra.gmra.mrb[44].mxu1 %v2321_v60 }
 0x6ef   :  { %8052 = vmatprep.mubr.msk.bf16.mxu1 %vm74_vm0, %v2324_v46  ;;  %v2291_v20 = vsel %vm525_vm1, %v2275_v23, %v8998_v11  ;;  %v2292_v34 = vsel %vm525_vm1, %v2276_v42, %v8999_v10 }
 0x6f1   :  { %v9007_v57 = vpop.permute.xlu1 %9006 }
 0x6f2   :  { %v9009_v30 = vunpack.i.h.bf16 %v9007_v57  ;;  %v9008_v18 = vunpack.i.l.bf16 %v9007_v57 }
 0x6f3   :  { %v9012_v8 = vpop.permute.xlu0 %9011 }
 0x6f4   :  { %v9014_v50 = vunpack.i.h.bf16 %v9012_v8  ;;  %v9013_v19 = vunpack.i.l.bf16 %v9012_v8  ;;  %v2307_v40 = vsel %vm542_vm2, %v2291_v20, %v9008_v18  ;;  %v2308_v26 = vsel %vm542_vm2, %v2292_v34, %v9009_v30 }
 0x6f5   :  { %v9017_v44 = vpop.permute.xlu1 %9016  ;;  %v2323_v29 = vpack.c.bf16 %v2308_v26, %v2307_v40  ;;  %v2328_v8 = vpack.c.bf16 %v11723_v17, %v11612_v31 }
 0x6f6   :  { %v2278_v41 = vsel %vm74_vm0, %v11592_v6, %v9014_v50  ;;  %v2277_v55 = vsel %vm74_vm0, %v11572_v36, %v9013_v19  ;;  %v9019_v63 = vunpack.i.h.bf16 %v9017_v44  ;;  %v9018_v1 = vunpack.i.l.bf16 %v9017_v44  ;;  %v11736_v50 = vld [vmem:[#allocation2 + $0x68] sm:$0xff] }
 0x6f7   :  { %v9022_v4 = vpop.permute.xlu0 %9021  ;;  %2488 = vmatmul.mubr.bf16.gmra.mrb[48].mxu1 %v2323_v29 }
 0x6f8   :  { %v9024_v48 = vunpack.i.h.bf16 %v9022_v4  ;;  %v9023_v25 = vunpack.i.l.bf16 %v9022_v4  ;;  %8053 = vmatprep.mubr.msk.bf16.mxu1 %vm74_vm0, %v2326_v21  ;;  %v2293_v52 = vsel %vm525_vm1, %v2277_v55, %v9018_v1  ;;  %v2294_v53 = vsel %vm525_vm1, %v2278_v41, %v9019_v63 }
 0x6f9   :  { %v9032_v60 = vpop.permute.xlu1 %9031  ;;  %v2330_v63 = vpack.c.bf16 %v11665_v59, %v11633_v49 }
 0x6fa   :  { %v9034_v3 = vunpack.i.h.bf16 %v9032_v60  ;;  %v9033_v51 = vunpack.i.l.bf16 %v9032_v60  ;;  %v2309_v6 = vsel %vm542_vm2, %v2293_v52, %v9023_v25  ;;  %v2310_v46 = vsel %vm542_vm2, %v2294_v53, %v9024_v48 }
 0x6fb   :  { %v9027_v36 = vpop.permute.xlu0 %9026  ;;  %v2325_v23 = vpack.c.bf16 %v2310_v46, %v2309_v6 }
 0x6fc   :  { %v2280_v32 = vsel %vm74_vm0, %v11622_v58, %v9034_v3  ;;  %v2279_v10 = vsel %vm74_vm0, %v11588_v45, %v9033_v51  ;;  %v9029_v11 = vunpack.i.h.bf16 %v9027_v36  ;;  %v9028_v57 = vunpack.i.l.bf16 %v9027_v36 }
 0x6fd   :  { %v9037_v42 = vpop.permute.xlu1 %9036  ;;  %v2332_v36 = vpack.c.bf16 %v11675_v39, %v11654_v43 }
 0x6fe   :  { %v9039_v30 = vunpack.i.h.bf16 %v9037_v42  ;;  %v9038_v18 = vunpack.i.l.bf16 %v9037_v42  ;;  %v2295_v20 = vsel %vm525_vm1, %v2279_v10, %v9028_v57  ;;  %v2296_v34 = vsel %vm525_vm1, %v2280_v32, %v9029_v11 }
 0x6ff   :  { %2496 = vmatmul.mubr.bf16.gmra.mrb[52].mxu1 %v2325_v23 }
 0x700   :  { %8054 = vmatprep.mubr.msk.bf16.mxu1 %vm74_vm0, %v2328_v8  ;;  %v2311_v58 = vsel %vm542_vm2, %v2295_v20, %v9038_v18  ;;  %v2312_v45 = vsel %vm542_vm2, %v2296_v34, %v9039_v30 }
 0x701   :  { %v2327_v31 = vpack.c.bf16 %v2312_v45, %v2311_v58 }
 0x703   :  { %v9042_v19 = vpop.permute.xlu0 %9041 }
 0x704   :  { %v9047_v40 = vpop.permute.xlu1 %9046  ;;  %v9044_v26 = vunpack.i.h.bf16 %v9042_v19  ;;  %v9043_v44 = vunpack.i.l.bf16 %v9042_v19 }
 0x705   :  { %v9049_v29 = vunpack.i.h.bf16 %v9047_v40  ;;  %v9048_v21 = vunpack.i.l.bf16 %v9047_v40 }
 0x706   :  { %v2282_v41 = vsel %vm74_vm0, %v11631_v14, %v9044_v26  ;;  %v2281_v55 = vsel %vm74_vm0, %v11736_v50, %v9043_v44 }
 0x707   :  { %v9052_v1 = vpop.permute.xlu0 %9051  ;;  %2504 = vmatmul.mubr.bf16.gmra.mrb[56].mxu1 %v2327_v31  ;;  %v2297_v25 = vsel %vm525_vm1, %v2281_v55, %v9048_v21  ;;  %v2298_v52 = vsel %vm525_vm1, %v2282_v41, %v9049_v29 }
 0x708   :  { %v9054_v4 = vunpack.i.h.bf16 %v9052_v1  ;;  %v9053_v48 = vunpack.i.l.bf16 %v9052_v1  ;;  %8055 = vmatprep.mubr.msk.bf16.mxu1 %vm74_vm0, %v2330_v63  ;;  %v9062_v60 = vpop.permute.xlu1 %9061 }
 0x709   :  { %v9064_v6 = vunpack.i.h.bf16 %v9062_v60  ;;  %v9063_v46 = vunpack.i.l.bf16 %v9062_v60 }
 0x70a   :  { %v2313_v53 = vsel %vm542_vm2, %v2297_v25, %v9053_v48  ;;  %v2314_v14 = vsel %vm542_vm2, %v2298_v52, %v9054_v4 }
 0x70b   :  { %v9057_v3 = vpop.permute.xlu0 %9056  ;;  %v2329_v51 = vpack.c.bf16 %v2314_v14, %v2313_v53  ;;  %v2284_v57 = vsel %vm74_vm0, %v11665_v59, %v9064_v6  ;;  %v2283_v42 = vsel %vm74_vm0, %v11633_v49, %v9063_v46  ;;  %v2334_v59 = vpack.c.bf16 %v11684_v15, %v11672_v38  ;;  %v11771_v53 = vld [vmem:[#allocation2 + $0xb0] sm:$0xff] }
 0x70c   :  { %v9059_v32 = vunpack.i.h.bf16 %v9057_v3  ;;  %v9058_v10 = vunpack.i.l.bf16 %v9057_v3 }
 0x70e   :  { %v2299_v8 = vsel %vm525_vm1, %v2283_v42, %v9058_v10  ;;  %v2300_v20 = vsel %vm525_vm1, %v2284_v57, %v9059_v32  ;;  %v2336_v10 = vpack.c.bf16 %v11771_v53, %v11681_v62  ;;  %v11790_v62 = vld [vmem:[%s13884_s3 + $0x2] ss:$0 sm:$0xff] }
 0x70f   :  { %2512 = vmatmul.mubr.bf16.gmra.mrb[60].mxu1 %v2329_v51 }
 0x710   :  { %8056 = vmatprep.mubr.msk.bf16.mxu1 %vm74_vm0, %v2332_v36 }
 0x711   :  { %v9067_v11 = vpop.permute.xlu1 %9066 }
 0x712   :  { %v9069_v23 = vunpack.i.h.bf16 %v9067_v11  ;;  %v9068_v30 = vunpack.i.l.bf16 %v9067_v11 }
 0x713   :  { %v9072_v18 = vpop.permute.xlu0 %9071 }
 0x714   :  { %v9074_v34 = vunpack.i.h.bf16 %v9072_v18  ;;  %v9073_v58 = vunpack.i.l.bf16 %v9072_v18  ;;  %v2315_v45 = vsel %vm542_vm2, %v2299_v8, %v9068_v30  ;;  %v2316_v19 = vsel %vm542_vm2, %v2300_v20, %v9069_v23  ;;  %v9764_v23 = vld [vmem:[%s13883_s2 + $0x20] sm:$0xff]  }
 0x715   :  { %v9077_v40 = vpop.permute.xlu1 %9076  ;;  %v2331_v26 = vpack.c.bf16 %v2316_v19, %v2315_v45  ;;  %8514 = vmatprep.subr.bf16.mxu0 %v9764_v23 }
 0x716   :  { %v2286_v49 = vsel %vm74_vm0, %v11675_v39, %v9074_v34  ;;  %v2285_v44 = vsel %vm74_vm0, %v11654_v43, %v9073_v58  ;;  %v9079_v29 = vunpack.i.h.bf16 %v9077_v40  ;;  %v9078_v21 = vunpack.i.l.bf16 %v9077_v40  ;;  %8515 = vmatpush3.bf16.msra.mxu0 %v9764_v23 }
 0x717   :  { %v9082_v31 = vpop.permute.xlu0 %9081  ;;  %2520 = vmatmul.mubr.bf16.gmra.mrb[64].mxu1 %v2331_v26 }
 0x718   :  { %v9084_v41 = vunpack.i.h.bf16 %v9082_v31  ;;  %v9083_v55 = vunpack.i.l.bf16 %v9082_v31  ;;  %8057 = vmatprep.mubr.msk.bf16.mxu1 %vm74_vm0, %v2334_v59  ;;  %v2301_v63 = vsel %vm525_vm1, %v2285_v44, %v9078_v21  ;;  %v2302_v1 = vsel %vm525_vm1, %v2286_v49, %v9079_v29 }
 0x719   :  { %v9092_v4 = vpop.permute.xlu1 %9091 }
 0x71a   :  { %v9094_v48 = vunpack.i.h.bf16 %v9092_v4  ;;  %v9093_v25 = vunpack.i.l.bf16 %v9092_v4  ;;  %v2317_v39 = vsel %vm542_vm2, %v2301_v63, %v9083_v55  ;;  %v2318_v52 = vsel %vm542_vm2, %v2302_v1, %v9084_v41 }
 0x71b   :  { %v9087_v43 = vpop.permute.xlu0 %9086  ;;  %v2333_v46 = vpack.c.bf16 %v2318_v52, %v2317_v39  ;;  %v9765_v52 = vld [vmem:[%s13883_s2 + $0x28] sm:$0xff]  }
 0x71c   :  { %v2288_v14 = vsel %vm74_vm0, %v11684_v15, %v9094_v48  ;;  %v2287_v60 = vsel %vm74_vm0, %v11672_v38, %v9093_v25  ;;  %v9089_v3 = vunpack.i.h.bf16 %v9087_v43  ;;  %v9088_v51 = vunpack.i.l.bf16 %v9087_v43  ;;  %8516 = vmatprep.subr.bf16.mxu0 %v9765_v52 }
 0x71d   :  { %v9097_v6 = vpop.permute.xlu1 %9096  ;;  %8517 = vmatpush3.bf16.msra.mxu0 %v9765_v52 }
 0x71e   :  { %v9099_v36 = vunpack.i.h.bf16 %v9097_v6  ;;  %v9098_v32 = vunpack.i.l.bf16 %v9097_v6  ;;  %v2303_v11 = vsel %vm525_vm1, %v2287_v60, %v9088_v51  ;;  %v2304_v57 = vsel %vm525_vm1, %v2288_v14, %v9089_v3  ;;  %3280 = vmatprep.subr.bf16.mxu0 %v10691_v0 }
 0x71f   :  { %2528 = vmatmul.mubr.bf16.gmra.mrb[68].mxu1 %v2333_v46 }
 0x720   :  { %8058 = vmatprep.mubr.msk.bf16.mxu1 %vm74_vm0, %v2336_v10  ;;  %v2319_v15 = vsel %vm542_vm2, %v2303_v11, %v9098_v32  ;;  %v2320_v38 = vsel %vm542_vm2, %v2304_v57, %v9099_v36 }
 0x721   :  { %v2335_v42 = vpack.c.bf16 %v2320_v38, %v2319_v15 }
 0x727   :  { %2536 = vmatmul.mubr.bf16.gmra.mrb[72].mxu1 %v2335_v42 }
 0x7c1   :  { %v2481_v30 = vpop.f32.mrb[44].mxu1 }
 0x7c2   :  { %v11793_v18 = vadd.f32 %v11790_v62, %v2481_v30  ;;  %v2483_v8 = vpop.f32.mrb[45].mxu1 }
 0x7c3   :  { %v2484_v20 = vpop.f32.mrb[46].mxu1 }
 0x7c4   :  { %v8059_v34 = vmul.f32 -1.442695, %v11793_v18  ;;  %v11797_v58 = vadd.f32 %v11790_v62, %v2484_v20  ;;  %v2486_v45 = vpop.f32.mrb[47].mxu1 }
 0x7c6   :  { %10036 = vpow2.f32 %v8059_v34  ;;  %v8060_v19 = vmul.f32 -1.442695, %v11797_v58 }
 0x7c8   :  { %10038 = vpow2.f32 %v8060_v19 }
 0x7ca   :  { %v2489_v40 = vpop.f32.mrb[48].mxu1 }
 0x7cb   :  { %v11801_v26 = vadd.f32 %v11790_v62, %v2489_v40  ;;  %v2491_v59 = vpop.f32.mrb[49].mxu1 }
 0x7cc   :  { %v2492_v49 = vpop.f32.mrb[50].mxu1 }
 0x7cd   :  { %v8061_v44 = vmul.f32 -1.442695, %v11801_v26  ;;  %v11805_v29 = vadd.f32 %v11790_v62, %v2492_v49  ;;  %v2494_v21 = vpop.f32.mrb[51].mxu1 }
 0x7cf   :  { %10040 = vpow2.f32 %v8061_v44  ;;  %v8062_v41 = vmul.f32 -1.442695, %v11805_v29 }
 0x7d0   :  { %v10037_v31 = vpop.eup %10036 }
 0x7d1   :  { %v2608_v55 = vadd.f32 1.0, %v10037_v31  ;;  %10042 = vpow2.f32 %v8062_v41 }
 0x7d2   :  { %v10039_v63 = vpop.eup %10038  ;;  %v2497_v4 = vpop.f32.mrb[52].mxu1 }
 0x7d3   :  { %10044 = vrcp.f32 %v2608_v55  ;;  %v2609_v1 = vadd.f32 1.0, %v10039_v63  ;;  %v11809_v48 = vadd.f32 %v11790_v62, %v2497_v4  ;;  %v2499_v25 = vpop.f32.mrb[53].mxu1 }
 0x7d4   :  { %v2500_v39 = vpop.f32.mrb[54].mxu1 }
 0x7d5   :  { %10046 = vrcp.f32 %v2609_v1  ;;  %v8063_v43 = vmul.f32 -1.442695, %v11809_v48  ;;  %v11816_v14 = vadd.f32 %v11790_v62, %v2500_v39  ;;  %v2502_v60 = vpop.f32.mrb[55].mxu1 }
 0x7d7   :  { %10048 = vpow2.f32 %v8063_v43  ;;  %v8064_v3 = vmul.f32 -1.442695, %v11816_v14 }
 0x7d9   :  { %v10041_v51 = vpop.eup %10040  ;;  %10050 = vpow2.f32 %v8064_v3 }
 0x7da   :  { %v2610_v6 = vadd.f32 1.0, %v10041_v51  ;;  %v2505_v46 = vpop.f32.mrb[56].mxu1 }
 0x7db   :  { %v10043_v36 = vpop.eup %10042  ;;  %v11821_v32 = vadd.f32 %v11790_v62, %v2505_v46  ;;  %v2507_v10 = vpop.f32.mrb[57].mxu1 }
 0x7dc   :  { %10052 = vrcp.f32 %v2610_v6  ;;  %v2611_v57 = vadd.f32 1.0, %v10043_v36  ;;  %v2508_v15 = vpop.f32.mrb[58].mxu1 }
 0x7dd   :  { %v10045_v11 = vpop.eup %10044  ;;  %v8065_v38 = vmul.f32 -1.442695, %v11821_v32  ;;  %v11825_v42 = vadd.f32 %v11790_v62, %v2508_v15  ;;  %v2510_v23 = vpop.f32.mrb[59].mxu1 }
 0x7de   :  { %2672 = vrot.lane.b32.xlu0 %v10045_v11, %s10694_s16  ;;  %10054 = vrcp.f32 %v2611_v57 }
 0x7df   :  { %v10047_v30 = vpop.eup %10046  ;;  %10056 = vpow2.f32 %v8065_v38  ;;  %v8066_v8 = vmul.f32 -1.442695, %v11825_v42 }
 0x7e0   :  { %2674 = vrot.lane.b32.xlu1 %v10047_v30, %s10694_s16 }
 0x7e1   :  { %v10049_v20 = vpop.eup %10048  ;;  %10058 = vpow2.f32 %v8066_v8 }
 0x7e2   :  { %v2612_v34 = vadd.f32 1.0, %v10049_v20  ;;  %v2513_v45 = vpop.f32.mrb[60].mxu1 }
 0x7e3   :  { %v10051_v19 = vpop.eup %10050  ;;  %v11831_v40 = vadd.f32 %v11790_v62, %v2513_v45  ;;  %v2515_v59 = vpop.f32.mrb[61].mxu1 }
 0x7e4   :  { %10060 = vrcp.f32 %v2612_v34  ;;  %v2613_v49 = vadd.f32 1.0, %v10051_v19  ;;  %v2516_v44 = vpop.f32.mrb[62].mxu1 }
 0x7e5   :  { %v8067_v21 = vmul.f32 -1.442695, %v11831_v40  ;;  %v11835_v31 = vadd.f32 %v11790_v62, %v2516_v44  ;;  %v2518_v41 = vpop.f32.mrb[63].mxu1 }
 0x7e6   :  { %v10053_v55 = vpop.eup %10052  ;;  %10062 = vrcp.f32 %v2613_v49 }
 0x7e7   :  { %10064 = vpow2.f32 %v8067_v21  ;;  %v8068_v63 = vmul.f32 -1.442695, %v11835_v31  ;;  %2676 = vrot.lane.b32.xlu0 %v10053_v55, %s10694_s16 }
 0x7e8   :  { %v10055_v1 = vpop.eup %10054 }
 0x7e9   :  { %v10057_v4 = vpop.eup %10056  ;;  %10066 = vpow2.f32 %v8068_v63  ;;  %2678 = vrot.lane.b32.xlu1 %v10055_v1, %s10694_s16 }
 0x7ea   :  { %v2614_v25 = vadd.f32 1.0, %v10057_v4  ;;  %v2521_v39 = vpop.f32.mrb[64].mxu1 }
 0x7eb   :  { %v10059_v52 = vpop.eup %10058  ;;  %v11841_v43 = vadd.f32 %v11790_v62, %v2521_v39  ;;  %v2523_v60 = vpop.f32.mrb[65].mxu1 }
 0x7ec   :  { %10068 = vrcp.f32 %v2614_v25  ;;  %v2615_v3 = vadd.f32 1.0, %v10059_v52  ;;  %v2524_v51 = vpop.f32.mrb[66].mxu1 }
 0x7ed   :  { %v8069_v6 = vmul.f32 -1.442695, %v11841_v43  ;;  %v11845_v46 = vadd.f32 %v11790_v62, %v2524_v51  ;;  %v2526_v36 = vpop.f32.mrb[67].mxu1 }
 0x7ee   :  { %v10061_v10 = vpop.eup %10060  ;;  %10070 = vrcp.f32 %v2615_v3 }
 0x7ef   :  { %10072 = vpow2.f32 %v8069_v6  ;;  %v8070_v11 = vmul.f32 -1.442695, %v11845_v46  ;;  %2680 = vrot.lane.b32.xlu0 %v10061_v10, %s10694_s16 }
 0x7f0   :  { %v10063_v57 = vpop.eup %10062 }
 0x7f1   :  { %v10065_v15 = vpop.eup %10064  ;;  %10074 = vpow2.f32 %v8070_v11  ;;  %2682 = vrot.lane.b32.xlu1 %v10063_v57, %s10694_s16 }
 0x7f2   :  { %v2616_v38 = vadd.f32 1.0, %v10065_v15  ;;  %v2529_v23 = vpop.f32.mrb[68].mxu1 }
 0x7f3   :  { %v10067_v30 = vpop.eup %10066  ;;  %v11851_v8 = vadd.f32 %v11790_v62, %v2529_v23  ;;  %v2531_v20 = vpop.f32.mrb[69].mxu1 }
 0x7f4   :  { %10076 = vrcp.f32 %v2616_v38  ;;  %v2617_v34 = vadd.f32 1.0, %v10067_v30  ;;  %v2532_v45 = vpop.f32.mrb[70].mxu1 }
 0x7f5   :  { %v8071_v19 = vmul.f32 -1.442695, %v11851_v8  ;;  %v11855_v59 = vadd.f32 %v11790_v62, %v2532_v45  ;;  %v2534_v49 = vpop.f32.mrb[71].mxu1 }
 0x7f6   :  { %v10069_v44 = vpop.eup %10068  ;;  %10078 = vrcp.f32 %v2617_v34 }
 0x7f7   :  { %10080 = vpow2.f32 %v8071_v19  ;;  %v8072_v21 = vmul.f32 -1.442695, %v11855_v59  ;;  %2684 = vrot.lane.b32.xlu0 %v10069_v44, %s10694_s16 }
 0x7f8   :  { %v10071_v41 = vpop.eup %10070 }
 0x7f9   :  { %v10073_v55 = vpop.eup %10072  ;;  %10082 = vpow2.f32 %v8072_v21  ;;  %2686 = vrot.lane.b32.xlu1 %v10071_v41, %s10694_s16 }
 0x7fa   :  { %v2618_v63 = vadd.f32 1.0, %v10073_v55  ;;  %v2537_v1 = vpop.f32.mrb[72].mxu1 }
 0x7fb   :  { %v10075_v4 = vpop.eup %10074  ;;  %v11861_v25 = vadd.f32 %v11790_v62, %v2537_v1  ;;  %v2539_v39 = vpop.f32.mrb[73].mxu1 }
 0x7fc   :  { %10084 = vrcp.f32 %v2618_v63  ;;  %v2619_v52 = vadd.f32 1.0, %v10075_v4  ;;  %v2540_v60 = vpop.f32.mrb[74].mxu1 }
 0x7fd   :  { %v8073_v3 = vmul.f32 -1.442695, %v11861_v25  ;;  %v11865_v51 = vadd.f32 %v11790_v62, %v2540_v60  ;;  %v2542_v6 = vpop.f32.mrb[75].mxu1 }
 0x7fe   :  { %v10077_v36 = vpop.eup %10076  ;;  %10086 = vrcp.f32 %v2619_v52 }
 0x7ff   :  { %10088 = vpow2.f32 %v8073_v3  ;;  %v8074_v10 = vmul.f32 -1.442695, %v11865_v51  ;;  %2688 = vrot.lane.b32.xlu0 %v10077_v36, %s10694_s16 }
 0x800   :  { %v10079_v11 = vpop.eup %10078 }
 0x801   :  { %v10081_v57 = vpop.eup %10080  ;;  %10090 = vpow2.f32 %v8074_v10  ;;  %2690 = vrot.lane.b32.xlu1 %v10079_v11, %s10694_s16 }
 0x802   :  { %v2620_v15 = vadd.f32 1.0, %v10081_v57 }
 0x803   :  { %v10083_v38 = vpop.eup %10082 }
 0x804   :  { %10092 = vrcp.f32 %v2620_v15  ;;  %v2621_v23 = vadd.f32 1.0, %v10083_v38 }
 0x806   :  { %v10085_v30 = vpop.eup %10084  ;;  %10094 = vrcp.f32 %v2621_v23 }
 0x807   :  { %2692 = vrot.lane.b32.xlu0 %v10085_v30, %s10694_s16 }
 0x808   :  { %v10087_v20 = vpop.eup %10086 }
 0x809   :  { %v10089_v34 = vpop.eup %10088  ;;  %2694 = vrot.lane.b32.xlu1 %v10087_v20, %s10694_s16 }
 0x80a   :  { %v2622_v45 = vadd.f32 1.0, %v10089_v34 }
 0x80b   :  { %v10091_v19 = vpop.eup %10090 }
 0x80c   :  { %10096 = vrcp.f32 %v2622_v45  ;;  %v2623_v49 = vadd.f32 1.0, %v10091_v19 }
 0x80e   :  { %v10093_v44 = vpop.eup %10092  ;;  %10098 = vrcp.f32 %v2623_v49 }
 0x80f   :  { %2696 = vrot.lane.b32.xlu0 %v10093_v44, %s10694_s16  ;;  %10100 = vtanh.f32 %v11793_v18 }
 0x810   :  { %v10095_v21 = vpop.eup %10094  ;;  %10102 = vtanh.f32 %v11797_v58 }
 0x811   :  { %2698 = vrot.lane.b32.xlu1 %v10095_v21, %s10694_s16  ;;  %10104 = vtanh.f32 %v11801_v26 }
 0x812   :  { %10106 = vtanh.f32 %v11805_v29 }
 0x813   :  { %10108 = vtanh.f32 %v11809_v48 }
 0x814   :  { %10110 = vtanh.f32 %v11816_v14 }
 0x815   :  { %10112 = vtanh.f32 %v11821_v32 }
 0x816   :  { %v10097_v41 = vpop.eup %10096  ;;  %10114 = vtanh.f32 %v11825_v42 }
 0x817   :  { %2700 = vrot.lane.b32.xlu0 %v10097_v41, %s10694_s16  ;;  %10116 = vtanh.f32 %v11831_v40 }
 0x818   :  { %v10099_v55 = vpop.eup %10098  ;;  %10118 = vtanh.f32 %v11835_v31 }
 0x819   :  { %2702 = vrot.lane.b32.xlu1 %v10099_v55, %s10694_s16  ;;  %v10101_v1 = vpop.eup %10100  ;;  %10120 = vtanh.f32 %v11841_v43 }
 0x81a   :  { %v10103_v4 = vpop.eup %10102  ;;  %10122 = vtanh.f32 %v11845_v46 }
 0x81b   :  { %2762 = vrot.lane.b32.xlu0 %v11790_v62, %s10688_s21  ;;  %v10105_v18 = vpop.eup %10104  ;;  %10124 = vtanh.f32 %v11851_v8 }
 0x81c   :  { %v10107_v58 = vpop.eup %10106  ;;  %10126 = vtanh.f32 %v11855_v59 }
 0x81d   :  { %v10109_v11 = vpop.eup %10108  ;;  %10128 = vtanh.f32 %v11861_v25 }
 0x81e   :  { %v10111_v57 = vpop.eup %10110  ;;  %10130 = vtanh.f32 %v11865_v51  ;;  %v9767_v51 = vld [vmem:[#allocation4 + $0xf8] sm:$0xff]  }
 0x81f   :  { %v10113_v30 = vpop.eup %10112 }
 0x820   :  { %v10115_v32 = vpop.eup %10114 }
 0x821   :  { %v10117_v49 = vpop.eup %10116 }
 0x822   :  { %v10119_v40 = vpop.eup %10118 }
 0x850   :  { %v2673_v63 = vpop.permute.xlu0 %2672 }
 0x851   :  { %v2720_v52 = vmul.f32 %v10101_v1, %v2673_v63  ;;  %v10121_v63 = vpop.eup %10120 }
 0x852   :  { %v2675_v39 = vpop.permute.xlu1 %2674  ;;  %v10123_v43 = vpop.eup %10122 }
 0x853   :  { %v2721_v60 = vmul.f32 %v10103_v4, %v2675_v39 }
 0x855   :  { %v2736_v3 = vpack.c.bf16 %v2721_v60, %v2720_v52  ;;  %v10125_v60 = vpop.eup %10124 }
 0x856   :  { %v10127_v8 = vpop.eup %10126 }
 0x857   :  { %8518 = vmatprep.mubr.msk.bf16.mxu0 %vm74_vm0, %v2736_v3 }
 0x859   :  { %v2677_v62 = vpop.permute.xlu0 %2676 }
 0x85a   :  { %v2722_v36 = vmul.f32 %v10105_v18, %v2677_v62 }
 0x85b   :  { %v2679_v6 = vpop.permute.xlu1 %2678 }
 0x85c   :  { %v2723_v10 = vmul.f32 %v10107_v58, %v2679_v6  ;;  %v10129_v6 = vpop.eup %10128 }
 0x85e   :  { %v2737_v26 = vpack.c.bf16 %v2723_v10, %v2722_v36  ;;  %v10131_v36 = vpop.eup %10130 }
 0x860   :  { %8519 = vmatmul.mubr.msk.bf16.vlgmr.msra.gmra.mrb[52].mxu0 %vm74_vm0, %v2737_v26 }
 0x861   :  { %v2681_v29 = vpop.permute.xlu0 %2680 }
 0x862   :  { %v2724_v48 = vmul.f32 %v10109_v11, %v2681_v29  ;;  %v9766_v11 = vld [vmem:[#allocation4 + $0xf0] sm:$0xff]  }
 0x863   :  { %v2683_v15 = vpop.permute.xlu1 %2682  ;;  %3281 = vmatpush1.bf16.msra.mxu0 %v9766_v11 }
 0x864   :  { %v2725_v38 = vmul.f32 %v10111_v57, %v2683_v15  ;;  %3282 = vmatprep.subr.bf16.mxu0 %v10691_v0  ;;  %v9768_v57 = vld [vmem:[#allocation4 + $0x100] sm:$0xff]   ;;  %v9769_v15 = vld [vmem:[#allocation4 + $0x108] sm:$0xff]  }
 0x866   :  { %v2738_v14 = vpack.c.bf16 %v2725_v38, %v2724_v48  ;;  %v9770_v48 = vld [vmem:[#allocation4 + $0x110] sm:$0xff]   ;;  %v9771_v38 = vld [vmem:[#allocation4 + $0x118] sm:$0xff]  }
 0x867   :  { %3283 = vmatpush1.bf16.msra.mxu0 %v9767_v51 }
 0x868   :  { %8522 = vmatprep.mubr.msk.bf16.mxu0 %vm74_vm0, %v2738_v14  ;;  %3284 = vmatprep.subr.bf16.mxu0 %v10691_v0  ;;  %v9772_v14 = vld [vmem:[#allocation4 + $0x120] sm:$0xff]  }
 0x869   :  { %v2685_v23 = vpop.permute.xlu0 %2684 }
 0x86a   :  { %v2726_v34 = vmul.f32 %v10113_v30, %v2685_v23  ;;  %v9773_v23 = vld [vmem:[#allocation4 + $0x128] sm:$0xff]  }
 0x86b   :  { %v2687_v20 = vpop.permute.xlu1 %2686  ;;  %3285 = vmatpush1.bf16.msra.mxu0 %v9768_v57 }
 0x86c   :  { %v2727_v45 = vmul.f32 %v10115_v32, %v2687_v20  ;;  %3286 = vmatprep.subr.bf16.mxu0 %v10691_v0 }
 0x86e   :  { %v2739_v42 = vpack.c.bf16 %v2727_v45, %v2726_v34 }
 0x86f   :  { %3287 = vmatpush1.bf16.msra.mxu0 %v9769_v15 }
 0x870   :  { %8523 = vmatmul.mubr.msk.bf16.gmra.mrb[56].mxu0 %vm74_vm0, %v2739_v42  ;;  %3288 = vmatprep.subr.bf16.mxu0 %v10691_v0 }
 0x871   :  { %v2689_v19 = vpop.permute.xlu0 %2688 }
 0x872   :  { %v2728_v21 = vmul.f32 %v10117_v49, %v2689_v19 }
 0x873   :  { %v2691_v44 = vpop.permute.xlu1 %2690  ;;  %3289 = vmatpush1.bf16.msra.mxu0 %v9770_v48 }
 0x874   :  { %v2729_v41 = vmul.f32 %v10119_v40, %v2691_v44  ;;  %3290 = vmatprep.subr.bf16.mxu0 %v10691_v0 }
 0x876   :  { %v2740_v31 = vpack.c.bf16 %v2729_v41, %v2728_v21 }
 0x877   :  { %3291 = vmatpush1.bf16.msra.mxu0 %v9771_v38 }
 0x878   :  { %8526 = vmatprep.mubr.msk.bf16.mxu0 %vm74_vm0, %v2740_v31  ;;  %3292 = vmatprep.subr.bf16.mxu0 %v10691_v0  ;;  %v9774_v31 = vld [vmem:[#allocation4 + $0x130] sm:$0xff]  }
 0x879   :  { %v2693_v55 = vpop.permute.xlu0 %2692 }
 0x87a   :  { %v2730_v4 = vmul.f32 %v10121_v63, %v2693_v55 }
 0x87b   :  { %v2695_v1 = vpop.permute.xlu1 %2694  ;;  %3293 = vmatpush1.bf16.msra.mxu0 %v9772_v14 }
 0x87c   :  { %v2731_v39 = vmul.f32 %v10123_v43, %v2695_v1  ;;  %3294 = vmatprep.subr.bf16.mxu0 %v10691_v0 }
 0x87e   :  { %v2741_v46 = vpack.c.bf16 %v2731_v39, %v2730_v4 }
 0x87f   :  { %3295 = vmatpush1.bf16.msra.mxu0 %v9773_v23 }
 0x880   :  { %8527 = vmatmul.mubr.msk.bf16.gmra.mrb[60].mxu0 %vm74_vm0, %v2741_v46  ;;  %3296 = vmatprep.subr.bf16.mxu0 %v10691_v0 }
 0x881   :  { %v2697_v52 = vpop.permute.xlu0 %2696 }
 0x882   :  { %v2732_v62 = vmul.f32 %v10125_v60, %v2697_v52 }
 0x883   :  { %v2699_v3 = vpop.permute.xlu1 %2698  ;;  %3297 = vmatpush1.bf16.msra.mxu0 %v9774_v31 }
 0x884   :  { %v2733_v18 = vmul.f32 %v10127_v8, %v2699_v3  ;;  %3298 = vmatprep.subr.bf16.mxu0 %v10691_v0 }
 0x886   :  { %v2742_v59 = vpack.c.bf16 %v2733_v18, %v2732_v62 }
 0x888   :  { %8530 = vmatprep.mubr.msk.bf16.mxu0 %vm74_vm0, %v2742_v59 }
 0x889   :  { %v2701_v58 = vpop.permute.xlu0 %2700 }
 0x88a   :  { %v2734_v26 = vmul.f32 %v10129_v6, %v2701_v58 }
 0x88b   :  { %v2703_v10 = vpop.permute.xlu1 %2702 }
 0x88c   :  { %v2735_v29 = vmul.f32 %v10131_v36, %v2703_v10 }
 0x88d   :  { %v11910_v30 = vpop.permute.xlu0 %2762 }
 0x88e   :  { %v2743_v25 = vpack.c.bf16 %v2735_v29, %v2734_v26 }
 0x890   :  { %8531 = vmatmul.mubr.msk.bf16.gmra.mrb[64].mxu0 %vm74_vm0, %v2743_v25 }
 0x933   :  { %v8520_v32 = vpop.f32.mrb[52].mxu0 }
 0x934   :  { %v2832_v20 = vadd.f32 %v8520_v32, %v11910_v30  ;;  %v2823_v34 = vpop.f32.mrb[53].mxu0 }
 0x935   :  { %v2824_v45 = vadd.f32 %v2823_v34, %v11910_v30  ;;  %v8521_v42 = vpop.f32.mrb[54].mxu0 }
 0x936   :  { %v11915_v19 = vadd.f32 %v2832_v20, %v11522_v12  ;;  %v2835_v49 = vadd.f32 %v8521_v42, %v11910_v30  ;;  %v2826_v40 = vpop.f32.mrb[55].mxu0 }
 0x937   :  { %v11919_v44 = vadd.f32 %v2824_v45, %v11526_v24  ;;  %v2827_v21 = vadd.f32 %v2826_v40, %v11910_v30  ;;  %v9775_v24 = vld [vmem:[#allocation4 + $0x138] sm:$0xff]  }
 0x938   :  { %2904 = vst.msk [vmem:[#allocation2 + $0x20] sm:$0xff] %vm74_vm0, %v11915_v19  ;;  %v11925_v41 = vadd.f32 %v2835_v49, %v11532_v37  ;;  %3299 = vmatpush1.bf16.msra.mxu0 %v9775_v24 }
 0x939   :  { %2902 = vst.msk [vmem:[#allocation2 + $0x10] sm:$0xff] %vm74_vm0, %v11919_v44  ;;  %v11930_v12 = vadd.f32 %v2827_v21, %v11537_v7  ;;  %8574 = vmatprep.subr.bf16.mxu0 %v10692_v9 }
 0x93a   :  { %2905 = vst.msk [vmem:[#allocation2 + $0x28] sm:$0xff] %vm74_vm0, %v11925_v41 }
 0x93b   :  { %2903 = vst.msk [vmem:[#allocation2 + $0x18] sm:$0xff] %vm74_vm0, %v11930_v12 }
 0x93f   :  { %v11941_v63 = vld [vmem:[#allocation2 + $0x20] sm:$0xff] }
 0x940   :  { %v11937_v55 = vld [vmem:[#allocation2 + $0x10] sm:$0xff] }
 0x941   :  { %v9100_v37 = vpack.i.bf16 %v11937_v55, %v11691_v2  ;;  %v11943_v7 = vld [vmem:[#allocation2 + $0x28] sm:$0xff] }
 0x942   :  { %v3155_v43 = vpack.c.bf16 %v11943_v7, %v11941_v63  ;;  %v11948_v1 = vld [vmem:[#allocation2 + $0x18] sm:$0xff] }
 0x943   :  { %v8524_v4 = vpop.f32.mrb[56].mxu0  ;;  %9101 = vrot.lane.b32.xlu1 %v9100_v37, %s10693_s15  ;;  %v9105_v39 = vpack.i.bf16 %v11948_v1, %v11937_v55  ;;  %v9110_v8 = vpack.i.bf16 %v11941_v63, %v11948_v1 }
 0x944   :  { %v2848_v46 = vadd.f32 %v8524_v4, %v11910_v30  ;;  %v2839_v2 = vpop.f32.mrb[57].mxu0  ;;  %8100 = vmatprep.mubr.msk.bf16.mxu0 %vm74_vm0, %v3155_v43 }
 0x945   :  { %v2840_v52 = vadd.f32 %v2839_v2, %v11910_v30  ;;  %v8525_v60 = vpop.f32.mrb[58].mxu0  ;;  %9106 = vrot.lane.b32.xlu0 %v9105_v39, %s10688_s21 }
 0x946   :  { %v11960_v3 = vadd.f32 %v2848_v46, %v11559_v47  ;;  %v2851_v62 = vadd.f32 %v8525_v60, %v11910_v30  ;;  %v2842_v18 = vpop.f32.mrb[59].mxu0 }
 0x947   :  { %v11964_v59 = vadd.f32 %v2840_v52, %v11564_v28  ;;  %v2843_v58 = vadd.f32 %v2842_v18, %v11910_v30  ;;  %9111 = vrot.lane.b32.xlu1 %v9110_v8, %s10694_s16  ;;  %v9115_v28 = vpack.i.bf16 %v11943_v7, %v11941_v63 }
 0x948   :  { %2908 = vst.msk [vmem:[#allocation2 + $0x40] sm:$0xff] %vm74_vm0, %v11960_v3  ;;  %v11971_v6 = vadd.f32 %v2851_v62, %v11570_v16 }
 0x949   :  { %2906 = vst.msk [vmem:[#allocation2 + $0x30] sm:$0xff] %vm74_vm0, %v11964_v59  ;;  %v11976_v47 = vadd.f32 %v2843_v58, %v11577_v54  ;;  %9121 = vrot.lane.b32.xlu0 %v9110_v8, %s10693_s15 }
 0x94a   :  { %2909 = vst.msk [vmem:[#allocation2 + $0x48] sm:$0xff] %vm74_vm0, %v11971_v6 }
 0x94b   :  { %2907 = vst.msk [vmem:[#allocation2 + $0x38] sm:$0xff] %vm74_vm0, %v11976_v47  ;;  %9116 = vrot.lane.b32.xlu1 %v9115_v28, %s10688_s21 }
 0x94f   :  { %v11995_v25 = vld [vmem:[#allocation2 + $0x40] sm:$0xff] }
 0x950   :  { %v11986_v16 = vld [vmem:[#allocation2 + $0x30] sm:$0xff] }
 0x951   :  { %v9125_v36 = vpack.i.bf16 %v11986_v16, %v11943_v7  ;;  %v12006_v23 = vld [vmem:[#allocation2 + $0x48] sm:$0xff] }
 0x952   :  { %v11990_v54 = vld [vmem:[#allocation2 + $0x38] sm:$0xff] }
 0x953   :  { %v8528_v10 = vpop.f32.mrb[60].mxu0  ;;  %9126 = vrot.lane.b32.xlu0 %v9125_v36, %s10694_s16  ;;  %9131 = vrot.lane.b32.xlu1 %v9125_v36, %s10693_s15  ;;  %v9135_v57 = vpack.i.bf16 %v11990_v54, %v11986_v16  ;;  %v9140_v15 = vpack.i.bf16 %v11995_v25, %v11990_v54 }
 0x954   :  { %v2864_v26 = vadd.f32 %v8528_v10, %v11910_v30  ;;  %v2855_v29 = vpop.f32.mrb[61].mxu0 }
 0x955   :  { %v2856_v11 = vadd.f32 %v2855_v29, %v11910_v30  ;;  %v8529_v51 = vpop.f32.mrb[62].mxu0 }
 0x956   :  { %v12003_v48 = vadd.f32 %v2864_v26, %v11599_v13  ;;  %v2867_v38 = vadd.f32 %v8529_v51, %v11910_v30  ;;  %v2858_v14 = vpop.f32.mrb[63].mxu0  ;;  %v2918_v26 = vld [vmem:[#allocation2] sm:$0xff] }
 0x957   :  { %v12009_v32 = vadd.f32 %v2856_v11, %v11603_v35  ;;  %v2859_v20 = vadd.f32 %v2858_v14, %v11910_v30  ;;  %9136 = vrot.lane.b32.xlu0 %v9135_v57, %s10688_s21  ;;  %9141 = vrot.lane.b32.xlu1 %v9140_v15, %s10694_s16  ;;  %v9145_v35 = vpack.i.bf16 %v12006_v23, %v11995_v25  ;;  %v10612_v57 = vld [vmem:[#allocation2 + $0x8] sm:$0xff] }
 0x958   :  { %2912 = vst.msk [vmem:[#allocation2 + $0x80] sm:$0xff] %vm74_vm0, %v12003_v48  ;;  %v12017_v13 = vadd.f32 %v2867_v38, %v11610_v61  ;;  %v9155_v61 = vpack.i.bf16 %v11723_v17, %v12006_v23 }
 0x959   :  { %2910 = vst.msk [vmem:[#allocation2 + $0x70] sm:$0xff] %vm74_vm0, %v12009_v32  ;;  %v12022_v34 = vadd.f32 %v2859_v20, %v11617_v5 }
 0x95a   :  { %2913 = vst.msk [vmem:[#allocation2 + $0x88] sm:$0xff] %vm74_vm0, %v12017_v13 }
 0x95b   :  { %2911 = vst.msk [vmem:[#allocation2 + $0x78] sm:$0xff] %vm74_vm0, %v12022_v34  ;;  %9151 = vrot.lane.b32.xlu0 %v9140_v15, %s10693_s15  ;;  %9146 = vrot.lane.b32.xlu1 %v9145_v35, %s10688_s21 }
 0x95f   :  { %9156 = vrot.lane.b32.xlu0 %v9155_v61, %s10694_s16  ;;  %v12045_v24 = vld [vmem:[#allocation2 + $0x80] sm:$0xff] }
 0x960   :  { %v12035_v5 = vld [vmem:[#allocation2 + $0x70] sm:$0xff] }
 0x961   :  { %v9160_v45 = vpack.i.bf16 %v12035_v5, %v11736_v50  ;;  %v12055_v46 = vld [vmem:[#allocation2 + $0x88] sm:$0xff] }
 0x962   :  { %v12039_v42 = vld [vmem:[#allocation2 + $0x78] sm:$0xff] }
 0x963   :  { %v8532_v49 = vpop.f32.mrb[64].mxu0  ;;  %9161 = vrot.lane.b32.xlu1 %v9160_v45, %s10693_s15  ;;  %v9165_v40 = vpack.i.bf16 %v12039_v42, %v12035_v5  ;;  %v9170_v50 = vpack.i.bf16 %v12045_v24, %v12039_v42 }
 0x964   :  { %v2880_v21 = vadd.f32 %v8532_v49, %v11910_v30  ;;  %v2871_v31 = vpop.f32.mrb[65].mxu0 }
 0x965   :  { %v2872_v17 = vadd.f32 %v2871_v31, %v11910_v30  ;;  %v8533_v37 = vpop.f32.mrb[66].mxu0  ;;  %9166 = vrot.lane.b32.xlu0 %v9165_v40, %s10688_s21 }
 0x966   :  { %v12052_v43 = vadd.f32 %v2880_v21, %v11642_v56  ;;  %v2883_v4 = vadd.f32 %v8533_v37, %v11910_v30  ;;  %v2874_v39 = vpop.f32.mrb[67].mxu0  ;;  %v3157_v37 = vpack.c.bf16 %v11990_v54, %v11986_v16 }
 0x967   :  { %v12058_v2 = vadd.f32 %v2872_v17, %v11646_v22  ;;  %v2875_v52 = vadd.f32 %v2874_v39, %v11910_v30  ;;  %9171 = vrot.lane.b32.xlu1 %v9170_v50, %s10694_s16  ;;  %v9175_v22 = vpack.i.bf16 %v12055_v46, %v12045_v24 }
 0x968   :  { %2916 = vst.msk [vmem:[#allocation2 + $0xa0] sm:$0xff] %vm74_vm0, %v12052_v43  ;;  %v12065_v60 = vadd.f32 %v2883_v4, %v11652_v33 }
 0x969   :  { %2914 = vst.msk [vmem:[#allocation2 + $0x90] sm:$0xff] %vm74_vm0, %v12058_v2  ;;  %v12070_v56 = vadd.f32 %v2875_v52, %v11659_v27  ;;  %9181 = vrot.lane.b32.xlu0 %v9170_v50, %s10693_s15 }
 0x96a   :  { %2917 = vst.msk [vmem:[#allocation2 + $0xa8] sm:$0xff] %vm74_vm0, %v12065_v60 }
 0x96b   :  { %2915 = vst.msk [vmem:[#allocation2 + $0x98] sm:$0xff] %vm74_vm0, %v12070_v56  ;;  %9176 = vrot.lane.b32.xlu1 %v9175_v22, %s10688_s21 }
 0x96f   :  { %v12088_v8 = vld [vmem:[#allocation2 + $0xa0] sm:$0xff] }
 0x970   :  { %v12080_v33 = vld [vmem:[#allocation2 + $0x90] sm:$0xff] }
 0x971   :  { %v9185_v30 = vpack.i.bf16 %v12080_v33, %v12055_v46  ;;  %v12094_v58 = vld [vmem:[#allocation2 + $0xa8] sm:$0xff] }
 0x972   :  { %v12084_v27 = vld [vmem:[#allocation2 + $0x98] sm:$0xff]  ;;  %v9205_v28 = vpack.i.bf16 %v12094_v58, %v12088_v8  ;;  %v9215_v36 = vpack.i.bf16 %v11771_v53, %v12094_v58 }
 0x973   :  { %9186 = vrot.lane.b32.xlu0 %v9185_v30, %s10694_s16  ;;  %9191 = vrot.lane.b32.xlu1 %v9185_v30, %s10693_s15  ;;  %v9195_v62 = vpack.i.bf16 %v12084_v27, %v12080_v33  ;;  %v9200_v18 = vpack.i.bf16 %v12088_v8, %v12084_v27 }
 0x977   :  { %9196 = vrot.lane.b32.xlu0 %v9195_v62, %s10688_s21  ;;  %9201 = vrot.lane.b32.xlu1 %v9200_v18, %s10694_s16 }
 0x97b   :  { %9211 = vrot.lane.b32.xlu0 %v9200_v18, %s10693_s15  ;;  %9206 = vrot.lane.b32.xlu1 %v9205_v28, %s10688_s21 }
 0x97f   :  { %9216 = vrot.lane.b32.xlu0 %v9215_v36, %s10694_s16 }
 0x9b5   :  { %v9102_v10 = vpop.permute.xlu1 %9101 }
 0x9b6   :  { %v9104_v29 = vunpack.i.h.bf16 %v9102_v10  ;;  %v9103_v11 = vunpack.i.l.bf16 %v9102_v10 }
 0x9b7   :  { %v9107_v51 = vpop.permute.xlu0 %9106 }
 0x9b8   :  { %v3107_v15 = vsel %vm74_vm0, %v10612_v57, %v9104_v29  ;;  %v3106_v38 = vsel %vm74_vm0, %v2918_v26, %v9103_v11  ;;  %v9109_v14 = vunpack.i.h.bf16 %v9107_v51  ;;  %v9108_v20 = vunpack.i.l.bf16 %v9107_v51 }
 0x9b9   :  { %v9112_v35 = vpop.permute.xlu1 %9111 }
 0x9ba   :  { %v3122_v61 = vsel %vm525_vm1, %v3106_v38, %v9108_v20  ;;  %v3123_v45 = vsel %vm525_vm1, %v3107_v15, %v9109_v14  ;;  %v9114_v53 = vunpack.i.h.bf16 %v9112_v35  ;;  %v9113_v49 = vunpack.i.l.bf16 %v9112_v35 }
 0x9bb   :  { %v9122_v17 = vpop.permute.xlu0 %9121 }
 0x9bc   :  { %v3138_v40 = vsel %vm542_vm2, %v3122_v61, %v9113_v49  ;;  %v3139_v21 = vsel %vm542_vm2, %v3123_v45, %v9114_v53  ;;  %v9124_v50 = vunpack.i.h.bf16 %v9122_v17  ;;  %v9123_v4 = vunpack.i.l.bf16 %v9122_v17  ;;  %v2940_v17 = vld [vmem:[#allocation2 + $0x58] sm:$0xff] }
 0x9bd   :  { %v3154_v31 = vpack.c.bf16 %v3139_v21, %v3138_v40  ;;  %v9117_v39 = vpop.permute.xlu1 %9116 }
 0x9be   :  { %v9119_v52 = vunpack.i.h.bf16 %v9117_v39  ;;  %v9118_v22 = vunpack.i.l.bf16 %v9117_v39  ;;  %v3109_v30 = vsel %vm74_vm0, %v11948_v1, %v9124_v50  ;;  %v3108_v62 = vsel %vm74_vm0, %v11937_v55, %v9123_v4 }
 0x9bf   :  { %3313 = vmatmul.mubr.bf16.vlgmr.msra.gmra.mrb[68].mxu0 %v3154_v31  ;;  %v3159_v55 = vpack.c.bf16 %v12006_v23, %v11995_v25 }
 0x9c0   :  { %8101 = vmatprep.mubr.msk.bf16.mxu0 %vm74_vm0, %v3157_v37  ;;  %v3124_v11 = vsel %vm525_vm1, %v3108_v62, %v9118_v22  ;;  %v3125_v51 = vsel %vm525_vm1, %v3109_v30, %v9119_v52 }
 0x9c5   :  { %v9127_v18 = vpop.permute.xlu0 %9126  ;;  %v9132_v28 = vpop.permute.xlu1 %9131 }
 0x9c6   :  { %v9129_v36 = vunpack.i.h.bf16 %v9127_v18  ;;  %v9128_v10 = vunpack.i.l.bf16 %v9127_v18  ;;  %v9134_v26 = vunpack.i.h.bf16 %v9132_v28  ;;  %v9133_v29 = vunpack.i.l.bf16 %v9132_v28 }
 0x9c8   :  { %v3140_v57 = vsel %vm542_vm2, %v3124_v11, %v9128_v10  ;;  %v3141_v15 = vsel %vm542_vm2, %v3125_v51, %v9129_v36  ;;  %v3111_v53 = vsel %vm74_vm0, %v11943_v7, %v9134_v26  ;;  %v3110_v49 = vsel %vm74_vm0, %v11941_v63, %v9133_v29  ;;  %v10613_v7 = vld [vmem:[#allocation2 + $0x50] sm:$0xff]  ;;  %v2926_v10 = vld [vmem:[#allocation2 + $0x60] sm:$0xff] }
 0x9c9   :  { %v9137_v38 = vpop.permute.xlu0 %9136  ;;  %v9142_v14 = vpop.permute.xlu1 %9141  ;;  %v3156_v1 = vpack.c.bf16 %v3141_v15, %v3140_v57  ;;  %v3161_v39 = vpack.c.bf16 %v2940_v17, %v10613_v7  ;;  %v3165_v7 = vpack.c.bf16 %v12084_v27, %v12080_v33 }
 0x9ca   :  { %v9139_v20 = vunpack.i.h.bf16 %v9137_v38  ;;  %v9138_v35 = vunpack.i.l.bf16 %v9137_v38  ;;  %v9144_v61 = vunpack.i.h.bf16 %v9142_v14  ;;  %v9143_v45 = vunpack.i.l.bf16 %v9142_v14  ;;  %v10614_v14 = vld [vmem:[#allocation2 + $0x68] sm:$0xff] }
 0x9cb   :  { %3321 = vmatmul.mubr.bf16.gmra.mrb[72].mxu0 %v3156_v1 }
 0x9cc   :  { %8102 = vmatprep.mubr.msk.bf16.mxu0 %vm74_vm0, %v3159_v55  ;;  %v3126_v40 = vsel %vm525_vm1, %v3110_v49, %v9138_v35  ;;  %v3127_v21 = vsel %vm525_vm1, %v3111_v53, %v9139_v20  ;;  %v3163_v49 = vpack.c.bf16 %v12055_v46, %v12045_v24 }
 0x9cd   :  { %v9152_v31 = vpop.permute.xlu0 %9151  ;;  %v9147_v37 = vpop.permute.xlu1 %9146  ;;  %v3142_v50 = vsel %vm542_vm2, %v3126_v40, %v9143_v45  ;;  %v3143_v4 = vsel %vm542_vm2, %v3127_v21, %v9144_v61 }
 0x9ce   :  { %v9154_v25 = vunpack.i.h.bf16 %v9152_v31  ;;  %v9153_v23 = vunpack.i.l.bf16 %v9152_v31  ;;  %v9149_v52 = vunpack.i.h.bf16 %v9147_v37  ;;  %v9148_v63 = vunpack.i.l.bf16 %v9147_v37 }
 0x9cf   :  { %v3158_v30 = vpack.c.bf16 %v3143_v4, %v3142_v50 }
 0x9d0   :  { %v3113_v62 = vsel %vm74_vm0, %v11990_v54, %v9154_v25  ;;  %v3112_v18 = vsel %vm74_vm0, %v11986_v16, %v9153_v23 }
 0x9d1   :  { %v9157_v22 = vpop.permute.xlu0 %9156  ;;  %v3128_v29 = vsel %vm525_vm1, %v3112_v18, %v9148_v63  ;;  %v3129_v11 = vsel %vm525_vm1, %v3113_v62, %v9149_v52 }
 0x9d2   :  { %v9159_v28 = vunpack.i.h.bf16 %v9157_v22  ;;  %v9158_v36 = vunpack.i.l.bf16 %v9157_v22 }
 0x9d3   :  { %3329 = vmatmul.mubr.bf16.gmra.mrb[76].mxu0 %v3158_v30 }
 0x9d4   :  { %8103 = vmatprep.mubr.msk.bf16.mxu0 %vm74_vm0, %v3161_v39  ;;  %v3144_v15 = vsel %vm542_vm2, %v3128_v29, %v9158_v36  ;;  %v3145_v54 = vsel %vm542_vm2, %v3129_v11, %v9159_v28 }
 0x9d5   :  { %v9162_v26 = vpop.permute.xlu1 %9161  ;;  %v3160_v61 = vpack.c.bf16 %v3145_v54, %v3144_v15 }
 0x9d6   :  { %v9164_v51 = vunpack.i.h.bf16 %v9162_v26  ;;  %v9163_v57 = vunpack.i.l.bf16 %v9162_v26 }
 0x9d7   :  { %v9167_v38 = vpop.permute.xlu0 %9166 }
 0x9d8   :  { %v3115_v16 = vsel %vm74_vm0, %v10614_v14, %v9164_v51  ;;  %v3114_v1 = vsel %vm74_vm0, %v2926_v10, %v9163_v57  ;;  %v9169_v55 = vunpack.i.h.bf16 %v9167_v38  ;;  %v9168_v20 = vunpack.i.l.bf16 %v9167_v38 }
 0x9d9   :  { %v9172_v35 = vpop.permute.xlu1 %9171 }
 0x9da   :  { %v9174_v45 = vunpack.i.h.bf16 %v9172_v35  ;;  %v9173_v53 = vunpack.i.l.bf16 %v9172_v35  ;;  %v3130_v40 = vsel %vm525_vm1, %v3114_v1, %v9168_v20  ;;  %v3131_v21 = vsel %vm525_vm1, %v3115_v16, %v9169_v55 }
 0x9db   :  { %3337 = vmatmul.mubr.bf16.gmra.mrb[80].mxu0 %v3160_v61  ;;  %v9182_v31 = vpop.permute.xlu0 %9181 }
 0x9dc   :  { %8104 = vmatprep.mubr.msk.bf16.mxu0 %vm74_vm0, %v3163_v49  ;;  %v3146_v17 = vsel %vm542_vm2, %v3130_v40, %v9173_v53  ;;  %v3147_v25 = vsel %vm542_vm2, %v3131_v21, %v9174_v45  ;;  %v9184_v23 = vunpack.i.h.bf16 %v9182_v31  ;;  %v9183_v37 = vunpack.i.l.bf16 %v9182_v31  ;;  %v2941_v45 = vld [vmem:[#allocation2 + $0xb8] sm:$0xff] }
 0x9dd   :  { %v9177_v50 = vpop.permute.xlu1 %9176  ;;  %v3162_v4 = vpack.c.bf16 %v3147_v25, %v3146_v17 }
 0x9de   :  { %v9179_v39 = vunpack.i.h.bf16 %v9177_v50  ;;  %v9178_v52 = vunpack.i.l.bf16 %v9177_v50  ;;  %v3117_v63 = vsel %vm74_vm0, %v12039_v42, %v9184_v23  ;;  %v3116_v22 = vsel %vm74_vm0, %v12035_v5, %v9183_v37 }
 0x9df   :  { %v3167_v5 = vpack.c.bf16 %v12094_v58, %v12088_v8 }
 0x9e0   :  { %v3132_v26 = vsel %vm525_vm1, %v3116_v22, %v9178_v52  ;;  %v3133_v29 = vsel %vm525_vm1, %v3117_v63, %v9179_v39 }
 0x9e3   :  { %3345 = vmatmul.mubr.bf16.gmra.mrb[84].mxu0 %v3162_v4 }
 0x9e4   :  { %8105 = vmatprep.mubr.msk.bf16.mxu0 %vm74_vm0, %v3165_v7 }
 0x9e5   :  { %v9187_v30 = vpop.permute.xlu0 %9186  ;;  %v9192_v62 = vpop.permute.xlu1 %9191 }
 0x9e6   :  { %v9189_v18 = vunpack.i.h.bf16 %v9187_v30  ;;  %v9188_v28 = vunpack.i.l.bf16 %v9187_v30  ;;  %v9194_v36 = vunpack.i.h.bf16 %v9192_v62  ;;  %v9193_v10 = vunpack.i.l.bf16 %v9192_v62 }
 0x9e8   :  { %v3148_v11 = vsel %vm542_vm2, %v3132_v26, %v9188_v28  ;;  %v3149_v51 = vsel %vm542_vm2, %v3133_v29, %v9189_v18  ;;  %v3119_v1 = vsel %vm74_vm0, %v12055_v46, %v9194_v36  ;;  %v3118_v55 = vsel %vm74_vm0, %v12045_v24, %v9193_v10  ;;  %v10615_v46 = vld [vmem:[#allocation2 + $0xb0] sm:$0xff] }
 0x9e9   :  { %v9197_v42 = vpop.permute.xlu0 %9196  ;;  %v9202_v57 = vpop.permute.xlu1 %9201  ;;  %v3164_v15 = vpack.c.bf16 %v3149_v51, %v3148_v11  ;;  %v3169_v21 = vpack.c.bf16 %v2941_v45, %v10615_v46 }
 0x9ea   :  { %v9199_v54 = vunpack.i.h.bf16 %v9197_v42  ;;  %v9198_v38 = vunpack.i.l.bf16 %v9197_v42  ;;  %v9204_v14 = vunpack.i.h.bf16 %v9202_v57  ;;  %v9203_v16 = vunpack.i.l.bf16 %v9202_v57 }
 0x9eb   :  { %3353 = vmatmul.mubr.bf16.gmra.mrb[88].mxu0 %v3164_v15 }
 0x9ec   :  { %8106 = vmatprep.mubr.msk.bf16.mxu0 %vm74_vm0, %v3167_v5  ;;  %v3134_v20 = vsel %vm525_vm1, %v3118_v55, %v9198_v38  ;;  %v3135_v35 = vsel %vm525_vm1, %v3119_v1, %v9199_v54 }
 0x9ed   :  { %v9212_v61 = vpop.permute.xlu0 %9211  ;;  %v9207_v53 = vpop.permute.xlu1 %9206  ;;  %v3150_v49 = vsel %vm542_vm2, %v3134_v20, %v9203_v16  ;;  %v3151_v40 = vsel %vm542_vm2, %v3135_v35, %v9204_v14 }
 0x9ee   :  { %v9214_v8 = vunpack.i.h.bf16 %v9212_v61  ;;  %v9213_v58 = vunpack.i.l.bf16 %v9212_v61  ;;  %v9209_v31 = vunpack.i.h.bf16 %v9207_v53  ;;  %v9208_v24 = vunpack.i.l.bf16 %v9207_v53 }
 0x9ef   :  { %v3166_v25 = vpack.c.bf16 %v3151_v40, %v3150_v49 }
 0x9f0   :  { %v3121_v23 = vsel %vm74_vm0, %v12084_v27, %v9214_v8  ;;  %v3120_v37 = vsel %vm74_vm0, %v12080_v33, %v9213_v58  ;;  %v9776_v27 = vld [vmem:[%s13883_s2 + $0x30] sm:$0xff]   ;;  %v12188_v33 = vld [vmem:[%s13884_s3 + $0x3] ss:$0 sm:$0xff]  ;;  %v9777_v8 = vld [vmem:[%s13883_s2 + $0x38] sm:$0xff]  }
 0x9f1   :  { %v9217_v17 = vpop.permute.xlu0 %9216  ;;  %v3136_v7 = vsel %vm525_vm1, %v3120_v37, %v9208_v24  ;;  %v3137_v39 = vsel %vm525_vm1, %v3121_v23, %v9209_v31  ;;  %8534 = vmatprep.subr.bf16.mxu1 %v9776_v27 }
 0x9f2   :  { %v9219_v50 = vunpack.i.h.bf16 %v9217_v17  ;;  %v9218_v4 = vunpack.i.l.bf16 %v9217_v17  ;;  %8535 = vmatpush3.bf16.msra.mxu1 %v9776_v27 }
 0x9f3   :  { %3361 = vmatmul.mubr.bf16.gmra.mrb[92].mxu0 %v3166_v25  ;;  %8536 = vmatprep.subr.bf16.mxu1 %v9777_v8 }
 0x9f4   :  { %8107 = vmatprep.mubr.msk.bf16.mxu0 %vm74_vm0, %v3169_v21  ;;  %v3152_v52 = vsel %vm542_vm2, %v3136_v7, %v9218_v4  ;;  %v3153_v63 = vsel %vm542_vm2, %v3137_v39, %v9219_v50 }
 0x9f5   :  { %v3168_v22 = vpack.c.bf16 %v3153_v63, %v3152_v52 }
 0x9f6   :  { %8537 = vmatpush3.bf16.msra.mxu1 %v9777_v8 }
 0x9fb   :  { %3369 = vmatmul.mubr.bf16.gmra.mrb[96].mxu0 %v3168_v22 }
 0x9fc   :  { %8590 = vmatprep.mubr.msk.bf16.mxu0 %vm10695_vm3, %v10692_v9 }
 0xa92   :  { %v3314_v30 = vpop.f32.mrb[68].mxu0 }
 0xa93   :  { %v12191_v62 = vadd.f32 %v12188_v33, %v3314_v30  ;;  %v3316_v18 = vpop.f32.mrb[69].mxu0 }
 0xa94   :  { %v3317_v28 = vpop.f32.mrb[70].mxu0 }
 0xa95   :  { %v8108_v36 = vmul.f32 -1.442695, %v12191_v62  ;;  %v12195_v10 = vadd.f32 %v12188_v33, %v3317_v28  ;;  %v3319_v26 = vpop.f32.mrb[71].mxu0 }
 0xa97   :  { %10132 = vpow2.f32 %v8108_v36  ;;  %v8109_v29 = vmul.f32 -1.442695, %v12195_v10 }
 0xa99   :  { %10134 = vpow2.f32 %v8109_v29 }
 0xa9e   :  { %v3322_v11 = vpop.f32.mrb[72].mxu0 }
 0xa9f   :  { %v12199_v51 = vadd.f32 %v12188_v33, %v3322_v11  ;;  %v3324_v42 = vpop.f32.mrb[73].mxu0 }
 0xaa0   :  { %v3325_v57 = vpop.f32.mrb[74].mxu0 }
 0xaa1   :  { %v10133_v15 = vpop.eup %10132  ;;  %v8110_v5 = vmul.f32 -1.442695, %v12199_v51  ;;  %v12203_v54 = vadd.f32 %v12188_v33, %v3325_v57  ;;  %v3327_v38 = vpop.f32.mrb[75].mxu0 }
 0xaa2   :  { %v3441_v14 = vadd.f32 1.0, %v10133_v15 }
 0xaa3   :  { %v10135_v16 = vpop.eup %10134  ;;  %10136 = vpow2.f32 %v8110_v5  ;;  %v8111_v1 = vmul.f32 -1.442695, %v12203_v54 }
 0xaa4   :  { %10138 = vrcp.f32 %v3441_v14  ;;  %v3442_v55 = vadd.f32 1.0, %v10135_v16 }
 0xaa6   :  { %10140 = vrcp.f32 %v3442_v55  ;;  %v3330_v20 = vpop.f32.mrb[76].mxu0 }
 0xaa7   :  { %10142 = vpow2.f32 %v8111_v1  ;;  %v12207_v35 = vadd.f32 %v12188_v33, %v3330_v20  ;;  %v3332_v61 = vpop.f32.mrb[77].mxu0 }
 0xaa8   :  { %v3333_v45 = vpop.f32.mrb[78].mxu0 }
 0xaa9   :  { %v8112_v58 = vmul.f32 -1.442695, %v12207_v35  ;;  %v12214_v53 = vadd.f32 %v12188_v33, %v3333_v45  ;;  %v3335_v49 = vpop.f32.mrb[79].mxu0 }
 0xaab   :  { %10144 = vpow2.f32 %v8112_v58  ;;  %v8113_v40 = vmul.f32 -1.442695, %v12214_v53 }
 0xaad   :  { %v10137_v46 = vpop.eup %10136  ;;  %10146 = vpow2.f32 %v8113_v40 }
 0xaae   :  { %v10139_v21 = vpop.eup %10138  ;;  %v3443_v31 = vadd.f32 1.0, %v10137_v46  ;;  %v3338_v24 = vpop.f32.mrb[80].mxu0 }
 0xaaf   :  { %v12218_v17 = vadd.f32 %v12188_v33, %v3338_v24  ;;  %v3340_v25 = vpop.f32.mrb[81].mxu0  ;;  %3505 = vrot.lane.b32.xlu1 %v10139_v21, %s10694_s16 }
 0xab0   :  { %v10141_v23 = vpop.eup %10140  ;;  %10148 = vrcp.f32 %v3443_v31  ;;  %v3341_v37 = vpop.f32.mrb[82].mxu0 }
 0xab1   :  { %v10143_v50 = vpop.eup %10142  ;;  %v8114_v4 = vmul.f32 -1.442695, %v12218_v17  ;;  %v12223_v7 = vadd.f32 %v12188_v33, %v3341_v37  ;;  %v3343_v39 = vpop.f32.mrb[83].mxu0  ;;  %3507 = vrot.lane.b32.xlu0 %v10141_v23, %s10694_s16 }
 0xab2   :  { %v3444_v52 = vadd.f32 1.0, %v10143_v50 }
 0xab3   :  { %10150 = vpow2.f32 %v8114_v4  ;;  %v8115_v63 = vmul.f32 -1.442695, %v12223_v7 }
 0xab4   :  { %10152 = vrcp.f32 %v3444_v52 }
 0xab5   :  { %v10145_v22 = vpop.eup %10144  ;;  %10154 = vpow2.f32 %v8115_v63 }
 0xab6   :  { %v3445_v27 = vadd.f32 1.0, %v10145_v22  ;;  %v3346_v30 = vpop.f32.mrb[84].mxu0 }
 0xab7   :  { %v10147_v18 = vpop.eup %10146  ;;  %v12228_v28 = vadd.f32 %v12188_v33, %v3346_v30  ;;  %v3348_v36 = vpop.f32.mrb[85].mxu0 }
 0xab8   :  { %10156 = vrcp.f32 %v3445_v27  ;;  %v3446_v26 = vadd.f32 1.0, %v10147_v18  ;;  %v3349_v29 = vpop.f32.mrb[86].mxu0 }
 0xab9   :  { %v8116_v11 = vmul.f32 -1.442695, %v12228_v28  ;;  %v12232_v42 = vadd.f32 %v12188_v33, %v3349_v29  ;;  %v3351_v57 = vpop.f32.mrb[87].mxu0 }
 0xaba   :  { %v10149_v15 = vpop.eup %10148  ;;  %10158 = vrcp.f32 %v3446_v26 }
 0xabb   :  { %10160 = vpow2.f32 %v8116_v11  ;;  %v8117_v5 = vmul.f32 -1.442695, %v12232_v42  ;;  %3509 = vrot.lane.b32.xlu1 %v10149_v15, %s10694_s16 }
 0xabd   :  { %v10151_v38 = vpop.eup %10150  ;;  %10162 = vpow2.f32 %v8117_v5 }
 0xabe   :  { %v10153_v14 = vpop.eup %10152  ;;  %v3447_v16 = vadd.f32 1.0, %v10151_v38  ;;  %v3354_v1 = vpop.f32.mrb[88].mxu0 }
 0xabf   :  { %3511 = vrot.lane.b32.xlu0 %v10153_v14, %s10694_s16  ;;  %v12238_v55 = vadd.f32 %v12188_v33, %v3354_v1  ;;  %v3356_v20 = vpop.f32.mrb[89].mxu0  ;;  %v10155_v61 = vpop.eup %10154 }
 0xac0   :  { %10164 = vrcp.f32 %v3447_v16  ;;  %v3357_v45 = vpop.f32.mrb[90].mxu0  ;;  %v3448_v8 = vadd.f32 1.0, %v10155_v61 }
 0xac1   :  { %v8118_v58 = vmul.f32 -1.442695, %v12238_v55  ;;  %v12242_v49 = vadd.f32 %v12188_v33, %v3357_v45  ;;  %v3359_v40 = vpop.f32.mrb[91].mxu0 }
 0xac2   :  { %v10157_v46 = vpop.eup %10156  ;;  %10166 = vrcp.f32 %v3448_v8 }
 0xac3   :  { %v8119_v21 = vmul.f32 -1.442695, %v12242_v49  ;;  %3513 = vrot.lane.b32.xlu1 %v10157_v46, %s10694_s16  ;;  %10168 = vpow2.f32 %v8118_v58 }
 0xac4   :  { %v10159_v31 = vpop.eup %10158 }
 0xac5   :  { %v10161_v24 = vpop.eup %10160  ;;  %3515 = vrot.lane.b32.xlu0 %v10159_v31, %s10694_s16  ;;  %10170 = vpow2.f32 %v8119_v21 }
 0xac6   :  { %v3449_v25 = vadd.f32 1.0, %v10161_v24  ;;  %v3362_v23 = vpop.f32.mrb[92].mxu0 }
 0xac7   :  { %v10163_v37 = vpop.eup %10162  ;;  %v12248_v50 = vadd.f32 %v12188_v33, %v3362_v23  ;;  %v3364_v4 = vpop.f32.mrb[93].mxu0 }
 0xac8   :  { %10172 = vrcp.f32 %v3449_v25  ;;  %v3450_v39 = vadd.f32 1.0, %v10163_v37  ;;  %v3365_v52 = vpop.f32.mrb[94].mxu0 }
 0xac9   :  { %v8120_v63 = vmul.f32 -1.442695, %v12248_v50  ;;  %v12252_v22 = vadd.f32 %v12188_v33, %v3365_v52  ;;  %v3367_v27 = vpop.f32.mrb[95].mxu0 }
 0xaca   :  { %v10165_v30 = vpop.eup %10164  ;;  %10174 = vrcp.f32 %v3450_v39 }
 0xacb   :  { %10176 = vpow2.f32 %v8120_v63  ;;  %v8121_v18 = vmul.f32 -1.442695, %v12252_v22  ;;  %3517 = vrot.lane.b32.xlu1 %v10165_v30, %s10694_s16 }
 0xacc   :  { %v10167_v36 = vpop.eup %10166 }
 0xacd   :  { %10178 = vpow2.f32 %v8121_v18  ;;  %v10169_v26 = vpop.eup %10168  ;;  %3519 = vrot.lane.b32.xlu0 %v10167_v36, %s10694_s16 }
 0xace   :  { %v3370_v29 = vpop.f32.mrb[96].mxu0  ;;  %v3451_v11 = vadd.f32 1.0, %v10169_v26 }
 0xacf   :  { %v12258_v57 = vadd.f32 %v12188_v33, %v3370_v29  ;;  %v3372_v15 = vpop.f32.mrb[97].mxu0  ;;  %v10171_v5 = vpop.eup %10170 }
 0xad0   :  { %v3373_v38 = vpop.f32.mrb[98].mxu0  ;;  %10180 = vrcp.f32 %v3451_v11  ;;  %v3452_v14 = vadd.f32 1.0, %v10171_v5 }
 0xad1   :  { %v8122_v16 = vmul.f32 -1.442695, %v12258_v57  ;;  %v12262_v1 = vadd.f32 %v12188_v33, %v3373_v38  ;;  %v3375_v20 = vpop.f32.mrb[99].mxu0 }
 0xad2   :  { %v10173_v61 = vpop.eup %10172  ;;  %10182 = vrcp.f32 %v3452_v14 }
 0xad3   :  { %v8123_v45 = vmul.f32 -1.442695, %v12262_v1  ;;  %3521 = vrot.lane.b32.xlu1 %v10173_v61, %s10694_s16  ;;  %10184 = vpow2.f32 %v8122_v16 }
 0xad4   :  { %v10175_v8 = vpop.eup %10174 }
 0xad5   :  { %v10177_v58 = vpop.eup %10176  ;;  %3523 = vrot.lane.b32.xlu0 %v10175_v8, %s10694_s16  ;;  %10186 = vpow2.f32 %v8123_v45 }
 0xad6   :  { %v3453_v40 = vadd.f32 1.0, %v10177_v58 }
 0xad7   :  { %v10179_v46 = vpop.eup %10178 }
 0xad8   :  { %10188 = vrcp.f32 %v3453_v40  ;;  %v3454_v21 = vadd.f32 1.0, %v10179_v46 }
 0xada   :  { %10190 = vrcp.f32 %v3454_v21  ;;  %v10181_v31 = vpop.eup %10180 }
 0xadb   :  { %3525 = vrot.lane.b32.xlu1 %v10181_v31, %s10694_s16 }
 0xadc   :  { %v10183_v24 = vpop.eup %10182 }
 0xadd   :  { %v10185_v25 = vpop.eup %10184  ;;  %3527 = vrot.lane.b32.xlu0 %v10183_v24, %s10694_s16 }
 0xade   :  { %v3455_v23 = vadd.f32 1.0, %v10185_v25 }
 0xadf   :  { %v10187_v37 = vpop.eup %10186 }
 0xae0   :  { %10192 = vrcp.f32 %v3455_v23  ;;  %v3456_v4 = vadd.f32 1.0, %v10187_v37 }
 0xae2   :  { %v10189_v39 = vpop.eup %10188  ;;  %10194 = vrcp.f32 %v3456_v4 }
 0xae3   :  { %3529 = vrot.lane.b32.xlu1 %v10189_v39, %s10694_s16  ;;  %10196 = vtanh.f32 %v12191_v62 }
 0xae4   :  { %v10191_v52 = vpop.eup %10190  ;;  %10198 = vtanh.f32 %v12195_v10 }
 0xae5   :  { %3531 = vrot.lane.b32.xlu0 %v10191_v52, %s10694_s16  ;;  %10200 = vtanh.f32 %v12199_v51 }
 0xae6   :  { %10202 = vtanh.f32 %v12203_v54 }
 0xae7   :  { %10204 = vtanh.f32 %v12207_v35 }
 0xae8   :  { %10206 = vtanh.f32 %v12214_v53 }
 0xae9   :  { %10208 = vtanh.f32 %v12218_v17 }
 0xaea   :  { %v10193_v63 = vpop.eup %10192  ;;  %10210 = vtanh.f32 %v12223_v7 }
 0xaeb   :  { %3533 = vrot.lane.b32.xlu1 %v10193_v63, %s10694_s16  ;;  %10212 = vtanh.f32 %v12228_v28 }
 0xaec   :  { %v10195_v27 = vpop.eup %10194  ;;  %10214 = vtanh.f32 %v12232_v42 }
 0xaed   :  { %3535 = vrot.lane.b32.xlu0 %v10195_v27, %s10694_s16  ;;  %v10197_v18 = vpop.eup %10196  ;;  %10216 = vtanh.f32 %v12238_v55 }
 0xaee   :  { %v10199_v36 = vpop.eup %10198  ;;  %10218 = vtanh.f32 %v12242_v49 }
 0xaef   :  { %3595 = vrot.lane.b32.xlu1 %v12188_v33, %s10688_s21  ;;  %v10201_v62 = vpop.eup %10200  ;;  %10220 = vtanh.f32 %v12248_v50 }
 0xaf0   :  { %v10203_v10 = vpop.eup %10202  ;;  %10222 = vtanh.f32 %v12252_v22 }
 0xaf1   :  { %v10205_v51 = vpop.eup %10204  ;;  %10224 = vtanh.f32 %v12258_v57 }
 0xaf2   :  { %v10207_v54 = vpop.eup %10206  ;;  %10226 = vtanh.f32 %v12262_v1 }
 0xaf3   :  { %v10209_v58 = vpop.eup %10208 }
 0xaf4   :  { %v10211_v17 = vpop.eup %10210 }
 0xaf5   :  { %v10213_v24 = vpop.eup %10212 }
 0xaf6   :  { %v10215_v28 = vpop.eup %10214 }
 0xaf7   :  { %v10217_v39 = vpop.eup %10216 }
 0xaf8   :  { %v10219_v55 = vpop.eup %10218 }
 0xb21   :  { %v3506_v30 = vpop.permute.xlu1 %3505 }
 0xb22   :  { %v3553_v29 = vmul.f32 %v10197_v18, %v3506_v30  ;;  %v10221_v18 = vpop.eup %10220 }
 0xb23   :  { %v3508_v26 = vpop.permute.xlu0 %3507  ;;  %v10223_v50 = vpop.eup %10222 }
 0xb24   :  { %v3554_v11 = vmul.f32 %v10199_v36, %v3508_v26 }
 0xb26   :  { %v3569_v15 = vpack.c.bf16 %v3554_v11, %v3553_v29 }
 0xb28   :  { %8538 = vmatprep.mubr.msk.bf16.mxu1 %vm74_vm0, %v3569_v15  ;;  %v10225_v15 = vpop.eup %10224 }
 0xb2d   :  { %v3510_v33 = vpop.permute.xlu1 %3509 }
 0xb2e   :  { %v3555_v38 = vmul.f32 %v10201_v62, %v3510_v33  ;;  %v10227_v33 = vpop.eup %10226 }
 0xb31   :  { %v3512_v5 = vpop.permute.xlu0 %3511 }
 0xb32   :  { %v3556_v14 = vmul.f32 %v10203_v10, %v3512_v5 }
 0xb34   :  { %v3570_v16 = vpack.c.bf16 %v3556_v14, %v3555_v38 }
 0xb35   :  { %v3514_v20 = vpop.permute.xlu1 %3513 }
 0xb36   :  { %8539 = vmatmul.mubr.msk.bf16.vlgmr.msra.gmra.mrb[76].mxu1 %vm74_vm0, %v3570_v16  ;;  %v3557_v35 = vmul.f32 %v10205_v51, %v3514_v20 }
 0xb37   :  { %v3516_v61 = vpop.permute.xlu0 %3515 }
 0xb38   :  { %v3558_v45 = vmul.f32 %v10207_v54, %v3516_v61 }
 0xb3a   :  { %v3571_v53 = vpack.c.bf16 %v3558_v45, %v3557_v35 }
 0xb3c   :  { %8542 = vmatprep.mubr.msk.bf16.mxu1 %vm74_vm0, %v3571_v53 }
 0xb3d   :  { %v3518_v8 = vpop.permute.xlu1 %3517 }
 0xb3e   :  { %v3559_v46 = vmul.f32 %v10209_v58, %v3518_v8 }
 0xb3f   :  { %v3520_v40 = vpop.permute.xlu0 %3519 }
 0xb40   :  { %v3560_v21 = vmul.f32 %v10211_v17, %v3520_v40 }
 0xb42   :  { %v3572_v7 = vpack.c.bf16 %v3560_v21, %v3559_v46 }
 0xb44   :  { %8543 = vmatmul.mubr.msk.bf16.gmra.mrb[80].mxu1 %vm74_vm0, %v3572_v7 }
 0xb45   :  { %v3522_v31 = vpop.permute.xlu1 %3521 }
 0xb46   :  { %v3561_v23 = vmul.f32 %v10213_v24, %v3522_v31 }
 0xb47   :  { %v3524_v25 = vpop.permute.xlu0 %3523 }
 0xb48   :  { %v3562_v37 = vmul.f32 %v10215_v28, %v3524_v25 }
 0xb4a   :  { %v3573_v42 = vpack.c.bf16 %v3562_v37, %v3561_v23 }
 0xb4c   :  { %8546 = vmatprep.mubr.msk.bf16.mxu1 %vm74_vm0, %v3573_v42 }
 0xb4d   :  { %v3526_v4 = vpop.permute.xlu1 %3525 }
 0xb4e   :  { %v3563_v63 = vmul.f32 %v10217_v39, %v3526_v4 }
 0xb4f   :  { %v3528_v52 = vpop.permute.xlu0 %3527 }
 0xb50   :  { %v3564_v27 = vmul.f32 %v10219_v55, %v3528_v52  ;;  %v9780_v52 = vld [vmem:[#allocation6 + $0x10] sm:$0xff]  }
 0xb52   :  { %v3574_v30 = vpack.c.bf16 %v3564_v27, %v3563_v63 }
 0xb54   :  { %8547 = vmatmul.mubr.msk.bf16.gmra.mrb[84].mxu1 %vm74_vm0, %v3574_v30 }
 0xb55   :  { %v3530_v49 = vpop.permute.xlu1 %3529 }
 0xb56   :  { %v3565_v26 = vmul.f32 %v10221_v18, %v3530_v49 }
 0xb57   :  { %v3532_v36 = vpop.permute.xlu0 %3531 }
 0xb58   :  { %v3566_v29 = vmul.f32 %v10223_v50, %v3532_v36 }
 0xb5a   :  { %v3575_v22 = vpack.c.bf16 %v3566_v29, %v3565_v26 }
 0xb5c   :  { %8550 = vmatprep.mubr.msk.bf16.mxu1 %vm74_vm0, %v3575_v22  ;;  %v9781_v22 = vld [vmem:[#allocation6 + $0x18] sm:$0xff]  }
 0xb5d   :  { %v3534_v11 = vpop.permute.xlu1 %3533 }
 0xb5e   :  { %v3567_v10 = vmul.f32 %v10225_v15, %v3534_v11 }
 0xb5f   :  { %v3536_v62 = vpop.permute.xlu0 %3535 }
 0xb60   :  { %v3568_v5 = vmul.f32 %v10227_v33, %v3536_v62 }
 0xb61   :  { %v12299_v38 = vpop.permute.xlu1 %3595 }
 0xb62   :  { %v3576_v57 = vpack.c.bf16 %v3568_v5, %v3567_v10 }
 0xb64   :  { %8551 = vmatmul.mubr.msk.bf16.gmra.mrb[88].mxu1 %vm74_vm0, %v3576_v57 }
 0xc09   :  { %v8540_v14 = vpop.f32.mrb[76].mxu1 }
 0xc0a   :  { %v3665_v1 = vadd.f32 %v8540_v14, %v12299_v38  ;;  %v3656_v16 = vpop.f32.mrb[77].mxu1 }
 0xc0b   :  { %v3657_v20 = vadd.f32 %v3656_v16, %v12299_v38  ;;  %v8541_v51 = vpop.f32.mrb[78].mxu1 }
 0xc0c   :  { %v3721_v54 = vadd.f32 %v3665_v1, %v11915_v19  ;;  %v3668_v61 = vadd.f32 %v8541_v51, %v12299_v38  ;;  %v3659_v35 = vpop.f32.mrb[79].mxu1 }
 0xc0d   :  { %v3719_v45 = vadd.f32 %v3657_v20, %v11919_v44  ;;  %v3660_v53 = vadd.f32 %v3659_v35, %v12299_v38  ;;  %v9785_v35 = vld [vmem:[#allocation6 + $0x38] sm:$0xff]  }
 0xc0e   :  { %3754 = vst.msk [vmem:[#allocation3 + $0x10] sm:$0xff] %vm74_vm0, %v3721_v54  ;;  %v3722_v8 = vadd.f32 %v3668_v61, %v11925_v41  ;;  %v9783_v54 = vld [vmem:[#allocation6 + $0x28] sm:$0xff]  }
 0xc0f   :  { %3752 = vst.msk [vmem:[#allocation3] sm:$0xff] %vm74_vm0, %v3719_v45  ;;  %v3720_v58 = vadd.f32 %v3660_v53, %v11930_v12 }
 0xc10   :  { %3755 = vst.msk [vmem:[#allocation3 + $0x18] sm:$0xff] %vm74_vm0, %v3722_v8 }
 0xc11   :  { %3753 = vst.msk [vmem:[#allocation3 + $0x8] sm:$0xff] %vm74_vm0, %v3720_v58 }
 0xc17   :  { %v8544_v19 = vpop.f32.mrb[80].mxu1 }
 0xc18   :  { %v3681_v17 = vadd.f32 %v8544_v19, %v12299_v38  ;;  %v3672_v40 = vpop.f32.mrb[81].mxu1  ;;  %v3776_v25 = vld [vmem:[#allocation3 + $0x1] ss:$4 sm:$0xff]  ;;  %v3784_v49 = vld [vmem:[#allocation3 + $0x2] ss:$4 sm:$0xff] }
 0xc19   :  { %v3673_v44 = vadd.f32 %v3672_v40, %v12299_v38  ;;  %v8545_v46 = vpop.f32.mrb[82].mxu1 }
 0xc1a   :  { %v3725_v21 = vadd.f32 %v3681_v17, %v11960_v3  ;;  %v3684_v7 = vadd.f32 %v8545_v46, %v12299_v38  ;;  %v3675_v41 = vpop.f32.mrb[83].mxu1  ;;  %v9778_v3 = vld [vmem:[#allocation6] sm:$0xff]  }
 0xc1b   :  { %v3723_v31 = vadd.f32 %v3673_v44, %v11964_v59  ;;  %v3676_v12 = vadd.f32 %v3675_v41, %v12299_v38  ;;  %8554 = vmatprep.subr.bf16.mxu1 %v9778_v3  ;;  %v3768_v41 = vld [vmem:[#allocation3] ss:$4 sm:$0xff] }
 0xc1c   :  { %3758 = vst.msk [vmem:[#allocation3 + $0x30] sm:$0xff] %vm74_vm0, %v3725_v21  ;;  %v3726_v24 = vadd.f32 %v3684_v7, %v11971_v6  ;;  %8555 = vmatpush3.bf16.msra.mxu1 %v9778_v3 }
 0xc1d   :  { %3756 = vst.msk [vmem:[#allocation3 + $0x20] sm:$0xff] %vm74_vm0, %v3723_v31  ;;  %v3724_v28 = vadd.f32 %v3676_v12, %v11976_v47  ;;  %v9779_v47 = vld [vmem:[#allocation6 + $0x8] sm:$0xff]  }
 0xc1e   :  { %3759 = vst.msk [vmem:[#allocation3 + $0x38] sm:$0xff] %vm74_vm0, %v3726_v24  ;;  %8556 = vmatprep.subr.bf16.mxu1 %v9779_v47 }
 0xc1f   :  { %3757 = vst.msk [vmem:[#allocation3 + $0x28] sm:$0xff] %vm74_vm0, %v3724_v28 }
 0xc20   :  { %8557 = vmatpush3.bf16.msra.mxu1 %v9779_v47 }
 0xc21   :  { %8558 = vmatprep.subr.bf16.mxu1 %v9780_v52 }
 0xc24   :  { %8559 = vmatpush3.bf16.msra.mxu1 %v9780_v52 }
 0xc25   :  { %8560 = vmatprep.subr.bf16.mxu1 %v9781_v22 }
 0xc26   :  { %v3778_v23 = vld [vmem:[#allocation3 + $0x21] ss:$4 sm:$0xff]  ;;  %v3786_v39 = vld [vmem:[#allocation3 + $0x22] ss:$4 sm:$0xff]  ;;  %v3794_v29 = vld [vmem:[#allocation3 + $0x23] ss:$4 sm:$0xff] }
 0xc27   :  { %v8548_v37 = vpop.f32.mrb[84].mxu1  ;;  %v9220_v59 = vpack.i.bf16 %v3778_v23, %v3776_v25  ;;  %v9225_v36 = vpack.i.bf16 %v3786_v39, %v3784_v49  ;;  %v3770_v7 = vld [vmem:[#allocation3 + $0x20] ss:$4 sm:$0xff] }
 0xc28   :  { %v3697_v42 = vadd.f32 %v8548_v37, %v12299_v38  ;;  %v3688_v4 = vpop.f32.mrb[85].mxu1  ;;  %8561 = vmatpush3.bf16.msra.mxu1 %v9781_v22 }
 0xc29   :  { %v3689_v6 = vadd.f32 %v3688_v4, %v12299_v38  ;;  %v8549_v55 = vpop.f32.mrb[86].mxu1  ;;  %9221 = vrot.lane.b32.xlu0 %v9220_v59, %s10693_s15 }
 0xc2a   :  { %v3729_v63 = vadd.f32 %v3697_v42, %v12003_v48  ;;  %v3700_v27 = vadd.f32 %v8549_v55, %v12299_v38  ;;  %v3691_v30 = vpop.f32.mrb[87].mxu1 }
 0xc2b   :  { %v3727_v18 = vadd.f32 %v3689_v6, %v12009_v32  ;;  %v3692_v50 = vadd.f32 %v3691_v30, %v12299_v38  ;;  %v3792_v32 = vld [vmem:[#allocation3 + $0x3] ss:$4 sm:$0xff] }
 0xc2c   :  { %3762 = vst.msk [vmem:[#allocation3 + $0x50] sm:$0xff] %vm74_vm0, %v3729_v63  ;;  %v3730_v26 = vadd.f32 %v3700_v27, %v12017_v13  ;;  %v9230_v11 = vpack.i.bf16 %v3794_v29, %v3792_v32  ;;  %v9782_v13 = vld [vmem:[#allocation6 + $0x20] sm:$0xff]  }
 0xc2d   :  { %3760 = vst.msk [vmem:[#allocation3 + $0x40] sm:$0xff] %vm74_vm0, %v3727_v18  ;;  %v3728_v48 = vadd.f32 %v3692_v50, %v12022_v34  ;;  %9226 = vrot.lane.b32.xlu0 %v9225_v36, %s10688_s21  ;;  %8562 = vmatprep.subr.bf16.mxu1 %v9782_v13 }
 0xc2e   :  { %3763 = vst.msk [vmem:[#allocation3 + $0x58] sm:$0xff] %vm74_vm0, %v3730_v26  ;;  %8563 = vmatpush3.bf16.msra.mxu1 %v9782_v13  ;;  %v9787_v13 = vld [vmem:[#allocation8 + $0x8] sm:$0xff]  }
 0xc2f   :  { %3761 = vst.msk [vmem:[#allocation3 + $0x48] sm:$0xff] %vm74_vm0, %v3728_v48  ;;  %8564 = vmatprep.subr.bf16.mxu1 %v9783_v54 }
 0xc31   :  { %9231 = vrot.lane.b32.xlu0 %v9230_v11, %s10694_s16  ;;  %v9786_v11 = vld [vmem:[#allocation8] sm:$0xff]  }
 0xc32   :  { %8565 = vmatpush3.bf16.msra.mxu1 %v9783_v54  ;;  %8575 = vmatpush3.bf16.msra.mxu0 %v9786_v11  ;;  %v9797_v11 = vld [vmem:[#allocation4 + $0x148] sm:$0xff]  }
 0xc33   :  { %8576 = vmatprep.subr.bf16.mxu0 %v10692_v9 }
 0xc36   :  { %v3796_v8 = vld [vmem:[#allocation3 + $0x43] ss:$4 sm:$0xff]  ;;  %v3772_v27 = vld [vmem:[#allocation3 + $0x40] ss:$4 sm:$0xff]  ;;  %8577 = vmatpush3.bf16.msra.mxu0 %v9787_v13 }
 0xc37   :  { %v8552_v15 = vpop.f32.mrb[88].mxu1  ;;  %8578 = vmatprep.subr.bf16.mxu0 %v10692_v9  ;;  %v9798_v13 = vld [vmem:[#allocation4 + $0x150] sm:$0xff]  }
 0xc38   :  { %v3713_v34 = vadd.f32 %v8552_v15, %v12299_v38  ;;  %v3704_v33 = vpop.f32.mrb[89].mxu1  ;;  %v9788_v15 = vld [vmem:[#allocation8 + $0x10] sm:$0xff]  }
 0xc39   :  { %v3705_v62 = vadd.f32 %v3704_v33, %v12299_v38  ;;  %v8553_v10 = vpop.f32.mrb[90].mxu1  ;;  %v9790_v33 = vld [vmem:[#allocation8 + $0x20] sm:$0xff]  }
 0xc3a   :  { %v3733_v5 = vadd.f32 %v3713_v34, %v12052_v43  ;;  %v3716_v57 = vadd.f32 %v8553_v10, %v12299_v38  ;;  %v3707_v14 = vpop.f32.mrb[91].mxu1  ;;  %v9784_v43 = vld [vmem:[#allocation6 + $0x30] sm:$0xff]   ;;  %8579 = vmatpush3.bf16.msra.mxu0 %v9788_v15  ;;  %v9789_v34 = vld [vmem:[#allocation8 + $0x18] sm:$0xff]  }
 0xc3b   :  { %v3731_v1 = vadd.f32 %v3705_v62, %v12058_v2  ;;  %v3708_v16 = vadd.f32 %v3707_v14, %v12299_v38  ;;  %8566 = vmatprep.subr.bf16.mxu1 %v9784_v43  ;;  %v3780_v2 = vld [vmem:[#allocation3 + $0x41] ss:$4 sm:$0xff]  ;;  %8580 = vmatprep.subr.bf16.mxu0 %v10692_v9 }
 0xc3c   :  { %3766 = vst.msk [vmem:[#allocation3 + $0x70] sm:$0xff] %vm74_vm0, %v3733_v5  ;;  %v3734_v20 = vadd.f32 %v3716_v57, %v12065_v60  ;;  %8567 = vmatpush3.bf16.msra.mxu1 %v9784_v43  ;;  %v3788_v60 = vld [vmem:[#allocation3 + $0x42] ss:$4 sm:$0xff]  ;;  %v8138_v5 = vld [vmem:[%s13889_s8 + $0x4] ss:$0 sm:$0xff] }
 0xc3d   :  { %3764 = vst.msk [vmem:[#allocation3 + $0x60] sm:$0xff] %vm74_vm0, %v3731_v1  ;;  %v3732_v51 = vadd.f32 %v3708_v16, %v12070_v56  ;;  %8568 = vmatprep.subr.bf16.mxu1 %v9785_v35  ;;  %v9791_v62 = vld [vmem:[#allocation8 + $0x28] sm:$0xff]   ;;  %v9792_v10 = vld [vmem:[#allocation8 + $0x30] sm:$0xff]   ;;  %v9793_v16 = vld [vmem:[#allocation8 + $0x38] sm:$0xff]  }
 0xc3e   :  { %3767 = vst.msk [vmem:[#allocation3 + $0x78] sm:$0xff] %vm74_vm0, %v3734_v20  ;;  %8581 = vmatpush3.bf16.msra.mxu0 %v9789_v34  ;;  %v9799_v15 = vld [vmem:[#allocation4 + $0x158] sm:$0xff]   ;;  %v9800_v34 = vld [vmem:[#allocation4 + $0x160] sm:$0xff]  }
 0xc3f   :  { %3765 = vst.msk [vmem:[#allocation3 + $0x68] sm:$0xff] %vm74_vm0, %v3732_v51  ;;  %8582 = vmatprep.subr.bf16.mxu0 %v10692_v9 }
 0xc40   :  { %8569 = vmatpush3.bf16.msra.mxu1 %v9785_v35 }
 0xc41   :  { %8594 = vmatprep.subr.bf16.mxu1 %v10692_v9 }
 0xc42   :  { %8583 = vmatpush3.bf16.msra.mxu0 %v9790_v33  ;;  %v9801_v33 = vld [vmem:[#allocation4 + $0x168] sm:$0xff]  }
 0xc43   :  { %8584 = vmatprep.subr.bf16.mxu0 %v10692_v9 }
 0xc46   :  { %v3782_v38 = vld [vmem:[#allocation3 + $0x61] ss:$4 sm:$0xff]  ;;  %v3790_v45 = vld [vmem:[#allocation3 + $0x62] ss:$4 sm:$0xff]  ;;  %v3798_v53 = vld [vmem:[#allocation3 + $0x63] ss:$4 sm:$0xff]  ;;  %8585 = vmatpush3.bf16.msra.mxu0 %v9791_v62 }
 0xc47   :  { %v9235_v61 = vpack.i.bf16 %v3782_v38, %v3780_v2  ;;  %v9240_v56 = vpack.i.bf16 %v3790_v45, %v3788_v60  ;;  %v9245_v58 = vpack.i.bf16 %v3798_v53, %v3796_v8  ;;  %v3774_v63 = vld [vmem:[#allocation3 + $0x60] ss:$4 sm:$0xff]  ;;  %8586 = vmatprep.subr.bf16.mxu0 %v10692_v9 }
 0xc48   :  { %v4095_v38 = vld [vmem:[%s13887_s6] sm:$0xf]  ;;  %v9802_v62 = vld [vmem:[#allocation4 + $0x170] sm:$0xff]  }
 0xc49   :  { %9236 = vrot.lane.b32.xlu1 %v9235_v61, %s10693_s15  ;;  %v4104_v61 = vsel %vm4102_vm4, %v4095_v38, 0 }
 0xc4a   :  { %8587 = vmatpush3.bf16.msra.mxu0 %v9792_v10  ;;  %v9803_v10 = vld [vmem:[#allocation4 + $0x178] sm:$0xff]  }
 0xc4b   :  { %8588 = vmatprep.subr.bf16.mxu0 %v10692_v9 }
 0xc4d   :  { %9241 = vrot.lane.b32.xlu1 %v9240_v56, %s10688_s21 }
 0xc4e   :  { %8589 = vmatpush3.bf16.msra.mxu0 %v9793_v16 }
 0xc51   :  { %9246 = vrot.lane.b32.xlu1 %v9245_v58, %s10694_s16 }
 0xc9b   :  { %v9222_v19 = vpop.permute.xlu0 %9221 }
 0xc9c   :  { %v9224_v40 = vunpack.i.h.bf16 %v9222_v19  ;;  %v9223_v44 = vunpack.i.l.bf16 %v9222_v19 }
 0xc9e   :  { %v3848_v12 = vsel %vm74_vm0, %v3770_v7, %v9224_v40  ;;  %v3847_v24 = vsel %vm74_vm0, %v3768_v41, %v9223_v44 }
 0xc9f   :  { %v9227_v17 = vpop.permute.xlu0 %9226 }
 0xca0   :  { %v9229_v46 = vunpack.i.h.bf16 %v9227_v17  ;;  %v9228_v21 = vunpack.i.l.bf16 %v9227_v17 }
 0xca2   :  { %v3851_v25 = vsel %vm525_vm1, %v3847_v24, %v9228_v21  ;;  %v3852_v23 = vsel %vm525_vm1, %v3848_v12, %v9229_v46  ;;  %v8147_v46 = vld [vmem:[%s13889_s8 + $0x5] ss:$0 sm:$0xff] }
 0xca3   :  { %v9232_v31 = vpop.permute.xlu0 %9231 }
 0xca4   :  { %v9234_v28 = vunpack.i.h.bf16 %v9232_v31  ;;  %v9233_v3 = vunpack.i.l.bf16 %v9232_v31 }
 0xca6   :  { %v3855_v37 = vsel %vm542_vm2, %v3851_v25, %v9233_v3  ;;  %v3856_v59 = vsel %vm542_vm2, %v3852_v23, %v9234_v28  ;;  %v9794_v28 = vld [vmem:[%s13888_s7] sm:$0xff]   ;;  %v9795_v3 = vld [vmem:[%s13888_s7 + $0x8] sm:$0xff]  }
 0xca7   :  { %v3859_v42 = vpack.c.bf16 %v3856_v59, %v3855_v37 }
 0xca9   :  { %8570 = vmatprep.mubr.bf16.mxu1 %v3859_v42 }
 0xcbb   :  { %v9237_v4 = vpop.permute.xlu1 %9236 }
 0xcbc   :  { %v9239_v6 = vunpack.i.h.bf16 %v9237_v4  ;;  %v9238_v55 = vunpack.i.l.bf16 %v9237_v4 }
 0xcbe   :  { %v3850_v49 = vsel %vm74_vm0, %v3774_v63, %v9239_v6  ;;  %v3849_v18 = vsel %vm74_vm0, %v3772_v27, %v9238_v55  ;;  %v8157_v6 = vld [vmem:[%s13889_s8 + $0x6] ss:$0 sm:$0xff] }
 0xcbf   :  { %v9242_v39 = vpop.permute.xlu1 %9241 }
 0xcc0   :  { %v9244_v47 = vunpack.i.h.bf16 %v9242_v39  ;;  %v9243_v52 = vunpack.i.l.bf16 %v9242_v39 }
 0xcc2   :  { %v3853_v26 = vsel %vm525_vm1, %v3849_v18, %v9243_v52  ;;  %v3854_v29 = vsel %vm525_vm1, %v3850_v49, %v9244_v47 }
 0xcc3   :  { %v9247_v30 = vpop.permute.xlu1 %9246 }
 0xcc4   :  { %v9249_v50 = vunpack.i.h.bf16 %v9247_v30  ;;  %v9248_v36 = vunpack.i.l.bf16 %v9247_v30 }
 0xcc6   :  { %v3857_v48 = vsel %vm542_vm2, %v3853_v26, %v9248_v36  ;;  %v3858_v22 = vsel %vm542_vm2, %v3854_v29, %v9249_v50 }
 0xcc7   :  { %v3860_v32 = vpack.c.bf16 %v3858_v22, %v3857_v48 }
 0xcc9   :  { %8571 = vmatmul.mubr.bf16.vlgmr.msra.gmra.mrb[92].mxu1 %v3860_v32  ;;  %v9796_v32 = vld [vmem:[#allocation4 + $0x140] sm:$0xff]  }
 0xcca   :  { %8596 = vmatprep.mubr.msk.bf16.mxu1 %vm10695_vm3, %v10692_v9  ;;  %8595 = vmatpush3.bf16.msra.mxu1 %v4104_v61 }
 0xccb   :  { %8600 = vmatprep.subr.bf16.mxu1 %v9794_v28 }
 0xd9c   :  { %v8572_v57 = vpop.f32.mrb[92].mxu1 }
 0xd9d   :  { %v3956_v14 = vadd.f32 %v8572_v57, %v8138_v5  ;;  %v3947_v1 = vpop.f32.mrb[93].mxu1 }
 0xd9e   :  { %v3948_v20 = vadd.f32 %v8138_v5, %v3947_v1  ;;  %v8573_v51 = vpop.f32.mrb[94].mxu1 }
 0xd9f   :  { %3981 = vst.msk [vmem:[#allocation3 + $0x10] sm:$0xff] %vm74_vm0, %v3956_v14  ;;  %v3959_v54 = vadd.f32 %v8573_v51, %v8138_v5  ;;  %v3950_v43 = vpop.f32.mrb[95].mxu1  ;;  %v12436_v51 = vld [vmem:[%s13889_s8 + $0x7] ss:$0 sm:$0xff] }
 0xda0   :  { %3979 = vst.msk [vmem:[#allocation3] sm:$0xff] %vm74_vm0, %v3948_v20  ;;  %v3951_v2 = vadd.f32 %v8138_v5, %v3950_v43 }
 0xda1   :  { %3982 = vst.msk [vmem:[#allocation3 + $0x18] sm:$0xff] %vm74_vm0, %v3959_v54 }
 0xda2   :  { %3980 = vst.msk [vmem:[#allocation3 + $0x8] sm:$0xff] %vm74_vm0, %v3951_v2 }
 0xda9   :  { %v3985_v35 = vld [vmem:[#allocation3 + $0x2] ss:$4 sm:$0xff]  ;;  %v3984_v45 = vld [vmem:[#allocation3 + $0x1] ss:$4 sm:$0xff]  ;;  %v3986_v60 = vld [vmem:[#allocation3 + $0x3] ss:$4 sm:$0xff] }
 0xdaa   :  { %3992 = vrot.lane.b32.xlu1 %v3985_v35, %s10688_s21  ;;  %3988 = vrot.lane.b32.xlu0 %v3984_v45, %s10693_s15  ;;  %v3983_v53 = vld [vmem:[#allocation3] ss:$4 sm:$0xff] }
 0xdae   :  { %3996 = vrot.lane.b32.xlu0 %v3986_v60, %s10694_s16 }
 0xe1c   :  { %v3989_v56 = vpop.permute.xlu0 %3988  ;;  %v3993_v8 = vpop.permute.xlu1 %3992 }
 0xe1d   :  { %v3999_v58 = vsel %vm74_vm0, %v3983_v53, %v3989_v56 }
 0xe1e   :  { %v4000_v17 = vsel %vm525_vm1, %v3999_v58, %v3993_v8  ;;  %v9804_v8 = vld [vmem:[#allocation4 + $0x180] sm:$0xff]  }
 0xe20   :  { %v3997_v19 = vpop.permute.xlu0 %3996 }
 0xe21   :  { %v4001_v40 = vsel %vm542_vm2, %v4000_v17, %v3997_v19 }
 0xe22   :  { %v4002_v44 = vpack.c.bf16 %v4001_v40, %v4001_v40 }
 0xe24   :  { %8591 = vmatmul.mubr.bf16.vlgmr.msra.gmra.mrb[100].mxu0 %v4002_v44 }
 0xef7   :  { %v4089_v21 = vpop.f32.mrb[100].mxu0 }
 0xef8   :  { %v4090_v7 = vadd.f32 %v8147_v46, %v4089_v21  ;;  %v8592_v41 = vpop.f32.mrb[101].mxu0 }
 0xef9   :  { %v4092_v31 = vpop.f32.mrb[102].mxu0 }
 0xefa   :  { %v4097_v12 = vpack.c.bf16 %v4090_v7, %v4090_v7  ;;  %v8593_v24 = vpop.f32.mrb[103].mxu0 }
 0xefc   :  { %8597 = vmatmul.mubr.msk.bf16.vlgmr.msra.gmra.mrb[96].mxu1 %vm4098_vm5, %v4097_v12  ;;  %v9805_v12 = vld [vmem:[#allocation4 + $0x188] sm:$0xff]  }
 0xefd   :  { %8601 = vmatpush3.bf16.msra.mxu1 %v9794_v28 }
 0xefe   :  { %8602 = vmatprep.subr.bf16.mxu1 %v9795_v3 }
 0xf01   :  { %8603 = vmatpush3.bf16.msra.mxu1 %v9795_v3  ;;  %v12479_v3 = vld [vmem:[#allocation2 + $0x8] sm:$0xff] }
 0xf02   :  { %4716 = vmatprep.subr.bf16.mxu1 %v10691_v0 }
 0xfcf   :  { %v4140_v25 = vpop.f32.mrb[96].mxu1 }
 0xfd0   :  { %4146 = vst [vmem:[#allocation3] ss:$4 sm:$0xff] %v4140_v25  ;;  %4152 = vrot.lane.b32.xlu0 %v4140_v25, %s10688_s21  ;;  %4148 = vrot.lane.b32.xlu1 %v4140_v25, %s10694_s16  ;;  %v8598_v23 = vpop.f32.mrb[97].mxu1 }
 0xfd1   :  { %v4143_v37 = vpop.f32.mrb[98].mxu1 }
 0xfd2   :  { %v8599_v59 = vpop.f32.mrb[99].mxu1 }
 0xfd4   :  { %4156 = vrot.lane.b32.xlu1 %v4140_v25, %s10693_s15 }
0x1042   :  { %v4153_v42 = vpop.permute.xlu0 %4152  ;;  %v4149_v4 = vpop.permute.xlu1 %4148 }
0x1043   :  { %4155 = vst [vmem:[#allocation3 + $0x2] ss:$4 sm:$0xff] %v4153_v42  ;;  %4151 = vst [vmem:[#allocation3 + $0x1] ss:$4 sm:$0xff] %v4149_v4 }
0x1046   :  { %v4157_v39 = vpop.permute.xlu1 %4156 }
0x1047   :  { %4159 = vst [vmem:[#allocation3 + $0x3] ss:$4 sm:$0xff] %v4157_v39 }
0x104e   :  { %v4160_v55 = vld [vmem:[#allocation3] sm:$0xff]  ;;  %v4161_v47 = vld [vmem:[#allocation3 + $0x8] sm:$0xff]  ;;  %v4162_v52 = vld [vmem:[#allocation3 + $0x10] sm:$0xff] }
0x104f   :  { %v4168_v63 = vadd.f32 %v8157_v6, %v4160_v55  ;;  %v4169_v27 = vadd.f32 %v8157_v6, %v4161_v47  ;;  %v4163_v30 = vld [vmem:[#allocation3 + $0x18] sm:$0xff]  ;;  %v4170_v49 = vadd.f32 %v8157_v6, %v4162_v52 }
0x1050   :  { %v4171_v18 = vadd.f32 %v8157_v6, %v4163_v30 }
0x1051   :  { %v4177_v50 = vpack.c.bf16 %v4169_v27, %v4168_v63 }
0x1052   :  { %v4178_v36 = vpack.c.bf16 %v4171_v18, %v4170_v49 }
0x1053   :  { %8604 = vmatprep.mubr.msk.bf16.mxu1 %vm74_vm0, %v4177_v50 }
0x1054   :  { %8605 = vmatmul.mubr.msk.bf16.vlgmr.msra.gmra.mrb[100].mxu1 %vm74_vm0, %v4178_v36 }
0x1055   :  { %4717 = vmatpush1.bf16.msra.mxu1 %v9796_v32 }
0x1056   :  { %4718 = vmatprep.subr.bf16.mxu1 %v10691_v0 }
0x1059   :  { %4719 = vmatpush1.bf16.msra.mxu1 %v9797_v11 }
0x105a   :  { %4720 = vmatprep.subr.bf16.mxu1 %v10691_v0 }
0x105d   :  { %4721 = vmatpush1.bf16.msra.mxu1 %v9798_v13 }
0x105e   :  { %4722 = vmatprep.subr.bf16.mxu1 %v10691_v0 }
0x1061   :  { %4723 = vmatpush1.bf16.msra.mxu1 %v9799_v15 }
0x1062   :  { %4724 = vmatprep.subr.bf16.mxu1 %v10691_v0 }
0x1065   :  { %4725 = vmatpush1.bf16.msra.mxu1 %v9800_v34 }
0x1066   :  { %4726 = vmatprep.subr.bf16.mxu1 %v10691_v0 }
0x1069   :  { %4727 = vmatpush1.bf16.msra.mxu1 %v9801_v33 }
0x106a   :  { %4728 = vmatprep.subr.bf16.mxu1 %v10691_v0 }
0x106d   :  { %4729 = vmatpush1.bf16.msra.mxu1 %v9802_v62 }
0x106e   :  { %4730 = vmatprep.subr.bf16.mxu1 %v10691_v0 }
0x1071   :  { %4731 = vmatpush1.bf16.msra.mxu1 %v9803_v10 }
0x1072   :  { %4732 = vmatprep.subr.bf16.mxu1 %v10691_v0 }
0x1075   :  { %4733 = vmatpush1.bf16.msra.mxu1 %v9804_v8 }
0x1076   :  { %4734 = vmatprep.subr.bf16.mxu1 %v10691_v0 }
0x1079   :  { %4735 = vmatpush1.bf16.msra.mxu1 %v9805_v12 }
0x1127   :  { %v8606_v26 = vpop.f32.mrb[100].mxu1 }
0x1128   :  { %4248 = vst [vmem:[#allocation3 + $0x40] ss:$4 sm:$0xff] %v8606_v26  ;;  %v4231_v29 = vpop.f32.mrb[101].mxu1 }
0x1129   :  { %4246 = vst [vmem:[#allocation3] ss:$4 sm:$0xff] %v4231_v29  ;;  %4270 = vrot.lane.b32.xlu1 %v4231_v29, %s10688_s21  ;;  %4254 = vrot.lane.b32.xlu0 %v4231_v29, %s10694_s16  ;;  %v8607_v48 = vpop.f32.mrb[102].mxu1 }
0x112a   :  { %4249 = vst [vmem:[#allocation3 + $0x60] ss:$4 sm:$0xff] %v8607_v48  ;;  %v4234_v22 = vpop.f32.mrb[103].mxu1 }
0x112b   :  { %4247 = vst [vmem:[#allocation3 + $0x20] ss:$4 sm:$0xff] %v4234_v22 }
0x112d   :  { %4286 = vrot.lane.b32.xlu0 %v4231_v29, %s10693_s15  ;;  %4256 = vrot.lane.b32.xlu1 %v4234_v22, %s10694_s16 }
0x1131   :  { %4272 = vrot.lane.b32.xlu0 %v4234_v22, %s10688_s21  ;;  %4288 = vrot.lane.b32.xlu1 %v4234_v22, %s10693_s15 }
0x1135   :  { %4258 = vrot.lane.b32.xlu0 %v8606_v26, %s10694_s16  ;;  %4274 = vrot.lane.b32.xlu1 %v8606_v26, %s10688_s21 }
0x1139   :  { %4290 = vrot.lane.b32.xlu0 %v8606_v26, %s10693_s15  ;;  %4260 = vrot.lane.b32.xlu1 %v8607_v48, %s10694_s16 }
0x113d   :  { %4276 = vrot.lane.b32.xlu0 %v8607_v48, %s10688_s21  ;;  %4292 = vrot.lane.b32.xlu1 %v8607_v48, %s10693_s15 }
0x119b   :  { %v4271_v5 = vpop.permute.xlu1 %4270  ;;  %v4255_v57 = vpop.permute.xlu0 %4254 }
0x119c   :  { %4282 = vst [vmem:[#allocation3 + $0x2] ss:$4 sm:$0xff] %v4271_v5  ;;  %4266 = vst [vmem:[#allocation3 + $0x1] ss:$4 sm:$0xff] %v4255_v57 }
0x119f   :  { %v4287_v14 = vpop.permute.xlu0 %4286  ;;  %v4257_v1 = vpop.permute.xlu1 %4256 }
0x11a0   :  { %4298 = vst [vmem:[#allocation3 + $0x3] ss:$4 sm:$0xff] %v4287_v14  ;;  %4267 = vst [vmem:[#allocation3 + $0x21] ss:$4 sm:$0xff] %v4257_v1  ;;  %v12562_v14 = vld [vmem:[#allocation2 + $0x50] sm:$0xff] }
0x11a3   :  { %v4273_v16 = vpop.permute.xlu0 %4272  ;;  %v4289_v20 = vpop.permute.xlu1 %4288 }
0x11a4   :  { %4283 = vst [vmem:[#allocation3 + $0x22] ss:$4 sm:$0xff] %v4273_v16  ;;  %4299 = vst [vmem:[#allocation3 + $0x23] ss:$4 sm:$0xff] %v4289_v20  ;;  %v12570_v20 = vld [vmem:[#allocation2 + $0x68] sm:$0xff] }
0x11a7   :  { %v4302_v54 = vld [vmem:[#allocation3] sm:$0xff]  ;;  %v4303_v43 = vld [vmem:[#allocation3 + $0x8] sm:$0xff]  ;;  %v4304_v2 = vld [vmem:[#allocation3 + $0x10] sm:$0xff]  ;;  %v4259_v38 = vpop.permute.xlu0 %4258  ;;  %v4275_v61 = vpop.permute.xlu1 %4274 }
0x11a8   :  { %v4305_v35 = vld [vmem:[#allocation3 + $0x18] sm:$0xff]  ;;  %v12439_v45 = vadd.f32 %v12436_v51, %v4302_v54  ;;  %v12442_v60 = vadd.f32 %v12436_v51, %v4303_v43  ;;  %v12445_v56 = vadd.f32 %v12436_v51, %v4304_v2  ;;  %4268 = vst [vmem:[#allocation3 + $0x41] ss:$4 sm:$0xff] %v4259_v38  ;;  %4284 = vst [vmem:[#allocation3 + $0x42] ss:$4 sm:$0xff] %v4275_v61 }
0x11a9   :  { %v12448_v53 = vadd.f32 %v12436_v51, %v4305_v35 }
0x11aa   :  { %4338 = vst.msk [vmem:[#allocation2 + $0x10] sm:$0xff] %vm74_vm0, %v12439_v45  ;;  %4339 = vst.msk [vmem:[#allocation2 + $0x18] sm:$0xff] %vm74_vm0, %v12442_v60 }
0x11ab   :  { %4340 = vst.msk [vmem:[#allocation2 + $0x20] sm:$0xff] %vm74_vm0, %v12445_v56  ;;  %4341 = vst.msk [vmem:[#allocation2 + $0x28] sm:$0xff] %vm74_vm0, %v12448_v53  ;;  %v4306_v58 = vld [vmem:[#allocation3 + $0x20] sm:$0xff]  ;;  %v4307_v19 = vld [vmem:[#allocation3 + $0x28] sm:$0xff]  ;;  %v4291_v40 = vpop.permute.xlu0 %4290  ;;  %v4261_v44 = vpop.permute.xlu1 %4260 }
0x11ac   :  { %v4308_v17 = vld [vmem:[#allocation3 + $0x30] sm:$0xff]  ;;  %v4309_v46 = vld [vmem:[#allocation3 + $0x38] sm:$0xff]  ;;  %v12459_v21 = vadd.f32 %v12436_v51, %v4306_v58  ;;  %v12462_v7 = vadd.f32 %v12436_v51, %v4307_v19  ;;  %4300 = vst [vmem:[#allocation3 + $0x43] ss:$4 sm:$0xff] %v4291_v40  ;;  %4269 = vst [vmem:[#allocation3 + $0x61] ss:$4 sm:$0xff] %v4261_v44 }
0x11ad   :  { %v12465_v41 = vadd.f32 %v12436_v51, %v4308_v17  ;;  %v12468_v31 = vadd.f32 %v12436_v51, %v4309_v46 }
0x11ae   :  { %4342 = vst.msk [vmem:[#allocation2 + $0x30] sm:$0xff] %vm74_vm0, %v12459_v21  ;;  %4343 = vst.msk [vmem:[#allocation2 + $0x38] sm:$0xff] %vm74_vm0, %v12462_v7 }
0x11af   :  { %4344 = vst.msk [vmem:[#allocation2 + $0x40] sm:$0xff] %vm74_vm0, %v12465_v41  ;;  %4345 = vst.msk [vmem:[#allocation2 + $0x48] sm:$0xff] %vm74_vm0, %v12468_v31  ;;  %v4277_v24 = vpop.permute.xlu0 %4276  ;;  %v4293_v28 = vpop.permute.xlu1 %4292 }
0x11b0   :  { %4285 = vst [vmem:[#allocation3 + $0x62] ss:$4 sm:$0xff] %v4277_v24  ;;  %4301 = vst [vmem:[#allocation3 + $0x63] ss:$4 sm:$0xff] %v4293_v28  ;;  %v12612_v24 = vld [vmem:[#allocation2 + $0xb0] sm:$0xff] }
0x11b1   :  { %v12483_v23 = vld [vmem:[#allocation2 + $0x10] sm:$0xff]  ;;  %v12485_v37 = vld [vmem:[#allocation2 + $0x18] sm:$0xff] }
0x11b2   :  { %v12481_v25 = vld [vmem:[#allocation2 + $0x20] sm:$0xff]  ;;  %v12487_v59 = vld [vmem:[#allocation2 + $0x28] sm:$0xff]  ;;  %v9250_v42 = vpack.i.bf16 %v12483_v23, %v12479_v3  ;;  %v9255_v4 = vpack.i.bf16 %v12485_v37, %v12483_v23 }
0x11b3   :  { %v4310_v39 = vld [vmem:[#allocation3 + $0x40] sm:$0xff]  ;;  %v4311_v6 = vld [vmem:[#allocation3 + $0x48] sm:$0xff]  ;;  %v4312_v55 = vld [vmem:[#allocation3 + $0x50] sm:$0xff]  ;;  %v4591_v47 = vpack.c.bf16 %v12487_v59, %v12481_v25  ;;  %v9260_v18 = vpack.i.bf16 %v12481_v25, %v12485_v37  ;;  %v9270_v15 = vpack.i.bf16 %v12487_v59, %v12481_v25 }
0x11b4   :  { %v4313_v52 = vld [vmem:[#allocation3 + $0x58] sm:$0xff]  ;;  %v12496_v63 = vadd.f32 %v12436_v51, %v4310_v39  ;;  %v12499_v27 = vadd.f32 %v12436_v51, %v4311_v6  ;;  %v12502_v30 = vadd.f32 %v12436_v51, %v4312_v55  ;;  %9251 = vrot.lane.b32.xlu0 %v9250_v42, %s10693_s15  ;;  %9256 = vrot.lane.b32.xlu1 %v9255_v4, %s10688_s21  ;;  %v4354_v4 = vld [vmem:[#allocation2] sm:$0xff] }
0x11b5   :  { %v12507_v49 = vadd.f32 %v12436_v51, %v4313_v52  ;;  %8174 = vmatprep.mubr.msk.bf16.mxu1 %vm74_vm0, %v4591_v47  ;;  %v12518_v50 = vld [vmem:[#allocation2 + $0x30] sm:$0xff]  ;;  %v12548_v33 = vld [vmem:[#allocation2 + $0x38] sm:$0xff] }
0x11b6   :  { %4346 = vst.msk [vmem:[#allocation2 + $0x70] sm:$0xff] %vm74_vm0, %v12496_v63  ;;  %4347 = vst.msk [vmem:[#allocation2 + $0x78] sm:$0xff] %vm74_vm0, %v12499_v27  ;;  %v9275_v34 = vpack.i.bf16 %v12518_v50, %v12487_v59  ;;  %v9285_v62 = vpack.i.bf16 %v12548_v33, %v12518_v50  ;;  %v12554_v10 = vld [vmem:[#allocation2 + $0x40] sm:$0xff]  ;;  %v12560_v57 = vld [vmem:[#allocation2 + $0x48] sm:$0xff] }
0x11b7   :  { %4348 = vst.msk [vmem:[#allocation2 + $0x80] sm:$0xff] %vm74_vm0, %v12502_v30  ;;  %4349 = vst.msk [vmem:[#allocation2 + $0x88] sm:$0xff] %vm74_vm0, %v12507_v49  ;;  %v4314_v36 = vld [vmem:[#allocation3 + $0x60] sm:$0xff]  ;;  %v4315_v26 = vld [vmem:[#allocation3 + $0x68] sm:$0xff]  ;;  %v9290_v5 = vpack.i.bf16 %v12554_v10, %v12548_v33  ;;  %v9300_v1 = vpack.i.bf16 %v12560_v57, %v12554_v10  ;;  %v9305_v16 = vpack.i.bf16 %v12562_v14, %v12560_v57 }
0x11b8   :  { %v4316_v29 = vld [vmem:[#allocation3 + $0x70] sm:$0xff]  ;;  %v4317_v48 = vld [vmem:[#allocation3 + $0x78] sm:$0xff]  ;;  %v12523_v22 = vadd.f32 %v12436_v51, %v4314_v36  ;;  %v12526_v32 = vadd.f32 %v12436_v51, %v4315_v26  ;;  %9261 = vrot.lane.b32.xlu0 %v9260_v18, %s10694_s16  ;;  %9266 = vrot.lane.b32.xlu1 %v9260_v18, %s10693_s15 }
0x11b9   :  { %v12529_v11 = vadd.f32 %v12436_v51, %v4316_v29  ;;  %v12534_v13 = vadd.f32 %v12436_v51, %v4317_v48 }
0x11ba   :  { %4350 = vst.msk [vmem:[#allocation2 + $0x90] sm:$0xff] %vm74_vm0, %v12523_v22  ;;  %4351 = vst.msk [vmem:[#allocation2 + $0x98] sm:$0xff] %vm74_vm0, %v12526_v32 }
0x11bb   :  { %4352 = vst.msk [vmem:[#allocation2 + $0xa0] sm:$0xff] %vm74_vm0, %v12529_v11  ;;  %4353 = vst.msk [vmem:[#allocation2 + $0xa8] sm:$0xff] %vm74_vm0, %v12534_v13 }
0x11bc   :  { %9271 = vrot.lane.b32.xlu0 %v9270_v15, %s10688_s21  ;;  %9276 = vrot.lane.b32.xlu1 %v9275_v34, %s10694_s16 }
0x11bd   :  { %v12572_v51 = vld [vmem:[#allocation2 + $0x70] sm:$0xff]  ;;  %v12574_v54 = vld [vmem:[#allocation2 + $0x78] sm:$0xff] }
0x11be   :  { %v9310_v43 = vpack.i.bf16 %v12572_v51, %v12570_v20  ;;  %v9315_v2 = vpack.i.bf16 %v12574_v54, %v12572_v51  ;;  %v12582_v38 = vld [vmem:[#allocation2 + $0x80] sm:$0xff]  ;;  %v12588_v35 = vld [vmem:[#allocation2 + $0x88] sm:$0xff] }
0x11bf   :  { %v9320_v61 = vpack.i.bf16 %v12582_v38, %v12574_v54  ;;  %v9330_v58 = vpack.i.bf16 %v12588_v35, %v12582_v38 }
0x11c0   :  { %9281 = vrot.lane.b32.xlu0 %v9275_v34, %s10693_s15  ;;  %9286 = vrot.lane.b32.xlu1 %v9285_v62, %s10688_s21 }
0x11c1   :  { %v12590_v8 = vld [vmem:[#allocation2 + $0x90] sm:$0xff]  ;;  %v12598_v17 = vld [vmem:[#allocation2 + $0x98] sm:$0xff] }
0x11c2   :  { %v9335_v19 = vpack.i.bf16 %v12590_v8, %v12588_v35  ;;  %v9345_v40 = vpack.i.bf16 %v12598_v17, %v12590_v8  ;;  %v12604_v44 = vld [vmem:[#allocation2 + $0xa0] sm:$0xff]  ;;  %v12610_v12 = vld [vmem:[#allocation2 + $0xa8] sm:$0xff] }
0x11c3   :  { %v9350_v46 = vpack.i.bf16 %v12604_v44, %v12598_v17  ;;  %v9360_v28 = vpack.i.bf16 %v12610_v12, %v12604_v44  ;;  %v9365_v42 = vpack.i.bf16 %v12612_v24, %v12610_v12 }
0x11c4   :  { %9291 = vrot.lane.b32.xlu0 %v9290_v5, %s10694_s16  ;;  %9296 = vrot.lane.b32.xlu1 %v9290_v5, %s10693_s15 }
0x11c8   :  { %9301 = vrot.lane.b32.xlu0 %v9300_v1, %s10688_s21  ;;  %9306 = vrot.lane.b32.xlu1 %v9305_v16, %s10694_s16 }
0x11cc   :  { %9311 = vrot.lane.b32.xlu0 %v9310_v43, %s10693_s15  ;;  %9316 = vrot.lane.b32.xlu1 %v9315_v2, %s10688_s21 }
0x11d0   :  { %9321 = vrot.lane.b32.xlu0 %v9320_v61, %s10694_s16  ;;  %9326 = vrot.lane.b32.xlu1 %v9320_v61, %s10693_s15 }
0x11d4   :  { %9331 = vrot.lane.b32.xlu0 %v9330_v58, %s10688_s21  ;;  %9336 = vrot.lane.b32.xlu1 %v9335_v19, %s10694_s16 }
0x11d8   :  { %9341 = vrot.lane.b32.xlu0 %v9335_v19, %s10693_s15  ;;  %9346 = vrot.lane.b32.xlu1 %v9345_v40, %s10688_s21 }
0x11dc   :  { %9351 = vrot.lane.b32.xlu0 %v9350_v46, %s10694_s16  ;;  %9356 = vrot.lane.b32.xlu1 %v9350_v46, %s10693_s15 }
0x11e0   :  { %9361 = vrot.lane.b32.xlu0 %v9360_v28, %s10688_s21  ;;  %9366 = vrot.lane.b32.xlu1 %v9365_v42, %s10694_s16 }
0x1226   :  { %v9252_v39 = vpop.permute.xlu0 %9251  ;;  %v9257_v6 = vpop.permute.xlu1 %9256 }
0x1227   :  { %v9254_v55 = vunpack.i.h.bf16 %v9252_v39  ;;  %v9253_v47 = vunpack.i.l.bf16 %v9252_v39  ;;  %v9259_v52 = vunpack.i.h.bf16 %v9257_v6  ;;  %v9258_v18 = vunpack.i.l.bf16 %v9257_v6 }
0x1229   :  { %v4543_v36 = vsel %vm74_vm0, %v12479_v3, %v9254_v55  ;;  %v4542_v26 = vsel %vm74_vm0, %v4354_v4, %v9253_v47  ;;  %v4593_v3 = vpack.c.bf16 %v12548_v33, %v12518_v50 }
0x122a   :  { %v9262_v29 = vpop.permute.xlu0 %9261  ;;  %v9267_v48 = vpop.permute.xlu1 %9266  ;;  %v4559_v62 = vsel %vm525_vm1, %v4543_v36, %v9259_v52  ;;  %v4558_v5 = vsel %vm525_vm1, %v4542_v26, %v9258_v18 }
0x122b   :  { %v9264_v15 = vunpack.i.h.bf16 %v9262_v29  ;;  %v9263_v34 = vunpack.i.l.bf16 %v9262_v29  ;;  %v9269_v1 = vunpack.i.h.bf16 %v9267_v48  ;;  %v9268_v16 = vunpack.i.l.bf16 %v9267_v48 }
0x122d   :  { %v4574_v43 = vsel %vm542_vm2, %v4558_v5, %v9263_v34  ;;  %v4575_v2 = vsel %vm542_vm2, %v4559_v62, %v9264_v15  ;;  %v4545_v4 = vsel %vm74_vm0, %v12485_v37, %v9269_v1  ;;  %v4544_v39 = vsel %vm74_vm0, %v12483_v23, %v9268_v16 }
0x122e   :  { %v9272_v61 = vpop.permute.xlu0 %9271  ;;  %v9277_v58 = vpop.permute.xlu1 %9276  ;;  %v4590_v19 = vpack.c.bf16 %v4575_v2, %v4574_v43  ;;  %v4595_v62 = vpack.c.bf16 %v12560_v57, %v12554_v10 }
0x122f   :  { %v9274_v40 = vunpack.i.h.bf16 %v9272_v61  ;;  %v9273_v46 = vunpack.i.l.bf16 %v9272_v61  ;;  %v9279_v28 = vunpack.i.h.bf16 %v9277_v58  ;;  %v9278_v42 = vunpack.i.l.bf16 %v9277_v58 }
0x1230   :  { %4749 = vmatmul.mubr.bf16.vlgmr.msra.gmra.mrb[104].mxu1 %v4590_v19 }
0x1231   :  { %8175 = vmatprep.mubr.msk.bf16.mxu1 %vm74_vm0, %v4593_v3  ;;  %v4560_v6 = vsel %vm525_vm1, %v4544_v39, %v9273_v46  ;;  %v4561_v55 = vsel %vm525_vm1, %v4545_v4, %v9274_v40  ;;  %v4376_v3 = vld [vmem:[#allocation2 + $0x58] sm:$0xff] }
0x1232   :  { %v9282_v47 = vpop.permute.xlu0 %9281  ;;  %v9287_v52 = vpop.permute.xlu1 %9286  ;;  %v4576_v26 = vsel %vm542_vm2, %v4560_v6, %v9278_v42  ;;  %v4577_v29 = vsel %vm542_vm2, %v4561_v55, %v9279_v28  ;;  %v4597_v28 = vpack.c.bf16 %v4376_v3, %v12562_v14 }
0x1233   :  { %v9284_v18 = vunpack.i.h.bf16 %v9282_v47  ;;  %v9283_v36 = vunpack.i.l.bf16 %v9282_v47  ;;  %v9289_v48 = vunpack.i.h.bf16 %v9287_v52  ;;  %v9288_v37 = vunpack.i.l.bf16 %v9287_v52 }
0x1234   :  { %v4592_v23 = vpack.c.bf16 %v4577_v29, %v4576_v26 }
0x1235   :  { %v4547_v5 = vsel %vm74_vm0, %v12487_v59, %v9284_v18  ;;  %v4546_v1 = vsel %vm74_vm0, %v12481_v25, %v9283_v36 }
0x1236   :  { %v9292_v15 = vpop.permute.xlu0 %9291  ;;  %v9297_v34 = vpop.permute.xlu1 %9296  ;;  %v4562_v58 = vsel %vm525_vm1, %v4546_v1, %v9288_v37  ;;  %v4563_v19 = vsel %vm525_vm1, %v4547_v5, %v9289_v48 }
0x1237   :  { %v9294_v16 = vunpack.i.h.bf16 %v9292_v15  ;;  %v9293_v43 = vunpack.i.l.bf16 %v9292_v15  ;;  %v9299_v40 = vunpack.i.h.bf16 %v9297_v34  ;;  %v9298_v10 = vunpack.i.l.bf16 %v9297_v34 }
0x1238   :  { %4757 = vmatmul.mubr.bf16.gmra.mrb[108].mxu1 %v4592_v23 }
0x1239   :  { %8176 = vmatprep.mubr.msk.bf16.mxu1 %vm74_vm0, %v4595_v62  ;;  %v4578_v57 = vsel %vm542_vm2, %v4562_v58, %v9293_v43  ;;  %v4579_v59 = vsel %vm542_vm2, %v4563_v19, %v9294_v16  ;;  %v4549_v6 = vsel %vm74_vm0, %v12548_v33, %v9299_v40  ;;  %v4548_v55 = vsel %vm74_vm0, %v12518_v50, %v9298_v10  ;;  %v4362_v33 = vld [vmem:[#allocation2 + $0x60] sm:$0xff] }
0x123a   :  { %v9302_v2 = vpop.permute.xlu0 %9301  ;;  %v9307_v61 = vpop.permute.xlu1 %9306  ;;  %v4594_v39 = vpack.c.bf16 %v4579_v59, %v4578_v57  ;;  %v4599_v62 = vpack.c.bf16 %v12588_v35, %v12582_v38 }
0x123b   :  { %v9304_v46 = vunpack.i.h.bf16 %v9302_v2  ;;  %v9303_v25 = vunpack.i.l.bf16 %v9302_v2  ;;  %v9309_v47 = vunpack.i.h.bf16 %v9307_v61  ;;  %v9308_v52 = vunpack.i.l.bf16 %v9307_v61 }
0x123d   :  { %v4564_v18 = vsel %vm525_vm1, %v4548_v55, %v9303_v25  ;;  %v4565_v36 = vsel %vm525_vm1, %v4549_v6, %v9304_v46 }
0x123e   :  { %v9312_v42 = vpop.permute.xlu0 %9311  ;;  %v9317_v4 = vpop.permute.xlu1 %9316  ;;  %v4580_v48 = vsel %vm542_vm2, %v4564_v18, %v9308_v52  ;;  %v4581_v37 = vsel %vm542_vm2, %v4565_v36, %v9309_v47 }
0x123f   :  { %v9314_v14 = vunpack.i.h.bf16 %v9312_v42  ;;  %v9313_v29 = vunpack.i.l.bf16 %v9312_v42  ;;  %v9319_v34 = vunpack.i.h.bf16 %v9317_v4  ;;  %v9318_v50 = vunpack.i.l.bf16 %v9317_v4 }
0x1240   :  { %4765 = vmatmul.mubr.bf16.gmra.mrb[112].mxu1 %v4594_v39  ;;  %v4596_v23 = vpack.c.bf16 %v4581_v37, %v4580_v48 }
0x1241   :  { %8177 = vmatprep.mubr.msk.bf16.mxu1 %vm74_vm0, %v4597_v28  ;;  %v4551_v5 = vsel %vm74_vm0, %v12570_v20, %v9314_v14  ;;  %v4550_v1 = vsel %vm74_vm0, %v4362_v33, %v9313_v29  ;;  %v4601_v28 = vpack.c.bf16 %v12598_v17, %v12590_v8  ;;  %v4603_v33 = vpack.c.bf16 %v12610_v12, %v12604_v44 }
0x1242   :  { %v9322_v26 = vpop.permute.xlu0 %9321  ;;  %v9327_v15 = vpop.permute.xlu1 %9326  ;;  %v4566_v58 = vsel %vm525_vm1, %v4550_v1, %v9318_v50  ;;  %v4567_v19 = vsel %vm525_vm1, %v4551_v5, %v9319_v34 }
0x1243   :  { %v9324_v16 = vunpack.i.h.bf16 %v9322_v26  ;;  %v9323_v43 = vunpack.i.l.bf16 %v9322_v26  ;;  %v9329_v3 = vunpack.i.h.bf16 %v9327_v15  ;;  %v9328_v40 = vunpack.i.l.bf16 %v9327_v15 }
0x1245   :  { %v4582_v10 = vsel %vm542_vm2, %v4566_v58, %v9323_v43  ;;  %v4583_v57 = vsel %vm542_vm2, %v4567_v19, %v9324_v16  ;;  %v4553_v42 = vsel %vm74_vm0, %v12574_v54, %v9329_v3  ;;  %v4552_v4 = vsel %vm74_vm0, %v12572_v51, %v9328_v40  ;;  %v4377_v16 = vld [vmem:[#allocation2 + $0xb8] sm:$0xff] }
0x1246   :  { %v9332_v2 = vpop.permute.xlu0 %9331  ;;  %v9337_v61 = vpop.permute.xlu1 %9336  ;;  %v4598_v25 = vpack.c.bf16 %v4583_v57, %v4582_v10  ;;  %v4605_v58 = vpack.c.bf16 %v4377_v16, %v12612_v24 }
0x1247   :  { %v9334_v20 = vunpack.i.h.bf16 %v9332_v2  ;;  %v9333_v59 = vunpack.i.l.bf16 %v9332_v2  ;;  %v9339_v39 = vunpack.i.h.bf16 %v9337_v61  ;;  %v9338_v6 = vunpack.i.l.bf16 %v9337_v61 }
0x1248   :  { %4773 = vmatmul.mubr.bf16.gmra.mrb[116].mxu1 %v4596_v23 }
0x1249   :  { %8178 = vmatprep.mubr.msk.bf16.mxu1 %vm74_vm0, %v4599_v62  ;;  %v4568_v47 = vsel %vm525_vm1, %v4552_v4, %v9333_v59  ;;  %v4569_v52 = vsel %vm525_vm1, %v4553_v42, %v9334_v20 }
0x124a   :  { %v9342_v46 = vpop.permute.xlu0 %9341  ;;  %v9347_v55 = vpop.permute.xlu1 %9346  ;;  %v4584_v14 = vsel %vm542_vm2, %v4568_v47, %v9338_v6  ;;  %v4585_v54 = vsel %vm542_vm2, %v4569_v52, %v9339_v39 }
0x124b   :  { %v9344_v18 = vunpack.i.h.bf16 %v9342_v46  ;;  %v9343_v36 = vunpack.i.l.bf16 %v9342_v46  ;;  %v9349_v29 = vunpack.i.h.bf16 %v9347_v55  ;;  %v9348_v48 = vunpack.i.l.bf16 %v9347_v55 }
0x124c   :  { %v4600_v37 = vpack.c.bf16 %v4585_v54, %v4584_v14 }
0x124d   :  { %v4555_v15 = vsel %vm74_vm0, %v12588_v35, %v9344_v18  ;;  %v4554_v34 = vsel %vm74_vm0, %v12582_v38, %v9343_v36 }
0x124e   :  { %v9352_v26 = vpop.permute.xlu0 %9351  ;;  %v9357_v51 = vpop.permute.xlu1 %9356  ;;  %v4570_v5 = vsel %vm525_vm1, %v4554_v34, %v9348_v48  ;;  %v4571_v1 = vsel %vm525_vm1, %v4555_v15, %v9349_v29 }
0x124f   :  { %v9354_v50 = vunpack.i.h.bf16 %v9352_v26  ;;  %v9353_v23 = vunpack.i.l.bf16 %v9352_v26  ;;  %v9359_v43 = vunpack.i.h.bf16 %v9357_v51  ;;  %v9358_v2 = vunpack.i.l.bf16 %v9357_v51 }
0x1250   :  { %4781 = vmatmul.mubr.bf16.gmra.mrb[120].mxu1 %v4598_v25 }
0x1251   :  { %8179 = vmatprep.mubr.msk.bf16.mxu1 %vm74_vm0, %v4601_v28  ;;  %v4586_v44 = vsel %vm542_vm2, %v4570_v5, %v9353_v23  ;;  %v4587_v35 = vsel %vm542_vm2, %v4571_v1, %v9354_v50  ;;  %v4557_v3 = vsel %vm74_vm0, %v12598_v17, %v9359_v43  ;;  %v4556_v40 = vsel %vm74_vm0, %v12590_v8, %v9358_v2  ;;  %v12706_v17 = vld [vmem:[%s13884_s3 + $0x4] ss:$0 sm:$0xff] }
0x1252   :  { %v9362_v62 = vpop.permute.xlu0 %9361  ;;  %v9367_v38 = vpop.permute.xlu1 %9366  ;;  %v4602_v19 = vpack.c.bf16 %v4587_v35, %v4586_v44  ;;  %v9806_v43 = vld [vmem:[%s13883_s2 + $0x40] sm:$0xff]  }
0x1253   :  { %v9364_v12 = vunpack.i.h.bf16 %v9362_v62  ;;  %v9363_v61 = vunpack.i.l.bf16 %v9362_v62  ;;  %v9369_v10 = vunpack.i.h.bf16 %v9367_v38  ;;  %v9368_v57 = vunpack.i.l.bf16 %v9367_v38  ;;  %8608 = vmatprep.subr.bf16.mxu0 %v9806_v43 }
0x1254   :  { %8609 = vmatpush3.bf16.msra.mxu0 %v9806_v43 }
0x1255   :  { %v4572_v20 = vsel %vm525_vm1, %v4556_v40, %v9363_v61  ;;  %v4573_v59 = vsel %vm525_vm1, %v4557_v3, %v9364_v12 }
0x1256   :  { %v4588_v46 = vsel %vm542_vm2, %v4572_v20, %v9368_v57  ;;  %v4589_v24 = vsel %vm542_vm2, %v4573_v59, %v9369_v10  ;;  %v9807_v20 = vld [vmem:[%s13883_s2 + $0x48] sm:$0xff]  }
0x1257   :  { %v4604_v25 = vpack.c.bf16 %v4589_v24, %v4588_v46  ;;  %8610 = vmatprep.subr.bf16.mxu0 %v9807_v20 }
0x1258   :  { %4789 = vmatmul.mubr.bf16.gmra.mrb[124].mxu1 %v4600_v37  ;;  %8611 = vmatpush3.bf16.msra.mxu0 %v9807_v20 }
0x1259   :  { %8180 = vmatprep.mubr.msk.bf16.mxu1 %vm74_vm0, %v4603_v33  ;;  %5577 = vmatprep.subr.bf16.mxu0 %v10691_v0 }
0x1260   :  { %4797 = vmatmul.mubr.bf16.gmra.mrb[128].mxu1 %v4602_v19 }
0x1261   :  { %8181 = vmatprep.mubr.msk.bf16.mxu1 %vm74_vm0, %v4605_v58 }
0x1268   :  { %4805 = vmatmul.mubr.bf16.gmra.mrb[132].mxu1 %v4604_v25 }
0x1303   :  { %v4750_v8 = vpop.f32.mrb[104].mxu1 }
0x1304   :  { %v12709_v28 = vadd.f32 %v12706_v17, %v4750_v8  ;;  %v4752_v42 = vpop.f32.mrb[105].mxu1 }
0x1305   :  { %v4753_v4 = vpop.f32.mrb[106].mxu1 }
0x1306   :  { %v8182_v39 = vmul.f32 -1.442695, %v12709_v28  ;;  %v12713_v6 = vadd.f32 %v12706_v17, %v4753_v4  ;;  %v4755_v55 = vpop.f32.mrb[107].mxu1 }
0x1308   :  { %10228 = vpow2.f32 %v8182_v39  ;;  %v8183_v47 = vmul.f32 -1.442695, %v12713_v6 }
0x130a   :  { %10230 = vpow2.f32 %v8183_v47 }
0x130b   :  { %v4758_v52 = vpop.f32.mrb[108].mxu1 }
0x130c   :  { %v12717_v18 = vadd.f32 %v12706_v17, %v4758_v52  ;;  %v4760_v36 = vpop.f32.mrb[109].mxu1 }
0x130d   :  { %v4761_v26 = vpop.f32.mrb[110].mxu1 }
0x130e   :  { %v8184_v14 = vmul.f32 -1.442695, %v12717_v18  ;;  %v12721_v54 = vadd.f32 %v12706_v17, %v4761_v26  ;;  %v4763_v29 = vpop.f32.mrb[111].mxu1 }
0x1310   :  { %10232 = vpow2.f32 %v8184_v14  ;;  %v8185_v48 = vmul.f32 -1.442695, %v12721_v54 }
0x1312   :  { %v10229_v51 = vpop.eup %10228  ;;  %10234 = vpow2.f32 %v8185_v48 }
0x1313   :  { %v4877_v37 = vadd.f32 1.0, %v10229_v51  ;;  %v4766_v33 = vpop.f32.mrb[112].mxu1 }
0x1314   :  { %v10231_v15 = vpop.eup %10230  ;;  %v12725_v34 = vadd.f32 %v12706_v17, %v4766_v33  ;;  %v4768_v50 = vpop.f32.mrb[113].mxu1 }
0x1315   :  { %10236 = vrcp.f32 %v4877_v37  ;;  %v4878_v23 = vadd.f32 1.0, %v10231_v15  ;;  %v4769_v62 = vpop.f32.mrb[114].mxu1 }
0x1316   :  { %v8186_v5 = vmul.f32 -1.442695, %v12725_v34  ;;  %v12729_v1 = vadd.f32 %v12706_v17, %v4769_v62  ;;  %v4771_v16 = vpop.f32.mrb[115].mxu1 }
0x1317   :  { %10238 = vrcp.f32 %v4878_v23 }
0x1318   :  { %10240 = vpow2.f32 %v8186_v5  ;;  %v8187_v2 = vmul.f32 -1.442695, %v12729_v1 }
0x131a   :  { %v10233_v44 = vpop.eup %10232  ;;  %10242 = vpow2.f32 %v8187_v2 }
0x131b   :  { %v4879_v35 = vadd.f32 1.0, %v10233_v44  ;;  %v4774_v12 = vpop.f32.mrb[116].mxu1 }
0x131c   :  { %v10235_v61 = vpop.eup %10234  ;;  %v12736_v38 = vadd.f32 %v12706_v17, %v4774_v12  ;;  %v4776_v58 = vpop.f32.mrb[117].mxu1 }
0x131d   :  { %10244 = vrcp.f32 %v4879_v35  ;;  %v4880_v19 = vadd.f32 1.0, %v10235_v61  ;;  %v4777_v3 = vpop.f32.mrb[118].mxu1 }
0x131e   :  { %v8188_v40 = vmul.f32 -1.442695, %v12736_v38  ;;  %v12740_v10 = vadd.f32 %v12706_v17, %v4777_v3  ;;  %v4779_v57 = vpop.f32.mrb[119].mxu1 }
0x131f   :  { %v10237_v59 = vpop.eup %10236  ;;  %10246 = vrcp.f32 %v4880_v19 }
0x1320   :  { %10248 = vpow2.f32 %v8188_v40  ;;  %v8189_v46 = vmul.f32 -1.442695, %v12740_v10  ;;  %4941 = vrot.lane.b32.xlu0 %v10237_v59, %s10694_s16 }
0x1321   :  { %v10239_v24 = vpop.eup %10238 }
0x1322   :  { %v10241_v25 = vpop.eup %10240  ;;  %10250 = vpow2.f32 %v8189_v46  ;;  %4943 = vrot.lane.b32.xlu1 %v10239_v24, %s10694_s16 }
0x1323   :  { %v4881_v8 = vadd.f32 1.0, %v10241_v25  ;;  %v4782_v42 = vpop.f32.mrb[120].mxu1 }
0x1324   :  { %v10243_v4 = vpop.eup %10242  ;;  %v12750_v39 = vadd.f32 %v12706_v17, %v4782_v42  ;;  %v4784_v55 = vpop.f32.mrb[121].mxu1 }
0x1325   :  { %10252 = vrcp.f32 %v4881_v8  ;;  %v4882_v47 = vadd.f32 1.0, %v10243_v4  ;;  %v4785_v52 = vpop.f32.mrb[122].mxu1 }
0x1326   :  { %v8190_v36 = vmul.f32 -1.442695, %v12750_v39  ;;  %v12754_v26 = vadd.f32 %v12706_v17, %v4785_v52  ;;  %v4787_v14 = vpop.f32.mrb[123].mxu1 }
0x1327   :  { %v10245_v29 = vpop.eup %10244  ;;  %10254 = vrcp.f32 %v4882_v47 }
0x1328   :  { %10256 = vpow2.f32 %v8190_v36  ;;  %v8191_v48 = vmul.f32 -1.442695, %v12754_v26  ;;  %4945 = vrot.lane.b32.xlu0 %v10245_v29, %s10694_s16 }
0x1329   :  { %v10247_v51 = vpop.eup %10246 }
0x132a   :  { %v10249_v37 = vpop.eup %10248  ;;  %10258 = vpow2.f32 %v8191_v48  ;;  %4947 = vrot.lane.b32.xlu1 %v10247_v51, %s10694_s16 }
0x132b   :  { %v4883_v33 = vadd.f32 1.0, %v10249_v37  ;;  %v4790_v15 = vpop.f32.mrb[124].mxu1 }
0x132c   :  { %v10251_v50 = vpop.eup %10250  ;;  %v12760_v23 = vadd.f32 %v12706_v17, %v4790_v15  ;;  %v4792_v62 = vpop.f32.mrb[125].mxu1 }
0x132d   :  { %10260 = vrcp.f32 %v4883_v33  ;;  %v4884_v5 = vadd.f32 1.0, %v10251_v50  ;;  %v4793_v16 = vpop.f32.mrb[126].mxu1 }
0x132e   :  { %v8192_v43 = vmul.f32 -1.442695, %v12760_v23  ;;  %v12764_v2 = vadd.f32 %v12706_v17, %v4793_v16  ;;  %v4795_v44 = vpop.f32.mrb[127].mxu1 }
0x132f   :  { %v10253_v35 = vpop.eup %10252  ;;  %10262 = vrcp.f32 %v4884_v5 }
0x1330   :  { %10264 = vpow2.f32 %v8192_v43  ;;  %v8193_v12 = vmul.f32 -1.442695, %v12764_v2  ;;  %4949 = vrot.lane.b32.xlu0 %v10253_v35, %s10694_s16 }
0x1331   :  { %v10255_v61 = vpop.eup %10254 }
0x1332   :  { %v10257_v58 = vpop.eup %10256  ;;  %10266 = vpow2.f32 %v8193_v12  ;;  %4951 = vrot.lane.b32.xlu1 %v10255_v61, %s10694_s16 }
0x1333   :  { %v4885_v19 = vadd.f32 1.0, %v10257_v58  ;;  %v4798_v3 = vpop.f32.mrb[128].mxu1 }
0x1334   :  { %v10259_v40 = vpop.eup %10258  ;;  %v12770_v57 = vadd.f32 %v12706_v17, %v4798_v3  ;;  %v4800_v20 = vpop.f32.mrb[129].mxu1 }
0x1335   :  { %10268 = vrcp.f32 %v4885_v19  ;;  %v4886_v59 = vadd.f32 1.0, %v10259_v40  ;;  %v4801_v46 = vpop.f32.mrb[130].mxu1 }
0x1336   :  { %v8194_v24 = vmul.f32 -1.442695, %v12770_v57  ;;  %v12774_v25 = vadd.f32 %v12706_v17, %v4801_v46  ;;  %v4803_v8 = vpop.f32.mrb[131].mxu1 }
0x1337   :  { %v10261_v42 = vpop.eup %10260  ;;  %10270 = vrcp.f32 %v4886_v59 }
0x1338   :  { %10272 = vpow2.f32 %v8194_v24  ;;  %v8195_v4 = vmul.f32 -1.442695, %v12774_v25  ;;  %4953 = vrot.lane.b32.xlu0 %v10261_v42, %s10694_s16 }
0x1339   :  { %v10263_v55 = vpop.eup %10262 }
0x133a   :  { %v10265_v47 = vpop.eup %10264  ;;  %10274 = vpow2.f32 %v8195_v4  ;;  %4955 = vrot.lane.b32.xlu1 %v10263_v55, %s10694_s16 }
0x133b   :  { %v4887_v52 = vadd.f32 1.0, %v10265_v47  ;;  %v4806_v36 = vpop.f32.mrb[132].mxu1 }
0x133c   :  { %v10267_v14 = vpop.eup %10266  ;;  %v12780_v29 = vadd.f32 %v12706_v17, %v4806_v36  ;;  %v4808_v48 = vpop.f32.mrb[133].mxu1 }
0x133d   :  { %10276 = vrcp.f32 %v4887_v52  ;;  %v4888_v51 = vadd.f32 1.0, %v10267_v14  ;;  %v4809_v37 = vpop.f32.mrb[134].mxu1 }
0x133e   :  { %v8196_v33 = vmul.f32 -1.442695, %v12780_v29  ;;  %v12784_v15 = vadd.f32 %v12706_v17, %v4809_v37  ;;  %v4811_v50 = vpop.f32.mrb[135].mxu1 }
0x133f   :  { %v10269_v62 = vpop.eup %10268  ;;  %10278 = vrcp.f32 %v4888_v51 }
0x1340   :  { %10280 = vpow2.f32 %v8196_v33  ;;  %v8197_v5 = vmul.f32 -1.442695, %v12784_v15  ;;  %4957 = vrot.lane.b32.xlu0 %v10269_v62, %s10694_s16 }
0x1341   :  { %v10271_v16 = vpop.eup %10270 }
0x1342   :  { %v10273_v43 = vpop.eup %10272  ;;  %10282 = vpow2.f32 %v8197_v5  ;;  %4959 = vrot.lane.b32.xlu1 %v10271_v16, %s10694_s16 }
0x1343   :  { %v4889_v44 = vadd.f32 1.0, %v10273_v43 }
0x1344   :  { %v10275_v35 = vpop.eup %10274 }
0x1345   :  { %10284 = vrcp.f32 %v4889_v44  ;;  %v4890_v12 = vadd.f32 1.0, %v10275_v35 }
0x1347   :  { %v10277_v61 = vpop.eup %10276  ;;  %10286 = vrcp.f32 %v4890_v12 }
0x1348   :  { %4961 = vrot.lane.b32.xlu0 %v10277_v61, %s10694_s16 }
0x1349   :  { %v10279_v58 = vpop.eup %10278 }
0x134a   :  { %v10281_v19 = vpop.eup %10280  ;;  %4963 = vrot.lane.b32.xlu1 %v10279_v58, %s10694_s16 }
0x134b   :  { %v4891_v3 = vadd.f32 1.0, %v10281_v19 }
0x134c   :  { %v10283_v40 = vpop.eup %10282 }
0x134d   :  { %10288 = vrcp.f32 %v4891_v3  ;;  %v4892_v20 = vadd.f32 1.0, %v10283_v40 }
0x134f   :  { %v10285_v59 = vpop.eup %10284  ;;  %10290 = vrcp.f32 %v4892_v20 }
0x1350   :  { %4965 = vrot.lane.b32.xlu0 %v10285_v59, %s10694_s16  ;;  %10292 = vtanh.f32 %v12709_v28 }
0x1351   :  { %v10287_v46 = vpop.eup %10286  ;;  %10294 = vtanh.f32 %v12713_v6 }
0x1352   :  { %4967 = vrot.lane.b32.xlu1 %v10287_v46, %s10694_s16  ;;  %10296 = vtanh.f32 %v12717_v18 }
0x1353   :  { %10298 = vtanh.f32 %v12721_v54 }
0x1354   :  { %10300 = vtanh.f32 %v12725_v34 }
0x1355   :  { %10302 = vtanh.f32 %v12729_v1 }
0x1356   :  { %10304 = vtanh.f32 %v12736_v38 }
0x1357   :  { %v10289_v24 = vpop.eup %10288  ;;  %10306 = vtanh.f32 %v12740_v10 }
0x1358   :  { %4969 = vrot.lane.b32.xlu0 %v10289_v24, %s10694_s16  ;;  %10308 = vtanh.f32 %v12750_v39 }
0x1359   :  { %v10291_v8 = vpop.eup %10290  ;;  %10310 = vtanh.f32 %v12754_v26 }
0x135a   :  { %4971 = vrot.lane.b32.xlu1 %v10291_v8, %s10694_s16  ;;  %v10293_v4 = vpop.eup %10292  ;;  %10312 = vtanh.f32 %v12760_v23 }
0x135b   :  { %v10295_v55 = vpop.eup %10294  ;;  %10314 = vtanh.f32 %v12764_v2 }
0x135c   :  { %5031 = vrot.lane.b32.xlu0 %v12706_v17, %s10688_s21  ;;  %v10297_v28 = vpop.eup %10296  ;;  %10316 = vtanh.f32 %v12770_v57 }
0x135d   :  { %v10299_v6 = vpop.eup %10298  ;;  %10318 = vtanh.f32 %v12774_v25 }
0x135e   :  { %v10301_v33 = vpop.eup %10300  ;;  %10320 = vtanh.f32 %v12780_v29 }
0x135f   :  { %v10303_v34 = vpop.eup %10302  ;;  %10322 = vtanh.f32 %v12784_v15  ;;  %v9809_v15 = vld [vmem:[#allocation4 + $0x198] sm:$0xff]  }
0x1360   :  { %v10305_v43 = vpop.eup %10304 }
0x1361   :  { %v10307_v38 = vpop.eup %10306 }
0x1362   :  { %v10309_v58 = vpop.eup %10308 }
0x1363   :  { %v10311_v39 = vpop.eup %10310 }
0x1364   :  { %v10313_v59 = vpop.eup %10312 }
0x1365   :  { %v10315_v23 = vpop.eup %10314 }
0x1392   :  { %v4942_v42 = vpop.permute.xlu0 %4941 }
0x1393   :  { %v4989_v52 = vmul.f32 %v10293_v4, %v4942_v42  ;;  %v10317_v4 = vpop.eup %10316 }
0x1394   :  { %v4944_v47 = vpop.permute.xlu1 %4943  ;;  %v10319_v57 = vpop.eup %10318 }
0x1395   :  { %v4990_v36 = vmul.f32 %v10295_v55, %v4944_v47 }
0x1397   :  { %v5005_v14 = vpack.c.bf16 %v4990_v36, %v4989_v52 }
0x1399   :  { %8612 = vmatprep.mubr.msk.bf16.mxu0 %vm74_vm0, %v5005_v14  ;;  %v10321_v14 = vpop.eup %10320 }
0x139a   :  { %v4946_v17 = vpop.permute.xlu0 %4945 }
0x139b   :  { %v4991_v18 = vmul.f32 %v10297_v28, %v4946_v17  ;;  %v10323_v17 = vpop.eup %10322 }
0x139c   :  { %v4948_v48 = vpop.permute.xlu1 %4947 }
0x139d   :  { %v4992_v51 = vmul.f32 %v10299_v6, %v4948_v48 }
0x139f   :  { %v5006_v54 = vpack.c.bf16 %v4992_v51, %v4991_v18  ;;  %v9808_v18 = vld [vmem:[#allocation4 + $0x190] sm:$0xff]   ;;  %v9810_v51 = vld [vmem:[#allocation4 + $0x1a0] sm:$0xff]  }
0x13a1   :  { %8613 = vmatmul.mubr.msk.bf16.vlgmr.msra.gmra.mrb[104].mxu0 %vm74_vm0, %v5006_v54  ;;  %v9811_v54 = vld [vmem:[#allocation4 + $0x1a8] sm:$0xff]  }
0x13a2   :  { %v4950_v37 = vpop.permute.xlu0 %4949  ;;  %5578 = vmatpush1.bf16.msra.mxu0 %v9808_v18 }
0x13a3   :  { %v4993_v62 = vmul.f32 %v10301_v33, %v4950_v37  ;;  %5579 = vmatprep.subr.bf16.mxu0 %v10691_v0  ;;  %v9812_v37 = vld [vmem:[#allocation4 + $0x1b0] sm:$0xff]   ;;  %v9813_v33 = vld [vmem:[#allocation4 + $0x1b8] sm:$0xff]  }
0x13a4   :  { %v4952_v50 = vpop.permute.xlu1 %4951 }
0x13a5   :  { %v4994_v5 = vmul.f32 %v10303_v34, %v4952_v50  ;;  %v9814_v34 = vld [vmem:[#allocation4 + $0x1c0] sm:$0xff]   ;;  %v9815_v50 = vld [vmem:[#allocation4 + $0x1c8] sm:$0xff]  }
0x13a6   :  { %5580 = vmatpush1.bf16.msra.mxu0 %v9809_v15 }
0x13a7   :  { %v5007_v1 = vpack.c.bf16 %v4994_v5, %v4993_v62  ;;  %5581 = vmatprep.subr.bf16.mxu0 %v10691_v0 }
0x13a9   :  { %8616 = vmatprep.mubr.msk.bf16.mxu0 %vm74_vm0, %v5007_v1 }
0x13aa   :  { %v4954_v16 = vpop.permute.xlu0 %4953  ;;  %5582 = vmatpush1.bf16.msra.mxu0 %v9810_v51 }
0x13ab   :  { %v4995_v35 = vmul.f32 %v10305_v43, %v4954_v16  ;;  %5583 = vmatprep.subr.bf16.mxu0 %v10691_v0 }
0x13ac   :  { %v4956_v44 = vpop.permute.xlu1 %4955 }
0x13ad   :  { %v4996_v12 = vmul.f32 %v10307_v38, %v4956_v44 }
0x13ae   :  { %5584 = vmatpush1.bf16.msra.mxu0 %v9811_v54 }
0x13af   :  { %v5008_v10 = vpack.c.bf16 %v4996_v12, %v4995_v35  ;;  %5585 = vmatprep.subr.bf16.mxu0 %v10691_v0 }
0x13b1   :  { %8617 = vmatmul.mubr.msk.bf16.gmra.mrb[108].mxu0 %vm74_vm0, %v5008_v10 }
0x13b2   :  { %v4958_v61 = vpop.permute.xlu0 %4957  ;;  %5586 = vmatpush1.bf16.msra.mxu0 %v9812_v37 }
0x13b3   :  { %v4997_v3 = vmul.f32 %v10309_v58, %v4958_v61  ;;  %5587 = vmatprep.subr.bf16.mxu0 %v10691_v0 }
0x13b4   :  { %v4960_v19 = vpop.permute.xlu1 %4959 }
0x13b5   :  { %v4998_v40 = vmul.f32 %v10311_v39, %v4960_v19  ;;  %v9817_v39 = vld [vmem:[#allocation4 + $0x1d8] sm:$0xff]  }
0x13b6   :  { %5588 = vmatpush1.bf16.msra.mxu0 %v9813_v33 }
0x13b7   :  { %v5009_v26 = vpack.c.bf16 %v4998_v40, %v4997_v3  ;;  %5589 = vmatprep.subr.bf16.mxu0 %v10691_v0 }
0x13b9   :  { %8620 = vmatprep.mubr.msk.bf16.mxu0 %vm74_vm0, %v5009_v26 }
0x13ba   :  { %v4962_v20 = vpop.permute.xlu0 %4961  ;;  %5590 = vmatpush1.bf16.msra.mxu0 %v9814_v34 }
0x13bb   :  { %v4999_v24 = vmul.f32 %v10313_v59, %v4962_v20  ;;  %5591 = vmatprep.subr.bf16.mxu0 %v10691_v0 }
0x13bc   :  { %v4964_v46 = vpop.permute.xlu1 %4963 }
0x13bd   :  { %v5000_v8 = vmul.f32 %v10315_v23, %v4964_v46 }
0x13be   :  { %5592 = vmatpush1.bf16.msra.mxu0 %v9815_v50 }
0x13bf   :  { %v5010_v2 = vpack.c.bf16 %v5000_v8, %v4999_v24  ;;  %5593 = vmatprep.subr.bf16.mxu0 %v10691_v0 }
0x13c1   :  { %8621 = vmatmul.mubr.msk.bf16.gmra.mrb[112].mxu0 %vm74_vm0, %v5010_v2 }
0x13c2   :  { %v4966_v42 = vpop.permute.xlu0 %4965 }
0x13c3   :  { %v5001_v47 = vmul.f32 %v10317_v4, %v4966_v42 }
0x13c4   :  { %v4968_v55 = vpop.permute.xlu1 %4967 }
0x13c5   :  { %v5002_v52 = vmul.f32 %v10319_v57, %v4968_v55 }
0x13c7   :  { %v5011_v25 = vpack.c.bf16 %v5002_v52, %v5001_v47 }
0x13c9   :  { %8624 = vmatprep.mubr.msk.bf16.mxu0 %vm74_vm0, %v5011_v25 }
0x13ca   :  { %v4970_v36 = vpop.permute.xlu0 %4969 }
0x13cb   :  { %v5003_v6 = vmul.f32 %v10321_v14, %v4970_v36 }
0x13cc   :  { %v4972_v28 = vpop.permute.xlu1 %4971 }
0x13cd   :  { %v5004_v48 = vmul.f32 %v10323_v17, %v4972_v28 }
0x13ce   :  { %v12829_v62 = vpop.permute.xlu0 %5031 }
0x13cf   :  { %v5012_v29 = vpack.c.bf16 %v5004_v48, %v5003_v6 }
0x13d1   :  { %8625 = vmatmul.mubr.msk.bf16.gmra.mrb[116].mxu0 %vm74_vm0, %v5012_v29 }
0x1474   :  { %v8614_v5 = vpop.f32.mrb[104].mxu0 }
0x1475   :  { %v5101_v1 = vadd.f32 %v8614_v5, %v12829_v62  ;;  %v5092_v16 = vpop.f32.mrb[105].mxu0 }
0x1476   :  { %v5093_v43 = vadd.f32 %v5092_v16, %v12829_v62  ;;  %v8615_v38 = vpop.f32.mrb[106].mxu0 }
0x1477   :  { %v12834_v44 = vadd.f32 %v5101_v1, %v12445_v56  ;;  %v5104_v35 = vadd.f32 %v8615_v38, %v12829_v62  ;;  %v5095_v12 = vpop.f32.mrb[107].mxu0 }
0x1478   :  { %v12838_v10 = vadd.f32 %v5093_v43, %v12439_v45  ;;  %v5096_v61 = vadd.f32 %v5095_v12, %v12829_v62  ;;  %v9816_v45 = vld [vmem:[#allocation4 + $0x1d0] sm:$0xff]  }
0x1479   :  { %5173 = vst.msk [vmem:[#allocation2 + $0x20] sm:$0xff] %vm74_vm0, %v12834_v44  ;;  %v12844_v58 = vadd.f32 %v5104_v35, %v12448_v53  ;;  %5594 = vmatpush1.bf16.msra.mxu0 %v9816_v45 }
0x147a   :  { %5171 = vst.msk [vmem:[#allocation2 + $0x10] sm:$0xff] %vm74_vm0, %v12838_v10  ;;  %v12849_v56 = vadd.f32 %v5096_v61, %v12442_v60  ;;  %5595 = vmatprep.subr.bf16.mxu0 %v10691_v0 }
0x147b   :  { %5174 = vst.msk [vmem:[#allocation2 + $0x28] sm:$0xff] %vm74_vm0, %v12844_v58 }
0x147c   :  { %5172 = vst.msk [vmem:[#allocation2 + $0x18] sm:$0xff] %vm74_vm0, %v12849_v56 }
0x147d   :  { %5596 = vmatpush1.bf16.msra.mxu0 %v9817_v39 }
0x147e   :  { %6480 = vmatprep.subr.bf16.mxu0 %v10691_v0 }
0x1480   :  { %v12856_v19 = vld [vmem:[#allocation2 + $0x20] sm:$0xff] }
0x1481   :  { %v5203_v53 = vld [vmem:[#allocation2 + $0xc] sm:$0xff] }
0x1482   :  { %v12860_v60 = vld [vmem:[#allocation2 + $0x10] sm:$0xff]  ;;  %v5206_v4 = vld [vmem:[#allocation2 + $0x24] sm:$0xff] }
0x1483   :  { %v12858_v3 = vld [vmem:[#allocation2 + $0x18] sm:$0xff] }
0x1484   :  { %v5204_v40 = vld [vmem:[#allocation2 + $0x14] sm:$0xff]  ;;  %v8618_v26 = vpop.f32.mrb[108].mxu0  ;;  %v5452_v20 = vpack.c.bf16 %v12856_v19, %v12858_v3  ;;  %v9375_v23 = vpack.i.bf16 %v12858_v3, %v12860_v60  ;;  %v5205_v8 = vld [vmem:[#allocation2 + $0x1c] sm:$0xff] }
0x1485   :  { %v9370_v59 = vpack.i.bf16 %v5204_v40, %v5203_v53  ;;  %v5117_v46 = vadd.f32 %v8618_v26, %v12829_v62  ;;  %v5108_v24 = vpop.f32.mrb[109].mxu0  ;;  %v9380_v36 = vpack.i.bf16 %v5205_v8, %v5204_v40  ;;  %v9390_v17 = vpack.i.bf16 %v5206_v4, %v5205_v8 }
0x1486   :  { %v5109_v2 = vadd.f32 %v5108_v24, %v12829_v62  ;;  %v8619_v42 = vpop.f32.mrb[110].mxu0  ;;  %8223 = vmatprep.mubr.msk.bf16.mxu0 %vm74_vm0, %v5452_v20  ;;  %9376 = vrot.lane.b32.xlu0 %v9375_v23, %s10688_s21 }
0x1487   :  { %9371 = vrot.lane.b32.xlu1 %v9370_v59, %s10693_s15  ;;  %v12872_v57 = vadd.f32 %v5117_v46, %v12465_v41  ;;  %v5120_v55 = vadd.f32 %v8619_v42, %v12829_v62  ;;  %v5111_v47 = vpop.f32.mrb[111].mxu0  ;;  %v12885_v41 = vld [vmem:[#allocation2 + $0x28] sm:$0xff] }
0x1488   :  { %v12877_v52 = vadd.f32 %v5109_v2, %v12459_v21  ;;  %v5112_v25 = vadd.f32 %v5111_v47, %v12829_v62  ;;  %v9385_v21 = vpack.i.bf16 %v12885_v41, %v12856_v19 }
0x1489   :  { %5177 = vst.msk [vmem:[#allocation2 + $0x40] sm:$0xff] %vm74_vm0, %v12872_v57  ;;  %v12883_v14 = vadd.f32 %v5120_v55, %v12468_v31 }
0x148a   :  { %5175 = vst.msk [vmem:[#allocation2 + $0x30] sm:$0xff] %vm74_vm0, %v12877_v52  ;;  %v12890_v28 = vadd.f32 %v5112_v25, %v12462_v7  ;;  %9391 = vrot.lane.b32.xlu0 %v9390_v17, %s10693_s15 }
0x148b   :  { %9381 = vrot.lane.b32.xlu1 %v9380_v36, %s10694_s16  ;;  %5178 = vst.msk [vmem:[#allocation2 + $0x48] sm:$0xff] %vm74_vm0, %v12883_v14 }
0x148c   :  { %5176 = vst.msk [vmem:[#allocation2 + $0x38] sm:$0xff] %vm74_vm0, %v12890_v28 }
0x148f   :  { %9386 = vrot.lane.b32.xlu1 %v9385_v21, %s10688_s21 }
0x1490   :  { %v12935_v39 = vld [vmem:[#allocation2 + $0x40] sm:$0xff] }
0x1491   :  { %v5207_v31 = vld [vmem:[#allocation2 + $0x2c] sm:$0xff] }
0x1492   :  { %v9395_v6 = vpack.i.bf16 %v5207_v31, %v5206_v4  ;;  %v12905_v54 = vld [vmem:[#allocation2 + $0x30] sm:$0xff]  ;;  %v5210_v43 = vld [vmem:[#allocation2 + $0x44] sm:$0xff] }
0x1493   :  { %v5208_v48 = vld [vmem:[#allocation2 + $0x34] sm:$0xff]  ;;  %v5209_v37 = vld [vmem:[#allocation2 + $0x3c] sm:$0xff]  ;;  %v5221_v53 = vld [vmem:[#allocation2 + $0x4c] sm:$0xff] }
0x1494   :  { %v12901_v7 = vld [vmem:[#allocation2 + $0x38] sm:$0xff]  ;;  %v8622_v29 = vpop.f32.mrb[112].mxu0  ;;  %9396 = vrot.lane.b32.xlu0 %v9395_v6, %s10694_s16  ;;  %v9400_v18 = vpack.i.bf16 %v5208_v48, %v5207_v31  ;;  %v9410_v12 = vpack.i.bf16 %v5209_v37, %v5208_v48 }
0x1495   :  { %v5133_v15 = vadd.f32 %v8622_v29, %v12829_v62  ;;  %v5124_v51 = vpop.f32.mrb[113].mxu0  ;;  %v9405_v50 = vpack.i.bf16 %v12901_v7, %v12905_v54 }
0x1496   :  { %v5125_v33 = vadd.f32 %v5124_v51, %v12829_v62  ;;  %v8623_v34 = vpop.f32.mrb[114].mxu0  ;;  %9401 = vrot.lane.b32.xlu1 %v9400_v18, %s10693_s15 }
0x1497   :  { %v12912_v5 = vadd.f32 %v5133_v15, %v12502_v30  ;;  %v5136_v1 = vadd.f32 %v8623_v34, %v12829_v62  ;;  %v5127_v16 = vpop.f32.mrb[115].mxu0  ;;  %v12925_v30 = vld [vmem:[#allocation2 + $0x48] sm:$0xff] }
0x1498   :  { %v12916_v38 = vadd.f32 %v5125_v33, %v12496_v63  ;;  %v5128_v35 = vadd.f32 %v5127_v16, %v12829_v62  ;;  %9406 = vrot.lane.b32.xlu0 %v9405_v50, %s10688_s21  ;;  %v9420_v63 = vpack.i.bf16 %v5210_v43, %v5209_v37 }
0x1499   :  { %5181 = vst.msk [vmem:[#allocation2 + $0x80] sm:$0xff] %vm74_vm0, %v12912_v5  ;;  %v12923_v61 = vadd.f32 %v5136_v1, %v12507_v49  ;;  %v9415_v49 = vpack.i.bf16 %v12925_v30, %v12935_v39 }
0x149a   :  { %5179 = vst.msk [vmem:[#allocation2 + $0x70] sm:$0xff] %vm74_vm0, %v12916_v38  ;;  %v12930_v45 = vadd.f32 %v5128_v35, %v12499_v27  ;;  %9411 = vrot.lane.b32.xlu1 %v9410_v12, %s10694_s16  ;;  %v9425_v27 = vpack.i.bf16 %v5221_v53, %v5210_v43 }
0x149b   :  { %5182 = vst.msk [vmem:[#allocation2 + $0x88] sm:$0xff] %vm74_vm0, %v12923_v61 }
0x149c   :  { %5180 = vst.msk [vmem:[#allocation2 + $0x78] sm:$0xff] %vm74_vm0, %v12930_v45  ;;  %9421 = vrot.lane.b32.xlu0 %v9420_v63, %s10693_s15 }
0x149e   :  { %9416 = vrot.lane.b32.xlu1 %v9415_v49, %s10688_s21 }
0x14a0   :  { %9426 = vrot.lane.b32.xlu0 %v9425_v27, %s10694_s16  ;;  %v5187_v27 = vld [vmem:[#allocation2 + $0x8] sm:$0xff] }
0x14a1   :  { %v5211_v40 = vld [vmem:[#allocation2 + $0x6c] sm:$0xff] }
0x14a2   :  { %v12944_v20 = vld [vmem:[#allocation2 + $0x70] sm:$0xff]  ;;  %v5214_v4 = vld [vmem:[#allocation2 + $0x84] sm:$0xff] }
0x14a3   :  { %v5212_v26 = vld [vmem:[#allocation2 + $0x74] sm:$0xff]  ;;  %v5213_v42 = vld [vmem:[#allocation2 + $0x7c] sm:$0xff]  ;;  %v12967_v18 = vld [vmem:[#allocation2 + $0x88] sm:$0xff] }
0x14a4   :  { %v12946_v59 = vld [vmem:[#allocation2 + $0x78] sm:$0xff]  ;;  %v8626_v23 = vpop.f32.mrb[116].mxu0  ;;  %v9430_v46 = vpack.i.bf16 %v5212_v26, %v5211_v40  ;;  %v9440_v6 = vpack.i.bf16 %v5213_v42, %v5212_v26  ;;  %v9450_v48 = vpack.i.bf16 %v5214_v4, %v5213_v42 }
0x14a5   :  { %v9435_v24 = vpack.i.bf16 %v12946_v59, %v12944_v20  ;;  %v5149_v8 = vadd.f32 %v8626_v23, %v12829_v62  ;;  %v5140_v2 = vpop.f32.mrb[117].mxu0 }
0x14a6   :  { %v5141_v55 = vadd.f32 %v5140_v2, %v12829_v62  ;;  %v8627_v47 = vpop.f32.mrb[118].mxu0  ;;  %9431 = vrot.lane.b32.xlu1 %v9430_v46, %s10693_s15 }
0x14a7   :  { %9436 = vrot.lane.b32.xlu0 %v9435_v24, %s10688_s21  ;;  %v12955_v25 = vadd.f32 %v5149_v8, %v12529_v11  ;;  %v5152_v36 = vadd.f32 %v8627_v47, %v12829_v62  ;;  %v5143_v17 = vpop.f32.mrb[119].mxu0 }
0x14a8   :  { %v12959_v21 = vadd.f32 %v5141_v55, %v12523_v22  ;;  %v5144_v31 = vadd.f32 %v5143_v17, %v12829_v62  ;;  %v12978_v22 = vld [vmem:[#allocation2 + $0x80] sm:$0xff] }
0x14a9   :  { %5185 = vst.msk [vmem:[#allocation2 + $0xa0] sm:$0xff] %vm74_vm0, %v12955_v25  ;;  %v12965_v29 = vadd.f32 %v5152_v36, %v12534_v13  ;;  %v9445_v13 = vpack.i.bf16 %v12967_v18, %v12978_v22 }
0x14aa   :  { %5183 = vst.msk [vmem:[#allocation2 + $0x90] sm:$0xff] %vm74_vm0, %v12959_v21  ;;  %v12972_v11 = vadd.f32 %v5144_v31, %v12526_v32  ;;  %9441 = vrot.lane.b32.xlu1 %v9440_v6, %s10694_s16 }
0x14ab   :  { %9451 = vrot.lane.b32.xlu0 %v9450_v48, %s10693_s15  ;;  %5186 = vst.msk [vmem:[#allocation2 + $0xa8] sm:$0xff] %vm74_vm0, %v12965_v29 }
0x14ac   :  { %5184 = vst.msk [vmem:[#allocation2 + $0x98] sm:$0xff] %vm74_vm0, %v12972_v11 }
0x14ae   :  { %9446 = vrot.lane.b32.xlu1 %v9445_v13, %s10688_s21 }
0x14b0   :  { %v12997_v12 = vld [vmem:[#allocation2 + $0xa0] sm:$0xff] }
0x14b1   :  { %v5215_v62 = vld [vmem:[#allocation2 + $0x8c] sm:$0xff] }
0x14b2   :  { %v9455_v32 = vpack.i.bf16 %v5215_v62, %v5214_v4  ;;  %v12988_v33 = vld [vmem:[#allocation2 + $0x90] sm:$0xff]  ;;  %v5218_v1 = vld [vmem:[#allocation2 + $0xa4] sm:$0xff] }
0x14b3   :  { %v5216_v15 = vld [vmem:[#allocation2 + $0x94] sm:$0xff]  ;;  %v5217_v34 = vld [vmem:[#allocation2 + $0x9c] sm:$0xff]  ;;  %v12994_v43 = vld [vmem:[#allocation2 + $0xa8] sm:$0xff] }
0x14b4   :  { %v12985_v51 = vld [vmem:[#allocation2 + $0x98] sm:$0xff]  ;;  %9456 = vrot.lane.b32.xlu0 %v9455_v32, %s10694_s16  ;;  %v9460_v37 = vpack.i.bf16 %v5216_v15, %v5215_v62  ;;  %v9470_v16 = vpack.i.bf16 %v5217_v34, %v5216_v15  ;;  %v9480_v35 = vpack.i.bf16 %v5218_v1, %v5217_v34  ;;  %v5222_v63 = vld [vmem:[#allocation2 + $0xac] sm:$0xff]  ;;  %v9475_v53 = vpack.i.bf16 %v12994_v43, %v12997_v12 }
0x14b5   :  { %v9465_v50 = vpack.i.bf16 %v12985_v51, %v12988_v33  ;;  %v9485_v49 = vpack.i.bf16 %v5222_v63, %v5218_v1  ;;  %v5454_v32 = vpack.c.bf16 %v12905_v54, %v12885_v41 }
0x14b6   :  { %9461 = vrot.lane.b32.xlu1 %v9460_v37, %s10693_s15 }
0x14b8   :  { %9466 = vrot.lane.b32.xlu0 %v9465_v50, %s10688_s21 }
0x14ba   :  { %9471 = vrot.lane.b32.xlu1 %v9470_v16, %s10694_s16 }
0x14bc   :  { %9481 = vrot.lane.b32.xlu0 %v9480_v35, %s10693_s15 }
0x14be   :  { %9476 = vrot.lane.b32.xlu1 %v9475_v53, %s10688_s21 }
0x14c0   :  { %9486 = vrot.lane.b32.xlu0 %v9485_v49, %s10694_s16 }
0x14f8   :  { %v9377_v46 = vpop.permute.xlu0 %9376 }
0x14f9   :  { %v9372_v40 = vpop.permute.xlu1 %9371  ;;  %v9379_v24 = vunpack.i.h.bf16 %v9377_v46  ;;  %v9378_v8 = vunpack.i.l.bf16 %v9377_v46 }
0x14fa   :  { %v9374_v26 = vunpack.i.h.bf16 %v9372_v40  ;;  %v9373_v23 = vunpack.i.l.bf16 %v9372_v40 }
0x14fc   :  { %v5403_v2 = vsel %vm74_vm0, %v5187_v27, %v9373_v23  ;;  %v5404_v42 = vsel %vm74_vm0, %v12860_v60, %v9374_v26  ;;  %v9392_v13 = vpop.permute.xlu0 %9391 }
0x14fd   :  { %v9382_v4 = vpop.permute.xlu1 %9381  ;;  %v5419_v36 = vsel %vm525_vm1, %v5403_v2, %v9378_v8  ;;  %v5420_v17 = vsel %vm525_vm1, %v5404_v42, %v9379_v24  ;;  %v9394_v15 = vunpack.i.h.bf16 %v9392_v13  ;;  %v9393_v60 = vunpack.i.l.bf16 %v9392_v13 }
0x14fe   :  { %v9384_v55 = vunpack.i.h.bf16 %v9382_v4  ;;  %v9383_v47 = vunpack.i.l.bf16 %v9382_v4 }
0x14ff   :  { %v5406_v1 = vsel %vm74_vm0, %v12856_v19, %v9394_v15  ;;  %v5405_v16 = vsel %vm74_vm0, %v12858_v3, %v9393_v60  ;;  %v5456_v19 = vpack.c.bf16 %v12935_v39, %v12901_v7 }
0x1500   :  { %v5435_v31 = vsel %vm542_vm2, %v5419_v36, %v9383_v47  ;;  %v5436_v6 = vsel %vm542_vm2, %v5420_v17, %v9384_v55 }
0x1501   :  { %v5451_v48 = vpack.c.bf16 %v5436_v6, %v5435_v31  ;;  %v9387_v62 = vpop.permute.xlu1 %9386 }
0x1502   :  { %v9389_v37 = vunpack.i.h.bf16 %v9387_v62  ;;  %v9388_v34 = vunpack.i.l.bf16 %v9387_v62 }
0x1503   :  { %5610 = vmatmul.mubr.bf16.vlgmr.msra.gmra.mrb[120].mxu0 %v5451_v48 }
0x1504   :  { %8224 = vmatprep.mubr.msk.bf16.mxu0 %vm74_vm0, %v5454_v32  ;;  %v5421_v49 = vsel %vm525_vm1, %v5405_v16, %v9388_v34  ;;  %v5422_v27 = vsel %vm525_vm1, %v5406_v1, %v9389_v37  ;;  %v5223_v32 = vld [vmem:[#allocation2 + $0x50] sm:$0xff] }
0x1506   :  { %v9397_v50 = vpop.permute.xlu0 %9396 }
0x1507   :  { %v9399_v35 = vunpack.i.h.bf16 %v9397_v50  ;;  %v9398_v63 = vunpack.i.l.bf16 %v9397_v50 }
0x1508   :  { %v9402_v53 = vpop.permute.xlu1 %9401 }
0x1509   :  { %v9404_v40 = vunpack.i.h.bf16 %v9402_v53  ;;  %v9403_v26 = vunpack.i.l.bf16 %v9402_v53  ;;  %v5437_v23 = vsel %vm542_vm2, %v5421_v49, %v9398_v63  ;;  %v5438_v46 = vsel %vm542_vm2, %v5422_v27, %v9399_v35 }
0x150a   :  { %v9407_v24 = vpop.permute.xlu0 %9406  ;;  %v5453_v8 = vpack.c.bf16 %v5438_v46, %v5437_v23  ;;  %v5458_v63 = vpack.c.bf16 %v5223_v32, %v12925_v30 }
0x150b   :  { %v5408_v3 = vsel %vm74_vm0, %v12905_v54, %v9404_v40  ;;  %v5407_v2 = vsel %vm74_vm0, %v12885_v41, %v9403_v26  ;;  %v9409_v42 = vunpack.i.h.bf16 %v9407_v24  ;;  %v9408_v4 = vunpack.i.l.bf16 %v9407_v24 }
0x150c   :  { %v9412_v55 = vpop.permute.xlu1 %9411  ;;  %5618 = vmatmul.mubr.bf16.gmra.mrb[124].mxu0 %v5453_v8 }
0x150d   :  { %v9414_v47 = vunpack.i.h.bf16 %v9412_v55  ;;  %v9413_v36 = vunpack.i.l.bf16 %v9412_v55  ;;  %8225 = vmatprep.mubr.msk.bf16.mxu0 %vm74_vm0, %v5456_v19  ;;  %v5423_v17 = vsel %vm525_vm1, %v5407_v2, %v9408_v4  ;;  %v5424_v31 = vsel %vm525_vm1, %v5408_v3, %v9409_v42 }
0x150e   :  { %v9422_v6 = vpop.permute.xlu0 %9421  ;;  %v5460_v2 = vpack.c.bf16 %v12978_v22, %v12946_v59 }
0x150f   :  { %v9424_v48 = vunpack.i.h.bf16 %v9422_v6  ;;  %v9423_v13 = vunpack.i.l.bf16 %v9422_v6  ;;  %v5439_v54 = vsel %vm542_vm2, %v5423_v17, %v9413_v36  ;;  %v5440_v62 = vsel %vm542_vm2, %v5424_v31, %v9414_v47 }
0x1510   :  { %v9417_v41 = vpop.permute.xlu1 %9416  ;;  %v5455_v1 = vpack.c.bf16 %v5440_v62, %v5439_v54  ;;  %v5462_v62 = vpack.c.bf16 %v12988_v33, %v12967_v18 }
0x1511   :  { %v5410_v15 = vsel %vm74_vm0, %v12935_v39, %v9424_v48  ;;  %v5409_v60 = vsel %vm74_vm0, %v12901_v7, %v9423_v13  ;;  %v9419_v37 = vunpack.i.h.bf16 %v9417_v41  ;;  %v9418_v34 = vunpack.i.l.bf16 %v9417_v41  ;;  %v5195_v7 = vld [vmem:[#allocation2 + $0x68] sm:$0xff] }
0x1512   :  { %v9427_v50 = vpop.permute.xlu0 %9426 }
0x1513   :  { %v9429_v16 = vunpack.i.h.bf16 %v9427_v50  ;;  %v9428_v35 = vunpack.i.l.bf16 %v9427_v50  ;;  %v5425_v53 = vsel %vm525_vm1, %v5409_v60, %v9418_v34  ;;  %v5426_v49 = vsel %vm525_vm1, %v5410_v15, %v9419_v37 }
0x1514   :  { %5626 = vmatmul.mubr.bf16.gmra.mrb[128].mxu0 %v5455_v1 }
0x1515   :  { %8226 = vmatprep.mubr.msk.bf16.mxu0 %vm74_vm0, %v5458_v63  ;;  %v5441_v39 = vsel %vm542_vm2, %v5425_v53, %v9428_v35  ;;  %v5442_v27 = vsel %vm542_vm2, %v5426_v49, %v9429_v16 }
0x1516   :  { %v5457_v19 = vpack.c.bf16 %v5442_v27, %v5441_v39 }
0x1518   :  { %v9432_v40 = vpop.permute.xlu1 %9431 }
0x1519   :  { %v9437_v26 = vpop.permute.xlu0 %9436  ;;  %v9434_v23 = vunpack.i.h.bf16 %v9432_v40  ;;  %v9433_v46 = vunpack.i.l.bf16 %v9432_v40 }
0x151a   :  { %v9439_v24 = vunpack.i.h.bf16 %v9437_v26  ;;  %v9438_v8 = vunpack.i.l.bf16 %v9437_v26 }
0x151b   :  { %v5412_v30 = vsel %vm74_vm0, %v12944_v20, %v9434_v23  ;;  %v5411_v3 = vsel %vm74_vm0, %v5195_v7, %v9433_v46 }
0x151c   :  { %v9442_v42 = vpop.permute.xlu1 %9441  ;;  %5634 = vmatmul.mubr.bf16.gmra.mrb[132].mxu0 %v5457_v19  ;;  %v5427_v47 = vsel %vm525_vm1, %v5411_v3, %v9438_v8  ;;  %v5428_v36 = vsel %vm525_vm1, %v5412_v30, %v9439_v24 }
0x151d   :  { %v9444_v4 = vunpack.i.h.bf16 %v9442_v42  ;;  %v9443_v55 = vunpack.i.l.bf16 %v9442_v42  ;;  %8227 = vmatprep.mubr.msk.bf16.mxu0 %vm74_vm0, %v5460_v2  ;;  %v9452_v20 = vpop.permute.xlu0 %9451 }
0x151e   :  { %v9454_v13 = vunpack.i.h.bf16 %v9452_v20  ;;  %v9453_v54 = vunpack.i.l.bf16 %v9452_v20 }
0x151f   :  { %v5443_v17 = vsel %vm542_vm2, %v5427_v47, %v9443_v55  ;;  %v5444_v31 = vsel %vm542_vm2, %v5428_v36, %v9444_v4  ;;  %v5224_v55 = vld [vmem:[#allocation2 + $0xb0] sm:$0xff] }
0x1520   :  { %v9447_v6 = vpop.permute.xlu1 %9446  ;;  %v5459_v48 = vpack.c.bf16 %v5444_v31, %v5443_v17  ;;  %v5414_v60 = vsel %vm74_vm0, %v12978_v22, %v9454_v13  ;;  %v5413_v37 = vsel %vm74_vm0, %v12946_v59, %v9453_v54  ;;  %v5464_v22 = vpack.c.bf16 %v12997_v12, %v12985_v51 }
0x1521   :  { %v9449_v41 = vunpack.i.h.bf16 %v9447_v6  ;;  %v9448_v32 = vunpack.i.l.bf16 %v9447_v6  ;;  %v5466_v54 = vpack.c.bf16 %v5224_v55, %v12994_v43  ;;  %v9819_v43 = vld [vmem:[%s13883_s2 + $0x58] sm:$0xff]  }
0x1523   :  { %v5429_v16 = vsel %vm525_vm1, %v5413_v37, %v9448_v32  ;;  %v5430_v35 = vsel %vm525_vm1, %v5414_v60, %v9449_v41  ;;  %v13094_v60 = vld [vmem:[%s13884_s3 + $0x5] ss:$0 sm:$0xff] }
0x1524   :  { %5642 = vmatmul.mubr.bf16.gmra.mrb[136].mxu0 %v5459_v48 }
0x1525   :  { %8228 = vmatprep.mubr.msk.bf16.mxu0 %vm74_vm0, %v5462_v62 }
0x1526   :  { %v9457_v15 = vpop.permute.xlu0 %9456 }
0x1527   :  { %v9459_v34 = vunpack.i.h.bf16 %v9457_v15  ;;  %v9458_v50 = vunpack.i.l.bf16 %v9457_v15  ;;  %v9818_v15 = vld [vmem:[%s13883_s2 + $0x50] sm:$0xff]  }
0x1528   :  { %v9462_v1 = vpop.permute.xlu1 %9461  ;;  %8628 = vmatprep.subr.bf16.mxu1 %v9818_v15 }
0x1529   :  { %v9464_v63 = vunpack.i.h.bf16 %v9462_v1  ;;  %v9463_v53 = vunpack.i.l.bf16 %v9462_v1  ;;  %v5445_v49 = vsel %vm542_vm2, %v5429_v16, %v9458_v50  ;;  %v5446_v39 = vsel %vm542_vm2, %v5430_v35, %v9459_v34  ;;  %8629 = vmatpush3.bf16.msra.mxu1 %v9818_v15 }
0x152a   :  { %v9467_v27 = vpop.permute.xlu0 %9466  ;;  %v5461_v7 = vpack.c.bf16 %v5446_v39, %v5445_v49  ;;  %8630 = vmatprep.subr.bf16.mxu1 %v9819_v43 }
0x152b   :  { %v5416_v59 = vsel %vm74_vm0, %v12988_v33, %v9464_v63  ;;  %v5415_v40 = vsel %vm74_vm0, %v12967_v18, %v9463_v53  ;;  %v9469_v26 = vunpack.i.h.bf16 %v9467_v27  ;;  %v9468_v23 = vunpack.i.l.bf16 %v9467_v27 }
0x152c   :  { %v9472_v46 = vpop.permute.xlu1 %9471  ;;  %5650 = vmatmul.mubr.bf16.gmra.mrb[140].mxu0 %v5461_v7 }
0x152d   :  { %v9474_v24 = vunpack.i.h.bf16 %v9472_v46  ;;  %v9473_v8 = vunpack.i.l.bf16 %v9472_v46  ;;  %8229 = vmatprep.mubr.msk.bf16.mxu0 %vm74_vm0, %v5464_v22  ;;  %v5431_v19 = vsel %vm525_vm1, %v5415_v40, %v9468_v23  ;;  %v5432_v30 = vsel %vm525_vm1, %v5416_v59, %v9469_v26  ;;  %8631 = vmatpush3.bf16.msra.mxu1 %v9819_v43 }
0x152e   :  { %v9482_v3 = vpop.permute.xlu0 %9481 }
0x152f   :  { %v9484_v2 = vunpack.i.h.bf16 %v9482_v3  ;;  %v9483_v42 = vunpack.i.l.bf16 %v9482_v3  ;;  %v5447_v33 = vsel %vm542_vm2, %v5431_v19, %v9473_v8  ;;  %v5448_v4 = vsel %vm542_vm2, %v5432_v30, %v9474_v24 }
0x1530   :  { %v9477_v18 = vpop.permute.xlu1 %9476  ;;  %v5463_v6 = vpack.c.bf16 %v5448_v4, %v5447_v33 }
0x1531   :  { %v5418_v47 = vsel %vm74_vm0, %v12997_v12, %v9484_v2  ;;  %v5417_v36 = vsel %vm74_vm0, %v12985_v51, %v9483_v42  ;;  %v9479_v17 = vunpack.i.h.bf16 %v9477_v18  ;;  %v9478_v31 = vunpack.i.l.bf16 %v9477_v18 }
0x1532   :  { %v9487_v20 = vpop.permute.xlu0 %9486 }
0x1533   :  { %v9489_v48 = vunpack.i.h.bf16 %v9487_v20  ;;  %v9488_v13 = vunpack.i.l.bf16 %v9487_v20  ;;  %v5433_v62 = vsel %vm525_vm1, %v5417_v36, %v9478_v31  ;;  %v5434_v41 = vsel %vm525_vm1, %v5418_v47, %v9479_v17 }
0x1534   :  { %5658 = vmatmul.mubr.bf16.gmra.mrb[144].mxu0 %v5463_v6 }
0x1535   :  { %8230 = vmatprep.mubr.msk.bf16.mxu0 %vm74_vm0, %v5466_v54  ;;  %v5449_v12 = vsel %vm542_vm2, %v5433_v62, %v9488_v13  ;;  %v5450_v32 = vsel %vm542_vm2, %v5434_v41, %v9489_v48 }
0x1536   :  { %v5465_v51 = vpack.c.bf16 %v5450_v32, %v5449_v12 }
0x153c   :  { %5666 = vmatmul.mubr.bf16.gmra.mrb[148].mxu0 %v5465_v51 }
0x15d6   :  { %v5611_v37 = vpop.f32.mrb[120].mxu0 }
0x15d7   :  { %v13097_v34 = vadd.f32 %v13094_v60, %v5611_v37  ;;  %v5613_v50 = vpop.f32.mrb[121].mxu0 }
0x15d8   :  { %v5614_v1 = vpop.f32.mrb[122].mxu0 }
0x15d9   :  { %v8231_v16 = vmul.f32 -1.442695, %v13097_v34  ;;  %v13101_v35 = vadd.f32 %v13094_v60, %v5614_v1  ;;  %v5616_v63 = vpop.f32.mrb[123].mxu0 }
0x15db   :  { %10324 = vpow2.f32 %v8231_v16  ;;  %v8232_v53 = vmul.f32 -1.442695, %v13101_v35 }
0x15dd   :  { %10326 = vpow2.f32 %v8232_v53 }
0x15df   :  { %v5619_v49 = vpop.f32.mrb[124].mxu0 }
0x15e0   :  { %v13105_v39 = vadd.f32 %v13094_v60, %v5619_v49  ;;  %v5621_v27 = vpop.f32.mrb[125].mxu0 }
0x15e1   :  { %v5622_v7 = vpop.f32.mrb[126].mxu0 }
0x15e2   :  { %v8233_v22 = vmul.f32 -1.442695, %v13105_v39  ;;  %v13109_v59 = vadd.f32 %v13094_v60, %v5622_v7  ;;  %v5624_v40 = vpop.f32.mrb[127].mxu0 }
0x15e4   :  { %10328 = vpow2.f32 %v8233_v22  ;;  %v8234_v23 = vmul.f32 -1.442695, %v13109_v59 }
0x15e5   :  { %v10325_v26 = vpop.eup %10324 }
0x15e6   :  { %v5738_v46 = vadd.f32 1.0, %v10325_v26  ;;  %10330 = vpow2.f32 %v8234_v23 }
0x15e7   :  { %v10327_v24 = vpop.eup %10326  ;;  %v5627_v19 = vpop.f32.mrb[128].mxu0 }
0x15e8   :  { %10332 = vrcp.f32 %v5738_v46  ;;  %v5739_v8 = vadd.f32 1.0, %v10327_v24  ;;  %v13113_v30 = vadd.f32 %v13094_v60, %v5627_v19  ;;  %v5629_v3 = vpop.f32.mrb[129].mxu0 }
0x15e9   :  { %v5630_v2 = vpop.f32.mrb[130].mxu0 }
0x15ea   :  { %10334 = vrcp.f32 %v5739_v8  ;;  %v8235_v42 = vmul.f32 -1.442695, %v13113_v30  ;;  %v13117_v33 = vadd.f32 %v13094_v60, %v5630_v2  ;;  %v5632_v4 = vpop.f32.mrb[131].mxu0 }
0x15ec   :  { %10336 = vpow2.f32 %v8235_v42  ;;  %v8236_v18 = vmul.f32 -1.442695, %v13117_v33 }
0x15ee   :  { %v10329_v55 = vpop.eup %10328  ;;  %10338 = vpow2.f32 %v8236_v18 }
0x15ef   :  { %v5740_v47 = vadd.f32 1.0, %v10329_v55  ;;  %v5635_v36 = vpop.f32.mrb[132].mxu0 }
0x15f0   :  { %v10331_v17 = vpop.eup %10330  ;;  %v13121_v31 = vadd.f32 %v13094_v60, %v5635_v36  ;;  %v5637_v20 = vpop.f32.mrb[133].mxu0 }
0x15f1   :  { %10340 = vrcp.f32 %v5740_v47  ;;  %v5741_v48 = vadd.f32 1.0, %v10331_v17  ;;  %v5638_v13 = vpop.f32.mrb[134].mxu0 }
0x15f2   :  { %v10333_v6 = vpop.eup %10332  ;;  %v8237_v54 = vmul.f32 -1.442695, %v13121_v31  ;;  %v13125_v62 = vadd.f32 %v13094_v60, %v5638_v13  ;;  %v5640_v41 = vpop.f32.mrb[135].mxu0 }
0x15f3   :  { %5802 = vrot.lane.b32.xlu1 %v10333_v6, %s10694_s16  ;;  %10342 = vrcp.f32 %v5741_v48 }
0x15f4   :  { %v10335_v12 = vpop.eup %10334  ;;  %10344 = vpow2.f32 %v8237_v54  ;;  %v8238_v32 = vmul.f32 -1.442695, %v13125_v62 }
0x15f5   :  { %5804 = vrot.lane.b32.xlu0 %v10335_v12, %s10694_s16 }
0x15f6   :  { %v10337_v51 = vpop.eup %10336  ;;  %10346 = vpow2.f32 %v8238_v32 }
0x15f7   :  { %v5742_v15 = vadd.f32 1.0, %v10337_v51  ;;  %v5643_v43 = vpop.f32.mrb[136].mxu0 }
0x15f8   :  { %v10339_v37 = vpop.eup %10338  ;;  %v13131_v50 = vadd.f32 %v13094_v60, %v5643_v43  ;;  %v5645_v1 = vpop.f32.mrb[137].mxu0 }
0x15f9   :  { %10348 = vrcp.f32 %v5742_v15  ;;  %v5743_v16 = vadd.f32 1.0, %v10339_v37  ;;  %v5646_v63 = vpop.f32.mrb[138].mxu0 }
0x15fa   :  { %v8239_v53 = vmul.f32 -1.442695, %v13131_v50  ;;  %v13135_v49 = vadd.f32 %v13094_v60, %v5646_v63  ;;  %v5648_v27 = vpop.f32.mrb[139].mxu0 }
0x15fb   :  { %v10341_v7 = vpop.eup %10340  ;;  %10350 = vrcp.f32 %v5743_v16 }
0x15fc   :  { %10352 = vpow2.f32 %v8239_v53  ;;  %v8240_v22 = vmul.f32 -1.442695, %v13135_v49  ;;  %5806 = vrot.lane.b32.xlu1 %v10341_v7, %s10694_s16 }
0x15fd   :  { %v10343_v40 = vpop.eup %10342 }
0x15fe   :  { %v10345_v26 = vpop.eup %10344  ;;  %10354 = vpow2.f32 %v8240_v22  ;;  %5808 = vrot.lane.b32.xlu0 %v10343_v40, %s10694_s16 }
0x15ff   :  { %v5744_v23 = vadd.f32 1.0, %v10345_v26  ;;  %v5651_v46 = vpop.f32.mrb[140].mxu0 }
0x1600   :  { %v10347_v24 = vpop.eup %10346  ;;  %v13141_v8 = vadd.f32 %v13094_v60, %v5651_v46  ;;  %v5653_v19 = vpop.f32.mrb[141].mxu0 }
0x1601   :  { %10356 = vrcp.f32 %v5744_v23  ;;  %v5745_v3 = vadd.f32 1.0, %v10347_v24  ;;  %v5654_v2 = vpop.f32.mrb[142].mxu0 }
0x1602   :  { %v8241_v42 = vmul.f32 -1.442695, %v13141_v8  ;;  %v13145_v4 = vadd.f32 %v13094_v60, %v5654_v2  ;;  %v5656_v18 = vpop.f32.mrb[143].mxu0 }
0x1603   :  { %v10349_v55 = vpop.eup %10348  ;;  %10358 = vrcp.f32 %v5745_v3 }
0x1604   :  { %10360 = vpow2.f32 %v8241_v42  ;;  %v8242_v47 = vmul.f32 -1.442695, %v13145_v4  ;;  %5810 = vrot.lane.b32.xlu1 %v10349_v55, %s10694_s16 }
0x1605   :  { %v10351_v36 = vpop.eup %10350 }
0x1606   :  { %v10353_v17 = vpop.eup %10352  ;;  %10362 = vpow2.f32 %v8242_v47  ;;  %5812 = vrot.lane.b32.xlu0 %v10351_v36, %s10694_s16 }
0x1607   :  { %v5746_v20 = vadd.f32 1.0, %v10353_v17  ;;  %v5659_v6 = vpop.f32.mrb[144].mxu0 }
0x1608   :  { %v10355_v48 = vpop.eup %10354  ;;  %v13151_v13 = vadd.f32 %v13094_v60, %v5659_v6  ;;  %v5661_v54 = vpop.f32.mrb[145].mxu0 }
0x1609   :  { %10364 = vrcp.f32 %v5746_v20  ;;  %v5747_v41 = vadd.f32 1.0, %v10355_v48  ;;  %v5662_v12 = vpop.f32.mrb[146].mxu0 }
0x160a   :  { %v8243_v32 = vmul.f32 -1.442695, %v13151_v13  ;;  %v13155_v51 = vadd.f32 %v13094_v60, %v5662_v12  ;;  %v5664_v15 = vpop.f32.mrb[147].mxu0 }
0x160b   :  { %v10357_v43 = vpop.eup %10356  ;;  %10366 = vrcp.f32 %v5747_v41 }
0x160c   :  { %10368 = vpow2.f32 %v8243_v32  ;;  %v8244_v37 = vmul.f32 -1.442695, %v13155_v51  ;;  %5814 = vrot.lane.b32.xlu1 %v10357_v43, %s10694_s16 }
0x160d   :  { %v10359_v1 = vpop.eup %10358 }
0x160e   :  { %v10361_v16 = vpop.eup %10360  ;;  %10370 = vpow2.f32 %v8244_v37  ;;  %5816 = vrot.lane.b32.xlu0 %v10359_v1, %s10694_s16 }
0x160f   :  { %v5748_v63 = vadd.f32 1.0, %v10361_v16  ;;  %v5667_v53 = vpop.f32.mrb[148].mxu0 }
0x1610   :  { %v10363_v27 = vpop.eup %10362  ;;  %v13161_v7 = vadd.f32 %v13094_v60, %v5667_v53  ;;  %v5669_v22 = vpop.f32.mrb[149].mxu0 }
0x1611   :  { %10372 = vrcp.f32 %v5748_v63  ;;  %v5749_v40 = vadd.f32 1.0, %v10363_v27  ;;  %v5670_v26 = vpop.f32.mrb[150].mxu0 }
0x1612   :  { %v8245_v23 = vmul.f32 -1.442695, %v13161_v7  ;;  %v13165_v46 = vadd.f32 %v13094_v60, %v5670_v26  ;;  %v5672_v24 = vpop.f32.mrb[151].mxu0 }
0x1613   :  { %v10365_v19 = vpop.eup %10364  ;;  %10374 = vrcp.f32 %v5749_v40 }
0x1614   :  { %10376 = vpow2.f32 %v8245_v23  ;;  %v8246_v3 = vmul.f32 -1.442695, %v13165_v46  ;;  %5818 = vrot.lane.b32.xlu1 %v10365_v19, %s10694_s16 }
0x1615   :  { %v10367_v2 = vpop.eup %10366 }
0x1616   :  { %v10369_v42 = vpop.eup %10368  ;;  %10378 = vpow2.f32 %v8246_v3  ;;  %5820 = vrot.lane.b32.xlu0 %v10367_v2, %s10694_s16 }
0x1617   :  { %v5750_v18 = vadd.f32 1.0, %v10369_v42 }
0x1618   :  { %v10371_v55 = vpop.eup %10370 }
0x1619   :  { %10380 = vrcp.f32 %v5750_v18  ;;  %v5751_v47 = vadd.f32 1.0, %v10371_v55 }
0x161b   :  { %v10373_v36 = vpop.eup %10372  ;;  %10382 = vrcp.f32 %v5751_v47 }
0x161c   :  { %5822 = vrot.lane.b32.xlu1 %v10373_v36, %s10694_s16 }
0x161d   :  { %v10375_v17 = vpop.eup %10374 }
0x161e   :  { %v10377_v20 = vpop.eup %10376  ;;  %5824 = vrot.lane.b32.xlu0 %v10375_v17, %s10694_s16 }
0x161f   :  { %v5752_v6 = vadd.f32 1.0, %v10377_v20 }
0x1620   :  { %v10379_v48 = vpop.eup %10378 }
0x1621   :  { %10384 = vrcp.f32 %v5752_v6  ;;  %v5753_v54 = vadd.f32 1.0, %v10379_v48 }
0x1623   :  { %v10381_v41 = vpop.eup %10380  ;;  %10386 = vrcp.f32 %v5753_v54 }
0x1624   :  { %5826 = vrot.lane.b32.xlu1 %v10381_v41, %s10694_s16  ;;  %10388 = vtanh.f32 %v13097_v34 }
0x1625   :  { %v10383_v12 = vpop.eup %10382  ;;  %10390 = vtanh.f32 %v13101_v35 }
0x1626   :  { %5828 = vrot.lane.b32.xlu0 %v10383_v12, %s10694_s16  ;;  %10392 = vtanh.f32 %v13105_v39 }
0x1627   :  { %10394 = vtanh.f32 %v13109_v59 }
0x1628   :  { %10396 = vtanh.f32 %v13113_v30 }
0x1629   :  { %10398 = vtanh.f32 %v13117_v33 }
0x162a   :  { %10400 = vtanh.f32 %v13121_v31 }
0x162b   :  { %v10385_v32 = vpop.eup %10384  ;;  %10402 = vtanh.f32 %v13125_v62 }
0x162c   :  { %5830 = vrot.lane.b32.xlu1 %v10385_v32, %s10694_s16  ;;  %10404 = vtanh.f32 %v13131_v50 }
0x162d   :  { %v10387_v15 = vpop.eup %10386  ;;  %10406 = vtanh.f32 %v13135_v49 }
0x162e   :  { %5832 = vrot.lane.b32.xlu0 %v10387_v15, %s10694_s16  ;;  %v10389_v37 = vpop.eup %10388  ;;  %10408 = vtanh.f32 %v13141_v8 }
0x162f   :  { %v10391_v1 = vpop.eup %10390  ;;  %10410 = vtanh.f32 %v13145_v4 }
0x1630   :  { %5892 = vrot.lane.b32.xlu1 %v13094_v60, %s10688_s21  ;;  %v10393_v34 = vpop.eup %10392  ;;  %10412 = vtanh.f32 %v13151_v13 }
0x1631   :  { %v10395_v35 = vpop.eup %10394  ;;  %10414 = vtanh.f32 %v13155_v51 }
0x1632   :  { %v10397_v23 = vpop.eup %10396  ;;  %10416 = vtanh.f32 %v13161_v7 }
0x1633   :  { %v10399_v24 = vpop.eup %10398  ;;  %10418 = vtanh.f32 %v13165_v46  ;;  %v9821_v46 = vld [vmem:[#allocation4 + $0x1e8] sm:$0xff]  }
0x1634   :  { %v10401_v42 = vpop.eup %10400 }
0x1635   :  { %v10403_v31 = vpop.eup %10402 }
0x1636   :  { %v10405_v17 = vpop.eup %10404 }
0x1637   :  { %v10407_v50 = vpop.eup %10406 }
0x1638   :  { %v10409_v41 = vpop.eup %10408 }
0x1639   :  { %v10411_v8 = vpop.eup %10410 }
0x1665   :  { %v5803_v43 = vpop.permute.xlu1 %5802 }
0x1666   :  { %v5850_v63 = vmul.f32 %v10389_v37, %v5803_v43  ;;  %v10413_v37 = vpop.eup %10412 }
0x1667   :  { %v5805_v16 = vpop.permute.xlu0 %5804  ;;  %v10415_v13 = vpop.eup %10414 }
0x1668   :  { %v5851_v53 = vmul.f32 %v10391_v1, %v5805_v16 }
0x166a   :  { %v5866_v27 = vpack.c.bf16 %v5851_v53, %v5850_v63 }
0x166c   :  { %8632 = vmatprep.mubr.msk.bf16.mxu1 %vm74_vm0, %v5866_v27  ;;  %v10417_v27 = vpop.eup %10416 }
0x166e   :  { %v5807_v60 = vpop.permute.xlu1 %5806 }
0x166f   :  { %v5852_v40 = vmul.f32 %v10393_v34, %v5807_v60  ;;  %v10419_v60 = vpop.eup %10418 }
0x1670   :  { %v5809_v22 = vpop.permute.xlu0 %5808 }
0x1671   :  { %v5853_v26 = vmul.f32 %v10395_v35, %v5809_v22 }
0x1673   :  { %v5867_v39 = vpack.c.bf16 %v5853_v26, %v5852_v40  ;;  %v9820_v40 = vld [vmem:[#allocation4 + $0x1e0] sm:$0xff]   ;;  %v9822_v26 = vld [vmem:[#allocation4 + $0x1f0] sm:$0xff]  }
0x1674   :  { %6481 = vmatpush1.bf16.msra.mxu0 %v9820_v40 }
0x1675   :  { %8633 = vmatmul.mubr.msk.bf16.vlgmr.msra.gmra.mrb[136].mxu1 %vm74_vm0, %v5867_v39  ;;  %6482 = vmatprep.subr.bf16.mxu0 %v10691_v0  ;;  %v9823_v39 = vld [vmem:[#allocation4 + $0x1f8] sm:$0xff]  }
0x1676   :  { %v5811_v59 = vpop.permute.xlu1 %5810 }
0x1677   :  { %v5854_v30 = vmul.f32 %v10397_v23, %v5811_v59  ;;  %v9824_v59 = vld [vmem:[#allocation4 + $0x200] sm:$0xff]   ;;  %v9825_v23 = vld [vmem:[#allocation4 + $0x208] sm:$0xff]  }
0x1678   :  { %v5813_v19 = vpop.permute.xlu0 %5812  ;;  %6483 = vmatpush1.bf16.msra.mxu0 %v9821_v46 }
0x1679   :  { %v5855_v3 = vmul.f32 %v10399_v24, %v5813_v19  ;;  %6484 = vmatprep.subr.bf16.mxu0 %v10691_v0  ;;  %v9826_v24 = vld [vmem:[#allocation4 + $0x210] sm:$0xff]   ;;  %v9827_v19 = vld [vmem:[#allocation4 + $0x218] sm:$0xff]  }
0x167b   :  { %v5868_v33 = vpack.c.bf16 %v5855_v3, %v5854_v30 }
0x167c   :  { %6485 = vmatpush1.bf16.msra.mxu0 %v9822_v26 }
0x167d   :  { %8636 = vmatprep.mubr.msk.bf16.mxu1 %vm74_vm0, %v5868_v33  ;;  %6486 = vmatprep.subr.bf16.mxu0 %v10691_v0 }
0x167e   :  { %v5815_v2 = vpop.permute.xlu1 %5814 }
0x167f   :  { %v5856_v55 = vmul.f32 %v10401_v42, %v5815_v2 }
0x1680   :  { %v5817_v18 = vpop.permute.xlu0 %5816  ;;  %6487 = vmatpush1.bf16.msra.mxu0 %v9823_v39 }
0x1681   :  { %v5857_v47 = vmul.f32 %v10403_v31, %v5817_v18  ;;  %6488 = vmatprep.subr.bf16.mxu0 %v10691_v0 }
0x1683   :  { %v5869_v62 = vpack.c.bf16 %v5857_v47, %v5856_v55 }
0x1684   :  { %6489 = vmatpush1.bf16.msra.mxu0 %v9824_v59 }
0x1685   :  { %8637 = vmatmul.mubr.msk.bf16.gmra.mrb[140].mxu1 %vm74_vm0, %v5869_v62  ;;  %6490 = vmatprep.subr.bf16.mxu0 %v10691_v0 }
0x1686   :  { %v5819_v36 = vpop.permute.xlu1 %5818 }
0x1687   :  { %v5858_v6 = vmul.f32 %v10405_v17, %v5819_v36 }
0x1688   :  { %v5821_v20 = vpop.permute.xlu0 %5820  ;;  %6491 = vmatpush1.bf16.msra.mxu0 %v9825_v23 }
0x1689   :  { %v5859_v48 = vmul.f32 %v10407_v50, %v5821_v20  ;;  %6492 = vmatprep.subr.bf16.mxu0 %v10691_v0  ;;  %v9828_v50 = vld [vmem:[#allocation4 + $0x220] sm:$0xff]  }
0x168b   :  { %v5870_v49 = vpack.c.bf16 %v5859_v48, %v5858_v6 }
0x168c   :  { %6493 = vmatpush1.bf16.msra.mxu0 %v9826_v24 }
0x168d   :  { %8640 = vmatprep.mubr.msk.bf16.mxu1 %vm74_vm0, %v5870_v49  ;;  %6494 = vmatprep.subr.bf16.mxu0 %v10691_v0 }
0x168e   :  { %v5823_v54 = vpop.permute.xlu1 %5822 }
0x168f   :  { %v5860_v32 = vmul.f32 %v10409_v41, %v5823_v54 }
0x1690   :  { %v5825_v12 = vpop.permute.xlu0 %5824  ;;  %6495 = vmatpush1.bf16.msra.mxu0 %v9827_v19 }
0x1691   :  { %v5861_v15 = vmul.f32 %v10411_v8, %v5825_v12  ;;  %6496 = vmatprep.subr.bf16.mxu0 %v10691_v0 }
0x1693   :  { %v5871_v4 = vpack.c.bf16 %v5861_v15, %v5860_v32 }
0x1694   :  { %6497 = vmatpush1.bf16.msra.mxu0 %v9828_v50 }
0x1695   :  { %8641 = vmatmul.mubr.msk.bf16.gmra.mrb[144].mxu1 %vm74_vm0, %v5871_v4  ;;  %6498 = vmatprep.subr.bf16.mxu0 %v10691_v0 }
0x1696   :  { %v5827_v43 = vpop.permute.xlu1 %5826 }
0x1697   :  { %v5862_v16 = vmul.f32 %v10413_v37, %v5827_v43 }
0x1698   :  { %v5829_v1 = vpop.permute.xlu0 %5828 }
0x1699   :  { %v5863_v63 = vmul.f32 %v10415_v13, %v5829_v1 }
0x169b   :  { %v5872_v51 = vpack.c.bf16 %v5863_v63, %v5862_v16 }
0x169d   :  { %8644 = vmatprep.mubr.msk.bf16.mxu1 %vm74_vm0, %v5872_v51 }
0x169e   :  { %v5831_v53 = vpop.permute.xlu1 %5830 }
0x169f   :  { %v5864_v35 = vmul.f32 %v10417_v27, %v5831_v53 }
0x16a0   :  { %v5833_v34 = vpop.permute.xlu0 %5832 }
0x16a1   :  { %v5865_v22 = vmul.f32 %v10419_v60, %v5833_v34 }
0x16a2   :  { %v13210_v30 = vpop.permute.xlu1 %5892 }
0x16a3   :  { %v5873_v7 = vpack.c.bf16 %v5865_v22, %v5864_v35 }
0x16a5   :  { %8645 = vmatmul.mubr.msk.bf16.gmra.mrb[148].mxu1 %vm74_vm0, %v5873_v7 }
0x1748   :  { %v8634_v3 = vpop.f32.mrb[136].mxu1 }
0x1749   :  { %v5962_v33 = vadd.f32 %v8634_v3, %v13210_v30  ;;  %v5953_v2 = vpop.f32.mrb[137].mxu1 }
0x174a   :  { %v5954_v42 = vadd.f32 %v5953_v2, %v13210_v30  ;;  %v8635_v31 = vpop.f32.mrb[138].mxu1 }
0x174b   :  { %v13215_v18 = vadd.f32 %v5962_v33, %v12834_v44  ;;  %v5965_v55 = vadd.f32 %v8635_v31, %v13210_v30  ;;  %v5956_v47 = vpop.f32.mrb[139].mxu1 }
0x174c   :  { %v13219_v62 = vadd.f32 %v5954_v42, %v12838_v10  ;;  %v5957_v36 = vadd.f32 %v5956_v47, %v13210_v30  ;;  %v9829_v10 = vld [vmem:[#allocation4 + $0x228] sm:$0xff]  }
0x174d   :  { %6034 = vst.msk [vmem:[#allocation2 + $0x20] sm:$0xff] %vm74_vm0, %v13215_v18  ;;  %v13225_v17 = vadd.f32 %v5965_v55, %v12844_v58  ;;  %6499 = vmatpush1.bf16.msra.mxu0 %v9829_v10 }
0x174e   :  { %6032 = vst.msk [vmem:[#allocation2 + $0x10] sm:$0xff] %vm74_vm0, %v13219_v62  ;;  %v13230_v44 = vadd.f32 %v5957_v36, %v12849_v56 }
0x174f   :  { %6035 = vst.msk [vmem:[#allocation2 + $0x28] sm:$0xff] %vm74_vm0, %v13225_v17 }
0x1750   :  { %6033 = vst.msk [vmem:[#allocation2 + $0x18] sm:$0xff] %vm74_vm0, %v13230_v44 }
0x1755   :  { %v6080_v20 = vld [vmem:[#allocation2 + $0x10] sm:$0xff] }
0x1756   :  { %v6064_v58 = vld [vmem:[#allocation2 + $0xe] sm:$0xff]  ;;  %v6067_v12 = vld [vmem:[#allocation2 + $0x26] sm:$0xff] }
0x1757   :  { %v6081_v6 = vld [vmem:[#allocation2 + $0x18] sm:$0xff]  ;;  %v6098_v40 = vld [vmem:[#allocation2 + $0x22] sm:$0xff] }
0x1758   :  { %v6065_v48 = vld [vmem:[#allocation2 + $0x16] sm:$0xff]  ;;  %v8638_v56 = vpop.f32.mrb[140].mxu1  ;;  %v9495_v54 = vpack.i.bf16 %v6081_v6, %v6080_v20  ;;  %v6066_v43 = vld [vmem:[#allocation2 + $0x1e] sm:$0xff] }
0x1759   :  { %v13237_v49 = vld [vmem:[#allocation2 + $0x14] sm:$0xff]  ;;  %v9490_v41 = vpack.i.bf16 %v6065_v48, %v6064_v58  ;;  %v13239_v8 = vld [vmem:[#allocation2 + $0x1c] sm:$0xff]  ;;  %v5978_v32 = vadd.f32 %v8638_v56, %v13210_v30  ;;  %v5969_v15 = vpop.f32.mrb[141].mxu1  ;;  %v9510_v34 = vpack.i.bf16 %v6067_v12, %v6066_v43 }
0x175a   :  { %v6355_v4 = vpack.c.bf16 %v13239_v8, %v13237_v49  ;;  %v6096_v37 = vld [vmem:[#allocation2 + $0x12] sm:$0xff]  ;;  %v6097_v13 = vld [vmem:[#allocation2 + $0x1a] sm:$0xff]  ;;  %v5970_v1 = vadd.f32 %v5969_v15, %v13210_v30  ;;  %v8639_v16 = vpop.f32.mrb[142].mxu1  ;;  %9496 = vrot.lane.b32.xlu1 %v9495_v54, %s10688_s21 }
0x175b   :  { %9491 = vrot.lane.b32.xlu0 %v9490_v41, %s10693_s15  ;;  %v13248_v63 = vadd.f32 %v5978_v32, %v12872_v57  ;;  %v5981_v51 = vadd.f32 %v8639_v16, %v13210_v30  ;;  %v5972_v53 = vpop.f32.mrb[143].mxu1  ;;  %v9500_v35 = vpack.i.bf16 %v6097_v13, %v6096_v37  ;;  %v6083_v57 = vld [vmem:[#allocation2 + $0x28] sm:$0xff] }
0x175c   :  { %8272 = vmatprep.mubr.msk.bf16.mxu0 %vm74_vm0, %v6355_v4  ;;  %v13253_v27 = vadd.f32 %v5970_v1, %v12877_v52  ;;  %v5973_v60 = vadd.f32 %v5972_v53, %v13210_v30  ;;  %v6082_v52 = vld [vmem:[#allocation2 + $0x20] sm:$0xff] }
0x175d   :  { %6038 = vst.msk [vmem:[#allocation2 + $0x40] sm:$0xff] %vm74_vm0, %v13248_v63  ;;  %v13259_v22 = vadd.f32 %v5981_v51, %v12883_v14  ;;  %v9505_v14 = vpack.i.bf16 %v6083_v57, %v6082_v52 }
0x175e   :  { %6036 = vst.msk [vmem:[#allocation2 + $0x30] sm:$0xff] %vm74_vm0, %v13253_v27  ;;  %v13264_v7 = vadd.f32 %v5973_v60, %v12890_v28  ;;  %9511 = vrot.lane.b32.xlu1 %v9510_v34, %s10693_s15 }
0x175f   :  { %9501 = vrot.lane.b32.xlu0 %v9500_v35, %s10694_s16  ;;  %6039 = vst.msk [vmem:[#allocation2 + $0x48] sm:$0xff] %vm74_vm0, %v13259_v22 }
0x1760   :  { %6037 = vst.msk [vmem:[#allocation2 + $0x38] sm:$0xff] %vm74_vm0, %v13264_v7 }
0x1763   :  { %9506 = vrot.lane.b32.xlu0 %v9505_v14, %s10688_s21 }
0x1764   :  { %v6086_v12 = vld [vmem:[#allocation2 + $0x40] sm:$0xff] }
0x1765   :  { %v6099_v46 = vld [vmem:[#allocation2 + $0x2a] sm:$0xff] }
0x1766   :  { %v9515_v26 = vpack.i.bf16 %v6099_v46, %v6098_v40  ;;  %v6068_v39 = vld [vmem:[#allocation2 + $0x2e] sm:$0xff]  ;;  %v6071_v58 = vld [vmem:[#allocation2 + $0x46] sm:$0xff] }
0x1767   :  { %v6069_v28 = vld [vmem:[#allocation2 + $0x36] sm:$0xff]  ;;  %v6070_v20 = vld [vmem:[#allocation2 + $0x3e] sm:$0xff]  ;;  %v6103_v15 = vld [vmem:[#allocation2 + $0x4a] sm:$0xff] }
0x1768   :  { %v6085_v59 = vld [vmem:[#allocation2 + $0x38] sm:$0xff]  ;;  %v8642_v23 = vpop.f32.mrb[144].mxu1  ;;  %9516 = vrot.lane.b32.xlu1 %v9515_v26, %s10694_s16  ;;  %v9520_v24 = vpack.i.bf16 %v6069_v28, %v6068_v39  ;;  %v6084_v33 = vld [vmem:[#allocation2 + $0x30] sm:$0xff]  ;;  %v6102_v32 = vld [vmem:[#allocation2 + $0x42] sm:$0xff] }
0x1769   :  { %v5994_v19 = vadd.f32 %v8642_v23, %v13210_v30  ;;  %v5985_v3 = vpop.f32.mrb[145].mxu1  ;;  %v6100_v2 = vld [vmem:[#allocation2 + $0x32] sm:$0xff]  ;;  %v6101_v42 = vld [vmem:[#allocation2 + $0x3a] sm:$0xff]  ;;  %v9525_v47 = vpack.i.bf16 %v6085_v59, %v6084_v33  ;;  %v9545_v4 = vpack.i.bf16 %v6103_v15, %v6102_v32 }
0x176a   :  { %v5986_v31 = vadd.f32 %v5985_v3, %v13210_v30  ;;  %v8643_v55 = vpop.f32.mrb[146].mxu1  ;;  %9521 = vrot.lane.b32.xlu0 %v9520_v24, %s10693_s15  ;;  %v9530_v56 = vpack.i.bf16 %v6101_v42, %v6100_v2 }
0x176b   :  { %v13278_v36 = vadd.f32 %v5994_v19, %v12912_v5  ;;  %v5997_v50 = vadd.f32 %v8643_v55, %v13210_v30  ;;  %v5988_v10 = vpop.f32.mrb[147].mxu1  ;;  %v6087_v5 = vld [vmem:[#allocation2 + $0x48] sm:$0xff] }
0x176c   :  { %v13282_v6 = vadd.f32 %v5986_v31, %v12916_v38  ;;  %v5989_v48 = vadd.f32 %v5988_v10, %v13210_v30  ;;  %9526 = vrot.lane.b32.xlu1 %v9525_v47, %s10688_s21  ;;  %v9540_v38 = vpack.i.bf16 %v6071_v58, %v6070_v20 }
0x176d   :  { %6042 = vst.msk [vmem:[#allocation2 + $0x80] sm:$0xff] %vm74_vm0, %v13278_v36  ;;  %v13289_v54 = vadd.f32 %v5997_v50, %v12923_v61  ;;  %v9535_v61 = vpack.i.bf16 %v6087_v5, %v6086_v12 }
0x176e   :  { %6040 = vst.msk [vmem:[#allocation2 + $0x70] sm:$0xff] %vm74_vm0, %v13282_v6  ;;  %v13294_v41 = vadd.f32 %v5989_v48, %v12930_v45  ;;  %9531 = vrot.lane.b32.xlu0 %v9530_v56, %s10694_s16 }
0x176f   :  { %6043 = vst.msk [vmem:[#allocation2 + $0x88] sm:$0xff] %vm74_vm0, %v13289_v54 }
0x1770   :  { %6041 = vst.msk [vmem:[#allocation2 + $0x78] sm:$0xff] %vm74_vm0, %v13294_v41  ;;  %9541 = vrot.lane.b32.xlu1 %v9540_v38, %s10693_s15 }
0x1772   :  { %9536 = vrot.lane.b32.xlu0 %v9535_v61, %s10688_s21 }
0x1774   :  { %9546 = vrot.lane.b32.xlu1 %v9545_v4, %s10694_s16 }
0x1775   :  { %v6088_v45 = vld [vmem:[#allocation2 + $0x70] sm:$0xff] }
0x1776   :  { %v6072_v37 = vld [vmem:[#allocation2 + $0x6e] sm:$0xff]  ;;  %v6075_v53 = vld [vmem:[#allocation2 + $0x86] sm:$0xff] }
0x1777   :  { %v6089_v43 = vld [vmem:[#allocation2 + $0x78] sm:$0xff]  ;;  %v6091_v3 = vld [vmem:[#allocation2 + $0x88] sm:$0xff] }
0x1778   :  { %v6073_v13 = vld [vmem:[#allocation2 + $0x76] sm:$0xff]  ;;  %v8646_v1 = vpop.f32.mrb[148].mxu1  ;;  %v9555_v16 = vpack.i.bf16 %v6089_v43, %v6088_v45  ;;  %v6074_v35 = vld [vmem:[#allocation2 + $0x7e] sm:$0xff] }
0x1779   :  { %v9550_v51 = vpack.i.bf16 %v6073_v13, %v6072_v37  ;;  %v6010_v60 = vadd.f32 %v8646_v1, %v13210_v30  ;;  %v6001_v34 = vpop.f32.mrb[149].mxu1  ;;  %v6104_v57 = vld [vmem:[#allocation2 + $0x72] sm:$0xff]  ;;  %v6105_v52 = vld [vmem:[#allocation2 + $0x7a] sm:$0xff]  ;;  %v9570_v23 = vpack.i.bf16 %v6075_v53, %v6074_v35 }
0x177a   :  { %v6002_v14 = vadd.f32 %v6001_v34, %v13210_v30  ;;  %v8647_v40 = vpop.f32.mrb[150].mxu1  ;;  %9556 = vrot.lane.b32.xlu1 %v9555_v16, %s10688_s21  ;;  %v9560_v24 = vpack.i.bf16 %v6105_v52, %v6104_v57 }
0x177b   :  { %9551 = vrot.lane.b32.xlu0 %v9550_v51, %s10693_s15  ;;  %v13309_v46 = vadd.f32 %v6010_v60, %v12955_v25  ;;  %v6013_v26 = vadd.f32 %v8647_v40, %v13210_v30  ;;  %v6004_v39 = vpop.f32.mrb[151].mxu1  ;;  %v6048_v51 = vld [vmem:[#allocation2 + $0xc] sm:$0xff] }
0x177c   :  { %v13313_v28 = vadd.f32 %v6002_v14, %v12959_v21  ;;  %v6005_v59 = vadd.f32 %v6004_v39, %v13210_v30  ;;  %v6090_v21 = vld [vmem:[#allocation2 + $0x80] sm:$0xff]  ;;  %v6052_v40 = vld [vmem:[#allocation2 + $0x2c] sm:$0xff] }
0x177d   :  { %6046 = vst.msk [vmem:[#allocation2 + $0xa0] sm:$0xff] %vm74_vm0, %v13309_v46  ;;  %v13319_v19 = vadd.f32 %v6013_v26, %v12965_v29  ;;  %v9565_v29 = vpack.i.bf16 %v6091_v3, %v6090_v21  ;;  %v6106_v30 = vld [vmem:[#allocation2 + $0x82] sm:$0xff] }
0x177e   :  { %6044 = vst.msk [vmem:[#allocation2 + $0x90] sm:$0xff] %vm74_vm0, %v13313_v28  ;;  %v13324_v25 = vadd.f32 %v6005_v59, %v12972_v11  ;;  %9571 = vrot.lane.b32.xlu1 %v9570_v23, %s10693_s15  ;;  %v6051_v59 = vld [vmem:[#allocation2 + $0x24] sm:$0xff] }
0x177f   :  { %9561 = vrot.lane.b32.xlu0 %v9560_v24, %s10694_s16  ;;  %6047 = vst.msk [vmem:[#allocation2 + $0xa8] sm:$0xff] %vm74_vm0, %v13319_v19  ;;  %v6357_v21 = vpack.c.bf16 %v6052_v40, %v6051_v59 }
0x1780   :  { %6045 = vst.msk [vmem:[#allocation2 + $0x98] sm:$0xff] %vm74_vm0, %v13324_v25 }
0x1783   :  { %9566 = vrot.lane.b32.xlu0 %v9565_v29, %s10688_s21 }
0x1784   :  { %v6094_v12 = vld [vmem:[#allocation2 + $0xa0] sm:$0xff] }
0x1785   :  { %v6107_v33 = vld [vmem:[#allocation2 + $0x8a] sm:$0xff] }
0x1786   :  { %v9575_v2 = vpack.i.bf16 %v6107_v33, %v6106_v30  ;;  %v6076_v42 = vld [vmem:[#allocation2 + $0x8e] sm:$0xff]  ;;  %v6079_v48 = vld [vmem:[#allocation2 + $0xa6] sm:$0xff] }
0x1787   :  { %v6077_v11 = vld [vmem:[#allocation2 + $0x96] sm:$0xff]  ;;  %v6078_v58 = vld [vmem:[#allocation2 + $0x9e] sm:$0xff]  ;;  %v6095_v5 = vld [vmem:[#allocation2 + $0xa8] sm:$0xff] }
0x1788   :  { %v6093_v31 = vld [vmem:[#allocation2 + $0x98] sm:$0xff]  ;;  %9576 = vrot.lane.b32.xlu1 %v9575_v2, %s10694_s16  ;;  %v9580_v55 = vpack.i.bf16 %v6077_v11, %v6076_v42  ;;  %v6092_v47 = vld [vmem:[#allocation2 + $0x90] sm:$0xff]  ;;  %v9600_v38 = vpack.i.bf16 %v6079_v48, %v6078_v58  ;;  %v6110_v32 = vld [vmem:[#allocation2 + $0xa2] sm:$0xff]  ;;  %v9595_v61 = vpack.i.bf16 %v6095_v5, %v6094_v12 }
0x1789   :  { %v6108_v50 = vld [vmem:[#allocation2 + $0x92] sm:$0xff]  ;;  %v6109_v10 = vld [vmem:[#allocation2 + $0x9a] sm:$0xff]  ;;  %v9585_v20 = vpack.i.bf16 %v6093_v31, %v6092_v47  ;;  %v6111_v15 = vld [vmem:[#allocation2 + $0xaa] sm:$0xff] }
0x178a   :  { %9581 = vrot.lane.b32.xlu0 %v9580_v55, %s10693_s15  ;;  %v9590_v56 = vpack.i.bf16 %v6109_v10, %v6108_v50  ;;  %v9605_v4 = vpack.i.bf16 %v6111_v15, %v6110_v32  ;;  %v6053_v47 = vld [vmem:[#allocation2 + $0x34] sm:$0xff]  ;;  %v6054_v50 = vld [vmem:[#allocation2 + $0x3c] sm:$0xff] }
0x178b   :  { %v6359_v15 = vpack.c.bf16 %v6054_v50, %v6053_v47 }
0x178c   :  { %9586 = vrot.lane.b32.xlu1 %v9585_v20, %s10688_s21 }
0x178e   :  { %9591 = vrot.lane.b32.xlu0 %v9590_v56, %s10694_s16 }
0x1790   :  { %9601 = vrot.lane.b32.xlu1 %v9600_v38, %s10693_s15 }
0x1792   :  { %9596 = vrot.lane.b32.xlu0 %v9595_v61, %s10688_s21 }
0x1794   :  { %9606 = vrot.lane.b32.xlu1 %v9605_v4, %s10694_s16 }
0x17cc   :  { %v9497_v45 = vpop.permute.xlu1 %9496 }
0x17cd   :  { %v9492_v43 = vpop.permute.xlu0 %9491  ;;  %v9499_v1 = vunpack.i.h.bf16 %v9497_v45  ;;  %v9498_v16 = vunpack.i.l.bf16 %v9497_v45 }
0x17ce   :  { %v9494_v37 = vunpack.i.h.bf16 %v9492_v43  ;;  %v9493_v13 = vunpack.i.l.bf16 %v9492_v43 }
0x17d0   :  { %v6306_v53 = vsel %vm74_vm0, %v6048_v51, %v9493_v13  ;;  %v6307_v60 = vsel %vm74_vm0, %v13237_v49, %v9494_v37  ;;  %v9512_v23 = vpop.permute.xlu1 %9511 }
0x17d1   :  { %v9502_v34 = vpop.permute.xlu0 %9501  ;;  %v6322_v52 = vsel %vm525_vm1, %v6306_v53, %v9498_v16  ;;  %v6323_v14 = vsel %vm525_vm1, %v6307_v60, %v9499_v1  ;;  %v9514_v29 = vunpack.i.h.bf16 %v9512_v23  ;;  %v9513_v49 = vunpack.i.l.bf16 %v9512_v23 }
0x17d2   :  { %v9504_v35 = vunpack.i.h.bf16 %v9502_v34  ;;  %v9503_v57 = vunpack.i.l.bf16 %v9502_v34 }
0x17d3   :  { %v6309_v42 = vsel %vm74_vm0, %v6051_v59, %v9514_v29  ;;  %v6308_v11 = vsel %vm74_vm0, %v13239_v8, %v9513_v49 }
0x17d4   :  { %v6338_v26 = vsel %vm542_vm2, %v6322_v52, %v9503_v57  ;;  %v6339_v39 = vsel %vm542_vm2, %v6323_v14, %v9504_v35  ;;  %v6055_v57 = vld [vmem:[#allocation2 + $0x44] sm:$0xff]  ;;  %v6112_v14 = vld [vmem:[#allocation2 + $0x4c] sm:$0xff] }
0x17d5   :  { %v6354_v24 = vpack.c.bf16 %v6339_v39, %v6338_v26  ;;  %v9507_v3 = vpop.permute.xlu0 %9506  ;;  %v6361_v29 = vpack.c.bf16 %v6112_v14, %v6055_v57 }
0x17d6   :  { %v9509_v30 = vunpack.i.h.bf16 %v9507_v3  ;;  %v9508_v33 = vunpack.i.l.bf16 %v9507_v3 }
0x17d7   :  { %6513 = vmatmul.mubr.bf16.vlgmr.msra.gmra.mrb[152].mxu0 %v6354_v24 }
0x17d8   :  { %8273 = vmatprep.mubr.msk.bf16.mxu0 %vm74_vm0, %v6357_v21  ;;  %v6325_v10 = vsel %vm525_vm1, %v6309_v42, %v9509_v30  ;;  %v6324_v20 = vsel %vm525_vm1, %v6308_v11, %v9508_v33  ;;  %v6057_v11 = vld [vmem:[#allocation2 + $0x74] sm:$0xff] }
0x17da   :  { %v9517_v2 = vpop.permute.xlu1 %9516 }
0x17db   :  { %v9519_v31 = vunpack.i.h.bf16 %v9517_v2  ;;  %v9518_v55 = vunpack.i.l.bf16 %v9517_v2 }
0x17dc   :  { %v9522_v58 = vpop.permute.xlu0 %9521 }
0x17dd   :  { %v9524_v48 = vunpack.i.h.bf16 %v9522_v58  ;;  %v9523_v56 = vunpack.i.l.bf16 %v9522_v58  ;;  %v6340_v5 = vsel %vm542_vm2, %v6324_v20, %v9518_v55  ;;  %v6341_v38 = vsel %vm542_vm2, %v6325_v10, %v9519_v31  ;;  %v6058_v55 = vld [vmem:[#allocation2 + $0x7c] sm:$0xff]  ;;  %v6056_v58 = vld [vmem:[#allocation2 + $0x6c] sm:$0xff] }
0x17de   :  { %v9527_v12 = vpop.permute.xlu1 %9526  ;;  %v6356_v32 = vpack.c.bf16 %v6341_v38, %v6340_v5  ;;  %v6363_v38 = vpack.c.bf16 %v6058_v55, %v6057_v11 }
0x17df   :  { %v6311_v8 = vsel %vm74_vm0, %v6053_v47, %v9524_v48  ;;  %v6310_v61 = vsel %vm74_vm0, %v6052_v40, %v9523_v56  ;;  %v9529_v4 = vunpack.i.h.bf16 %v9527_v12  ;;  %v9528_v45 = vunpack.i.l.bf16 %v9527_v12 }
0x17e0   :  { %v9532_v43 = vpop.permute.xlu0 %9531  ;;  %6521 = vmatmul.mubr.bf16.gmra.mrb[156].mxu0 %v6356_v32 }
0x17e1   :  { %v6326_v37 = vsel %vm525_vm1, %v6310_v61, %v9528_v45  ;;  %v6327_v13 = vsel %vm525_vm1, %v6311_v8, %v9529_v4  ;;  %v9534_v1 = vunpack.i.h.bf16 %v9532_v43  ;;  %v9533_v16 = vunpack.i.l.bf16 %v9532_v43  ;;  %8274 = vmatprep.mubr.msk.bf16.mxu0 %vm74_vm0, %v6359_v15 }
0x17e2   :  { %v9542_v51 = vpop.permute.xlu1 %9541 }
0x17e3   :  { %v9544_v53 = vunpack.i.h.bf16 %v9542_v51  ;;  %v9543_v60 = vunpack.i.l.bf16 %v9542_v51  ;;  %v6342_v34 = vsel %vm542_vm2, %v6326_v37, %v9533_v16  ;;  %v6343_v35 = vsel %vm542_vm2, %v6327_v13, %v9534_v1  ;;  %v6060_v37 = vld [vmem:[#allocation2 + $0x8c] sm:$0xff]  ;;  %v6059_v1 = vld [vmem:[#allocation2 + $0x84] sm:$0xff] }
0x17e4   :  { %v9537_v52 = vpop.permute.xlu0 %9536  ;;  %v6358_v24 = vpack.c.bf16 %v6343_v35, %v6342_v34 }
0x17e5   :  { %v6313_v40 = vsel %vm74_vm0, %v6055_v57, %v9544_v53  ;;  %v6312_v26 = vsel %vm74_vm0, %v6054_v50, %v9543_v60  ;;  %v9539_v39 = vunpack.i.h.bf16 %v9537_v52  ;;  %v9538_v59 = vunpack.i.l.bf16 %v9537_v52 }
0x17e6   :  { %v9547_v23 = vpop.permute.xlu1 %9546  ;;  %v6365_v60 = vpack.c.bf16 %v6060_v37, %v6059_v1 }
0x17e7   :  { %v9549_v3 = vunpack.i.h.bf16 %v9547_v23  ;;  %v9548_v21 = vunpack.i.l.bf16 %v9547_v23  ;;  %v6329_v49 = vsel %vm525_vm1, %v6313_v40, %v9539_v39  ;;  %v6328_v30 = vsel %vm525_vm1, %v6312_v26, %v9538_v59  ;;  %v6061_v39 = vld [vmem:[#allocation2 + $0x94] sm:$0xff]  ;;  %v6062_v59 = vld [vmem:[#allocation2 + $0x9c] sm:$0xff] }
0x17e8   :  { %6529 = vmatmul.mubr.bf16.gmra.mrb[160].mxu0 %v6358_v24 }
0x17e9   :  { %8275 = vmatprep.mubr.msk.bf16.mxu0 %vm74_vm0, %v6361_v29  ;;  %v6344_v33 = vsel %vm542_vm2, %v6328_v30, %v9548_v21  ;;  %v6345_v2 = vsel %vm542_vm2, %v6329_v49, %v9549_v3 }
0x17ea   :  { %v6360_v48 = vpack.c.bf16 %v6345_v2, %v6344_v33 }
0x17ec   :  { %v9557_v42 = vpop.permute.xlu1 %9556 }
0x17ed   :  { %v9552_v31 = vpop.permute.xlu0 %9551  ;;  %v9559_v10 = vunpack.i.h.bf16 %v9557_v42  ;;  %v9558_v20 = vunpack.i.l.bf16 %v9557_v42  ;;  %v6367_v42 = vpack.c.bf16 %v6062_v59, %v6061_v39 }
0x17ee   :  { %v9554_v47 = vunpack.i.h.bf16 %v9552_v31  ;;  %v9553_v50 = vunpack.i.l.bf16 %v9552_v31 }
0x17f0   :  { %v6315_v56 = vsel %vm74_vm0, %v6057_v11, %v9554_v47  ;;  %v6314_v5 = vsel %vm74_vm0, %v6056_v58, %v9553_v50  ;;  %6537 = vmatmul.mubr.bf16.gmra.mrb[164].mxu0 %v6360_v48  ;;  %v9572_v43 = vpop.permute.xlu1 %9571 }
0x17f1   :  { %v9562_v12 = vpop.permute.xlu0 %9561  ;;  %8276 = vmatprep.mubr.msk.bf16.mxu0 %vm74_vm0, %v6363_v38  ;;  %v6330_v8 = vsel %vm525_vm1, %v6314_v5, %v9558_v20  ;;  %v6331_v61 = vsel %vm525_vm1, %v6315_v56, %v9559_v10  ;;  %v9574_v51 = vunpack.i.h.bf16 %v9572_v43  ;;  %v9573_v53 = vunpack.i.l.bf16 %v9572_v43 }
0x17f2   :  { %v9564_v32 = vunpack.i.h.bf16 %v9562_v12  ;;  %v9563_v15 = vunpack.i.l.bf16 %v9562_v12 }
0x17f3   :  { %v6317_v52 = vsel %vm74_vm0, %v6059_v1, %v9574_v51  ;;  %v6316_v14 = vsel %vm74_vm0, %v6058_v55, %v9573_v53 }
0x17f4   :  { %v6346_v4 = vsel %vm542_vm2, %v6330_v8, %v9563_v15  ;;  %v6347_v45 = vsel %vm542_vm2, %v6331_v61, %v9564_v32  ;;  %v6063_v15 = vld [vmem:[#allocation2 + $0xa4] sm:$0xff]  ;;  %v6113_v61 = vld [vmem:[#allocation2 + $0xac] sm:$0xff] }
0x17f5   :  { %v9567_v13 = vpop.permute.xlu0 %9566  ;;  %v6362_v16 = vpack.c.bf16 %v6347_v45, %v6346_v4  ;;  %v6369_v53 = vpack.c.bf16 %v6113_v61, %v6063_v15 }
0x17f6   :  { %v9569_v34 = vunpack.i.h.bf16 %v9567_v13  ;;  %v9568_v35 = vunpack.i.l.bf16 %v9567_v13 }
0x17f8   :  { %6545 = vmatmul.mubr.bf16.gmra.mrb[168].mxu0 %v6362_v16  ;;  %v6333_v23 = vsel %vm525_vm1, %v6317_v52, %v9569_v34  ;;  %v6332_v24 = vsel %vm525_vm1, %v6316_v14, %v9568_v35  ;;  %v9830_v14 = vld [vmem:[%s13883_s2 + $0x60] sm:$0xff]  }
0x17f9   :  { %8277 = vmatprep.mubr.msk.bf16.mxu0 %vm74_vm0, %v6365_v60  ;;  %8648 = vmatprep.subr.bf16.mxu1 %v9830_v14 }
0x17fa   :  { %v9577_v57 = vpop.permute.xlu1 %9576  ;;  %8649 = vmatpush3.bf16.msra.mxu1 %v9830_v14 }
0x17fb   :  { %v9579_v40 = vunpack.i.h.bf16 %v9577_v57  ;;  %v9578_v26 = vunpack.i.l.bf16 %v9577_v57 }
0x17fc   :  { %v9582_v3 = vpop.permute.xlu0 %9581 }
0x17fd   :  { %v9584_v21 = vunpack.i.h.bf16 %v9582_v3  ;;  %v9583_v29 = vunpack.i.l.bf16 %v9582_v3  ;;  %v6348_v49 = vsel %vm542_vm2, %v6332_v24, %v9578_v26  ;;  %v6349_v30 = vsel %vm542_vm2, %v6333_v23, %v9579_v40  ;;  %v13403_v40 = vld [vmem:[%s13884_s3 + $0x6] ss:$0 sm:$0xff] }
0x17fe   :  { %v9587_v33 = vpop.permute.xlu1 %9586  ;;  %v6364_v2 = vpack.c.bf16 %v6349_v30, %v6348_v49 }
0x17ff   :  { %v6319_v11 = vsel %vm74_vm0, %v6061_v39, %v9584_v21  ;;  %v6318_v31 = vsel %vm74_vm0, %v6060_v37, %v9583_v29  ;;  %v9589_v55 = vunpack.i.h.bf16 %v9587_v33  ;;  %v9588_v47 = vunpack.i.l.bf16 %v9587_v33 }
0x1800   :  { %v9592_v50 = vpop.permute.xlu0 %9591  ;;  %6553 = vmatmul.mubr.bf16.gmra.mrb[172].mxu0 %v6364_v2 }
0x1801   :  { %v6334_v10 = vsel %vm525_vm1, %v6318_v31, %v9588_v47  ;;  %v6335_v20 = vsel %vm525_vm1, %v6319_v11, %v9589_v55  ;;  %v9594_v58 = vunpack.i.h.bf16 %v9592_v50  ;;  %v9593_v48 = vunpack.i.l.bf16 %v9592_v50  ;;  %8278 = vmatprep.mubr.msk.bf16.mxu0 %vm74_vm0, %v6367_v42 }
0x1802   :  { %v9602_v56 = vpop.permute.xlu1 %9601 }
0x1803   :  { %v9604_v5 = vunpack.i.h.bf16 %v9602_v56  ;;  %v9603_v38 = vunpack.i.l.bf16 %v9602_v56  ;;  %v6350_v12 = vsel %vm542_vm2, %v6334_v10, %v9593_v48  ;;  %v6351_v32 = vsel %vm542_vm2, %v6335_v20, %v9594_v58 }
0x1804   :  { %v9597_v8 = vpop.permute.xlu0 %9596  ;;  %v6366_v1 = vpack.c.bf16 %v6351_v32, %v6350_v12 }
0x1805   :  { %v6321_v4 = vsel %vm74_vm0, %v6063_v15, %v9604_v5  ;;  %v6320_v45 = vsel %vm74_vm0, %v6062_v59, %v9603_v38  ;;  %v9599_v43 = vunpack.i.h.bf16 %v9597_v8  ;;  %v9598_v37 = vunpack.i.l.bf16 %v9597_v8  ;;  %v9831_v38 = vld [vmem:[%s13883_s2 + $0x68] sm:$0xff]  }
0x1806   :  { %v9607_v13 = vpop.permute.xlu1 %9606  ;;  %8650 = vmatprep.subr.bf16.mxu1 %v9831_v38 }
0x1807   :  { %v9609_v16 = vunpack.i.h.bf16 %v9607_v13  ;;  %v9608_v51 = vunpack.i.l.bf16 %v9607_v13  ;;  %v6337_v60 = vsel %vm525_vm1, %v6321_v4, %v9599_v43  ;;  %v6336_v34 = vsel %vm525_vm1, %v6320_v45, %v9598_v37  ;;  %8651 = vmatpush3.bf16.msra.mxu1 %v9831_v38 }
0x1808   :  { %6561 = vmatmul.mubr.bf16.gmra.mrb[176].mxu0 %v6366_v1  ;;  %7397 = vmatprep.subr.bf16.mxu1 %v10691_v0 }
0x1809   :  { %8279 = vmatprep.mubr.msk.bf16.mxu0 %vm74_vm0, %v6369_v53  ;;  %v6352_v35 = vsel %vm542_vm2, %v6336_v34, %v9608_v51  ;;  %v6353_v57 = vsel %vm542_vm2, %v6337_v60, %v9609_v16 }
0x180a   :  { %v6368_v52 = vpack.c.bf16 %v6353_v57, %v6352_v35 }
0x1810   :  { %6569 = vmatmul.mubr.bf16.gmra.mrb[180].mxu0 %v6368_v52 }
0x18aa   :  { %v6514_v26 = vpop.f32.mrb[152].mxu0 }
0x18ab   :  { %v13406_v39 = vadd.f32 %v13403_v40, %v6514_v26  ;;  %v6516_v59 = vpop.f32.mrb[153].mxu0 }
0x18ac   :  { %v6517_v23 = vpop.f32.mrb[154].mxu0 }
0x18ad   :  { %v8280_v24 = vmul.f32 -1.442695, %v13406_v39  ;;  %v13410_v3 = vadd.f32 %v13403_v40, %v6517_v23  ;;  %v6519_v21 = vpop.f32.mrb[155].mxu0 }
0x18af   :  { %10420 = vpow2.f32 %v8280_v24  ;;  %v8281_v29 = vmul.f32 -1.442695, %v13410_v3 }
0x18b1   :  { %10422 = vpow2.f32 %v8281_v29 }
0x18b3   :  { %v6522_v49 = vpop.f32.mrb[156].mxu0 }
0x18b4   :  { %v13414_v30 = vadd.f32 %v13403_v40, %v6522_v49  ;;  %v6524_v33 = vpop.f32.mrb[157].mxu0 }
0x18b5   :  { %v6525_v2 = vpop.f32.mrb[158].mxu0 }
0x18b6   :  { %v8282_v42 = vmul.f32 -1.442695, %v13414_v30  ;;  %v13418_v11 = vadd.f32 %v13403_v40, %v6525_v2  ;;  %v6527_v31 = vpop.f32.mrb[159].mxu0 }
0x18b8   :  { %10424 = vpow2.f32 %v8282_v42  ;;  %v8283_v47 = vmul.f32 -1.442695, %v13418_v11 }
0x18b9   :  { %v10421_v55 = vpop.eup %10420 }
0x18ba   :  { %v6641_v50 = vadd.f32 1.0, %v10421_v55  ;;  %10426 = vpow2.f32 %v8283_v47 }
0x18bb   :  { %v10423_v10 = vpop.eup %10422  ;;  %v6530_v58 = vpop.f32.mrb[160].mxu0 }
0x18bc   :  { %10428 = vrcp.f32 %v6641_v50  ;;  %v6642_v20 = vadd.f32 1.0, %v10423_v10  ;;  %v13422_v48 = vadd.f32 %v13403_v40, %v6530_v58  ;;  %v6532_v56 = vpop.f32.mrb[161].mxu0 }
0x18bd   :  { %v6533_v5 = vpop.f32.mrb[162].mxu0 }
0x18be   :  { %10430 = vrcp.f32 %v6642_v20  ;;  %v8284_v12 = vmul.f32 -1.442695, %v13422_v48  ;;  %v13429_v32 = vadd.f32 %v13403_v40, %v6533_v5  ;;  %v6535_v15 = vpop.f32.mrb[163].mxu0 }
0x18c0   :  { %10432 = vpow2.f32 %v8284_v12  ;;  %v8285_v8 = vmul.f32 -1.442695, %v13429_v32 }
0x18c2   :  { %v10425_v61 = vpop.eup %10424  ;;  %10434 = vpow2.f32 %v8285_v8 }
0x18c3   :  { %v6643_v4 = vadd.f32 1.0, %v10425_v61  ;;  %v6538_v45 = vpop.f32.mrb[164].mxu0 }
0x18c4   :  { %v10427_v43 = vpop.eup %10426  ;;  %v13434_v37 = vadd.f32 %v13403_v40, %v6538_v45  ;;  %v6540_v13 = vpop.f32.mrb[165].mxu0 }
0x18c5   :  { %10436 = vrcp.f32 %v6643_v4  ;;  %v6644_v16 = vadd.f32 1.0, %v10427_v43  ;;  %v6541_v51 = vpop.f32.mrb[166].mxu0 }
0x18c6   :  { %v10429_v1 = vpop.eup %10428  ;;  %v8286_v53 = vmul.f32 -1.442695, %v13434_v37  ;;  %v13438_v60 = vadd.f32 %v13403_v40, %v6541_v51  ;;  %v6543_v34 = vpop.f32.mrb[167].mxu0 }
0x18c7   :  { %6705 = vrot.lane.b32.xlu0 %v10429_v1, %s10694_s16  ;;  %10438 = vrcp.f32 %v6644_v16 }
0x18c8   :  { %v10431_v35 = vpop.eup %10430  ;;  %10440 = vpow2.f32 %v8286_v53  ;;  %v8287_v57 = vmul.f32 -1.442695, %v13438_v60 }
0x18c9   :  { %6707 = vrot.lane.b32.xlu1 %v10431_v35, %s10694_s16 }
0x18ca   :  { %v10433_v52 = vpop.eup %10432  ;;  %10442 = vpow2.f32 %v8287_v57 }
0x18cb   :  { %v6645_v14 = vadd.f32 1.0, %v10433_v52  ;;  %v6546_v26 = vpop.f32.mrb[168].mxu0 }
0x18cc   :  { %v10435_v59 = vpop.eup %10434  ;;  %v13444_v23 = vadd.f32 %v13403_v40, %v6546_v26  ;;  %v6548_v24 = vpop.f32.mrb[169].mxu0 }
0x18cd   :  { %10444 = vrcp.f32 %v6645_v14  ;;  %v6646_v21 = vadd.f32 1.0, %v10435_v59  ;;  %v6549_v29 = vpop.f32.mrb[170].mxu0 }
0x18ce   :  { %v8288_v49 = vmul.f32 -1.442695, %v13444_v23  ;;  %v13448_v33 = vadd.f32 %v13403_v40, %v6549_v29  ;;  %v6551_v2 = vpop.f32.mrb[171].mxu0 }
0x18cf   :  { %v10437_v42 = vpop.eup %10436  ;;  %10446 = vrcp.f32 %v6646_v21 }
0x18d0   :  { %10448 = vpow2.f32 %v8288_v49  ;;  %v8289_v31 = vmul.f32 -1.442695, %v13448_v33  ;;  %6709 = vrot.lane.b32.xlu0 %v10437_v42, %s10694_s16 }
0x18d1   :  { %v10439_v55 = vpop.eup %10438 }
0x18d2   :  { %v10441_v47 = vpop.eup %10440  ;;  %10450 = vpow2.f32 %v8289_v31  ;;  %6711 = vrot.lane.b32.xlu1 %v10439_v55, %s10694_s16 }
0x18d3   :  { %v6647_v50 = vadd.f32 1.0, %v10441_v47  ;;  %v6554_v10 = vpop.f32.mrb[172].mxu0 }
0x18d4   :  { %v10443_v20 = vpop.eup %10442  ;;  %v13454_v58 = vadd.f32 %v13403_v40, %v6554_v10  ;;  %v6556_v56 = vpop.f32.mrb[173].mxu0 }
0x18d5   :  { %10452 = vrcp.f32 %v6647_v50  ;;  %v6648_v5 = vadd.f32 1.0, %v10443_v20  ;;  %v6557_v38 = vpop.f32.mrb[174].mxu0 }
0x18d6   :  { %v8290_v12 = vmul.f32 -1.442695, %v13454_v58  ;;  %v13458_v15 = vadd.f32 %v13403_v40, %v6557_v38  ;;  %v6559_v8 = vpop.f32.mrb[175].mxu0 }
0x18d7   :  { %v10445_v61 = vpop.eup %10444  ;;  %10454 = vrcp.f32 %v6648_v5 }
0x18d8   :  { %10456 = vpow2.f32 %v8290_v12  ;;  %v8291_v4 = vmul.f32 -1.442695, %v13458_v15  ;;  %6713 = vrot.lane.b32.xlu0 %v10445_v61, %s10694_s16 }
0x18d9   :  { %v10447_v45 = vpop.eup %10446 }
0x18da   :  { %v10449_v43 = vpop.eup %10448  ;;  %10458 = vpow2.f32 %v8291_v4  ;;  %6715 = vrot.lane.b32.xlu1 %v10447_v45, %s10694_s16 }
0x18db   :  { %v6649_v13 = vadd.f32 1.0, %v10449_v43  ;;  %v6562_v1 = vpop.f32.mrb[176].mxu0 }
0x18dc   :  { %v10451_v16 = vpop.eup %10450  ;;  %v13464_v51 = vadd.f32 %v13403_v40, %v6562_v1  ;;  %v6564_v53 = vpop.f32.mrb[177].mxu0 }
0x18dd   :  { %10460 = vrcp.f32 %v6649_v13  ;;  %v6650_v34 = vadd.f32 1.0, %v10451_v16  ;;  %v6565_v35 = vpop.f32.mrb[178].mxu0 }
0x18de   :  { %v8292_v57 = vmul.f32 -1.442695, %v13464_v51  ;;  %v13468_v52 = vadd.f32 %v13403_v40, %v6565_v35  ;;  %v6567_v14 = vpop.f32.mrb[179].mxu0 }
0x18df   :  { %v10453_v26 = vpop.eup %10452  ;;  %10462 = vrcp.f32 %v6650_v34 }
0x18e0   :  { %10464 = vpow2.f32 %v8292_v57  ;;  %v8293_v59 = vmul.f32 -1.442695, %v13468_v52  ;;  %6717 = vrot.lane.b32.xlu0 %v10453_v26, %s10694_s16 }
0x18e1   :  { %v10455_v24 = vpop.eup %10454 }
0x18e2   :  { %v10457_v21 = vpop.eup %10456  ;;  %10466 = vpow2.f32 %v8293_v59  ;;  %6719 = vrot.lane.b32.xlu1 %v10455_v24, %s10694_s16 }
0x18e3   :  { %v6651_v29 = vadd.f32 1.0, %v10457_v21  ;;  %v6570_v49 = vpop.f32.mrb[180].mxu0 }
0x18e4   :  { %v10459_v2 = vpop.eup %10458  ;;  %v13474_v42 = vadd.f32 %v13403_v40, %v6570_v49  ;;  %v6572_v31 = vpop.f32.mrb[181].mxu0 }
0x18e5   :  { %10468 = vrcp.f32 %v6651_v29  ;;  %v6652_v55 = vadd.f32 1.0, %v10459_v2  ;;  %v6573_v47 = vpop.f32.mrb[182].mxu0 }
0x18e6   :  { %v8294_v50 = vmul.f32 -1.442695, %v13474_v42  ;;  %v13478_v10 = vadd.f32 %v13403_v40, %v6573_v47  ;;  %v6575_v20 = vpop.f32.mrb[183].mxu0 }
0x18e7   :  { %v10461_v56 = vpop.eup %10460  ;;  %10470 = vrcp.f32 %v6652_v55 }
0x18e8   :  { %10472 = vpow2.f32 %v8294_v50  ;;  %v8295_v5 = vmul.f32 -1.442695, %v13478_v10  ;;  %6721 = vrot.lane.b32.xlu0 %v10461_v56, %s10694_s16 }
0x18e9   :  { %v10463_v38 = vpop.eup %10462 }
0x18ea   :  { %v10465_v12 = vpop.eup %10464  ;;  %10474 = vpow2.f32 %v8295_v5  ;;  %6723 = vrot.lane.b32.xlu1 %v10463_v38, %s10694_s16 }
0x18eb   :  { %v6653_v8 = vadd.f32 1.0, %v10465_v12 }
0x18ec   :  { %v10467_v61 = vpop.eup %10466 }
0x18ed   :  { %10476 = vrcp.f32 %v6653_v8  ;;  %v6654_v4 = vadd.f32 1.0, %v10467_v61 }
0x18ef   :  { %v10469_v45 = vpop.eup %10468  ;;  %10478 = vrcp.f32 %v6654_v4 }
0x18f0   :  { %6725 = vrot.lane.b32.xlu0 %v10469_v45, %s10694_s16 }
0x18f1   :  { %v10471_v43 = vpop.eup %10470 }
0x18f2   :  { %v10473_v13 = vpop.eup %10472  ;;  %6727 = vrot.lane.b32.xlu1 %v10471_v43, %s10694_s16 }
0x18f3   :  { %v6655_v1 = vadd.f32 1.0, %v10473_v13 }
0x18f4   :  { %v10475_v16 = vpop.eup %10474 }
0x18f5   :  { %10480 = vrcp.f32 %v6655_v1  ;;  %v6656_v53 = vadd.f32 1.0, %v10475_v16 }
0x18f7   :  { %v10477_v34 = vpop.eup %10476  ;;  %10482 = vrcp.f32 %v6656_v53 }
0x18f8   :  { %6729 = vrot.lane.b32.xlu0 %v10477_v34, %s10694_s16  ;;  %10484 = vtanh.f32 %v13406_v39 }
0x18f9   :  { %v10479_v35 = vpop.eup %10478  ;;  %10486 = vtanh.f32 %v13410_v3 }
0x18fa   :  { %6731 = vrot.lane.b32.xlu1 %v10479_v35, %s10694_s16  ;;  %10488 = vtanh.f32 %v13414_v30 }
0x18fb   :  { %10490 = vtanh.f32 %v13418_v11 }
0x18fc   :  { %10492 = vtanh.f32 %v13422_v48 }
0x18fd   :  { %10494 = vtanh.f32 %v13429_v32 }
0x18fe   :  { %10496 = vtanh.f32 %v13434_v37 }
0x18ff   :  { %v10481_v57 = vpop.eup %10480  ;;  %10498 = vtanh.f32 %v13438_v60 }
0x1900   :  { %6733 = vrot.lane.b32.xlu0 %v10481_v57, %s10694_s16  ;;  %10500 = vtanh.f32 %v13444_v23 }
0x1901   :  { %v10483_v14 = vpop.eup %10482  ;;  %10502 = vtanh.f32 %v13448_v33 }
0x1902   :  { %6735 = vrot.lane.b32.xlu1 %v10483_v14, %s10694_s16  ;;  %v10485_v59 = vpop.eup %10484  ;;  %10504 = vtanh.f32 %v13454_v58 }
0x1903   :  { %v10487_v24 = vpop.eup %10486  ;;  %10506 = vtanh.f32 %v13458_v15 }
0x1904   :  { %6795 = vrot.lane.b32.xlu0 %v13403_v40, %s10688_s21  ;;  %v10489_v39 = vpop.eup %10488  ;;  %10508 = vtanh.f32 %v13464_v51 }
0x1905   :  { %v10491_v3 = vpop.eup %10490  ;;  %10510 = vtanh.f32 %v13468_v52 }
0x1906   :  { %v10493_v50 = vpop.eup %10492  ;;  %10512 = vtanh.f32 %v13474_v42 }
0x1907   :  { %v10495_v20 = vpop.eup %10494  ;;  %10514 = vtanh.f32 %v13478_v10  ;;  %v9833_v10 = vld [vmem:[#allocation4 + $0x238] sm:$0xff]  }
0x1908   :  { %v10497_v12 = vpop.eup %10496 }
0x1909   :  { %v10499_v37 = vpop.eup %10498 }
0x190a   :  { %v10501_v43 = vpop.eup %10500 }
0x190b   :  { %v10503_v23 = vpop.eup %10502 }
0x190c   :  { %v10505_v34 = vpop.eup %10504 }
0x190d   :  { %v10507_v58 = vpop.eup %10506 }
0x1939   :  { %v6706_v26 = vpop.permute.xlu0 %6705 }
0x193a   :  { %v6753_v29 = vmul.f32 %v10485_v59, %v6706_v26  ;;  %v10509_v59 = vpop.eup %10508 }
0x193b   :  { %v6708_v21 = vpop.permute.xlu1 %6707  ;;  %v10511_v51 = vpop.eup %10510 }
0x193c   :  { %v6754_v49 = vmul.f32 %v10487_v24, %v6708_v21 }
0x193e   :  { %v6769_v2 = vpack.c.bf16 %v6754_v49, %v6753_v29 }
0x1940   :  { %8652 = vmatprep.mubr.msk.bf16.mxu1 %vm74_vm0, %v6769_v2  ;;  %v10513_v2 = vpop.eup %10512 }
0x1942   :  { %v6710_v40 = vpop.permute.xlu0 %6709 }
0x1943   :  { %v6755_v55 = vmul.f32 %v10489_v39, %v6710_v40  ;;  %v10515_v40 = vpop.eup %10514 }
0x1944   :  { %v6712_v31 = vpop.permute.xlu1 %6711 }
0x1945   :  { %v6756_v47 = vmul.f32 %v10491_v3, %v6712_v31 }
0x1947   :  { %v6770_v30 = vpack.c.bf16 %v6756_v47, %v6755_v55  ;;  %v9832_v55 = vld [vmem:[#allocation4 + $0x230] sm:$0xff]   ;;  %v9834_v47 = vld [vmem:[#allocation4 + $0x240] sm:$0xff]  }
0x1949   :  { %8653 = vmatmul.mubr.msk.bf16.vlgmr.msra.gmra.mrb[152].mxu1 %vm74_vm0, %v6770_v30  ;;  %v9835_v30 = vld [vmem:[#allocation4 + $0x248] sm:$0xff]  }
0x194a   :  { %v6714_v11 = vpop.permute.xlu0 %6713  ;;  %7398 = vmatpush1.bf16.msra.mxu1 %v9832_v55 }
0x194b   :  { %v6757_v48 = vmul.f32 %v10493_v50, %v6714_v11  ;;  %7399 = vmatprep.subr.bf16.mxu1 %v10691_v0  ;;  %v9836_v11 = vld [vmem:[#allocation4 + $0x250] sm:$0xff]   ;;  %v9837_v50 = vld [vmem:[#allocation4 + $0x258] sm:$0xff]  }
0x194c   :  { %v6716_v56 = vpop.permute.xlu1 %6715 }
0x194d   :  { %v6758_v5 = vmul.f32 %v10495_v20, %v6716_v56  ;;  %v9838_v20 = vld [vmem:[#allocation4 + $0x260] sm:$0xff]   ;;  %v9839_v56 = vld [vmem:[#allocation4 + $0x268] sm:$0xff]  }
0x194e   :  { %7400 = vmatpush1.bf16.msra.mxu1 %v9833_v10 }
0x194f   :  { %v6771_v32 = vpack.c.bf16 %v6758_v5, %v6757_v48  ;;  %7401 = vmatprep.subr.bf16.mxu1 %v10691_v0 }
0x1951   :  { %8656 = vmatprep.mubr.msk.bf16.mxu1 %vm74_vm0, %v6771_v32 }
0x1952   :  { %v6718_v38 = vpop.permute.xlu0 %6717  ;;  %7402 = vmatpush1.bf16.msra.mxu1 %v9834_v47 }
0x1953   :  { %v6759_v61 = vmul.f32 %v10497_v12, %v6718_v38  ;;  %7403 = vmatprep.subr.bf16.mxu1 %v10691_v0 }
0x1954   :  { %v6720_v8 = vpop.permute.xlu1 %6719 }
0x1955   :  { %v6760_v4 = vmul.f32 %v10499_v37, %v6720_v8 }
0x1956   :  { %7404 = vmatpush1.bf16.msra.mxu1 %v9835_v30 }
0x1957   :  { %v6772_v60 = vpack.c.bf16 %v6760_v4, %v6759_v61  ;;  %7405 = vmatprep.subr.bf16.mxu1 %v10691_v0 }
0x1959   :  { %8657 = vmatmul.mubr.msk.bf16.gmra.mrb[156].mxu1 %vm74_vm0, %v6772_v60 }
0x195a   :  { %v6722_v45 = vpop.permute.xlu0 %6721  ;;  %7406 = vmatpush1.bf16.msra.mxu1 %v9836_v11 }
0x195b   :  { %v6761_v1 = vmul.f32 %v10501_v43, %v6722_v45  ;;  %7407 = vmatprep.subr.bf16.mxu1 %v10691_v0 }
0x195c   :  { %v6724_v13 = vpop.permute.xlu1 %6723 }
0x195d   :  { %v6762_v16 = vmul.f32 %v10503_v23, %v6724_v13 }
0x195e   :  { %7408 = vmatpush1.bf16.msra.mxu1 %v9837_v50 }
0x195f   :  { %v6773_v33 = vpack.c.bf16 %v6762_v16, %v6761_v1  ;;  %7409 = vmatprep.subr.bf16.mxu1 %v10691_v0 }
0x1961   :  { %8660 = vmatprep.mubr.msk.bf16.mxu1 %vm74_vm0, %v6773_v33 }
0x1962   :  { %v6726_v53 = vpop.permute.xlu0 %6725  ;;  %7410 = vmatpush1.bf16.msra.mxu1 %v9838_v20 }
0x1963   :  { %v6763_v57 = vmul.f32 %v10505_v34, %v6726_v53  ;;  %7411 = vmatprep.subr.bf16.mxu1 %v10691_v0 }
0x1964   :  { %v6728_v35 = vpop.permute.xlu1 %6727 }
0x1965   :  { %v6764_v14 = vmul.f32 %v10507_v58, %v6728_v35 }
0x1966   :  { %7412 = vmatpush1.bf16.msra.mxu1 %v9839_v56 }
0x1967   :  { %v6774_v15 = vpack.c.bf16 %v6764_v14, %v6763_v57  ;;  %7413 = vmatprep.subr.bf16.mxu1 %v10691_v0 }
0x1969   :  { %8661 = vmatmul.mubr.msk.bf16.gmra.mrb[160].mxu1 %vm74_vm0, %v6774_v15 }
0x196a   :  { %v6730_v26 = vpop.permute.xlu0 %6729 }
0x196b   :  { %v6765_v21 = vmul.f32 %v10509_v59, %v6730_v26 }
0x196c   :  { %v6732_v24 = vpop.permute.xlu1 %6731 }
0x196d   :  { %v6766_v29 = vmul.f32 %v10511_v51, %v6732_v24  ;;  %v9841_v24 = vld [vmem:[#allocation4 + $0x278] sm:$0xff]  }
0x196f   :  { %v6775_v52 = vpack.c.bf16 %v6766_v29, %v6765_v21 }
0x1971   :  { %8664 = vmatprep.mubr.msk.bf16.mxu1 %vm74_vm0, %v6775_v52 }
0x1972   :  { %v6734_v49 = vpop.permute.xlu0 %6733 }
0x1973   :  { %v6767_v3 = vmul.f32 %v10513_v2, %v6734_v49 }
0x1974   :  { %v6736_v39 = vpop.permute.xlu1 %6735 }
0x1975   :  { %v6768_v31 = vmul.f32 %v10515_v40, %v6736_v39 }
0x1976   :  { %v13523_v48 = vpop.permute.xlu0 %6795 }
0x1977   :  { %v6776_v42 = vpack.c.bf16 %v6768_v31, %v6767_v3 }
0x1979   :  { %8665 = vmatmul.mubr.msk.bf16.gmra.mrb[164].mxu1 %vm74_vm0, %v6776_v42 }
0x1a1c   :  { %v8654_v5 = vpop.f32.mrb[152].mxu1 }
0x1a1d   :  { %v6865_v32 = vadd.f32 %v8654_v5, %v13523_v48  ;;  %v6856_v38 = vpop.f32.mrb[153].mxu1 }
0x1a1e   :  { %v6857_v12 = vadd.f32 %v6856_v38, %v13523_v48  ;;  %v8655_v37 = vpop.f32.mrb[154].mxu1 }
0x1a1f   :  { %v13528_v8 = vadd.f32 %v6865_v32, %v13215_v18  ;;  %v6868_v61 = vadd.f32 %v8655_v37, %v13523_v48  ;;  %v6859_v4 = vpop.f32.mrb[155].mxu1 }
0x1a20   :  { %v13532_v60 = vadd.f32 %v6857_v12, %v13219_v62  ;;  %v6860_v45 = vadd.f32 %v6859_v4, %v13523_v48  ;;  %v9840_v62 = vld [vmem:[#allocation4 + $0x270] sm:$0xff]  }
0x1a21   :  { %6937 = vst.msk [vmem:[#allocation2 + $0x20] sm:$0xff] %vm74_vm0, %v13528_v8  ;;  %v13538_v43 = vadd.f32 %v6868_v61, %v13225_v17  ;;  %7414 = vmatpush1.bf16.msra.mxu1 %v9840_v62 }
0x1a22   :  { %6935 = vst.msk [vmem:[#allocation2 + $0x10] sm:$0xff] %vm74_vm0, %v13532_v60  ;;  %v13543_v18 = vadd.f32 %v6860_v45, %v13230_v44  ;;  %7415 = vmatprep.subr.bf16.mxu1 %v10691_v0 }
0x1a23   :  { %6938 = vst.msk [vmem:[#allocation2 + $0x28] sm:$0xff] %vm74_vm0, %v13538_v43 }
0x1a24   :  { %6936 = vst.msk [vmem:[#allocation2 + $0x18] sm:$0xff] %vm74_vm0, %v13543_v18 }
0x1a25   :  { %7416 = vmatpush1.bf16.msra.mxu1 %v9841_v24 }
0x1a26   :  { %8688 = vmatprep.subr.bf16.mxu1 %v10692_v9 }
0x1a29   :  { %v6983_v23 = vld [vmem:[#allocation2 + $0x10] sm:$0xff] }
0x1a2a   :  { %v6967_v34 = vld [vmem:[#allocation2 + $0xf] sm:$0xff]  ;;  %v6970_v15 = vld [vmem:[#allocation2 + $0x27] sm:$0xff] }
0x1a2b   :  { %v7015_v13 = vld [vmem:[#allocation2 + $0x12] sm:$0xff]  ;;  %v7016_v17 = vld [vmem:[#allocation2 + $0x1a] sm:$0xff] }
0x1a2c   :  { %v6984_v1 = vld [vmem:[#allocation2 + $0x18] sm:$0xff]  ;;  %v8658_v16 = vpop.f32.mrb[156].mxu1  ;;  %v7272_v33 = vpack.c.bf16 %v7016_v17, %v7015_v13  ;;  %v7001_v42 = vld [vmem:[#allocation2 + $0x21] sm:$0xff] }
0x1a2d   :  { %v9615_v53 = vpack.i.bf16 %v6984_v1, %v6983_v23  ;;  %v6968_v44 = vld [vmem:[#allocation2 + $0x17] sm:$0xff]  ;;  %v6881_v58 = vadd.f32 %v8658_v16, %v13523_v48  ;;  %v6872_v35 = vpop.f32.mrb[157].mxu1  ;;  %v6969_v14 = vld [vmem:[#allocation2 + $0x1f] sm:$0xff] }
0x1a2e   :  { %v9610_v57 = vpack.i.bf16 %v6968_v44, %v6967_v34  ;;  %v6873_v26 = vadd.f32 %v6872_v35, %v13523_v48  ;;  %v8659_v59 = vpop.f32.mrb[158].mxu1  ;;  %8321 = vmatprep.mubr.msk.bf16.mxu1 %vm74_vm0, %v7272_v33  ;;  %v6999_v0 = vld [vmem:[#allocation2 + $0x11] sm:$0xff]  ;;  %v7000_v51 = vld [vmem:[#allocation2 + $0x19] sm:$0xff]  ;;  %v9630_v40 = vpack.i.bf16 %v6970_v15, %v6969_v14 }
0x1a2f   :  { %9616 = vrot.lane.b32.xlu0 %v9615_v53, %s10688_s21  ;;  %v13555_v21 = vadd.f32 %v6881_v58, %v13248_v63  ;;  %v6884_v29 = vadd.f32 %v8659_v59, %v13523_v48  ;;  %v6875_v52 = vpop.f32.mrb[159].mxu1  ;;  %v9620_v63 = vpack.i.bf16 %v7000_v51, %v6999_v0 }
0x1a30   :  { %9611 = vrot.lane.b32.xlu1 %v9610_v57, %s10693_s15  ;;  %v13560_v49 = vadd.f32 %v6873_v26, %v13253_v27  ;;  %v6876_v2 = vadd.f32 %v6875_v52, %v13523_v48  ;;  %v6986_v27 = vld [vmem:[#allocation2 + $0x28] sm:$0xff] }
0x1a31   :  { %6941 = vst.msk [vmem:[#allocation2 + $0x40] sm:$0xff] %vm74_vm0, %v13555_v21  ;;  %v13566_v39 = vadd.f32 %v6884_v29, %v13259_v22  ;;  %v6985_v22 = vld [vmem:[#allocation2 + $0x20] sm:$0xff] }
0x1a32   :  { %6939 = vst.msk [vmem:[#allocation2 + $0x30] sm:$0xff] %vm74_vm0, %v13560_v49  ;;  %v13572_v3 = vadd.f32 %v6876_v2, %v13264_v7  ;;  %v9625_v31 = vpack.i.bf16 %v6986_v27, %v6985_v22 }
0x1a33   :  { %9631 = vrot.lane.b32.xlu0 %v9630_v40, %s10693_s15  ;;  %6942 = vst.msk [vmem:[#allocation2 + $0x48] sm:$0xff] %vm74_vm0, %v13566_v39 }
0x1a34   :  { %9621 = vrot.lane.b32.xlu1 %v9620_v63, %s10694_s16  ;;  %6940 = vst.msk [vmem:[#allocation2 + $0x38] sm:$0xff] %vm74_vm0, %v13572_v3 }
0x1a38   :  { %9626 = vrot.lane.b32.xlu1 %v9625_v31, %s10688_s21  ;;  %v6989_v34 = vld [vmem:[#allocation2 + $0x40] sm:$0xff] }
0x1a39   :  { %v7002_v55 = vld [vmem:[#allocation2 + $0x29] sm:$0xff] }
0x1a3a   :  { %v9635_v10 = vpack.i.bf16 %v7002_v55, %v7001_v42  ;;  %v6971_v7 = vld [vmem:[#allocation2 + $0x2f] sm:$0xff]  ;;  %v6974_v13 = vld [vmem:[#allocation2 + $0x47] sm:$0xff] }
0x1a3b   :  { %v6972_v47 = vld [vmem:[#allocation2 + $0x37] sm:$0xff]  ;;  %v6973_v23 = vld [vmem:[#allocation2 + $0x3f] sm:$0xff]  ;;  %v7006_v58 = vld [vmem:[#allocation2 + $0x49] sm:$0xff] }
0x1a3c   :  { %v6988_v30 = vld [vmem:[#allocation2 + $0x38] sm:$0xff]  ;;  %v8662_v11 = vpop.f32.mrb[160].mxu1  ;;  %9636 = vrot.lane.b32.xlu0 %v9635_v10, %s10694_s16  ;;  %v9640_v50 = vpack.i.bf16 %v6972_v47, %v6971_v7  ;;  %v6987_v5 = vld [vmem:[#allocation2 + $0x30] sm:$0xff]  ;;  %v7005_v44 = vld [vmem:[#allocation2 + $0x41] sm:$0xff] }
0x1a3d   :  { %v6897_v20 = vadd.f32 %v8662_v11, %v13523_v48  ;;  %v6888_v56 = vpop.f32.mrb[161].mxu1  ;;  %v7003_v32 = vld [vmem:[#allocation2 + $0x31] sm:$0xff]  ;;  %v7004_v38 = vld [vmem:[#allocation2 + $0x39] sm:$0xff]  ;;  %v9645_v61 = vpack.i.bf16 %v6988_v30, %v6987_v5  ;;  %v9665_v35 = vpack.i.bf16 %v7006_v58, %v7005_v44 }
0x1a3e   :  { %v6889_v12 = vadd.f32 %v6888_v56, %v13523_v48  ;;  %v8663_v37 = vpop.f32.mrb[162].mxu1  ;;  %9641 = vrot.lane.b32.xlu1 %v9640_v50, %s10693_s15  ;;  %v9650_v16 = vpack.i.bf16 %v7004_v38, %v7003_v32 }
0x1a3f   :  { %v13586_v4 = vadd.f32 %v6897_v20, %v13278_v36  ;;  %v6900_v45 = vadd.f32 %v8663_v37, %v13523_v48  ;;  %v6891_v62 = vpop.f32.mrb[163].mxu1  ;;  %v6990_v36 = vld [vmem:[#allocation2 + $0x48] sm:$0xff] }
0x1a40   :  { %v13590_v17 = vadd.f32 %v6889_v12, %v13282_v6  ;;  %v6892_v1 = vadd.f32 %v6891_v62, %v13523_v48  ;;  %9646 = vrot.lane.b32.xlu0 %v9645_v61, %s10688_s21  ;;  %v9660_v6 = vpack.i.bf16 %v6974_v13, %v6973_v23 }
0x1a41   :  { %6945 = vst.msk [vmem:[#allocation2 + $0x80] sm:$0xff] %vm74_vm0, %v13586_v4  ;;  %v13597_v33 = vadd.f32 %v6900_v45, %v13289_v54  ;;  %v9655_v54 = vpack.i.bf16 %v6990_v36, %v6989_v34 }
0x1a42   :  { %6943 = vst.msk [vmem:[#allocation2 + $0x70] sm:$0xff] %vm74_vm0, %v13590_v17  ;;  %v13602_v53 = vadd.f32 %v6892_v1, %v13294_v41  ;;  %9651 = vrot.lane.b32.xlu1 %v9650_v16, %s10694_s16 }
0x1a43   :  { %6946 = vst.msk [vmem:[#allocation2 + $0x88] sm:$0xff] %vm74_vm0, %v13597_v33 }
0x1a44   :  { %6944 = vst.msk [vmem:[#allocation2 + $0x78] sm:$0xff] %vm74_vm0, %v13602_v53  ;;  %9661 = vrot.lane.b32.xlu0 %v9660_v6, %s10693_s15 }
0x1a46   :  { %9656 = vrot.lane.b32.xlu1 %v9655_v54, %s10688_s21 }
0x1a48   :  { %9666 = vrot.lane.b32.xlu0 %v9665_v35, %s10694_s16 }
0x1a49   :  { %v6991_v41 = vld [vmem:[#allocation2 + $0x70] sm:$0xff] }
0x1a4a   :  { %v6975_v14 = vld [vmem:[#allocation2 + $0x6f] sm:$0xff]  ;;  %v6978_v51 = vld [vmem:[#allocation2 + $0x87] sm:$0xff] }
0x1a4b   :  { %v6992_v57 = vld [vmem:[#allocation2 + $0x78] sm:$0xff]  ;;  %v6994_v11 = vld [vmem:[#allocation2 + $0x88] sm:$0xff] }
0x1a4c   :  { %v6976_v15 = vld [vmem:[#allocation2 + $0x77] sm:$0xff]  ;;  %v8666_v26 = vpop.f32.mrb[164].mxu1  ;;  %v9675_v59 = vpack.i.bf16 %v6992_v57, %v6991_v41  ;;  %v6977_v52 = vld [vmem:[#allocation2 + $0x7f] sm:$0xff] }
0x1a4d   :  { %v9670_v0 = vpack.i.bf16 %v6976_v15, %v6975_v14  ;;  %v6913_v24 = vadd.f32 %v8666_v26, %v13523_v48  ;;  %v6904_v29 = vpop.f32.mrb[165].mxu1  ;;  %v7007_v2 = vld [vmem:[#allocation2 + $0x71] sm:$0xff]  ;;  %v7008_v40 = vld [vmem:[#allocation2 + $0x79] sm:$0xff]  ;;  %v9690_v7 = vpack.i.bf16 %v6978_v51, %v6977_v52 }
0x1a4e   :  { %v6905_v63 = vadd.f32 %v6904_v29, %v13523_v48  ;;  %v8667_v27 = vpop.f32.mrb[166].mxu1  ;;  %9676 = vrot.lane.b32.xlu0 %v9675_v59, %s10688_s21  ;;  %v9680_v47 = vpack.i.bf16 %v7008_v40, %v7007_v2  ;;  %v6951_v15 = vld [vmem:[#allocation2 + $0xe] sm:$0xff]  ;;  %v6952_v26 = vld [vmem:[#allocation2 + $0x16] sm:$0xff] }
0x1a4f   :  { %9671 = vrot.lane.b32.xlu1 %v9670_v0, %s10693_s15  ;;  %v13617_v22 = vadd.f32 %v6913_v24, %v13309_v46  ;;  %v6916_v31 = vadd.f32 %v8667_v27, %v13523_v48  ;;  %v6907_v42 = vpop.f32.mrb[167].mxu1  ;;  %v7018_v40 = vld [vmem:[#allocation2 + $0x2a] sm:$0xff] }
0x1a50   :  { %v13621_v55 = vadd.f32 %v6905_v63, %v13313_v28  ;;  %v6908_v10 = vadd.f32 %v6907_v42, %v13523_v48  ;;  %v6993_v28 = vld [vmem:[#allocation2 + $0x80] sm:$0xff] }
0x1a51   :  { %6949 = vst.msk [vmem:[#allocation2 + $0xa0] sm:$0xff] %vm74_vm0, %v13617_v22  ;;  %v13627_v30 = vadd.f32 %v6916_v31, %v13319_v19  ;;  %v9685_v19 = vpack.i.bf16 %v6994_v11, %v6993_v28  ;;  %v7009_v48 = vld [vmem:[#allocation2 + $0x81] sm:$0xff] }
0x1a52   :  { %6947 = vst.msk [vmem:[#allocation2 + $0x90] sm:$0xff] %vm74_vm0, %v13621_v55  ;;  %v13632_v46 = vadd.f32 %v6908_v10, %v13324_v25  ;;  %9691 = vrot.lane.b32.xlu0 %v9690_v7, %s10693_s15  ;;  %v7017_v7 = vld [vmem:[#allocation2 + $0x22] sm:$0xff] }
0x1a53   :  { %9681 = vrot.lane.b32.xlu1 %v9680_v47, %s10694_s16  ;;  %6950 = vst.msk [vmem:[#allocation2 + $0xa8] sm:$0xff] %vm74_vm0, %v13627_v30  ;;  %v7274_v47 = vpack.c.bf16 %v7018_v40, %v7017_v7 }
0x1a54   :  { %6948 = vst.msk [vmem:[#allocation2 + $0x98] sm:$0xff] %vm74_vm0, %v13632_v46 }
0x1a57   :  { %9686 = vrot.lane.b32.xlu1 %v9685_v19, %s10688_s21 }
0x1a58   :  { %v6997_v16 = vld [vmem:[#allocation2 + $0xa0] sm:$0xff] }
0x1a59   :  { %v7010_v50 = vld [vmem:[#allocation2 + $0x89] sm:$0xff] }
0x1a5a   :  { %v9695_v20 = vpack.i.bf16 %v7010_v50, %v7009_v48  ;;  %v6979_v56 = vld [vmem:[#allocation2 + $0x8f] sm:$0xff]  ;;  %v6982_v62 = vld [vmem:[#allocation2 + $0xa7] sm:$0xff]  ;;  %v6953_v50 = vld [vmem:[#allocation2 + $0x1e] sm:$0xff] }
0x1a5b   :  { %v6980_v25 = vld [vmem:[#allocation2 + $0x97] sm:$0xff]  ;;  %v6981_v45 = vld [vmem:[#allocation2 + $0x9f] sm:$0xff]  ;;  %v6998_v13 = vld [vmem:[#allocation2 + $0xa8] sm:$0xff] }
0x1a5c   :  { %v6996_v5 = vld [vmem:[#allocation2 + $0x98] sm:$0xff]  ;;  %9696 = vrot.lane.b32.xlu0 %v9695_v20, %s10694_s16  ;;  %v9700_v32 = vpack.i.bf16 %v6980_v25, %v6979_v56  ;;  %v6995_v38 = vld [vmem:[#allocation2 + $0x90] sm:$0xff]  ;;  %v9720_v1 = vpack.i.bf16 %v6982_v62, %v6981_v45  ;;  %v7013_v36 = vld [vmem:[#allocation2 + $0xa1] sm:$0xff]  ;;  %v9715_v34 = vpack.i.bf16 %v6998_v13, %v6997_v16 }
0x1a5d   :  { %v7011_v12 = vld [vmem:[#allocation2 + $0x91] sm:$0xff]  ;;  %v7012_v37 = vld [vmem:[#allocation2 + $0x99] sm:$0xff]  ;;  %v9705_v61 = vpack.i.bf16 %v6996_v5, %v6995_v38  ;;  %v7014_v6 = vld [vmem:[#allocation2 + $0xa9] sm:$0xff] }
0x1a5e   :  { %9701 = vrot.lane.b32.xlu1 %v9700_v32, %s10693_s15  ;;  %v9710_v23 = vpack.i.bf16 %v7012_v37, %v7011_v12  ;;  %v9725_v44 = vpack.i.bf16 %v7014_v6, %v7013_v36  ;;  %v6954_v20 = vld [vmem:[#allocation2 + $0x26] sm:$0xff]  ;;  %v7019_v12 = vld [vmem:[#allocation2 + $0x32] sm:$0xff]  ;;  %v7020_v37 = vld [vmem:[#allocation2 + $0x3a] sm:$0xff] }
0x1a5f   :  { %v6955_v36 = vld [vmem:[#allocation2 + $0x2e] sm:$0xff]  ;;  %v6956_v6 = vld [vmem:[#allocation2 + $0x36] sm:$0xff] }
0x1a60   :  { %9706 = vrot.lane.b32.xlu0 %v9705_v61, %s10688_s21 }
0x1a62   :  { %9711 = vrot.lane.b32.xlu1 %v9710_v23, %s10694_s16 }
0x1a64   :  { %9721 = vrot.lane.b32.xlu0 %v9720_v1, %s10693_s15 }
0x1a66   :  { %9716 = vrot.lane.b32.xlu1 %v9715_v34, %s10688_s21 }
0x1a68   :  { %9726 = vrot.lane.b32.xlu0 %v9725_v44, %s10694_s16 }
0x1aa1   :  { %v9617_v58 = vpop.permute.xlu0 %9616 }
0x1aa2   :  { %v9612_v54 = vpop.permute.xlu1 %9611  ;;  %v9619_v57 = vunpack.i.h.bf16 %v9617_v58  ;;  %v9618_v14 = vunpack.i.l.bf16 %v9617_v58  ;;  %v7276_v58 = vpack.c.bf16 %v7020_v37, %v7019_v12  ;;  %v7023_v37 = vld [vmem:[#allocation2 + $0x72] sm:$0xff] }
0x1aa3   :  { %v9614_v35 = vunpack.i.h.bf16 %v9612_v54  ;;  %v9613_v41 = vunpack.i.l.bf16 %v9612_v54 }
0x1aa5   :  { %v7223_v59 = vsel %vm74_vm0, %v6951_v15, %v9613_v41  ;;  %v7224_v0 = vsel %vm74_vm0, %v6952_v26, %v9614_v35  ;;  %v9632_v63 = vpop.permute.xlu0 %9631 }
0x1aa6   :  { %v9622_v51 = vpop.permute.xlu1 %9621  ;;  %v7239_v52 = vsel %vm525_vm1, %v7223_v59, %v9618_v14  ;;  %v7240_v2 = vsel %vm525_vm1, %v7224_v0, %v9619_v57  ;;  %v9634_v11 = vunpack.i.h.bf16 %v9632_v63  ;;  %v9633_v28 = vunpack.i.l.bf16 %v9632_v63  ;;  %v6958_v63 = vld [vmem:[#allocation2 + $0x46] sm:$0xff] }
0x1aa7   :  { %v9624_v24 = vunpack.i.h.bf16 %v9622_v51  ;;  %v9623_v29 = vunpack.i.l.bf16 %v9622_v51 }
0x1aa8   :  { %v7226_v25 = vsel %vm74_vm0, %v6954_v20, %v9634_v11  ;;  %v7225_v5 = vsel %vm74_vm0, %v6953_v50, %v9633_v28 }
0x1aa9   :  { %v7255_v27 = vsel %vm542_vm2, %v7239_v52, %v9623_v29  ;;  %v7256_v31 = vsel %vm542_vm2, %v7240_v2, %v9624_v24  ;;  %v6957_v24 = vld [vmem:[#allocation2 + $0x3e] sm:$0xff] }
0x1aaa   :  { %v7271_v42 = vpack.c.bf16 %v7256_v31, %v7255_v27  ;;  %v9627_v10 = vpop.permute.xlu1 %9626  ;;  %v7021_v31 = vld [vmem:[#allocation2 + $0x42] sm:$0xff] }
0x1aab   :  { %v9629_v19 = vunpack.i.h.bf16 %v9627_v10  ;;  %v9628_v48 = vunpack.i.l.bf16 %v9627_v10 }
0x1aac   :  { %7430 = vmatmul.mubr.bf16.vlgmr.msra.gmra.mrb[168].mxu1 %v7271_v42  ;;  %v7022_v42 = vld [vmem:[#allocation2 + $0x4a] sm:$0xff] }
0x1aad   :  { %8322 = vmatprep.mubr.msk.bf16.mxu1 %vm74_vm0, %v7274_v47  ;;  %v7242_v61 = vsel %vm525_vm1, %v7226_v25, %v9629_v19  ;;  %v7241_v45 = vsel %vm525_vm1, %v7225_v5, %v9628_v48  ;;  %v7278_v20 = vpack.c.bf16 %v7022_v42, %v7021_v31  ;;  %v6962_v31 = vld [vmem:[#allocation2 + $0x86] sm:$0xff] }
0x1aae   :  { %v9637_v56 = vpop.permute.xlu0 %9636 }
0x1aaf   :  { %v9639_v32 = vunpack.i.h.bf16 %v9637_v56  ;;  %v9638_v38 = vunpack.i.l.bf16 %v9637_v56 }
0x1ab0   :  { %v9642_v62 = vpop.permute.xlu1 %9641 }
0x1ab1   :  { %v9644_v23 = vunpack.i.h.bf16 %v9642_v62  ;;  %v9643_v13 = vunpack.i.l.bf16 %v9642_v62  ;;  %v7257_v1 = vsel %vm542_vm2, %v7241_v45, %v9638_v38  ;;  %v7258_v16 = vsel %vm542_vm2, %v7242_v61, %v9639_v32  ;;  %v7024_v61 = vld [vmem:[#allocation2 + $0x7a] sm:$0xff] }
0x1ab2   :  { %v9647_v34 = vpop.permute.xlu0 %9646  ;;  %v7273_v44 = vpack.c.bf16 %v7258_v16, %v7257_v1  ;;  %v6959_v1 = vld [vmem:[#allocation2 + $0x6e] sm:$0xff]  ;;  %v6960_v16 = vld [vmem:[#allocation2 + $0x76] sm:$0xff] }
0x1ab3   :  { %v7228_v54 = vsel %vm74_vm0, %v6956_v6, %v9644_v23  ;;  %v7227_v35 = vsel %vm74_vm0, %v6955_v36, %v9643_v13  ;;  %v9649_v41 = vunpack.i.h.bf16 %v9647_v34  ;;  %v9648_v57 = vunpack.i.l.bf16 %v9647_v34 }
0x1ab4   :  { %v9652_v14 = vpop.permute.xlu1 %9651  ;;  %7438 = vmatmul.mubr.bf16.gmra.mrb[172].mxu1 %v7273_v44  ;;  %v7280_v44 = vpack.c.bf16 %v7024_v61, %v7023_v37 }
0x1ab5   :  { %v7243_v15 = vsel %vm525_vm1, %v7227_v35, %v9648_v57  ;;  %v7244_v26 = vsel %vm525_vm1, %v7228_v54, %v9649_v41  ;;  %v9654_v59 = vunpack.i.h.bf16 %v9652_v14  ;;  %v9653_v0 = vunpack.i.l.bf16 %v9652_v14  ;;  %8323 = vmatprep.mubr.msk.bf16.mxu1 %vm74_vm0, %v7276_v58 }
0x1ab6   :  { %v9662_v51 = vpop.permute.xlu0 %9661 }
0x1ab7   :  { %v9664_v29 = vunpack.i.h.bf16 %v9662_v51  ;;  %v9663_v52 = vunpack.i.l.bf16 %v9662_v51  ;;  %v7259_v2 = vsel %vm542_vm2, %v7243_v15, %v9653_v0  ;;  %v7260_v40 = vsel %vm542_vm2, %v7244_v26, %v9654_v59  ;;  %v7026_v59 = vld [vmem:[#allocation2 + $0x8a] sm:$0xff] }
0x1ab8   :  { %v9657_v27 = vpop.permute.xlu1 %9656  ;;  %v7275_v19 = vpack.c.bf16 %v7260_v40, %v7259_v2 }
0x1ab9   :  { %v7230_v10 = vsel %vm74_vm0, %v6958_v63, %v9664_v29  ;;  %v7229_v7 = vsel %vm74_vm0, %v6957_v24, %v9663_v52  ;;  %v9659_v47 = vunpack.i.h.bf16 %v9657_v27  ;;  %v9658_v11 = vunpack.i.l.bf16 %v9657_v27  ;;  %v7025_v24 = vld [vmem:[#allocation2 + $0x82] sm:$0xff] }
0x1aba   :  { %v9667_v28 = vpop.permute.xlu0 %9666  ;;  %v7282_v2 = vpack.c.bf16 %v7026_v59, %v7025_v24  ;;  %v6961_v27 = vld [vmem:[#allocation2 + $0x7e] sm:$0xff] }
0x1abb   :  { %v9669_v48 = vunpack.i.h.bf16 %v9667_v28  ;;  %v9668_v50 = vunpack.i.l.bf16 %v9667_v28  ;;  %v7246_v56 = vsel %vm525_vm1, %v7230_v10, %v9659_v47  ;;  %v7245_v25 = vsel %vm525_vm1, %v7229_v7, %v9658_v11  ;;  %v7027_v28 = vld [vmem:[#allocation2 + $0x92] sm:$0xff]  ;;  %v7029_v59 = vld [vmem:[#allocation2 + $0xa2] sm:$0xff] }
0x1abc   :  { %7446 = vmatmul.mubr.bf16.gmra.mrb[176].mxu1 %v7275_v19  ;;  %v7028_v19 = vld [vmem:[#allocation2 + $0x9a] sm:$0xff] }
0x1abd   :  { %8324 = vmatprep.mubr.msk.bf16.mxu1 %vm74_vm0, %v7278_v20  ;;  %v7261_v5 = vsel %vm542_vm2, %v7245_v25, %v9668_v50  ;;  %v7262_v32 = vsel %vm542_vm2, %v7246_v56, %v9669_v48 }
0x1abe   :  { %v7277_v36 = vpack.c.bf16 %v7262_v32, %v7261_v5 }
0x1ac0   :  { %v9677_v38 = vpop.permute.xlu0 %9676 }
0x1ac1   :  { %v9672_v12 = vpop.permute.xlu1 %9671  ;;  %v9679_v23 = vunpack.i.h.bf16 %v9677_v38  ;;  %v9678_v13 = vunpack.i.l.bf16 %v9677_v38  ;;  %v6963_v38 = vld [vmem:[#allocation2 + $0x8e] sm:$0xff] }
0x1ac2   :  { %v9674_v45 = vunpack.i.h.bf16 %v9672_v12  ;;  %v9673_v62 = vunpack.i.l.bf16 %v9672_v12  ;;  %v6964_v12 = vld [vmem:[#allocation2 + $0x96] sm:$0xff] }
0x1ac4   :  { %v7232_v6 = vsel %vm74_vm0, %v6960_v16, %v9674_v45  ;;  %v7231_v34 = vsel %vm74_vm0, %v6959_v1, %v9673_v62  ;;  %7454 = vmatmul.mubr.bf16.gmra.mrb[180].mxu1 %v7277_v36  ;;  %v9692_v26 = vpop.permute.xlu0 %9691  ;;  %v7284_v45 = vpack.c.bf16 %v7028_v19, %v7027_v28  ;;  %v9842_v28 = vld [vmem:[%s13883_s2 + $0x70] sm:$0xff]   ;;  %v9843_v19 = vld [vmem:[%s13883_s2 + $0x78] sm:$0xff]  }
0x1ac5   :  { %v9682_v58 = vpop.permute.xlu1 %9681  ;;  %8325 = vmatprep.mubr.msk.bf16.mxu1 %vm74_vm0, %v7280_v44  ;;  %v7247_v41 = vsel %vm525_vm1, %v7231_v34, %v9678_v13  ;;  %v7248_v57 = vsel %vm525_vm1, %v7232_v6, %v9679_v23  ;;  %v9694_v29 = vunpack.i.h.bf16 %v9692_v26  ;;  %v9693_v52 = vunpack.i.l.bf16 %v9692_v26  ;;  %8668 = vmatprep.subr.bf16.mxu0 %v9842_v28 }
0x1ac6   :  { %v9684_v54 = vunpack.i.h.bf16 %v9682_v58  ;;  %v9683_v35 = vunpack.i.l.bf16 %v9682_v58  ;;  %8669 = vmatpush3.bf16.msra.mxu0 %v9842_v28 }
0x1ac7   :  { %v7234_v10 = vsel %vm74_vm0, %v6962_v31, %v9694_v29  ;;  %v7233_v7 = vsel %vm74_vm0, %v6961_v27, %v9693_v52  ;;  %8670 = vmatprep.subr.bf16.mxu0 %v9843_v19 }
0x1ac8   :  { %v7263_v14 = vsel %vm542_vm2, %v7247_v41, %v9683_v35  ;;  %v7264_v15 = vsel %vm542_vm2, %v7248_v57, %v9684_v54  ;;  %v6965_v54 = vld [vmem:[#allocation2 + $0x9e] sm:$0xff] }
0x1ac9   :  { %v9687_v0 = vpop.permute.xlu1 %9686  ;;  %v7279_v51 = vpack.c.bf16 %v7264_v15, %v7263_v14  ;;  %v6966_v15 = vld [vmem:[#allocation2 + $0xa6] sm:$0xff] }
0x1aca   :  { %v9689_v40 = vunpack.i.h.bf16 %v9687_v0  ;;  %v9688_v63 = vunpack.i.l.bf16 %v9687_v0  ;;  %v7030_v0 = vld [vmem:[#allocation2 + $0xaa] sm:$0xff]  ;;  %8671 = vmatpush3.bf16.msra.mxu0 %v9843_v19 }
0x1acb   :  { %v7286_v31 = vpack.c.bf16 %v7030_v0, %v7029_v59 }
0x1acc   :  { %7462 = vmatmul.mubr.bf16.gmra.mrb[184].mxu1 %v7279_v51  ;;  %v7250_v48 = vsel %vm525_vm1, %v7234_v10, %v9689_v40  ;;  %v7249_v50 = vsel %vm525_vm1, %v7233_v7, %v9688_v63 }
0x1acd   :  { %8326 = vmatprep.mubr.msk.bf16.mxu1 %vm74_vm0, %v7282_v2 }
0x1ace   :  { %v9697_v42 = vpop.permute.xlu0 %9696 }
0x1acf   :  { %v9699_v47 = vunpack.i.h.bf16 %v9697_v42  ;;  %v9698_v11 = vunpack.i.l.bf16 %v9697_v42 }
0x1ad0   :  { %v9702_v20 = vpop.permute.xlu1 %9701 }
0x1ad1   :  { %v9704_v56 = vunpack.i.h.bf16 %v9702_v20  ;;  %v9703_v25 = vunpack.i.l.bf16 %v9702_v20  ;;  %v7265_v5 = vsel %vm542_vm2, %v7249_v50, %v9698_v11  ;;  %v7266_v32 = vsel %vm542_vm2, %v7250_v48, %v9699_v47  ;;  %v13714_v48 = vld [vmem:[%s13884_s3 + $0x7] ss:$0 sm:$0xff] }
0x1ad2   :  { %v9707_v37 = vpop.permute.xlu0 %9706  ;;  %v7281_v61 = vpack.c.bf16 %v7266_v32, %v7265_v5 }
0x1ad3   :  { %v7236_v62 = vsel %vm74_vm0, %v6964_v12, %v9704_v56  ;;  %v7235_v23 = vsel %vm74_vm0, %v6963_v38, %v9703_v25  ;;  %v9709_v13 = vunpack.i.h.bf16 %v9707_v37  ;;  %v9708_v1 = vunpack.i.l.bf16 %v9707_v37 }
0x1ad4   :  { %v9712_v16 = vpop.permute.xlu1 %9711  ;;  %7470 = vmatmul.mubr.bf16.gmra.mrb[188].mxu1 %v7281_v61 }
0x1ad5   :  { %v7251_v36 = vsel %vm525_vm1, %v7235_v23, %v9708_v1  ;;  %v7252_v6 = vsel %vm525_vm1, %v7236_v62, %v9709_v13  ;;  %v9714_v34 = vunpack.i.h.bf16 %v9712_v16  ;;  %v9713_v44 = vunpack.i.l.bf16 %v9712_v16  ;;  %8327 = vmatprep.mubr.msk.bf16.mxu1 %vm74_vm0, %v7284_v45 }
0x1ad6   :  { %v9722_v58 = vpop.permute.xlu0 %9721 }
0x1ad7   :  { %v9724_v35 = vunpack.i.h.bf16 %v9722_v58  ;;  %v9723_v41 = vunpack.i.l.bf16 %v9722_v58  ;;  %v7267_v57 = vsel %vm542_vm2, %v7251_v36, %v9713_v44  ;;  %v7268_v14 = vsel %vm542_vm2, %v7252_v6, %v9714_v34 }
0x1ad8   :  { %v9717_v26 = vpop.permute.xlu1 %9716  ;;  %v7283_v40 = vpack.c.bf16 %v7268_v14, %v7267_v57 }
0x1ad9   :  { %v7238_v51 = vsel %vm74_vm0, %v6966_v15, %v9724_v35  ;;  %v7237_v24 = vsel %vm74_vm0, %v6965_v54, %v9723_v41  ;;  %v9719_v29 = vunpack.i.h.bf16 %v9717_v26  ;;  %v9718_v52 = vunpack.i.l.bf16 %v9717_v26 }
0x1ada   :  { %v9727_v2 = vpop.permute.xlu0 %9726 }
0x1adb   :  { %v9729_v63 = vunpack.i.h.bf16 %v9727_v2  ;;  %v9728_v27 = vunpack.i.l.bf16 %v9727_v2  ;;  %v7254_v42 = vsel %vm525_vm1, %v7238_v51, %v9719_v29  ;;  %v7253_v10 = vsel %vm525_vm1, %v7237_v24, %v9718_v52 }
0x1adc   :  { %7478 = vmatmul.mubr.bf16.gmra.mrb[192].mxu1 %v7283_v40 }
0x1add   :  { %8328 = vmatprep.mubr.msk.bf16.mxu1 %vm74_vm0, %v7286_v31  ;;  %v7269_v7 = vsel %vm542_vm2, %v7253_v10, %v9728_v27  ;;  %v7270_v47 = vsel %vm542_vm2, %v7254_v42, %v9729_v63 }
0x1ade   :  { %v7285_v11 = vpack.c.bf16 %v7270_v47, %v7269_v7 }
0x1ae4   :  { %7486 = vmatmul.mubr.bf16.gmra.mrb[196].mxu1 %v7285_v11 }
0x1ae5   :  { %8704 = vmatprep.mubr.msk.bf16.mxu1 %vm10695_vm3, %v10692_v9 }
0x1b7f   :  { %v7431_v50 = vpop.f32.mrb[168].mxu1 }
0x1b80   :  { %v13717_v20 = vadd.f32 %v13714_v48, %v7431_v50  ;;  %v7433_v56 = vpop.f32.mrb[169].mxu1 }
0x1b81   :  { %v7434_v25 = vpop.f32.mrb[170].mxu1 }
0x1b82   :  { %v8329_v5 = vmul.f32 -1.442695, %v13717_v20  ;;  %v13721_v32 = vadd.f32 %v13714_v48, %v7434_v25  ;;  %v7436_v38 = vpop.f32.mrb[171].mxu1 }
0x1b84   :  { %10516 = vpow2.f32 %v8329_v5  ;;  %v8330_v12 = vmul.f32 -1.442695, %v13721_v32 }
0x1b86   :  { %10518 = vpow2.f32 %v8330_v12 }
0x1b87   :  { %v7439_v37 = vpop.f32.mrb[172].mxu1 }
0x1b88   :  { %v13725_v61 = vadd.f32 %v13714_v48, %v7439_v37  ;;  %v7441_v45 = vpop.f32.mrb[173].mxu1 }
0x1b89   :  { %v7442_v62 = vpop.f32.mrb[174].mxu1 }
0x1b8a   :  { %v8331_v23 = vmul.f32 -1.442695, %v13725_v61  ;;  %v13729_v13 = vadd.f32 %v13714_v48, %v7442_v62  ;;  %v7444_v1 = vpop.f32.mrb[175].mxu1 }
0x1b8c   :  { %10520 = vpow2.f32 %v8331_v23  ;;  %v8332_v16 = vmul.f32 -1.442695, %v13729_v13 }
0x1b8e   :  { %v10517_v36 = vpop.eup %10516  ;;  %10522 = vpow2.f32 %v8332_v16 }
0x1b8f   :  { %v7558_v6 = vadd.f32 1.0, %v10517_v36  ;;  %v7447_v44 = vpop.f32.mrb[176].mxu1 }
0x1b90   :  { %v10519_v34 = vpop.eup %10518  ;;  %v13733_v54 = vadd.f32 %v13714_v48, %v7447_v44  ;;  %v7449_v35 = vpop.f32.mrb[177].mxu1 }
0x1b91   :  { %10524 = vrcp.f32 %v7558_v6  ;;  %v7559_v58 = vadd.f32 1.0, %v10519_v34  ;;  %v7450_v41 = vpop.f32.mrb[178].mxu1 }
0x1b92   :  { %v8333_v57 = vmul.f32 -1.442695, %v13733_v54  ;;  %v13737_v14 = vadd.f32 %v13714_v48, %v7450_v41  ;;  %v7452_v15 = vpop.f32.mrb[179].mxu1 }
0x1b93   :  { %10526 = vrcp.f32 %v7559_v58 }
0x1b94   :  { %10528 = vpow2.f32 %v8333_v57  ;;  %v8334_v26 = vmul.f32 -1.442695, %v13737_v14 }
0x1b96   :  { %v10521_v59 = vpop.eup %10520  ;;  %10530 = vpow2.f32 %v8334_v26 }
0x1b97   :  { %v7560_v0 = vadd.f32 1.0, %v10521_v59  ;;  %v7455_v51 = vpop.f32.mrb[180].mxu1 }
0x1b98   :  { %v10523_v24 = vpop.eup %10522  ;;  %v13741_v29 = vadd.f32 %v13714_v48, %v7455_v51  ;;  %v7457_v52 = vpop.f32.mrb[181].mxu1 }
0x1b99   :  { %10532 = vrcp.f32 %v7560_v0  ;;  %v7561_v2 = vadd.f32 1.0, %v10523_v24  ;;  %v7458_v40 = vpop.f32.mrb[182].mxu1 }
0x1b9a   :  { %v8335_v27 = vmul.f32 -1.442695, %v13741_v29  ;;  %v13745_v31 = vadd.f32 %v13714_v48, %v7458_v40  ;;  %v7460_v42 = vpop.f32.mrb[183].mxu1 }
0x1b9b   :  { %v10525_v63 = vpop.eup %10524  ;;  %10534 = vrcp.f32 %v7561_v2 }
0x1b9c   :  { %7622 = vrot.lane.b32.xlu1 %v10525_v63, %s10694_s16  ;;  %10536 = vpow2.f32 %v8335_v27  ;;  %v8336_v7 = vmul.f32 -1.442695, %v13745_v31 }
0x1b9d   :  { %v10527_v10 = vpop.eup %10526 }
0x1b9e   :  { %7624 = vrot.lane.b32.xlu0 %v10527_v10, %s10694_s16  ;;  %v10529_v47 = vpop.eup %10528  ;;  %10538 = vpow2.f32 %v8336_v7 }
0x1b9f   :  { %v7562_v11 = vadd.f32 1.0, %v10529_v47  ;;  %v7463_v28 = vpop.f32.mrb[184].mxu1 }
0x1ba0   :  { %v10531_v19 = vpop.eup %10530  ;;  %v13751_v50 = vadd.f32 %v13714_v48, %v7463_v28  ;;  %v7465_v56 = vpop.f32.mrb[185].mxu1 }
0x1ba1   :  { %10540 = vrcp.f32 %v7562_v11  ;;  %v7563_v25 = vadd.f32 1.0, %v10531_v19  ;;  %v7466_v5 = vpop.f32.mrb[186].mxu1 }
0x1ba2   :  { %v8337_v38 = vmul.f32 -1.442695, %v13751_v50  ;;  %v13755_v12 = vadd.f32 %v13714_v48, %v7466_v5  ;;  %v7468_v37 = vpop.f32.mrb[187].mxu1 }
0x1ba3   :  { %v10533_v45 = vpop.eup %10532  ;;  %10542 = vrcp.f32 %v7563_v25 }
0x1ba4   :  { %10544 = vpow2.f32 %v8337_v38  ;;  %v8338_v62 = vmul.f32 -1.442695, %v13755_v12  ;;  %7626 = vrot.lane.b32.xlu1 %v10533_v45, %s10694_s16 }
0x1ba5   :  { %v10535_v23 = vpop.eup %10534 }
0x1ba6   :  { %v10537_v1 = vpop.eup %10536  ;;  %10546 = vpow2.f32 %v8338_v62  ;;  %7628 = vrot.lane.b32.xlu0 %v10535_v23, %s10694_s16 }
0x1ba7   :  { %v7564_v16 = vadd.f32 1.0, %v10537_v1  ;;  %v7471_v36 = vpop.f32.mrb[188].mxu1 }
0x1ba8   :  { %v10539_v6 = vpop.eup %10538  ;;  %v13761_v34 = vadd.f32 %v13714_v48, %v7471_v36  ;;  %v7473_v44 = vpop.f32.mrb[189].mxu1 }
0x1ba9   :  { %10548 = vrcp.f32 %v7564_v16  ;;  %v7565_v58 = vadd.f32 1.0, %v10539_v6  ;;  %v7474_v35 = vpop.f32.mrb[190].mxu1 }
0x1baa   :  { %v8339_v41 = vmul.f32 -1.442695, %v13761_v34  ;;  %v13765_v57 = vadd.f32 %v13714_v48, %v7474_v35  ;;  %v7476_v15 = vpop.f32.mrb[191].mxu1 }
0x1bab   :  { %v10541_v26 = vpop.eup %10540  ;;  %10550 = vrcp.f32 %v7565_v58 }
0x1bac   :  { %10552 = vpow2.f32 %v8339_v41  ;;  %v8340_v59 = vmul.f32 -1.442695, %v13765_v57  ;;  %7630 = vrot.lane.b32.xlu1 %v10541_v26, %s10694_s16 }
0x1bad   :  { %v10543_v0 = vpop.eup %10542 }
0x1bae   :  { %v10545_v51 = vpop.eup %10544  ;;  %10554 = vpow2.f32 %v8340_v59  ;;  %7632 = vrot.lane.b32.xlu0 %v10543_v0, %s10694_s16 }
0x1baf   :  { %v7566_v24 = vadd.f32 1.0, %v10545_v51  ;;  %v7479_v52 = vpop.f32.mrb[192].mxu1 }
0x1bb0   :  { %v10547_v2 = vpop.eup %10546  ;;  %v13771_v40 = vadd.f32 %v13714_v48, %v7479_v52  ;;  %v7481_v63 = vpop.f32.mrb[193].mxu1 }
0x1bb1   :  { %10556 = vrcp.f32 %v7566_v24  ;;  %v7567_v27 = vadd.f32 1.0, %v10547_v2  ;;  %v7482_v42 = vpop.f32.mrb[194].mxu1 }
0x1bb2   :  { %v8341_v10 = vmul.f32 -1.442695, %v13771_v40  ;;  %v13775_v7 = vadd.f32 %v13714_v48, %v7482_v42  ;;  %v7484_v47 = vpop.f32.mrb[195].mxu1 }
0x1bb3   :  { %v10549_v11 = vpop.eup %10548  ;;  %10558 = vrcp.f32 %v7567_v27  ;;  %v7929_v47 = vld [vmem:[%s13889_s8 + $0x3] sm:$0x1] }
0x1bb4   :  { %10560 = vpow2.f32 %v8341_v10  ;;  %v8342_v28 = vmul.f32 -1.442695, %v13775_v7  ;;  %7634 = vrot.lane.b32.xlu1 %v10549_v11, %s10694_s16 }
0x1bb5   :  { %v10551_v19 = vpop.eup %10550 }
0x1bb6   :  { %v10553_v56 = vpop.eup %10552  ;;  %10562 = vpow2.f32 %v8342_v28  ;;  %7636 = vrot.lane.b32.xlu0 %v10551_v19, %s10694_s16 }
0x1bb7   :  { %v7568_v25 = vadd.f32 1.0, %v10553_v56  ;;  %v7487_v5 = vpop.f32.mrb[196].mxu1 }
0x1bb8   :  { %v10555_v38 = vpop.eup %10554  ;;  %v13781_v37 = vadd.f32 %v13714_v48, %v7487_v5  ;;  %v7489_v45 = vpop.f32.mrb[197].mxu1 }
0x1bb9   :  { %10564 = vrcp.f32 %v7568_v25  ;;  %v7569_v62 = vadd.f32 1.0, %v10555_v38  ;;  %v7490_v23 = vpop.f32.mrb[198].mxu1 }
0x1bba   :  { %v8343_v1 = vmul.f32 -1.442695, %v13781_v37  ;;  %v13785_v16 = vadd.f32 %v13714_v48, %v7490_v23  ;;  %v7492_v36 = vpop.f32.mrb[199].mxu1 }
0x1bbb   :  { %v10557_v6 = vpop.eup %10556  ;;  %10566 = vrcp.f32 %v7569_v62 }
0x1bbc   :  { %10568 = vpow2.f32 %v8343_v1  ;;  %v8344_v44 = vmul.f32 -1.442695, %v13785_v16  ;;  %7638 = vrot.lane.b32.xlu1 %v10557_v6, %s10694_s16 }
0x1bbd   :  { %v10559_v58 = vpop.eup %10558 }
0x1bbe   :  { %v10561_v35 = vpop.eup %10560  ;;  %10570 = vpow2.f32 %v8344_v44  ;;  %7640 = vrot.lane.b32.xlu0 %v10559_v58, %s10694_s16 }
0x1bbf   :  { %v7570_v41 = vadd.f32 1.0, %v10561_v35 }
0x1bc0   :  { %v10563_v15 = vpop.eup %10562 }
0x1bc1   :  { %10572 = vrcp.f32 %v7570_v41  ;;  %v7571_v26 = vadd.f32 1.0, %v10563_v15 }
0x1bc3   :  { %v10565_v59 = vpop.eup %10564  ;;  %10574 = vrcp.f32 %v7571_v26 }
0x1bc4   :  { %7642 = vrot.lane.b32.xlu1 %v10565_v59, %s10694_s16 }
0x1bc5   :  { %v10567_v0 = vpop.eup %10566 }
0x1bc6   :  { %v10569_v51 = vpop.eup %10568  ;;  %7644 = vrot.lane.b32.xlu0 %v10567_v0, %s10694_s16 }
0x1bc7   :  { %v7572_v24 = vadd.f32 1.0, %v10569_v51 }
0x1bc8   :  { %v10571_v52 = vpop.eup %10570 }
0x1bc9   :  { %10576 = vrcp.f32 %v7572_v24  ;;  %v7573_v2 = vadd.f32 1.0, %v10571_v52 }
0x1bcb   :  { %v10573_v63 = vpop.eup %10572  ;;  %10578 = vrcp.f32 %v7573_v2 }
0x1bcc   :  { %7646 = vrot.lane.b32.xlu1 %v10573_v63, %s10694_s16  ;;  %10580 = vtanh.f32 %v13717_v20 }
0x1bcd   :  { %v10575_v27 = vpop.eup %10574  ;;  %10582 = vtanh.f32 %v13721_v32 }
0x1bce   :  { %7648 = vrot.lane.b32.xlu0 %v10575_v27, %s10694_s16  ;;  %10584 = vtanh.f32 %v13725_v61 }
0x1bcf   :  { %10586 = vtanh.f32 %v13729_v13 }
0x1bd0   :  { %10588 = vtanh.f32 %v13733_v54 }
0x1bd1   :  { %10590 = vtanh.f32 %v13737_v14 }
0x1bd2   :  { %10592 = vtanh.f32 %v13741_v29 }
0x1bd3   :  { %v10577_v42 = vpop.eup %10576  ;;  %10594 = vtanh.f32 %v13745_v31 }
0x1bd4   :  { %7650 = vrot.lane.b32.xlu1 %v10577_v42, %s10694_s16  ;;  %10596 = vtanh.f32 %v13751_v50 }
0x1bd5   :  { %v10579_v10 = vpop.eup %10578  ;;  %10598 = vtanh.f32 %v13755_v12 }
0x1bd6   :  { %7652 = vrot.lane.b32.xlu0 %v10579_v10, %s10694_s16  ;;  %v10581_v28 = vpop.eup %10580  ;;  %10600 = vtanh.f32 %v13761_v34 }
0x1bd7   :  { %v10583_v19 = vpop.eup %10582  ;;  %10602 = vtanh.f32 %v13765_v57 }
0x1bd8   :  { %7712 = vrot.lane.b32.xlu1 %v13714_v48, %s10688_s21  ;;  %v10585_v20 = vpop.eup %10584  ;;  %10604 = vtanh.f32 %v13771_v40 }
0x1bd9   :  { %v10587_v32 = vpop.eup %10586  ;;  %10606 = vtanh.f32 %v13775_v7 }
0x1bda   :  { %7932 = vperm.xlu0 %8738, %v7929_v47   ;;  %v10589_v1 = vpop.eup %10588  ;;  %10608 = vtanh.f32 %v13781_v37 }
0x1bdb   :  { %v10591_v36 = vpop.eup %10590  ;;  %10610 = vtanh.f32 %v13785_v16 }
0x1bdc   :  { %v10593_v35 = vpop.eup %10592 }
0x1bdd   :  { %v10595_v29 = vpop.eup %10594 }
0x1bde   :  { %v10597_v0 = vpop.eup %10596 }
0x1bdf   :  { %v10599_v50 = vpop.eup %10598 }
0x1be0   :  { %v10601_v63 = vpop.eup %10600 }
0x1be1   :  { %v10603_v34 = vpop.eup %10602 }
0x1c0e   :  { %v7623_v11 = vpop.permute.xlu1 %7622 }
0x1c0f   :  { %v7670_v25 = vmul.f32 %v10581_v28, %v7623_v11  ;;  %v10605_v11 = vpop.eup %10604 }
0x1c10   :  { %v7625_v56 = vpop.permute.xlu0 %7624  ;;  %v10607_v40 = vpop.eup %10606 }
0x1c11   :  { %v7671_v5 = vmul.f32 %v10583_v19, %v7625_v56 }
0x1c13   :  { %v7686_v38 = vpack.c.bf16 %v7671_v5, %v7670_v25  ;;  %v10609_v5 = vpop.eup %10608 }
0x1c15   :  { %8672 = vmatprep.mubr.msk.bf16.mxu0 %vm74_vm0, %v7686_v38  ;;  %v10611_v38 = vpop.eup %10610 }
0x1c16   :  { %v7627_v48 = vpop.permute.xlu1 %7626 }
0x1c17   :  { %v7672_v61 = vmul.f32 %v10585_v20, %v7627_v48 }
0x1c18   :  { %v7629_v45 = vpop.permute.xlu0 %7628 }
0x1c19   :  { %v7673_v62 = vmul.f32 %v10587_v32, %v7629_v45 }
0x1c1b   :  { %v7687_v23 = vpack.c.bf16 %v7673_v62, %v7672_v61 }
0x1c1d   :  { %8673 = vmatmul.mubr.msk.bf16.vlgmr.msra.gmra.mrb[184].mxu0 %vm74_vm0, %v7687_v23 }
0x1c1e   :  { %v7631_v13 = vpop.permute.xlu1 %7630 }
0x1c1f   :  { %v7674_v54 = vmul.f32 %v10589_v1, %v7631_v13 }
0x1c20   :  { %v7633_v6 = vpop.permute.xlu0 %7632 }
0x1c21   :  { %v7675_v44 = vmul.f32 %v10591_v36, %v7633_v6 }
0x1c23   :  { %v7688_v14 = vpack.c.bf16 %v7675_v44, %v7674_v54 }
0x1c25   :  { %8676 = vmatprep.mubr.msk.bf16.mxu0 %vm74_vm0, %v7688_v14 }
0x1c26   :  { %v7635_v58 = vpop.permute.xlu1 %7634 }
0x1c27   :  { %v7676_v15 = vmul.f32 %v10593_v35, %v7635_v58 }
0x1c28   :  { %v7637_v41 = vpop.permute.xlu0 %7636 }
0x1c29   :  { %v7677_v26 = vmul.f32 %v10595_v29, %v7637_v41 }
0x1c2b   :  { %v7689_v31 = vpack.c.bf16 %v7677_v26, %v7676_v15 }
0x1c2d   :  { %8677 = vmatmul.mubr.msk.bf16.gmra.mrb[188].mxu0 %vm74_vm0, %v7689_v31 }
0x1c2e   :  { %v7639_v59 = vpop.permute.xlu1 %7638 }
0x1c2f   :  { %v7678_v24 = vmul.f32 %v10597_v0, %v7639_v59 }
0x1c30   :  { %v7641_v51 = vpop.permute.xlu0 %7640 }
0x1c31   :  { %v7679_v52 = vmul.f32 %v10599_v50, %v7641_v51 }
0x1c33   :  { %v7690_v12 = vpack.c.bf16 %v7679_v52, %v7678_v24 }
0x1c35   :  { %8680 = vmatprep.mubr.msk.bf16.mxu0 %vm74_vm0, %v7690_v12 }
0x1c36   :  { %v7643_v2 = vpop.permute.xlu1 %7642 }
0x1c37   :  { %v7680_v42 = vmul.f32 %v10601_v63, %v7643_v2 }
0x1c38   :  { %v7645_v27 = vpop.permute.xlu0 %7644 }
0x1c39   :  { %v7681_v10 = vmul.f32 %v10603_v34, %v7645_v27 }
0x1c3b   :  { %v7691_v57 = vpack.c.bf16 %v7681_v10, %v7680_v42 }
0x1c3d   :  { %8681 = vmatmul.mubr.msk.bf16.gmra.mrb[192].mxu0 %vm74_vm0, %v7691_v57 }
0x1c3e   :  { %v7647_v47 = vpop.permute.xlu1 %7646 }
0x1c3f   :  { %v7682_v19 = vmul.f32 %v10605_v11, %v7647_v47 }
0x1c40   :  { %v7649_v28 = vpop.permute.xlu0 %7648 }
0x1c41   :  { %v7683_v56 = vmul.f32 %v10607_v40, %v7649_v28 }
0x1c43   :  { %v7692_v7 = vpack.c.bf16 %v7683_v56, %v7682_v19 }
0x1c45   :  { %8684 = vmatprep.mubr.msk.bf16.mxu0 %vm74_vm0, %v7692_v7 }
0x1c46   :  { %v7651_v25 = vpop.permute.xlu1 %7650 }
0x1c47   :  { %v7684_v20 = vmul.f32 %v10609_v5, %v7651_v25 }
0x1c48   :  { %v7653_v48 = vpop.permute.xlu0 %7652 }
0x1c49   :  { %v7685_v32 = vmul.f32 %v10611_v38, %v7653_v48 }
0x1c4a   :  { %v13825_v45 = vpop.permute.xlu1 %7712 }
0x1c4b   :  { %v7693_v37 = vpack.c.bf16 %v7685_v32, %v7684_v20 }
0x1c4d   :  { %8685 = vmatmul.mubr.msk.bf16.gmra.mrb[196].mxu0 %vm74_vm0, %v7693_v37 }
0x1cf0   :  { %v8674_v16 = vpop.f32.mrb[184].mxu0 }
0x1cf1   :  { %v7782_v61 = vadd.f32 %v8674_v16, %v13825_v45  ;;  %v7773_v62 = vpop.f32.mrb[185].mxu0 }
0x1cf2   :  { %v7774_v23 = vadd.f32 %v7773_v62, %v13825_v45  ;;  %v8675_v13 = vpop.f32.mrb[186].mxu0 }
0x1cf3   :  { %v7785_v1 = vadd.f32 %v8675_v13, %v13825_v45  ;;  %v7776_v36 = vpop.f32.mrb[187].mxu0  ;;  %v7838_v54 = vadd.f32 %v7782_v61, %v13528_v8 }
0x1cf4   :  { %v7777_v6 = vadd.f32 %v7776_v36, %v13825_v45  ;;  %v7836_v14 = vadd.f32 %v7774_v23, %v13532_v60 }
0x1cf5   :  { %v7839_v44 = vadd.f32 %v7785_v1, %v13538_v43 }
0x1cf6   :  { %v7837_v58 = vadd.f32 %v7777_v6, %v13543_v18 }
0x1cf7   :  { %v7855_v35 = vpack.c.bf16 %v7839_v44, %v7838_v54 }
0x1cf8   :  { %v7854_v29 = vpack.c.bf16 %v7837_v58, %v7836_v14 }
0x1cf9   :  { %v7869_v43 = vsel %vm74_vm0, %v7855_v35, 0 }
0x1cfa   :  { %v7866_v41 = vsel %vm74_vm0, %v7854_v29, 0 }
0x1cfb   :  { %8689 = vmatpush3.bf16.xpose.msra.mxu1 %v7866_v41 }
0x1cfc   :  { %8690 = vmatprep.subr.bf16.mxu1 %v10692_v9 }
0x1d00   :  { %v8678_v15 = vpop.f32.mrb[188].mxu0 }
0x1d01   :  { %v7798_v26 = vadd.f32 %v8678_v15, %v13825_v45  ;;  %v7789_v31 = vpop.f32.mrb[189].mxu0 }
0x1d02   :  { %v7790_v59 = vadd.f32 %v7789_v31, %v13825_v45  ;;  %v8679_v8 = vpop.f32.mrb[190].mxu0 }
0x1d03   :  { %v7801_v60 = vadd.f32 %v8679_v8, %v13825_v45  ;;  %v7792_v0 = vpop.f32.mrb[191].mxu0  ;;  %8691 = vmatpush3.bf16.xpose.msra.mxu1 %v7869_v43  ;;  %v7842_v50 = vadd.f32 %v7798_v26, %v13555_v21 }
0x1d04   :  { %v7793_v18 = vadd.f32 %v7792_v0, %v13825_v45  ;;  %8692 = vmatprep.subr.bf16.mxu1 %v10692_v9  ;;  %v7840_v24 = vadd.f32 %v7790_v59, %v13560_v49 }
0x1d05   :  { %v7843_v51 = vadd.f32 %v7801_v60, %v13566_v39 }
0x1d06   :  { %v7841_v52 = vadd.f32 %v7793_v18, %v13572_v3 }
0x1d07   :  { %v7857_v12 = vpack.c.bf16 %v7843_v51, %v7842_v50 }
0x1d08   :  { %v7856_v2 = vpack.c.bf16 %v7841_v52, %v7840_v24 }
0x1d09   :  { %v7875_v39 = vsel %vm74_vm0, %v7857_v12, 0 }
0x1d0a   :  { %v7872_v63 = vsel %vm74_vm0, %v7856_v2, 0 }
0x1d0b   :  { %8693 = vmatpush3.bf16.xpose.msra.mxu1 %v7872_v63 }
0x1d0c   :  { %8694 = vmatprep.subr.bf16.mxu1 %v10692_v9 }
0x1d10   :  { %v8682_v34 = vpop.f32.mrb[192].mxu0 }
0x1d11   :  { %v7814_v27 = vadd.f32 %v8682_v34, %v13825_v45  ;;  %v7805_v42 = vpop.f32.mrb[193].mxu0 }
0x1d12   :  { %v7806_v10 = vadd.f32 %v7805_v42, %v13825_v45  ;;  %v8683_v21 = vpop.f32.mrb[194].mxu0 }
0x1d13   :  { %v7817_v49 = vadd.f32 %v8683_v21, %v13825_v45  ;;  %v7808_v57 = vpop.f32.mrb[195].mxu0  ;;  %8695 = vmatpush3.bf16.xpose.msra.mxu1 %v7875_v39  ;;  %v7846_v47 = vadd.f32 %v7814_v27, %v13586_v4 }
0x1d14   :  { %v7809_v3 = vadd.f32 %v7808_v57, %v13825_v45  ;;  %8696 = vmatprep.subr.bf16.mxu1 %v10692_v9  ;;  %v7844_v40 = vadd.f32 %v7806_v10, %v13590_v17 }
0x1d15   :  { %v7847_v11 = vadd.f32 %v7817_v49, %v13597_v33 }
0x1d16   :  { %v7845_v28 = vadd.f32 %v7809_v3, %v13602_v53 }
0x1d17   :  { %v7859_v19 = vpack.c.bf16 %v7847_v11, %v7846_v47 }
0x1d18   :  { %v7858_v56 = vpack.c.bf16 %v7845_v28, %v7844_v40 }
0x1d19   :  { %v7881_v33 = vsel %vm74_vm0, %v7859_v19, 0 }
0x1d1a   :  { %v7878_v7 = vsel %vm74_vm0, %v7858_v56, 0 }
0x1d1b   :  { %8697 = vmatpush3.bf16.xpose.msra.mxu1 %v7878_v7 }
0x1d1c   :  { %8698 = vmatprep.subr.bf16.mxu1 %v10692_v9 }
0x1d20   :  { %v8686_v25 = vpop.f32.mrb[196].mxu0 }
0x1d21   :  { %v7830_v5 = vadd.f32 %v8686_v25, %v13825_v45  ;;  %v7821_v38 = vpop.f32.mrb[197].mxu0 }
0x1d22   :  { %v7822_v48 = vadd.f32 %v7821_v38, %v13825_v45  ;;  %v8687_v4 = vpop.f32.mrb[198].mxu0 }
0x1d23   :  { %v7833_v17 = vadd.f32 %v8687_v4, %v13825_v45  ;;  %v7824_v20 = vpop.f32.mrb[199].mxu0  ;;  %8699 = vmatpush3.bf16.xpose.msra.mxu1 %v7881_v33  ;;  %v7850_v32 = vadd.f32 %v7830_v5, %v13617_v22  ;;  %v7852_v22 = vld [vmem:[%s13889_s8] sm:$0xff] }
0x1d24   :  { %v7825_v53 = vadd.f32 %v7824_v20, %v13825_v45  ;;  %8700 = vmatprep.subr.bf16.mxu1 %v10692_v9  ;;  %v7848_v16 = vadd.f32 %v7822_v48, %v13621_v55  ;;  %v7853_v45 = vpack.c.bf16 %v7852_v22, %v7852_v22  ;;  %v7933_v55 = vpop.permute.xlu0 %7932 }
0x1d25   :  { %v7851_v37 = vadd.f32 %v7833_v17, %v13627_v30  ;;  %v7934_v30 = vrot.slane %v7933_v55, 6 }
0x1d26   :  { %v7849_v61 = vadd.f32 %v7825_v53, %v13632_v46 }
0x1d27   :  { %v7861_v62 = vpack.c.bf16 %v7851_v37, %v7850_v32 }
0x1d28   :  { %v7860_v23 = vpack.c.bf16 %v7849_v61, %v7848_v16 }
0x1d29   :  { %v7887_v1 = vsel %vm74_vm0, %v7861_v62, 0 }
0x1d2a   :  { %v7884_v13 = vsel %vm74_vm0, %v7860_v23, 0 }
0x1d2b   :  { %8701 = vmatpush3.bf16.xpose.msra.mxu1 %v7884_v13 }
0x1d2c   :  { %8702 = vmatprep.subr.bf16.mxu1 %v10692_v9 }
0x1d33   :  { %8703 = vmatpush3.bf16.xpose.msra.mxu1 %v7887_v1 }
0x1d3a   :  { %8705 = vmatmul.mubr.msk.bf16.vlgmr.msra.gmra.mrb[200].mxu1 %vm74_vm0, %v7853_v45 }
0x1e0d   :  { %v7923_v46 = vpop.f32.mrb[200].mxu1 }
0x1e0e   :  { %v7936_v36 = vadd.f32 %v7934_v30, %v7923_v46  ;;  %v8706_v6 = vpop.f32.mrb[201].mxu1 }
0x1e0f   :  { %v7926_v54 = vpop.f32.mrb[202].mxu1 }
0x1e10   :  { %7937 = vst [vmem:[%s13890_s9 - $0x2] sm:$0x4] %v7936_v36  ;;  %v8707_v9 = vpop.f32.mrb[203].mxu1 }
0x1e11   :  { %7942 = vsyncpa [#allocation5], 1 }
0x1e12   :  { %7943 = vsyncpa [#allocation7], 1 }

</bundles_post_ra>
